<compile_context>
chip_gen: v7x
topology: tpu7x:2x2x1
jax: 0.10.0
libtpu: 0.0.40
codegen_flags: <defaults>
</compile_context>

<pallas_src>
import math
import functools

import jax
import jax.numpy as jnp
from jax.experimental import pallas as pl
from jax.experimental.pallas import tpu as pltpu

# ---------------- hyper-params (small, consistent with the module) ----------------
H = 32          # n_hidden
V = 64          # vocab_size
DFF = 64        # d_ff
N_HEAD = 4      # n_head
DK = H // N_HEAD
ZC = 4          # opt.z_class
LAT = 32        # opt.latent_size (>= 20 so the 20-index mask loop is valid)
C_SIGMA = 0.2
LN_EPS = 1e-5

_PARALLEL = pltpu.CompilerParams(dimension_semantics=("parallel",))


# ============================ in-kernel helpers ============================

def _dot(a, b):
    return jnp.dot(a, b, preferred_element_type=jnp.float32)


def _dot_nt(a, b):
    # (M, K) x (N, K) -> (M, N): contract last dims, no explicit transpose copy.
    return jax.lax.dot_general(a, b, (((1,), (1,)), ((), ())),
                               preferred_element_type=jnp.float32)


def _ln(x, g, b):
    mu = jnp.mean(x, axis=-1, keepdims=True)
    var = jnp.mean((x - mu) ** 2, axis=-1, keepdims=True)
    return (x - mu) * jax.lax.rsqrt(var + LN_EPS) * g + b


# ============================ fused MHA + residual + LayerNorm ============================

def _mha_ln_kernel(q_ref, kv_ref, wqkv_ref, bqkv_ref, wo_ref, bo_ref,
                   g_ref, beta_ref, m_ref, o_ref, *, self_attn):
    x = q_ref[0]                               # (Lq, H) query input == residual
    wqkv = wqkv_ref[...]                       # (H, 3H) packed q/k/v weights
    bqkv = bqkv_ref[...]                       # (1, 3H)
    if self_attn:
        qkv = _dot(x, wqkv) + bqkv             # one matmul for q, k, v
        q, k, v = qkv[:, :H], qkv[:, H:2 * H], qkv[:, 2 * H:]
    else:
        kv_in = kv_ref[0]                      # (Lk, H)
        q = _dot(x, wqkv[:, :H]) + bqkv[:, :H]
        kv = _dot(kv_in, wqkv[:, H:]) + bqkv[:, H:]
        k, v = kv[:, :H], kv[:, H:]

    scale = 1.0 / math.sqrt(DK)
    mask = m_ref[...]                          # (Lq, Lk) additive mask
    heads = []
    for h in range(N_HEAD):                    # heads handled inside the kernel
        sl = slice(h * DK, (h + 1) * DK)
        s = _dot_nt(q[:, sl], k[:, sl]) * scale + mask
        s = s - jnp.max(s, axis=-1, keepdims=True)
        p = jnp.exp(s)
        p = p * pl.reciprocal(jnp.sum(p, axis=-1, keepdims=True), approx=True)
        heads.append(_dot(p, v[:, sl]))
    attn = jnp.concatenate(heads, axis=-1)     # (Lq, H)

    proj = _dot(attn, wo_ref[...]) + bo_ref[...]
    o_ref[0] = _ln(x + proj, g_ref[...], beta_ref[...])


def mha_block(p, ln, q_in, kv_in, mask=None, self_attn=False):
    B, Lq, _ = q_in.shape
    Lk = kv_in.shape[1]
    if mask is None:
        mask = jnp.zeros((Lq, Lk), jnp.float32)
    kernel = functools.partial(_mha_ln_kernel, self_attn=self_attn)
    return pl.pallas_call(
        kernel,
        out_shape=jax.ShapeDtypeStruct((B, Lq, H), jnp.float32),
        grid=(B,),
        in_specs=[
            pl.BlockSpec((1, Lq, H), lambda b: (b, 0, 0)),
            pl.BlockSpec((1, Lk, H), lambda b: (b, 0, 0)),
            pl.BlockSpec((H, 3 * H), lambda b: (0, 0)),
            pl.BlockSpec((1, 3 * H), lambda b: (0, 0)),
            pl.BlockSpec((H, H), lambda b: (0, 0)),
            pl.BlockSpec((1, H), lambda b: (0, 0)),
            pl.BlockSpec((1, H), lambda b: (0, 0)),
            pl.BlockSpec((1, H), lambda b: (0, 0)),
            pl.BlockSpec((Lq, Lk), lambda b: (0, 0)),
        ],
        out_specs=pl.BlockSpec((1, Lq, H), lambda b: (b, 0, 0)),
        compiler_params=_PARALLEL,
    )(q_in.astype(jnp.float32), kv_in.astype(jnp.float32),
      p['wqkv'], p['bqkv'], p['wo'], p['bo'], ln[0], ln[1], mask)


# ============================ fused FFN + residual + LayerNorm ============================

def _ffn_res_ln_kernel(x_ref, w1_ref, b1_ref, w2_ref, b2_ref, g_ref, beta_ref, o_ref):
    x = x_ref[0]                                                       # (L, H)
    h = jnp.maximum(_dot(x, w1_ref[...]) + b1_ref[...], 0.0)
    y = _dot(h, w2_ref[...]) + b2_ref[...]
    o_ref[0] = _ln(x + y, g_ref[...], beta_ref[...])


def ffn_res_ln(x, p, ln):
    B, L, _ = x.shape
    return pl.pallas_call(
        _ffn_res_ln_kernel,
        out_shape=jax.ShapeDtypeStruct((B, L, H), jnp.float32),
        grid=(B,),
        in_specs=[
            pl.BlockSpec((1, L, H), lambda b: (b, 0, 0)),
            pl.BlockSpec((H, DFF), lambda b: (0, 0)),
            pl.BlockSpec((1, DFF), lambda b: (0, 0)),
            pl.BlockSpec((DFF, H), lambda b: (0, 0)),
            pl.BlockSpec((1, H), lambda b: (0, 0)),
            pl.BlockSpec((1, H), lambda b: (0, 0)),
            pl.BlockSpec((1, H), lambda b: (0, 0)),
        ],
        out_specs=pl.BlockSpec((1, L, H), lambda b: (b, 0, 0)),
        compiler_params=_PARALLEL,
    )(x, p['w1'], p['b1'], p['w2'], p['b2'], ln[0], ln[1])


# ============================ LSTM (input projection hoisted) ============================

def _lstm_kernel(x_ref, wih_ref, whh_ref, b_ref, o_ref):
    x = x_ref[0]                                       # (L, H)
    L = x.shape[0]
    xg = _dot(x, wih_ref[...]) + b_ref[...]            # (L, 4H) — all timesteps at once
    whh = whh_ref[...]
    h = jnp.zeros((1, H), jnp.float32)
    c = jnp.zeros((1, H), jnp.float32)
    ys = []
    for t in range(L):                                 # static unroll; only serial part
        g = xg[t:t + 1, :] + _dot(h, whh)
        i = jax.nn.sigmoid(g[:, 0 * H:1 * H])
        f = jax.nn.sigmoid(g[:, 1 * H:2 * H])
        gg = jnp.tanh(g[:, 2 * H:3 * H])
        o = jax.nn.sigmoid(g[:, 3 * H:4 * H])
        c = f * c + i * gg
        h = o * jnp.tanh(c)
        ys.append(h)
    o_ref[0] = jnp.concatenate(ys, axis=0)             # (L, H)


def pallas_lstm(x, wih, whh, b):
    B, L, Hh = x.shape
    return pl.pallas_call(
        _lstm_kernel,
        out_shape=jax.ShapeDtypeStruct((B, L, Hh), jnp.float32),
        grid=(B,),
        in_specs=[
            pl.BlockSpec((1, L, Hh), lambda i: (i, 0, 0)),
            pl.BlockSpec((Hh, 4 * Hh), lambda i: (0, 0)),
            pl.BlockSpec((Hh, 4 * Hh), lambda i: (0, 0)),
            pl.BlockSpec((1, 4 * Hh), lambda i: (0, 0)),
        ],
        out_specs=pl.BlockSpec((1, L, Hh), lambda i: (i, 0, 0)),
        compiler_params=_PARALLEL,
    )(x.astype(jnp.float32), wih, whh, b)


# ============================ VAE head: FFN(last token) + packed mean/logstd ============================

def _vae_head_kernel(x_ref, w1_ref, b1_ref, w2_ref, b2_ref, wm_ref, bm_ref, o_ref):
    xt = x_ref[:, x_ref.shape[1] - 1, :]               # (B, H) only the last token is used
    h = jnp.maximum(_dot(xt, w1_ref[...]) + b1_ref[...], 0.0)
    f = _dot(h, w2_ref[...]) + b2_ref[...]
    o_ref[...] = _dot(f, wm_ref[...]) + bm_ref[...]     # (B, 2*LAT) = [mean | logstd]


def vae_head(gt_att, ffn_p, ms_p):
    B, Lz, _ = gt_att.shape
    return pl.pallas_call(
        _vae_head_kernel,
        out_shape=jax.ShapeDtypeStruct((B, 2 * LAT), jnp.float32),
        grid=(1,),
        in_specs=[
            pl.BlockSpec((B, Lz, H), lambda i: (0, 0, 0)),
            pl.BlockSpec((H, DFF), lambda i: (0, 0)),
            pl.BlockSpec((1, DFF), lambda i: (0, 0)),
            pl.BlockSpec((DFF, H), lambda i: (0, 0)),
            pl.BlockSpec((1, H), lambda i: (0, 0)),
            pl.BlockSpec((H, 2 * LAT), lambda i: (0, 0)),
            pl.BlockSpec((1, 2 * LAT), lambda i: (0, 0)),
        ],
        out_specs=pl.BlockSpec((B, 2 * LAT), lambda i: (0, 0)),
    )(gt_att, ffn_p['w1'], ffn_p['b1'], ffn_p['w2'], ffn_p['b2'], ms_p[0], ms_p[1])


# ============================ coa classification: pool + linear + CE (scalar) ============================

def _pool_ce_kernel(y_ref, w_ref, b_ref, t_ref, o_ref):
    pooled = jnp.mean(y_ref[...], axis=1)                     # (B, H)
    logits = _dot(pooled, w_ref[...]) + b_ref[...]            # (B, ZC)
    t = t_ref[...]                                            # (B, 1) int32
    m = jnp.max(logits, axis=-1, keepdims=True)
    lse = jnp.log(jnp.sum(jnp.exp(logits - m), axis=-1, keepdims=True)) + m
    iota = jax.lax.broadcasted_iota(jnp.int32, logits.shape, 1)
    tl = jnp.sum(jnp.where(iota == t, logits, 0.0), axis=-1, keepdims=True)
    o_ref[...] = jnp.mean(lse - tl, keepdims=True)            # (1, 1)


def pool_linear_ce(y, w, b, targets):
    B, L, _ = y.shape
    t = targets.reshape(B, 1).astype(jnp.int32)
    return pl.pallas_call(
        _pool_ce_kernel,
        out_shape=jax.ShapeDtypeStruct((1, 1), jnp.float32),
        grid=(1,),
        in_specs=[
            pl.BlockSpec((B, L, H), lambda i: (0, 0, 0)),
            pl.BlockSpec((H, ZC), lambda i: (0, 0)),
            pl.BlockSpec((1, ZC), lambda i: (0, 0)),
            pl.BlockSpec((B, 1), lambda i: (0, 0)),
        ],
        out_specs=pl.BlockSpec((1, 1), lambda i: (0, 0)),
    )(y, w, b, t)


# ============================ output projection + token CE (scalar loss) ============================

def _proj_ce_kernel(x_ref, w_ref, b_ref, t_ref, o_ref):
    logits = _dot(x_ref[...], w_ref[...]) + b_ref[...]        # (N, V), never leaves VMEM
    t = t_ref[...]                                            # (N, 1) int32
    m = jnp.max(logits, axis=-1, keepdims=True)
    lse = jnp.log(jnp.sum(jnp.exp(logits - m), axis=-1, keepdims=True)) + m
    iota = jax.lax.broadcasted_iota(jnp.int32, logits.shape, 1)
    tl = jnp.sum(jnp.where(iota == t, logits, 0.0), axis=-1, keepdims=True)
    loss = jnp.where(t == 0, 0.0, lse - tl)                   # ignore_index = 0
    # valid count from targets (equivalent to PyTorch's nonzero(loss) with ignore_index=0)
    valid = jnp.sum((t != 0).astype(jnp.float32), keepdims=True)
    o_ref[...] = jnp.sum(loss, keepdims=True) / jnp.maximum(valid, 1.0)


def proj_ce(x, w, b, tgt):
    N, D2 = x.shape
    return pl.pallas_call(
        _proj_ce_kernel,
        out_shape=jax.ShapeDtypeStruct((1, 1), jnp.float32),
        grid=(1,),
        in_specs=[
            pl.BlockSpec((N, D2), lambda i: (0, 0)),
            pl.BlockSpec((D2, V), lambda i: (0, 0)),
            pl.BlockSpec((1, V), lambda i: (0, 0)),
            pl.BlockSpec((N, 1), lambda i: (0, 0)),
        ],
        out_specs=pl.BlockSpec((1, 1), lambda i: (0, 0)),
    )(x, w, b, tgt)


# ============================ small matmul + bias (z_emb) ============================

def _mm_bias_kernel(a_ref, w_ref, b_ref, o_ref):
    o_ref[...] = _dot(a_ref[...], w_ref[...]) + b_ref[...]


def pallas_matmul_bias(a, w, b):
    M, K = a.shape
    N = w.shape[1]
    return pl.pallas_call(
        _mm_bias_kernel,
        out_shape=jax.ShapeDtypeStruct((M, N), jnp.float32),
        grid=(1,),
        in_specs=[
            pl.BlockSpec((M, K), lambda i: (0, 0)),
            pl.BlockSpec((K, N), lambda i: (0, 0)),
            pl.BlockSpec((1, N), lambda i: (0, 0)),
        ],
        out_specs=pl.BlockSpec((M, N), lambda i: (0, 0)),
    )(a.astype(jnp.float32), w, b)


# ============================ plain-JAX glue ============================

def positional_encoding(L, D):
    pos = jnp.arange(L, dtype=jnp.float32)[:, None]
    div = jnp.exp(jnp.arange(0, D, 2, dtype=jnp.float32) * (-math.log(10000.0) / D))
    pe = jnp.zeros((L, D), jnp.float32)
    pe = pe.at[:, 0::2].set(jnp.sin(pos * div))
    pe = pe.at[:, 1::2].set(jnp.cos(pos * div))
    return pe


def embed_seq(tokens, table):
    # Embeddings(n_hidden, vocab) scales by sqrt(n_hidden); PositionalEncoding adds pe.
    e = jnp.take(table, tokens, axis=0) * jnp.sqrt(jnp.float32(H))
    return e + positional_encoding(tokens.shape[1], H)[None]


def model_forward(params, label, label_mean, c_sigma, X, Y, T, rng):
    # ---- encode_text: embedding + PE + LSTM ----
    T_emb = embed_seq(T, params['emb_table'])
    T_enc = pallas_lstm(T_emb, params['lstm_wih'], params['lstm_whh'], params['lstm_b'])

    # ---- co-attention ----
    # TODO(synk): coa_MAC is an external MAC co-attention module not defined in the source;
    # this is a simplified co-attention stand-in with the same output arity/shapes.
    coa = params['coa']
    x_out = mha_block(coa['mha_xt'], coa['ln_x'], X, T_enc)
    y_out = mha_block(coa['mha_tx'], coa['ln_y'], T_enc, X)
    x_out1 = ffn_res_ln(x_out, coa['ffn_x'], coa['ln_x1'])
    y_out1 = ffn_res_ln(y_out, coa['ffn_y'], coa['ln_y1'])
    l_idx = jnp.argmax(label, axis=-1).astype(jnp.int32)
    loss_z = pool_linear_ce(y_out, coa['wz'][0], coa['wz'][1], l_idx)[0, 0]

    # ---- maskVAE ----
    GT_emb = embed_seq(Y, params['emb_table'])
    # Matches PyTorch: self.label_emb(label.long()) indexes with the one-hot matrix cast to int.
    lab_e = jnp.take(params['label_emb'], label.astype(jnp.int32), axis=0)      # (B, ZC, H)
    label_att = mha_block(params['label_att'], params['lnorm2'], lab_e, lab_e, self_attn=True)
    GT_att = mha_block(params['z_att'], params['lnorm1'], label_att, GT_emb, self_attn=False)
    ms = vae_head(GT_att, params['feed_forward'], params['z_meanlogstd'])       # (B, 2*LAT)
    lz_mean, lz_logstd = ms[:, :LAT], ms[:, LAT:]

    k1, k2, k3 = jax.random.split(rng, 3)
    sample = jax.random.normal(k1, lz_mean.shape, jnp.float32)
    z = lz_mean + sample * jnp.sqrt(jnp.exp(lz_logstd))   # matches torch.sqrt(torch.exp(...))
    idx = jax.random.permutation(k2, LAT)[:20]
    samples20 = jax.random.normal(k3, (z.shape[0], 20), jnp.float32)
    z = z.at[:, idx].set(jnp.take(label_mean, idx, axis=1) + samples20 * c_sigma)
    z_emb = pallas_matmul_bias(z, *params['z_emb'])[:, None, :]                 # (B, 1, H)

    # ---- decode (self-attention shared between the two branches) ----
    B, L = Y.shape
    Lm1 = L - 1
    causal = jnp.where(jnp.arange(Lm1)[:, None] >= jnp.arange(Lm1)[None, :],
                       0.0, -1e9).astype(jnp.float32)
    embs = embed_seq(Y[:, :-1], params['emb_table'])
    dec = params['decoder']
    # TODO(synk): CommentDecoder is an external module; simplified single transformer-decoder
    # block conditioning on [x_out, y_out, z_emb, label_emb] as cross-attention memory.
    h_self = mha_block(dec['self_mha'], dec['ln1'], embs, embs, mask=causal, self_attn=True)

    def branch(mem):
        hc = mha_block(dec['cross_mha'], dec['ln2'], h_self, mem)
        return ffn_res_ln(hc, dec['ffn'], dec['ln3'])

    out = branch(jnp.concatenate([x_out, y_out, z_emb, lab_e], axis=1))
    out1 = branch(jnp.concatenate([x_out1, y_out1, z_emb, lab_e], axis=1))
    outs = jnp.concatenate([out1, out], axis=-1).reshape(-1, 2 * H)             # (B*(L-1), 2H)

    # ---- token loss: fused output projection + cross-entropy ----
    tgt = Y[:, 1:].reshape(-1, 1).astype(jnp.int32)
    loss = proj_ce(outs, params['output_layer'][0], params['output_layer'][1], tgt)[0, 0]
    return loss, lz_mean, lz_logstd, loss_z


# ============================ parameter init ============================

def init_params(key):
    keys = iter(jax.random.split(key, 64))

    def dense(din, dout, scale=0.05):
        return (jax.random.normal(next(keys), (din, dout), jnp.float32) * scale,
                jnp.zeros((1, dout), jnp.float32))

    def mhap():
        wqkv, bqkv = dense(H, 3 * H)     # packed q/k/v projection
        wo, bo = dense(H, H)
        return {'wqkv': wqkv, 'bqkv': bqkv, 'wo': wo, 'bo': bo}

    def lnp():
        return (jnp.ones((1, H), jnp.float32), jnp.zeros((1, H), jnp.float32))

    def ffnp():
        w1, b1 = dense(H, DFF)
        w2, b2 = dense(DFF, H)
        return {'w1': w1, 'b1': b1, 'w2': w2, 'b2': b2}

    emb_table = jax.random.normal(next(keys), (V, H), jnp.float32) * 0.05
    label_emb = jax.random.normal(next(keys), (ZC, H), jnp.float32) * 0.05
    label_emb = label_emb.at[0].set(0.0)                # padding_idx=0

    params = {
        'emb_table': emb_table,
        'label_emb': label_emb,
        'lstm_wih': jax.random.normal(next(keys), (H, 4 * H), jnp.float32) * 0.05,
        'lstm_whh': jax.random.normal(next(keys), (H, 4 * H), jnp.float32) * 0.05,
        'lstm_b': jnp.zeros((1, 4 * H), jnp.float32),
        'coa': {
            'mha_xt': mhap(), 'mha_tx': mhap(),
            'ln_x': lnp(), 'ln_y': lnp(), 'ln_x1': lnp(), 'ln_y1': lnp(),
            'ffn_x': ffnp(), 'ffn_y': ffnp(),
            'wz': dense(H, ZC),
        },
        'label_att': mhap(),
        'z_att': mhap(),
        'lnorm1': lnp(),
        'lnorm2': lnp(),
        'feed_forward': ffnp(),
        'z_meanlogstd': dense(H, 2 * LAT),   # z_mean and z_logstd packed into one matmul
        'z_emb': dense(LAT, H),
        'decoder': {
            'self_mha': mhap(), 'cross_mha': mhap(),
            'ln1': lnp(), 'ln2': lnp(), 'ln3': lnp(),
            'ffn': ffnp(),
        },
        'output_layer': dense(2 * H, V),
    }
    return params


# ============================ main ============================

if __name__ == "__main__":
    key = jax.random.PRNGKey(0)
    kp, kd, kr = jax.random.split(key, 3)
    params = init_params(kp)

    B, L, F = 2, 8, 4
    k1, k2, k3, k4, k5 = jax.random.split(kd, 5)
    label_idx = jax.random.randint(k1, (B,), 0, ZC)
    label = jax.nn.one_hot(label_idx, ZC, dtype=jnp.float32)      # (B, z_class) one-hot
    label_mean = jax.random.normal(k2, (B, LAT), jnp.float32)     # (B, latent_size)
    X = jax.random.normal(k3, (B, F, H), jnp.float32)             # video features
    Y = jax.random.randint(k4, (B, L), 1, V)                      # comment tokens
    T = jax.random.randint(k5, (B, L), 1, V)                      # title tokens

    fwd = jax.jit(model_forward, static_argnums=(3,))
    loss, lz_mean, lz_logstd, loss_z = fwd(params, label, label_mean, C_SIGMA, X, Y, T, kr)
    jax.block_until_ready((loss, lz_mean, lz_logstd, loss_z))
    print("KERNEL_OK")
</pallas_src>

<mosaic_0001>
module attributes {stable_mosaic.version = 11 : i64} {
  func.func @_mha_ln_kernel(%arg0: i32, %arg1: memref<1x7x32xf32, #tpu.memory_space<vmem>>, %arg2: memref<1x7x32xf32, #tpu.memory_space<vmem>>, %arg3: memref<32x96xf32, #tpu.memory_space<vmem>>, %arg4: memref<1x96xf32, #tpu.memory_space<vmem>>, %arg5: memref<32x32xf32, #tpu.memory_space<vmem>>, %arg6: memref<1x32xf32, #tpu.memory_space<vmem>>, %arg7: memref<1x32xf32, #tpu.memory_space<vmem>>, %arg8: memref<1x32xf32, #tpu.memory_space<vmem>>, %arg9: memref<7x7xf32, #tpu.memory_space<vmem>>, %arg10: memref<1x7x32xf32, #tpu.memory_space<vmem>>) attributes {dimension_semantics = [#tpu.dimension_semantics<parallel>], iteration_bounds = array<i64: 2>, scalar_prefetch = 0 : i64, scratch_operands = 0 : i64, tpu.core_type = #tpu.core_type<tc>, window_params = [{transform_indices = @transform_0, window_bounds = array<i64: 1, 7, 32>}, {transform_indices = @transform_1, window_bounds = array<i64: 1, 7, 32>}, {pipeline_mode = #tpu.pipeline_mode<synchronous>, transform_indices = @transform_2, window_bounds = array<i64: 32, 96>}, {pipeline_mode = #tpu.pipeline_mode<synchronous>, transform_indices = @transform_3, window_bounds = array<i64: 1, 96>}, {pipeline_mode = #tpu.pipeline_mode<synchronous>, transform_indices = @transform_4, window_bounds = array<i64: 32, 32>}, {pipeline_mode = #tpu.pipeline_mode<synchronous>, transform_indices = @transform_5, window_bounds = array<i64: 1, 32>}, {pipeline_mode = #tpu.pipeline_mode<synchronous>, transform_indices = @transform_6, window_bounds = array<i64: 1, 32>}, {pipeline_mode = #tpu.pipeline_mode<synchronous>, transform_indices = @transform_7, window_bounds = array<i64: 1, 32>}, {pipeline_mode = #tpu.pipeline_mode<synchronous>, transform_indices = @transform_8, window_bounds = array<i64: 7, 7>}, {transform_indices = @transform_9, window_bounds = array<i64: 1, 7, 32>}]} {
    %c0 = arith.constant 0 : index
    %c0_0 = arith.constant 0 : index
    %c0_1 = arith.constant 0 : index
    %0 = vector.load %arg1[%c0, %c0_0, %c0_1] : memref<1x7x32xf32, #tpu.memory_space<vmem>>, vector<1x7x32xf32>
    %1 = vector.shape_cast %0 : vector<1x7x32xf32> to vector<7x32xf32>
    %c0_2 = arith.constant 0 : index
    %c0_3 = arith.constant 0 : index
    %2 = vector.load %arg3[%c0_2, %c0_3] : memref<32x96xf32, #tpu.memory_space<vmem>>, vector<32x96xf32>
    %c0_4 = arith.constant 0 : index
    %c0_5 = arith.constant 0 : index
    %3 = vector.load %arg4[%c0_4, %c0_5] : memref<1x96xf32, #tpu.memory_space<vmem>>, vector<1x96xf32>
    %cst = arith.constant dense<0.000000e+00> : vector<7x96xf32>
    %4 = tpu.matmul %1, %2, %cst {dimension_numbers = #tpu.dot_dimension_numbers<[1], [0], [0], [1], [0, 0, 1, 1], [], []>} : vector<7x32xf32>, vector<32x96xf32>, vector<7x96xf32> -> vector<7x96xf32>
    %5 = vector.broadcast %3 : vector<1x96xf32> to vector<7x96xf32>
    %6 = arith.addf %4, %5 : vector<7x96xf32>
    %7 = vector.extract_strided_slice %6 {offsets = [0, 0], sizes = [7, 32], strides = [1, 1]} : vector<7x96xf32> to vector<7x32xf32>
    %8 = vector.extract_strided_slice %6 {offsets = [0, 32], sizes = [7, 32], strides = [1, 1]} : vector<7x96xf32> to vector<7x32xf32>
    %9 = vector.extract_strided_slice %6 {offsets = [0, 64], sizes = [7, 32], strides = [1, 1]} : vector<7x96xf32> to vector<7x32xf32>
    %c0_6 = arith.constant 0 : index
    %c0_7 = arith.constant 0 : index
    %10 = vector.load %arg9[%c0_6, %c0_7] : memref<7x7xf32, #tpu.memory_space<vmem>>, vector<7x7xf32>
    %11 = vector.extract_strided_slice %7 {offsets = [0, 0], sizes = [7, 8], strides = [1, 1]} : vector<7x32xf32> to vector<7x8xf32>
    %12 = vector.extract_strided_slice %8 {offsets = [0, 0], sizes = [7, 8], strides = [1, 1]} : vector<7x32xf32> to vector<7x8xf32>
    %cst_8 = arith.constant dense<0.000000e+00> : vector<7x7xf32>
    %13 = tpu.matmul %11, %12, %cst_8 {dimension_numbers = #tpu.dot_dimension_numbers<[1], [1], [0], [0], [0, 0, 1, 0], [], []>} : vector<7x8xf32>, vector<7x8xf32>, vector<7x7xf32> -> vector<7x7xf32>
    %cst_9 = arith.constant 0.353553385 : f32
    %14 = vector.broadcast %cst_9 : f32 to vector<7x7xf32>
    %15 = arith.mulf %13, %14 : vector<7x7xf32>
    %16 = arith.addf %15, %10 : vector<7x7xf32>
    %cst_10 = arith.constant dense<0xFF800000> : vector<7xf32>
    %17 = vector.multi_reduction <maximumf>, %16, %cst_10 [1] : vector<7x7xf32> to vector<7xf32>
    %18 = vector.shape_cast %17 : vector<7xf32> to vector<7x1xf32>
    %19 = vector.broadcast %18 : vector<7x1xf32> to vector<7x7xf32>
    %20 = arith.subf %16, %19 : vector<7x7xf32>
    %21 = math.exp %20 : vector<7x7xf32>
    %cst_11 = arith.constant dense<0.000000e+00> : vector<7xf32>
    %22 = vector.multi_reduction <add>, %21, %cst_11 [1] : vector<7x7xf32> to vector<7xf32>
    %23 = vector.shape_cast %22 : vector<7xf32> to vector<7x1xf32>
    %24 = tpu.reciprocal %23 {approx = true} : vector<7x1xf32> -> vector<7x1xf32>
    %25 = vector.broadcast %24 : vector<7x1xf32> to vector<7x7xf32>
    %26 = arith.mulf %21, %25 : vector<7x7xf32>
    %27 = vector.extract_strided_slice %9 {offsets = [0, 0], sizes = [7, 8], strides = [1, 1]} : vector<7x32xf32> to vector<7x8xf32>
    %cst_12 = arith.constant dense<0.000000e+00> : vector<7x8xf32>
    %28 = tpu.matmul %26, %27, %cst_12 {dimension_numbers = #tpu.dot_dimension_numbers<[1], [0], [0], [1], [0, 0, 1, 1], [], []>} : vector<7x7xf32>, vector<7x8xf32>, vector<7x8xf32> -> vector<7x8xf32>
    %29 = vector.extract_strided_slice %7 {offsets = [0, 8], sizes = [7, 8], strides = [1, 1]} : vector<7x32xf32> to vector<7x8xf32>
    %30 = vector.extract_strided_slice %8 {offsets = [0, 8], sizes = [7, 8], strides = [1, 1]} : vector<7x32xf32> to vector<7x8xf32>
    %cst_13 = arith.constant dense<0.000000e+00> : vector<7x7xf32>
    %31 = tpu.matmul %29, %30, %cst_13 {dimension_numbers = #tpu.dot_dimension_numbers<[1], [1], [0], [0], [0, 0, 1, 0], [], []>} : vector<7x8xf32>, vector<7x8xf32>, vector<7x7xf32> -> vector<7x7xf32>
    %cst_14 = arith.constant 0.353553385 : f32
    %32 = vector.broadcast %cst_14 : f32 to vector<7x7xf32>
    %33 = arith.mulf %31, %32 : vector<7x7xf32>
    %34 = arith.addf %33, %10 : vector<7x7xf32>
    %cst_15 = arith.constant dense<0xFF800000> : vector<7xf32>
    %35 = vector.multi_reduction <maximumf>, %34, %cst_15 [1] : vector<7x7xf32> to vector<7xf32>
    %36 = vector.shape_cast %35 : vector<7xf32> to vector<7x1xf32>
    %37 = vector.broadcast %36 : vector<7x1xf32> to vector<7x7xf32>
    %38 = arith.subf %34, %37 : vector<7x7xf32>
    %39 = math.exp %38 : vector<7x7xf32>
    %cst_16 = arith.constant dense<0.000000e+00> : vector<7xf32>
    %40 = vector.multi_reduction <add>, %39, %cst_16 [1] : vector<7x7xf32> to vector<7xf32>
    %41 = vector.shape_cast %40 : vector<7xf32> to vector<7x1xf32>
    %42 = tpu.reciprocal %41 {approx = true} : vector<7x1xf32> -> vector<7x1xf32>
    %43 = vector.broadcast %42 : vector<7x1xf32> to vector<7x7xf32>
    %44 = arith.mulf %39, %43 : vector<7x7xf32>
    %45 = vector.extract_strided_slice %9 {offsets = [0, 8], sizes = [7, 8], strides = [1, 1]} : vector<7x32xf32> to vector<7x8xf32>
    %cst_17 = arith.constant dense<0.000000e+00> : vector<7x8xf32>
    %46 = tpu.matmul %44, %45, %cst_17 {dimension_numbers = #tpu.dot_dimension_numbers<[1], [0], [0], [1], [0, 0, 1, 1], [], []>} : vector<7x7xf32>, vector<7x8xf32>, vector<7x8xf32> -> vector<7x8xf32>
    %47 = vector.extract_strided_slice %7 {offsets = [0, 16], sizes = [7, 8], strides = [1, 1]} : vector<7x32xf32> to vector<7x8xf32>
    %48 = vector.extract_strided_slice %8 {offsets = [0, 16], sizes = [7, 8], strides = [1, 1]} : vector<7x32xf32> to vector<7x8xf32>
    %cst_18 = arith.constant dense<0.000000e+00> : vector<7x7xf32>
    %49 = tpu.matmul %47, %48, %cst_18 {dimension_numbers = #tpu.dot_dimension_numbers<[1], [1], [0], [0], [0, 0, 1, 0], [], []>} : vector<7x8xf32>, vector<7x8xf32>, vector<7x7xf32> -> vector<7x7xf32>
    %cst_19 = arith.constant 0.353553385 : f32
    %50 = vector.broadcast %cst_19 : f32 to vector<7x7xf32>
    %51 = arith.mulf %49, %50 : vector<7x7xf32>
    %52 = arith.addf %51, %10 : vector<7x7xf32>
    %cst_20 = arith.constant dense<0xFF800000> : vector<7xf32>
    %53 = vector.multi_reduction <maximumf>, %52, %cst_20 [1] : vector<7x7xf32> to vector<7xf32>
    %54 = vector.shape_cast %53 : vector<7xf32> to vector<7x1xf32>
    %55 = vector.broadcast %54 : vector<7x1xf32> to vector<7x7xf32>
    %56 = arith.subf %52, %55 : vector<7x7xf32>
    %57 = math.exp %56 : vector<7x7xf32>
    %cst_21 = arith.constant dense<0.000000e+00> : vector<7xf32>
    %58 = vector.multi_reduction <add>, %57, %cst_21 [1] : vector<7x7xf32> to vector<7xf32>
    %59 = vector.shape_cast %58 : vector<7xf32> to vector<7x1xf32>
    %60 = tpu.reciprocal %59 {approx = true} : vector<7x1xf32> -> vector<7x1xf32>
    %61 = vector.broadcast %60 : vector<7x1xf32> to vector<7x7xf32>
    %62 = arith.mulf %57, %61 : vector<7x7xf32>
    %63 = vector.extract_strided_slice %9 {offsets = [0, 16], sizes = [7, 8], strides = [1, 1]} : vector<7x32xf32> to vector<7x8xf32>
    %cst_22 = arith.constant dense<0.000000e+00> : vector<7x8xf32>
    %64 = tpu.matmul %62, %63, %cst_22 {dimension_numbers = #tpu.dot_dimension_numbers<[1], [0], [0], [1], [0, 0, 1, 1], [], []>} : vector<7x7xf32>, vector<7x8xf32>, vector<7x8xf32> -> vector<7x8xf32>
    %65 = vector.extract_strided_slice %7 {offsets = [0, 24], sizes = [7, 8], strides = [1, 1]} : vector<7x32xf32> to vector<7x8xf32>
    %66 = vector.extract_strided_slice %8 {offsets = [0, 24], sizes = [7, 8], strides = [1, 1]} : vector<7x32xf32> to vector<7x8xf32>
    %cst_23 = arith.constant dense<0.000000e+00> : vector<7x7xf32>
    %67 = tpu.matmul %65, %66, %cst_23 {dimension_numbers = #tpu.dot_dimension_numbers<[1], [1], [0], [0], [0, 0, 1, 0], [], []>} : vector<7x8xf32>, vector<7x8xf32>, vector<7x7xf32> -> vector<7x7xf32>
    %cst_24 = arith.constant 0.353553385 : f32
    %68 = vector.broadcast %cst_24 : f32 to vector<7x7xf32>
    %69 = arith.mulf %67, %68 : vector<7x7xf32>
    %70 = arith.addf %69, %10 : vector<7x7xf32>
    %cst_25 = arith.constant dense<0xFF800000> : vector<7xf32>
    %71 = vector.multi_reduction <maximumf>, %70, %cst_25 [1] : vector<7x7xf32> to vector<7xf32>
    %72 = vector.shape_cast %71 : vector<7xf32> to vector<7x1xf32>
    %73 = vector.broadcast %72 : vector<7x1xf32> to vector<7x7xf32>
    %74 = arith.subf %70, %73 : vector<7x7xf32>
    %75 = math.exp %74 : vector<7x7xf32>
    %cst_26 = arith.constant dense<0.000000e+00> : vector<7xf32>
    %76 = vector.multi_reduction <add>, %75, %cst_26 [1] : vector<7x7xf32> to vector<7xf32>
    %77 = vector.shape_cast %76 : vector<7xf32> to vector<7x1xf32>
    %78 = tpu.reciprocal %77 {approx = true} : vector<7x1xf32> -> vector<7x1xf32>
    %79 = vector.broadcast %78 : vector<7x1xf32> to vector<7x7xf32>
    %80 = arith.mulf %75, %79 : vector<7x7xf32>
    %81 = vector.extract_strided_slice %9 {offsets = [0, 24], sizes = [7, 8], strides = [1, 1]} : vector<7x32xf32> to vector<7x8xf32>
    %cst_27 = arith.constant dense<0.000000e+00> : vector<7x8xf32>
    %82 = tpu.matmul %80, %81, %cst_27 {dimension_numbers = #tpu.dot_dimension_numbers<[1], [0], [0], [1], [0, 0, 1, 1], [], []>} : vector<7x7xf32>, vector<7x8xf32>, vector<7x8xf32> -> vector<7x8xf32>
    %83 = tpu.concatenate %28, %46, %64, %82 in 1 : vector<7x8xf32>, vector<7x8xf32>, vector<7x8xf32>, vector<7x8xf32> -> vector<7x32xf32>
    %c0_28 = arith.constant 0 : index
    %c0_29 = arith.constant 0 : index
    %84 = vector.load %arg5[%c0_28, %c0_29] : memref<32x32xf32, #tpu.memory_space<vmem>>, vector<32x32xf32>
    %cst_30 = arith.constant dense<0.000000e+00> : vector<7x32xf32>
    %85 = tpu.matmul %83, %84, %cst_30 {dimension_numbers = #tpu.dot_dimension_numbers<[1], [0], [0], [1], [0, 0, 1, 1], [], []>} : vector<7x32xf32>, vector<32x32xf32>, vector<7x32xf32> -> vector<7x32xf32>
    %c0_31 = arith.constant 0 : index
    %c0_32 = arith.constant 0 : index
    %86 = vector.load %arg6[%c0_31, %c0_32] : memref<1x32xf32, #tpu.memory_space<vmem>>, vector<1x32xf32>
    %87 = vector.broadcast %86 : vector<1x32xf32> to vector<7x32xf32>
    %88 = arith.addf %85, %87 : vector<7x32xf32>
    %89 = arith.addf %1, %88 : vector<7x32xf32>
    %c0_33 = arith.constant 0 : index
    %c0_34 = arith.constant 0 : index
    %90 = vector.load %arg7[%c0_33, %c0_34] : memref<1x32xf32, #tpu.memory_space<vmem>>, vector<1x32xf32>
    %c0_35 = arith.constant 0 : index
    %c0_36 = arith.constant 0 : index
    %91 = vector.load %arg8[%c0_35, %c0_36] : memref<1x32xf32, #tpu.memory_space<vmem>>, vector<1x32xf32>
    %cst_37 = arith.constant dense<0.000000e+00> : vector<7xf32>
    %92 = vector.multi_reduction <add>, %89, %cst_37 [1] : vector<7x32xf32> to vector<7xf32>
    %93 = vector.shape_cast %92 : vector<7xf32> to vector<7x1xf32>
    %cst_38 = arith.constant 3.200000e+01 : f32
    %94 = vector.broadcast %cst_38 : f32 to vector<7x1xf32>
    %95 = arith.divf %93, %94 : vector<7x1xf32>
    %96 = vector.broadcast %95 : vector<7x1xf32> to vector<7x32xf32>
    %97 = arith.subf %89, %96 : vector<7x32xf32>
    %98 = arith.mulf %97, %97 : vector<7x32xf32>
    %cst_39 = arith.constant dense<0.000000e+00> : vector<7xf32>
    %99 = vector.multi_reduction <add>, %98, %cst_39 [1] : vector<7x32xf32> to vector<7xf32>
    %100 = vector.shape_cast %99 : vector<7xf32> to vector<7x1xf32>
    %cst_40 = arith.constant 3.200000e+01 : f32
    %101 = vector.broadcast %cst_40 : f32 to vector<7x1xf32>
    %102 = arith.divf %100, %101 : vector<7x1xf32>
    %103 = vector.broadcast %95 : vector<7x1xf32> to vector<7x32xf32>
    %104 = arith.subf %89, %103 : vector<7x32xf32>
    %cst_41 = arith.constant 9.99999974E-6 : f32
    %105 = vector.broadcast %cst_41 : f32 to vector<7x1xf32>
    %106 = arith.addf %102, %105 : vector<7x1xf32>
    %107 = math.rsqrt %106 : vector<7x1xf32>
    %108 = vector.broadcast %107 : vector<7x1xf32> to vector<7x32xf32>
    %109 = arith.mulf %104, %108 : vector<7x32xf32>
    %110 = vector.broadcast %90 : vector<1x32xf32> to vector<7x32xf32>
    %111 = arith.mulf %109, %110 : vector<7x32xf32>
    %112 = vector.broadcast %91 : vector<1x32xf32> to vector<7x32xf32>
    %113 = arith.addf %111, %112 : vector<7x32xf32>
    %c0_42 = arith.constant 0 : index
    %c0_43 = arith.constant 0 : index
    %c0_44 = arith.constant 0 : index
    %114 = vector.load %arg10[%c0_42, %c0_43, %c0_44] : memref<1x7x32xf32, #tpu.memory_space<vmem>>, vector<1x7x32xf32>
    %115 = vector.shape_cast %114 : vector<1x7x32xf32> to vector<7x32xf32>
    %116 = vector.shape_cast %113 : vector<7x32xf32> to vector<1x7x32xf32>
    tpu.vector_store %arg10[%c0_42, %c0_43, %c0_44], %116 {strides = array<i32>} : memref<1x7x32xf32, #tpu.memory_space<vmem>>, vector<1x7x32xf32>,
    return
  }
  func.func @transform_0(%arg0: i32) -> (i32, i32, i32) {
    %c0_i32 = arith.constant 0 : i32
    %c0_i32_0 = arith.constant 0 : i32
    %c0_i32_1 = arith.constant 0 : i32
    return %arg0, %c0_i32, %c0_i32_0 : i32, i32, i32
  }
  func.func @transform_1(%arg0: i32) -> (i32, i32, i32) {
    %c0_i32 = arith.constant 0 : i32
    %c0_i32_0 = arith.constant 0 : i32
    %c0_i32_1 = arith.constant 0 : i32
    return %arg0, %c0_i32, %c0_i32_0 : i32, i32, i32
  }
  func.func @transform_2(%arg0: i32) -> (i32, i32) {
    %c0_i32 = arith.constant 0 : i32
    %c0_i32_0 = arith.constant 0 : i32
    %c0_i32_1 = arith.constant 0 : i32
    return %c0_i32, %c0_i32_0 : i32, i32
  }
  func.func @transform_3(%arg0: i32) -> (i32, i32) {
    %c0_i32 = arith.constant 0 : i32
    %c0_i32_0 = arith.constant 0 : i32
    %c0_i32_1 = arith.constant 0 : i32
    return %c0_i32, %c0_i32_0 : i32, i32
  }
  func.func @transform_4(%arg0: i32) -> (i32, i32) {
    %c0_i32 = arith.constant 0 : i32
    %c0_i32_0 = arith.constant 0 : i32
    %c0_i32_1 = arith.constant 0 : i32
    return %c0_i32, %c0_i32_0 : i32, i32
  }
  func.func @transform_5(%arg0: i32) -> (i32, i32) {
    %c0_i32 = arith.constant 0 : i32
    %c0_i32_0 = arith.constant 0 : i32
    %c0_i32_1 = arith.constant 0 : i32
    return %c0_i32, %c0_i32_0 : i32, i32
  }
  func.func @transform_6(%arg0: i32) -> (i32, i32) {
    %c0_i32 = arith.constant 0 : i32
    %c0_i32_0 = arith.constant 0 : i32
    %c0_i32_1 = arith.constant 0 : i32
    return %c0_i32, %c0_i32_0 : i32, i32
  }
  func.func @transform_7(%arg0: i32) -> (i32, i32) {
    %c0_i32 = arith.constant 0 : i32
    %c0_i32_0 = arith.constant 0 : i32
    %c0_i32_1 = arith.constant 0 : i32
    return %c0_i32, %c0_i32_0 : i32, i32
  }
  func.func @transform_8(%arg0: i32) -> (i32, i32) {
    %c0_i32 = arith.constant 0 : i32
    %c0_i32_0 = arith.constant 0 : i32
    %c0_i32_1 = arith.constant 0 : i32
    return %c0_i32, %c0_i32_0 : i32, i32
  }
  func.func @transform_9(%arg0: i32) -> (i32, i32, i32) {
    %c0_i32 = arith.constant 0 : i32
    %c0_i32_0 = arith.constant 0 : i32
    %c0_i32_1 = arith.constant 0 : i32
    return %arg0, %c0_i32, %c0_i32_0 : i32, i32, i32
  }
}

module attributes {stable_mosaic.version = 11 : i64} {
  func.func @_mha_ln_kernel(%arg0: i32, %arg1: memref<1x4x32xf32, #tpu.memory_space<vmem>>, %arg2: memref<1x4x32xf32, #tpu.memory_space<vmem>>, %arg3: memref<32x96xf32, #tpu.memory_space<vmem>>, %arg4: memref<1x96xf32, #tpu.memory_space<vmem>>, %arg5: memref<32x32xf32, #tpu.memory_space<vmem>>, %arg6: memref<1x32xf32, #tpu.memory_space<vmem>>, %arg7: memref<1x32xf32, #tpu.memory_space<vmem>>, %arg8: memref<1x32xf32, #tpu.memory_space<vmem>>, %arg9: memref<4x4xf32, #tpu.memory_space<vmem>>, %arg10: memref<1x4x32xf32, #tpu.memory_space<vmem>>) attributes {dimension_semantics = [#tpu.dimension_semantics<parallel>], iteration_bounds = array<i64: 2>, scalar_prefetch = 0 : i64, scratch_operands = 0 : i64, tpu.core_type = #tpu.core_type<tc>, window_params = [{transform_indices = @transform_0, window_bounds = array<i64: 1, 4, 32>}, {transform_indices = @transform_1, window_bounds = array<i64: 1, 4, 32>}, {pipeline_mode = #tpu.pipeline_mode<synchronous>, transform_indices = @transform_2, window_bounds = array<i64: 32, 96>}, {pipeline_mode = #tpu.pipeline_mode<synchronous>, transform_indices = @transform_3, window_bounds = array<i64: 1, 96>}, {pipeline_mode = #tpu.pipeline_mode<synchronous>, transform_indices = @transform_4, window_bounds = array<i64: 32, 32>}, {pipeline_mode = #tpu.pipeline_mode<synchronous>, transform_indices = @transform_5, window_bounds = array<i64: 1, 32>}, {pipeline_mode = #tpu.pipeline_mode<synchronous>, transform_indices = @transform_6, window_bounds = array<i64: 1, 32>}, {pipeline_mode = #tpu.pipeline_mode<synchronous>, transform_indices = @transform_7, window_bounds = array<i64: 1, 32>}, {pipeline_mode = #tpu.pipeline_mode<synchronous>, transform_indices = @transform_8, window_bounds = array<i64: 4, 4>}, {transform_indices = @transform_9, window_bounds = array<i64: 1, 4, 32>}]} {
    %c0 = arith.constant 0 : index
    %c0_0 = arith.constant 0 : index
    %c0_1 = arith.constant 0 : index
    %0 = vector.load %arg1[%c0, %c0_0, %c0_1] : memref<1x4x32xf32, #tpu.memory_space<vmem>>, vector<1x4x32xf32>
    %1 = vector.shape_cast %0 : vector<1x4x32xf32> to vector<4x32xf32>
    %c0_2 = arith.constant 0 : index
    %c0_3 = arith.constant 0 : index
    %2 = vector.load %arg3[%c0_2, %c0_3] : memref<32x96xf32, #tpu.memory_space<vmem>>, vector<32x96xf32>
    %c0_4 = arith.constant 0 : index
    %c0_5 = arith.constant 0 : index
    %3 = vector.load %arg4[%c0_4, %c0_5] : memref<1x96xf32, #tpu.memory_space<vmem>>, vector<1x96xf32>
    %cst = arith.constant dense<0.000000e+00> : vector<4x96xf32>
    %4 = tpu.matmul %1, %2, %cst {dimension_numbers = #tpu.dot_dimension_numbers<[1], [0], [0], [1], [0, 0, 1, 1], [], []>} : vector<4x32xf32>, vector<32x96xf32>, vector<4x96xf32> -> vector<4x96xf32>
    %5 = vector.broadcast %3 : vector<1x96xf32> to vector<4x96xf32>
    %6 = arith.addf %4, %5 : vector<4x96xf32>
    %7 = vector.extract_strided_slice %6 {offsets = [0, 0], sizes = [4, 32], strides = [1, 1]} : vector<4x96xf32> to vector<4x32xf32>
    %8 = vector.extract_strided_slice %6 {offsets = [0, 32], sizes = [4, 32], strides = [1, 1]} : vector<4x96xf32> to vector<4x32xf32>
    %9 = vector.extract_strided_slice %6 {offsets = [0, 64], sizes = [4, 32], strides = [1, 1]} : vector<4x96xf32> to vector<4x32xf32>
    %c0_6 = arith.constant 0 : index
    %c0_7 = arith.constant 0 : index
    %10 = vector.load %arg9[%c0_6, %c0_7] : memref<4x4xf32, #tpu.memory_space<vmem>>, vector<4x4xf32>
    %11 = vector.extract_strided_slice %7 {offsets = [0, 0], sizes = [4, 8], strides = [1, 1]} : vector<4x32xf32> to vector<4x8xf32>
    %12 = vector.extract_strided_slice %8 {offsets = [0, 0], sizes = [4, 8], strides = [1, 1]} : vector<4x32xf32> to vector<4x8xf32>
    %cst_8 = arith.constant dense<0.000000e+00> : vector<4x4xf32>
    %13 = tpu.matmul %11, %12, %cst_8 {dimension_numbers = #tpu.dot_dimension_numbers<[1], [1], [0], [0], [0, 0, 1, 0], [], []>} : vector<4x8xf32>, vector<4x8xf32>, vector<4x4xf32> -> vector<4x4xf32>
    %cst_9 = arith.constant 0.353553385 : f32
    %14 = vector.broadcast %cst_9 : f32 to vector<4x4xf32>
    %15 = arith.mulf %13, %14 : vector<4x4xf32>
    %16 = arith.addf %15, %10 : vector<4x4xf32>
    %cst_10 = arith.constant dense<0xFF800000> : vector<4xf32>
    %17 = vector.multi_reduction <maximumf>, %16, %cst_10 [1] : vector<4x4xf32> to vector<4xf32>
    %18 = vector.shape_cast %17 : vector<4xf32> to vector<4x1xf32>
    %19 = vector.broadcast %18 : vector<4x1xf32> to vector<4x4xf32>
    %20 = arith.subf %16, %19 : vector<4x4xf32>
    %21 = math.exp %20 : vector<4x4xf32>
    %cst_11 = arith.constant dense<0.000000e+00> : vector<4xf32>
    %22 = vector.multi_reduction <add>, %21, %cst_11 [1] : vector<4x4xf32> to vector<4xf32>
    %23 = vector.shape_cast %22 : vector<4xf32> to vector<4x1xf32>
    %24 = tpu.reciprocal %23 {approx = true} : vector<4x1xf32> -> vector<4x1xf32>
    %25 = vector.broadcast %24 : vector<4x1xf32> to vector<4x4xf32>
    %26 = arith.mulf %21, %25 : vector<4x4xf32>
    %27 = vector.extract_strided_slice %9 {offsets = [0, 0], sizes = [4, 8], strides = [1, 1]} : vector<4x32xf32> to vector<4x8xf32>
    %cst_12 = arith.constant dense<0.000000e+00> : vector<4x8xf32>
    %28 = tpu.matmul %26, %27, %cst_12 {dimension_numbers = #tpu.dot_dimension_numbers<[1], [0], [0], [1], [0, 0, 1, 1], [], []>} : vector<4x4xf32>, vector<4x8xf32>, vector<4x8xf32> -> vector<4x8xf32>
    %29 = vector.extract_strided_slice %7 {offsets = [0, 8], sizes = [4, 8], strides = [1, 1]} : vector<4x32xf32> to vector<4x8xf32>
    %30 = vector.extract_strided_slice %8 {offsets = [0, 8], sizes = [4, 8], strides = [1, 1]} : vector<4x32xf32> to vector<4x8xf32>
    %cst_13 = arith.constant dense<0.000000e+00> : vector<4x4xf32>
    %31 = tpu.matmul %29, %30, %cst_13 {dimension_numbers = #tpu.dot_dimension_numbers<[1], [1], [0], [0], [0, 0, 1, 0], [], []>} : vector<4x8xf32>, vector<4x8xf32>, vector<4x4xf32> -> vector<4x4xf32>
    %cst_14 = arith.constant 0.353553385 : f32
    %32 = vector.broadcast %cst_14 : f32 to vector<4x4xf32>
    %33 = arith.mulf %31, %32 : vector<4x4xf32>
    %34 = arith.addf %33, %10 : vector<4x4xf32>
    %cst_15 = arith.constant dense<0xFF800000> : vector<4xf32>
    %35 = vector.multi_reduction <maximumf>, %34, %cst_15 [1] : vector<4x4xf32> to vector<4xf32>
    %36 = vector.shape_cast %35 : vector<4xf32> to vector<4x1xf32>
    %37 = vector.broadcast %36 : vector<4x1xf32> to vector<4x4xf32>
    %38 = arith.subf %34, %37 : vector<4x4xf32>
    %39 = math.exp %38 : vector<4x4xf32>
    %cst_16 = arith.constant dense<0.000000e+00> : vector<4xf32>
    %40 = vector.multi_reduction <add>, %39, %cst_16 [1] : vector<4x4xf32> to vector<4xf32>
    %41 = vector.shape_cast %40 : vector<4xf32> to vector<4x1xf32>
    %42 = tpu.reciprocal %41 {approx = true} : vector<4x1xf32> -> vector<4x1xf32>
    %43 = vector.broadcast %42 : vector<4x1xf32> to vector<4x4xf32>
    %44 = arith.mulf %39, %43 : vector<4x4xf32>
    %45 = vector.extract_strided_slice %9 {offsets = [0, 8], sizes = [4, 8], strides = [1, 1]} : vector<4x32xf32> to vector<4x8xf32>
    %cst_17 = arith.constant dense<0.000000e+00> : vector<4x8xf32>
    %46 = tpu.matmul %44, %45, %cst_17 {dimension_numbers = #tpu.dot_dimension_numbers<[1], [0], [0], [1], [0, 0, 1, 1], [], []>} : vector<4x4xf32>, vector<4x8xf32>, vector<4x8xf32> -> vector<4x8xf32>
    %47 = vector.extract_strided_slice %7 {offsets = [0, 16], sizes = [4, 8], strides = [1, 1]} : vector<4x32xf32> to vector<4x8xf32>
    %48 = vector.extract_strided_slice %8 {offsets = [0, 16], sizes = [4, 8], strides = [1, 1]} : vector<4x32xf32> to vector<4x8xf32>
    %cst_18 = arith.constant dense<0.000000e+00> : vector<4x4xf32>
    %49 = tpu.matmul %47, %48, %cst_18 {dimension_numbers = #tpu.dot_dimension_numbers<[1], [1], [0], [0], [0, 0, 1, 0], [], []>} : vector<4x8xf32>, vector<4x8xf32>, vector<4x4xf32> -> vector<4x4xf32>
    %cst_19 = arith.constant 0.353553385 : f32
    %50 = vector.broadcast %cst_19 : f32 to vector<4x4xf32>
    %51 = arith.mulf %49, %50 : vector<4x4xf32>
    %52 = arith.addf %51, %10 : vector<4x4xf32>
    %cst_20 = arith.constant dense<0xFF800000> : vector<4xf32>
    %53 = vector.multi_reduction <maximumf>, %52, %cst_20 [1] : vector<4x4xf32> to vector<4xf32>
    %54 = vector.shape_cast %53 : vector<4xf32> to vector<4x1xf32>
    %55 = vector.broadcast %54 : vector<4x1xf32> to vector<4x4xf32>
    %56 = arith.subf %52, %55 : vector<4x4xf32>
    %57 = math.exp %56 : vector<4x4xf32>
    %cst_21 = arith.constant dense<0.000000e+00> : vector<4xf32>
    %58 = vector.multi_reduction <add>, %57, %cst_21 [1] : vector<4x4xf32> to vector<4xf32>
    %59 = vector.shape_cast %58 : vector<4xf32> to vector<4x1xf32>
    %60 = tpu.reciprocal %59 {approx = true} : vector<4x1xf32> -> vector<4x1xf32>
    %61 = vector.broadcast %60 : vector<4x1xf32> to vector<4x4xf32>
    %62 = arith.mulf %57, %61 : vector<4x4xf32>
    %63 = vector.extract_strided_slice %9 {offsets = [0, 16], sizes = [4, 8], strides = [1, 1]} : vector<4x32xf32> to vector<4x8xf32>
    %cst_22 = arith.constant dense<0.000000e+00> : vector<4x8xf32>
    %64 = tpu.matmul %62, %63, %cst_22 {dimension_numbers = #tpu.dot_dimension_numbers<[1], [0], [0], [1], [0, 0, 1, 1], [], []>} : vector<4x4xf32>, vector<4x8xf32>, vector<4x8xf32> -> vector<4x8xf32>
    %65 = vector.extract_strided_slice %7 {offsets = [0, 24], sizes = [4, 8], strides = [1, 1]} : vector<4x32xf32> to vector<4x8xf32>
    %66 = vector.extract_strided_slice %8 {offsets = [0, 24], sizes = [4, 8], strides = [1, 1]} : vector<4x32xf32> to vector<4x8xf32>
    %cst_23 = arith.constant dense<0.000000e+00> : vector<4x4xf32>
    %67 = tpu.matmul %65, %66, %cst_23 {dimension_numbers = #tpu.dot_dimension_numbers<[1], [1], [0], [0], [0, 0, 1, 0], [], []>} : vector<4x8xf32>, vector<4x8xf32>, vector<4x4xf32> -> vector<4x4xf32>
    %cst_24 = arith.constant 0.353553385 : f32
    %68 = vector.broadcast %cst_24 : f32 to vector<4x4xf32>
    %69 = arith.mulf %67, %68 : vector<4x4xf32>
    %70 = arith.addf %69, %10 : vector<4x4xf32>
    %cst_25 = arith.constant dense<0xFF800000> : vector<4xf32>
    %71 = vector.multi_reduction <maximumf>, %70, %cst_25 [1] : vector<4x4xf32> to vector<4xf32>
    %72 = vector.shape_cast %71 : vector<4xf32> to vector<4x1xf32>
    %73 = vector.broadcast %72 : vector<4x1xf32> to vector<4x4xf32>
    %74 = arith.subf %70, %73 : vector<4x4xf32>
    %75 = math.exp %74 : vector<4x4xf32>
    %cst_26 = arith.constant dense<0.000000e+00> : vector<4xf32>
    %76 = vector.multi_reduction <add>, %75, %cst_26 [1] : vector<4x4xf32> to vector<4xf32>
    %77 = vector.shape_cast %76 : vector<4xf32> to vector<4x1xf32>
    %78 = tpu.reciprocal %77 {approx = true} : vector<4x1xf32> -> vector<4x1xf32>
    %79 = vector.broadcast %78 : vector<4x1xf32> to vector<4x4xf32>
    %80 = arith.mulf %75, %79 : vector<4x4xf32>
    %81 = vector.extract_strided_slice %9 {offsets = [0, 24], sizes = [4, 8], strides = [1, 1]} : vector<4x32xf32> to vector<4x8xf32>
    %cst_27 = arith.constant dense<0.000000e+00> : vector<4x8xf32>
    %82 = tpu.matmul %80, %81, %cst_27 {dimension_numbers = #tpu.dot_dimension_numbers<[1], [0], [0], [1], [0, 0, 1, 1], [], []>} : vector<4x4xf32>, vector<4x8xf32>, vector<4x8xf32> -> vector<4x8xf32>
    %83 = tpu.concatenate %28, %46, %64, %82 in 1 : vector<4x8xf32>, vector<4x8xf32>, vector<4x8xf32>, vector<4x8xf32> -> vector<4x32xf32>
    %c0_28 = arith.constant 0 : index
    %c0_29 = arith.constant 0 : index
    %84 = vector.load %arg5[%c0_28, %c0_29] : memref<32x32xf32, #tpu.memory_space<vmem>>, vector<32x32xf32>
    %cst_30 = arith.constant dense<0.000000e+00> : vector<4x32xf32>
    %85 = tpu.matmul %83, %84, %cst_30 {dimension_numbers = #tpu.dot_dimension_numbers<[1], [0], [0], [1], [0, 0, 1, 1], [], []>} : vector<4x32xf32>, vector<32x32xf32>, vector<4x32xf32> -> vector<4x32xf32>
    %c0_31 = arith.constant 0 : index
    %c0_32 = arith.constant 0 : index
    %86 = vector.load %arg6[%c0_31, %c0_32] : memref<1x32xf32, #tpu.memory_space<vmem>>, vector<1x32xf32>
    %87 = vector.broadcast %86 : vector<1x32xf32> to vector<4x32xf32>
    %88 = arith.addf %85, %87 : vector<4x32xf32>
    %89 = arith.addf %1, %88 : vector<4x32xf32>
    %c0_33 = arith.constant 0 : index
    %c0_34 = arith.constant 0 : index
    %90 = vector.load %arg7[%c0_33, %c0_34] : memref<1x32xf32, #tpu.memory_space<vmem>>, vector<1x32xf32>
    %c0_35 = arith.constant 0 : index
    %c0_36 = arith.constant 0 : index
    %91 = vector.load %arg8[%c0_35, %c0_36] : memref<1x32xf32, #tpu.memory_space<vmem>>, vector<1x32xf32>
    %cst_37 = arith.constant dense<0.000000e+00> : vector<4xf32>
    %92 = vector.multi_reduction <add>, %89, %cst_37 [1] : vector<4x32xf32> to vector<4xf32>
    %93 = vector.shape_cast %92 : vector<4xf32> to vector<4x1xf32>
    %cst_38 = arith.constant 3.200000e+01 : f32
    %94 = vector.broadcast %cst_38 : f32 to vector<4x1xf32>
    %95 = arith.divf %93, %94 : vector<4x1xf32>
    %96 = vector.broadcast %95 : vector<4x1xf32> to vector<4x32xf32>
    %97 = arith.subf %89, %96 : vector<4x32xf32>
    %98 = arith.mulf %97, %97 : vector<4x32xf32>
    %cst_39 = arith.constant dense<0.000000e+00> : vector<4xf32>
    %99 = vector.multi_reduction <add>, %98, %cst_39 [1] : vector<4x32xf32> to vector<4xf32>
    %100 = vector.shape_cast %99 : vector<4xf32> to vector<4x1xf32>
    %cst_40 = arith.constant 3.200000e+01 : f32
    %101 = vector.broadcast %cst_40 : f32 to vector<4x1xf32>
    %102 = arith.divf %100, %101 : vector<4x1xf32>
    %103 = vector.broadcast %95 : vector<4x1xf32> to vector<4x32xf32>
    %104 = arith.subf %89, %103 : vector<4x32xf32>
    %cst_41 = arith.constant 9.99999974E-6 : f32
    %105 = vector.broadcast %cst_41 : f32 to vector<4x1xf32>
    %106 = arith.addf %102, %105 : vector<4x1xf32>
    %107 = math.rsqrt %106 : vector<4x1xf32>
    %108 = vector.broadcast %107 : vector<4x1xf32> to vector<4x32xf32>
    %109 = arith.mulf %104, %108 : vector<4x32xf32>
    %110 = vector.broadcast %90 : vector<1x32xf32> to vector<4x32xf32>
    %111 = arith.mulf %109, %110 : vector<4x32xf32>
    %112 = vector.broadcast %91 : vector<1x32xf32> to vector<4x32xf32>
    %113 = arith.addf %111, %112 : vector<4x32xf32>
    %c0_42 = arith.constant 0 : index
    %c0_43 = arith.constant 0 : index
    %c0_44 = arith.constant 0 : index
    %114 = vector.load %arg10[%c0_42, %c0_43, %c0_44] : memref<1x4x32xf32, #tpu.memory_space<vmem>>, vector<1x4x32xf32>
    %115 = vector.shape_cast %114 : vector<1x4x32xf32> to vector<4x32xf32>
    %116 = vector.shape_cast %113 : vector<4x32xf32> to vector<1x4x32xf32>
    tpu.vector_store %arg10[%c0_42, %c0_43, %c0_44], %116 {strides = array<i32>} : memref<1x4x32xf32, #tpu.memory_space<vmem>>, vector<1x4x32xf32>,
    return
  }
  func.func @transform_0(%arg0: i32) -> (i32, i32, i32) {
    %c0_i32 = arith.constant 0 : i32
    %c0_i32_0 = arith.constant 0 : i32
    %c0_i32_1 = arith.constant 0 : i32
    return %arg0, %c0_i32, %c0_i32_0 : i32, i32, i32
  }
  func.func @transform_1(%arg0: i32) -> (i32, i32, i32) {
    %c0_i32 = arith.constant 0 : i32
    %c0_i32_0 = arith.constant 0 : i32
    %c0_i32_1 = arith.constant 0 : i32
    return %arg0, %c0_i32, %c0_i32_0 : i32, i32, i32
  }
  func.func @transform_2(%arg0: i32) -> (i32, i32) {
    %c0_i32 = arith.constant 0 : i32
    %c0_i32_0 = arith.constant 0 : i32
    %c0_i32_1 = arith.constant 0 : i32
    return %c0_i32, %c0_i32_0 : i32, i32
  }
  func.func @transform_3(%arg0: i32) -> (i32, i32) {
    %c0_i32 = arith.constant 0 : i32
    %c0_i32_0 = arith.constant 0 : i32
    %c0_i32_1 = arith.constant 0 : i32
    return %c0_i32, %c0_i32_0 : i32, i32
  }
  func.func @transform_4(%arg0: i32) -> (i32, i32) {
    %c0_i32 = arith.constant 0 : i32
    %c0_i32_0 = arith.constant 0 : i32
    %c0_i32_1 = arith.constant 0 : i32
    return %c0_i32, %c0_i32_0 : i32, i32
  }
  func.func @transform_5(%arg0: i32) -> (i32, i32) {
    %c0_i32 = arith.constant 0 : i32
    %c0_i32_0 = arith.constant 0 : i32
    %c0_i32_1 = arith.constant 0 : i32
    return %c0_i32, %c0_i32_0 : i32, i32
  }
  func.func @transform_6(%arg0: i32) -> (i32, i32) {
    %c0_i32 = arith.constant 0 : i32
    %c0_i32_0 = arith.constant 0 : i32
    %c0_i32_1 = arith.constant 0 : i32
    return %c0_i32, %c0_i32_0 : i32, i32
  }
  func.func @transform_7(%arg0: i32) -> (i32, i32) {
    %c0_i32 = arith.constant 0 : i32
    %c0_i32_0 = arith.constant 0 : i32
    %c0_i32_1 = arith.constant 0 : i32
    return %c0_i32, %c0_i32_0 : i32, i32
  }
  func.func @transform_8(%arg0: i32) -> (i32, i32) {
    %c0_i32 = arith.constant 0 : i32
    %c0_i32_0 = arith.constant 0 : i32
    %c0_i32_1 = arith.constant 0 : i32
    return %c0_i32, %c0_i32_0 : i32, i32
  }
  func.func @transform_9(%arg0: i32) -> (i32, i32, i32) {
    %c0_i32 = arith.constant 0 : i32
    %c0_i32_0 = arith.constant 0 : i32
    %c0_i32_1 = arith.constant 0 : i32
    return %arg0, %c0_i32, %c0_i32_0 : i32, i32, i32
  }
}

module attributes {stable_mosaic.version = 11 : i64} {
  func.func @_mha_ln_kernel(%arg0: i32, %arg1: memref<1x4x32xf32, #tpu.memory_space<vmem>>, %arg2: memref<1x8x32xf32, #tpu.memory_space<vmem>>, %arg3: memref<32x96xf32, #tpu.memory_space<vmem>>, %arg4: memref<1x96xf32, #tpu.memory_space<vmem>>, %arg5: memref<32x32xf32, #tpu.memory_space<vmem>>, %arg6: memref<1x32xf32, #tpu.memory_space<vmem>>, %arg7: memref<1x32xf32, #tpu.memory_space<vmem>>, %arg8: memref<1x32xf32, #tpu.memory_space<vmem>>, %arg9: memref<4x8xf32, #tpu.memory_space<vmem>>, %arg10: memref<1x4x32xf32, #tpu.memory_space<vmem>>) attributes {dimension_semantics = [#tpu.dimension_semantics<parallel>], iteration_bounds = array<i64: 2>, scalar_prefetch = 0 : i64, scratch_operands = 0 : i64, tpu.core_type = #tpu.core_type<tc>, window_params = [{transform_indices = @transform_0, window_bounds = array<i64: 1, 4, 32>}, {transform_indices = @transform_1, window_bounds = array<i64: 1, 8, 32>}, {pipeline_mode = #tpu.pipeline_mode<synchronous>, transform_indices = @transform_2, window_bounds = array<i64: 32, 96>}, {pipeline_mode = #tpu.pipeline_mode<synchronous>, transform_indices = @transform_3, window_bounds = array<i64: 1, 96>}, {pipeline_mode = #tpu.pipeline_mode<synchronous>, transform_indices = @transform_4, window_bounds = array<i64: 32, 32>}, {pipeline_mode = #tpu.pipeline_mode<synchronous>, transform_indices = @transform_5, window_bounds = array<i64: 1, 32>}, {pipeline_mode = #tpu.pipeline_mode<synchronous>, transform_indices = @transform_6, window_bounds = array<i64: 1, 32>}, {pipeline_mode = #tpu.pipeline_mode<synchronous>, transform_indices = @transform_7, window_bounds = array<i64: 1, 32>}, {pipeline_mode = #tpu.pipeline_mode<synchronous>, transform_indices = @transform_8, window_bounds = array<i64: 4, 8>}, {transform_indices = @transform_9, window_bounds = array<i64: 1, 4, 32>}]} {
    %c0 = arith.constant 0 : index
    %c0_0 = arith.constant 0 : index
    %c0_1 = arith.constant 0 : index
    %0 = vector.load %arg1[%c0, %c0_0, %c0_1] : memref<1x4x32xf32, #tpu.memory_space<vmem>>, vector<1x4x32xf32>
    %1 = vector.shape_cast %0 : vector<1x4x32xf32> to vector<4x32xf32>
    %c0_2 = arith.constant 0 : index
    %c0_3 = arith.constant 0 : index
    %2 = vector.load %arg3[%c0_2, %c0_3] : memref<32x96xf32, #tpu.memory_space<vmem>>, vector<32x96xf32>
    %c0_4 = arith.constant 0 : index
    %c0_5 = arith.constant 0 : index
    %3 = vector.load %arg4[%c0_4, %c0_5] : memref<1x96xf32, #tpu.memory_space<vmem>>, vector<1x96xf32>
    %c0_6 = arith.constant 0 : index
    %c0_7 = arith.constant 0 : index
    %c0_8 = arith.constant 0 : index
    %4 = vector.load %arg2[%c0_6, %c0_7, %c0_8] : memref<1x8x32xf32, #tpu.memory_space<vmem>>, vector<1x8x32xf32>
    %5 = vector.shape_cast %4 : vector<1x8x32xf32> to vector<8x32xf32>
    %6 = vector.extract_strided_slice %2 {offsets = [0, 0], sizes = [32, 32], strides = [1, 1]} : vector<32x96xf32> to vector<32x32xf32>
    %cst = arith.constant dense<0.000000e+00> : vector<4x32xf32>
    %7 = tpu.matmul %1, %6, %cst {dimension_numbers = #tpu.dot_dimension_numbers<[1], [0], [0], [1], [0, 0, 1, 1], [], []>} : vector<4x32xf32>, vector<32x32xf32>, vector<4x32xf32> -> vector<4x32xf32>
    %8 = vector.extract_strided_slice %3 {offsets = [0, 0], sizes = [1, 32], strides = [1, 1]} : vector<1x96xf32> to vector<1x32xf32>
    %9 = vector.broadcast %8 : vector<1x32xf32> to vector<4x32xf32>
    %10 = arith.addf %7, %9 : vector<4x32xf32>
    %11 = vector.extract_strided_slice %2 {offsets = [0, 32], sizes = [32, 64], strides = [1, 1]} : vector<32x96xf32> to vector<32x64xf32>
    %cst_9 = arith.constant dense<0.000000e+00> : vector<8x64xf32>
    %12 = tpu.matmul %5, %11, %cst_9 {dimension_numbers = #tpu.dot_dimension_numbers<[1], [0], [0], [1], [0, 0, 1, 1], [], []>} : vector<8x32xf32>, vector<32x64xf32>, vector<8x64xf32> -> vector<8x64xf32>
    %13 = vector.extract_strided_slice %3 {offsets = [0, 32], sizes = [1, 64], strides = [1, 1]} : vector<1x96xf32> to vector<1x64xf32>
    %14 = vector.broadcast %13 : vector<1x64xf32> to vector<8x64xf32>
    %15 = arith.addf %12, %14 : vector<8x64xf32>
    %16 = vector.extract_strided_slice %15 {offsets = [0, 0], sizes = [8, 32], strides = [1, 1]} : vector<8x64xf32> to vector<8x32xf32>
    %17 = vector.extract_strided_slice %15 {offsets = [0, 32], sizes = [8, 32], strides = [1, 1]} : vector<8x64xf32> to vector<8x32xf32>
    %c0_10 = arith.constant 0 : index
    %c0_11 = arith.constant 0 : index
    %18 = vector.load %arg9[%c0_10, %c0_11] : memref<4x8xf32, #tpu.memory_space<vmem>>, vector<4x8xf32>
    %19 = vector.extract_strided_slice %10 {offsets = [0, 0], sizes = [4, 8], strides = [1, 1]} : vector<4x32xf32> to vector<4x8xf32>
    %20 = vector.extract_strided_slice %16 {offsets = [0, 0], sizes = [8, 8], strides = [1, 1]} : vector<8x32xf32> to vector<8x8xf32>
    %cst_12 = arith.constant dense<0.000000e+00> : vector<4x8xf32>
    %21 = tpu.matmul %19, %20, %cst_12 {dimension_numbers = #tpu.dot_dimension_numbers<[1], [1], [0], [0], [0, 0, 1, 0], [], []>} : vector<4x8xf32>, vector<8x8xf32>, vector<4x8xf32> -> vector<4x8xf32>
    %cst_13 = arith.constant 0.353553385 : f32
    %22 = vector.broadcast %cst_13 : f32 to vector<4x8xf32>
    %23 = arith.mulf %21, %22 : vector<4x8xf32>
    %24 = arith.addf %23, %18 : vector<4x8xf32>
    %cst_14 = arith.constant dense<0xFF800000> : vector<4xf32>
    %25 = vector.multi_reduction <maximumf>, %24, %cst_14 [1] : vector<4x8xf32> to vector<4xf32>
    %26 = vector.shape_cast %25 : vector<4xf32> to vector<4x1xf32>
    %27 = vector.broadcast %26 : vector<4x1xf32> to vector<4x8xf32>
    %28 = arith.subf %24, %27 : vector<4x8xf32>
    %29 = math.exp %28 : vector<4x8xf32>
    %cst_15 = arith.constant dense<0.000000e+00> : vector<4xf32>
    %30 = vector.multi_reduction <add>, %29, %cst_15 [1] : vector<4x8xf32> to vector<4xf32>
    %31 = vector.shape_cast %30 : vector<4xf32> to vector<4x1xf32>
    %32 = tpu.reciprocal %31 {approx = true} : vector<4x1xf32> -> vector<4x1xf32>
    %33 = vector.broadcast %32 : vector<4x1xf32> to vector<4x8xf32>
    %34 = arith.mulf %29, %33 : vector<4x8xf32>
    %35 = vector.extract_strided_slice %17 {offsets = [0, 0], sizes = [8, 8], strides = [1, 1]} : vector<8x32xf32> to vector<8x8xf32>
    %cst_16 = arith.constant dense<0.000000e+00> : vector<4x8xf32>
    %36 = tpu.matmul %34, %35, %cst_16 {dimension_numbers = #tpu.dot_dimension_numbers<[1], [0], [0], [1], [0, 0, 1, 1], [], []>} : vector<4x8xf32>, vector<8x8xf32>, vector<4x8xf32> -> vector<4x8xf32>
    %37 = vector.extract_strided_slice %10 {offsets = [0, 8], sizes = [4, 8], strides = [1, 1]} : vector<4x32xf32> to vector<4x8xf32>
    %38 = vector.extract_strided_slice %16 {offsets = [0, 8], sizes = [8, 8], strides = [1, 1]} : vector<8x32xf32> to vector<8x8xf32>
    %cst_17 = arith.constant dense<0.000000e+00> : vector<4x8xf32>
    %39 = tpu.matmul %37, %38, %cst_17 {dimension_numbers = #tpu.dot_dimension_numbers<[1], [1], [0], [0], [0, 0, 1, 0], [], []>} : vector<4x8xf32>, vector<8x8xf32>, vector<4x8xf32> -> vector<4x8xf32>
    %cst_18 = arith.constant 0.353553385 : f32
    %40 = vector.broadcast %cst_18 : f32 to vector<4x8xf32>
    %41 = arith.mulf %39, %40 : vector<4x8xf32>
    %42 = arith.addf %41, %18 : vector<4x8xf32>
    %cst_19 = arith.constant dense<0xFF800000> : vector<4xf32>
    %43 = vector.multi_reduction <maximumf>, %42, %cst_19 [1] : vector<4x8xf32> to vector<4xf32>
    %44 = vector.shape_cast %43 : vector<4xf32> to vector<4x1xf32>
    %45 = vector.broadcast %44 : vector<4x1xf32> to vector<4x8xf32>
    %46 = arith.subf %42, %45 : vector<4x8xf32>
    %47 = math.exp %46 : vector<4x8xf32>
    %cst_20 = arith.constant dense<0.000000e+00> : vector<4xf32>
    %48 = vector.multi_reduction <add>, %47, %cst_20 [1] : vector<4x8xf32> to vector<4xf32>
    %49 = vector.shape_cast %48 : vector<4xf32> to vector<4x1xf32>
    %50 = tpu.reciprocal %49 {approx = true} : vector<4x1xf32> -> vector<4x1xf32>
    %51 = vector.broadcast %50 : vector<4x1xf32> to vector<4x8xf32>
    %52 = arith.mulf %47, %51 : vector<4x8xf32>
    %53 = vector.extract_strided_slice %17 {offsets = [0, 8], sizes = [8, 8], strides = [1, 1]} : vector<8x32xf32> to vector<8x8xf32>
    %cst_21 = arith.constant dense<0.000000e+00> : vector<4x8xf32>
    %54 = tpu.matmul %52, %53, %cst_21 {dimension_numbers = #tpu.dot_dimension_numbers<[1], [0], [0], [1], [0, 0, 1, 1], [], []>} : vector<4x8xf32>, vector<8x8xf32>, vector<4x8xf32> -> vector<4x8xf32>
    %55 = vector.extract_strided_slice %10 {offsets = [0, 16], sizes = [4, 8], strides = [1, 1]} : vector<4x32xf32> to vector<4x8xf32>
    %56 = vector.extract_strided_slice %16 {offsets = [0, 16], sizes = [8, 8], strides = [1, 1]} : vector<8x32xf32> to vector<8x8xf32>
    %cst_22 = arith.constant dense<0.000000e+00> : vector<4x8xf32>
    %57 = tpu.matmul %55, %56, %cst_22 {dimension_numbers = #tpu.dot_dimension_numbers<[1], [1], [0], [0], [0, 0, 1, 0], [], []>} : vector<4x8xf32>, vector<8x8xf32>, vector<4x8xf32> -> vector<4x8xf32>
    %cst_23 = arith.constant 0.353553385 : f32
    %58 = vector.broadcast %cst_23 : f32 to vector<4x8xf32>
    %59 = arith.mulf %57, %58 : vector<4x8xf32>
    %60 = arith.addf %59, %18 : vector<4x8xf32>
    %cst_24 = arith.constant dense<0xFF800000> : vector<4xf32>
    %61 = vector.multi_reduction <maximumf>, %60, %cst_24 [1] : vector<4x8xf32> to vector<4xf32>
    %62 = vector.shape_cast %61 : vector<4xf32> to vector<4x1xf32>
    %63 = vector.broadcast %62 : vector<4x1xf32> to vector<4x8xf32>
    %64 = arith.subf %60, %63 : vector<4x8xf32>
    %65 = math.exp %64 : vector<4x8xf32>
    %cst_25 = arith.constant dense<0.000000e+00> : vector<4xf32>
    %66 = vector.multi_reduction <add>, %65, %cst_25 [1] : vector<4x8xf32> to vector<4xf32>
    %67 = vector.shape_cast %66 : vector<4xf32> to vector<4x1xf32>
    %68 = tpu.reciprocal %67 {approx = true} : vector<4x1xf32> -> vector<4x1xf32>
    %69 = vector.broadcast %68 : vector<4x1xf32> to vector<4x8xf32>
    %70 = arith.mulf %65, %69 : vector<4x8xf32>
    %71 = vector.extract_strided_slice %17 {offsets = [0, 16], sizes = [8, 8], strides = [1, 1]} : vector<8x32xf32> to vector<8x8xf32>
    %cst_26 = arith.constant dense<0.000000e+00> : vector<4x8xf32>
    %72 = tpu.matmul %70, %71, %cst_26 {dimension_numbers = #tpu.dot_dimension_numbers<[1], [0], [0], [1], [0, 0, 1, 1], [], []>} : vector<4x8xf32>, vector<8x8xf32>, vector<4x8xf32> -> vector<4x8xf32>
    %73 = vector.extract_strided_slice %10 {offsets = [0, 24], sizes = [4, 8], strides = [1, 1]} : vector<4x32xf32> to vector<4x8xf32>
    %74 = vector.extract_strided_slice %16 {offsets = [0, 24], sizes = [8, 8], strides = [1, 1]} : vector<8x32xf32> to vector<8x8xf32>
    %cst_27 = arith.constant dense<0.000000e+00> : vector<4x8xf32>
    %75 = tpu.matmul %73, %74, %cst_27 {dimension_numbers = #tpu.dot_dimension_numbers<[1], [1], [0], [0], [0, 0, 1, 0], [], []>} : vector<4x8xf32>, vector<8x8xf32>, vector<4x8xf32> -> vector<4x8xf32>
    %cst_28 = arith.constant 0.353553385 : f32
    %76 = vector.broadcast %cst_28 : f32 to vector<4x8xf32>
    %77 = arith.mulf %75, %76 : vector<4x8xf32>
    %78 = arith.addf %77, %18 : vector<4x8xf32>
    %cst_29 = arith.constant dense<0xFF800000> : vector<4xf32>
    %79 = vector.multi_reduction <maximumf>, %78, %cst_29 [1] : vector<4x8xf32> to vector<4xf32>
    %80 = vector.shape_cast %79 : vector<4xf32> to vector<4x1xf32>
    %81 = vector.broadcast %80 : vector<4x1xf32> to vector<4x8xf32>
    %82 = arith.subf %78, %81 : vector<4x8xf32>
    %83 = math.exp %82 : vector<4x8xf32>
    %cst_30 = arith.constant dense<0.000000e+00> : vector<4xf32>
    %84 = vector.multi_reduction <add>, %83, %cst_30 [1] : vector<4x8xf32> to vector<4xf32>
    %85 = vector.shape_cast %84 : vector<4xf32> to vector<4x1xf32>
    %86 = tpu.reciprocal %85 {approx = true} : vector<4x1xf32> -> vector<4x1xf32>
    %87 = vector.broadcast %86 : vector<4x1xf32> to vector<4x8xf32>
    %88 = arith.mulf %83, %87 : vector<4x8xf32>
    %89 = vector.extract_strided_slice %17 {offsets = [0, 24], sizes = [8, 8], strides = [1, 1]} : vector<8x32xf32> to vector<8x8xf32>
    %cst_31 = arith.constant dense<0.000000e+00> : vector<4x8xf32>
    %90 = tpu.matmul %88, %89, %cst_31 {dimension_numbers = #tpu.dot_dimension_numbers<[1], [0], [0], [1], [0, 0, 1, 1], [], []>} : vector<4x8xf32>, vector<8x8xf32>, vector<4x8xf32> -> vector<4x8xf32>
    %91 = tpu.concatenate %36, %54, %72, %90 in 1 : vector<4x8xf32>, vector<4x8xf32>, vector<4x8xf32>, vector<4x8xf32> -> vector<4x32xf32>
    %c0_32 = arith.constant 0 : index
    %c0_33 = arith.constant 0 : index
    %92 = vector.load %arg5[%c0_32, %c0_33] : memref<32x32xf32, #tpu.memory_space<vmem>>, vector<32x32xf32>
    %cst_34 = arith.constant dense<0.000000e+00> : vector<4x32xf32>
    %93 = tpu.matmul %91, %92, %cst_34 {dimension_numbers = #tpu.dot_dimension_numbers<[1], [0], [0], [1], [0, 0, 1, 1], [], []>} : vector<4x32xf32>, vector<32x32xf32>, vector<4x32xf32> -> vector<4x32xf32>
    %c0_35 = arith.constant 0 : index
    %c0_36 = arith.constant 0 : index
    %94 = vector.load %arg6[%c0_35, %c0_36] : memref<1x32xf32, #tpu.memory_space<vmem>>, vector<1x32xf32>
    %95 = vector.broadcast %94 : vector<1x32xf32> to vector<4x32xf32>
    %96 = arith.addf %93, %95 : vector<4x32xf32>
    %97 = arith.addf %1, %96 : vector<4x32xf32>
    %c0_37 = arith.constant 0 : index
    %c0_38 = arith.constant 0 : index
    %98 = vector.load %arg7[%c0_37, %c0_38] : memref<1x32xf32, #tpu.memory_space<vmem>>, vector<1x32xf32>
    %c0_39 = arith.constant 0 : index
    %c0_40 = arith.constant 0 : index
    %99 = vector.load %arg8[%c0_39, %c0_40] : memref<1x32xf32, #tpu.memory_space<vmem>>, vector<1x32xf32>
    %cst_41 = arith.constant dense<0.000000e+00> : vector<4xf32>
    %100 = vector.multi_reduction <add>, %97, %cst_41 [1] : vector<4x32xf32> to vector<4xf32>
    %101 = vector.shape_cast %100 : vector<4xf32> to vector<4x1xf32>
    %cst_42 = arith.constant 3.200000e+01 : f32
    %102 = vector.broadcast %cst_42 : f32 to vector<4x1xf32>
    %103 = arith.divf %101, %102 : vector<4x1xf32>
    %104 = vector.broadcast %103 : vector<4x1xf32> to vector<4x32xf32>
    %105 = arith.subf %97, %104 : vector<4x32xf32>
    %106 = arith.mulf %105, %105 : vector<4x32xf32>
    %cst_43 = arith.constant dense<0.000000e+00> : vector<4xf32>
    %107 = vector.multi_reduction <add>, %106, %cst_43 [1] : vector<4x32xf32> to vector<4xf32>
    %108 = vector.shape_cast %107 : vector<4xf32> to vector<4x1xf32>
    %cst_44 = arith.constant 3.200000e+01 : f32
    %109 = vector.broadcast %cst_44 : f32 to vector<4x1xf32>
    %110 = arith.divf %108, %109 : vector<4x1xf32>
    %111 = vector.broadcast %103 : vector<4x1xf32> to vector<4x32xf32>
    %112 = arith.subf %97, %111 : vector<4x32xf32>
    %cst_45 = arith.constant 9.99999974E-6 : f32
    %113 = vector.broadcast %cst_45 : f32 to vector<4x1xf32>
    %114 = arith.addf %110, %113 : vector<4x1xf32>
    %115 = math.rsqrt %114 : vector<4x1xf32>
    %116 = vector.broadcast %115 : vector<4x1xf32> to vector<4x32xf32>
    %117 = arith.mulf %112, %116 : vector<4x32xf32>
    %118 = vector.broadcast %98 : vector<1x32xf32> to vector<4x32xf32>
    %119 = arith.mulf %117, %118 : vector<4x32xf32>
    %120 = vector.broadcast %99 : vector<1x32xf32> to vector<4x32xf32>
    %121 = arith.addf %119, %120 : vector<4x32xf32>
    %c0_46 = arith.constant 0 : index
    %c0_47 = arith.constant 0 : index
    %c0_48 = arith.constant 0 : index
    %122 = vector.load %arg10[%c0_46, %c0_47, %c0_48] : memref<1x4x32xf32, #tpu.memory_space<vmem>>, vector<1x4x32xf32>
    %123 = vector.shape_cast %122 : vector<1x4x32xf32> to vector<4x32xf32>
    %124 = vector.shape_cast %121 : vector<4x32xf32> to vector<1x4x32xf32>
    tpu.vector_store %arg10[%c0_46, %c0_47, %c0_48], %124 {strides = array<i32>} : memref<1x4x32xf32, #tpu.memory_space<vmem>>, vector<1x4x32xf32>,
    return
  }
  func.func @transform_0(%arg0: i32) -> (i32, i32, i32) {
    %c0_i32 = arith.constant 0 : i32
    %c0_i32_0 = arith.constant 0 : i32
    %c0_i32_1 = arith.constant 0 : i32
    return %arg0, %c0_i32, %c0_i32_0 : i32, i32, i32
  }
  func.func @transform_1(%arg0: i32) -> (i32, i32, i32) {
    %c0_i32 = arith.constant 0 : i32
    %c0_i32_0 = arith.constant 0 : i32
    %c0_i32_1 = arith.constant 0 : i32
    return %arg0, %c0_i32, %c0_i32_0 : i32, i32, i32
  }
  func.func @transform_2(%arg0: i32) -> (i32, i32) {
    %c0_i32 = arith.constant 0 : i32
    %c0_i32_0 = arith.constant 0 : i32
    %c0_i32_1 = arith.constant 0 : i32
    return %c0_i32, %c0_i32_0 : i32, i32
  }
  func.func @transform_3(%arg0: i32) -> (i32, i32) {
    %c0_i32 = arith.constant 0 : i32
    %c0_i32_0 = arith.constant 0 : i32
    %c0_i32_1 = arith.constant 0 : i32
    return %c0_i32, %c0_i32_0 : i32, i32
  }
  func.func @transform_4(%arg0: i32) -> (i32, i32) {
    %c0_i32 = arith.constant 0 : i32
    %c0_i32_0 = arith.constant 0 : i32
    %c0_i32_1 = arith.constant 0 : i32
    return %c0_i32, %c0_i32_0 : i32, i32
  }
  func.func @transform_5(%arg0: i32) -> (i32, i32) {
    %c0_i32 = arith.constant 0 : i32
    %c0_i32_0 = arith.constant 0 : i32
    %c0_i32_1 = arith.constant 0 : i32
    return %c0_i32, %c0_i32_0 : i32, i32
  }
  func.func @transform_6(%arg0: i32) -> (i32, i32) {
    %c0_i32 = arith.constant 0 : i32
    %c0_i32_0 = arith.constant 0 : i32
    %c0_i32_1 = arith.constant 0 : i32
    return %c0_i32, %c0_i32_0 : i32, i32
  }
  func.func @transform_7(%arg0: i32) -> (i32, i32) {
    %c0_i32 = arith.constant 0 : i32
    %c0_i32_0 = arith.constant 0 : i32
    %c0_i32_1 = arith.constant 0 : i32
    return %c0_i32, %c0_i32_0 : i32, i32
  }
  func.func @transform_8(%arg0: i32) -> (i32, i32) {
    %c0_i32 = arith.constant 0 : i32
    %c0_i32_0 = arith.constant 0 : i32
    %c0_i32_1 = arith.constant 0 : i32
    return %c0_i32, %c0_i32_0 : i32, i32
  }
  func.func @transform_9(%arg0: i32) -> (i32, i32, i32) {
    %c0_i32 = arith.constant 0 : i32
    %c0_i32_0 = arith.constant 0 : i32
    %c0_i32_1 = arith.constant 0 : i32
    return %arg0, %c0_i32, %c0_i32_0 : i32, i32, i32
  }
}

module attributes {stable_mosaic.version = 11 : i64} {
  func.func @_vae_head_kernel(%arg0: i32, %arg1: memref<2x4x32xf32, #tpu.memory_space<vmem>>, %arg2: memref<32x64xf32, #tpu.memory_space<vmem>>, %arg3: memref<1x64xf32, #tpu.memory_space<vmem>>, %arg4: memref<64x32xf32, #tpu.memory_space<vmem>>, %arg5: memref<1x32xf32, #tpu.memory_space<vmem>>, %arg6: memref<32x64xf32, #tpu.memory_space<vmem>>, %arg7: memref<1x64xf32, #tpu.memory_space<vmem>>, %arg8: memref<2x64xf32, #tpu.memory_space<vmem>>) attributes {dimension_semantics = [#tpu.dimension_semantics<arbitrary>], iteration_bounds = array<i64: 1>, scalar_prefetch = 0 : i64, scratch_operands = 0 : i64, tpu.core_type = #tpu.core_type<tc>, window_params = [{pipeline_mode = #tpu.pipeline_mode<synchronous>, transform_indices = @transform_0, window_bounds = array<i64: 2, 4, 32>}, {pipeline_mode = #tpu.pipeline_mode<synchronous>, transform_indices = @transform_1, window_bounds = array<i64: 32, 64>}, {pipeline_mode = #tpu.pipeline_mode<synchronous>, transform_indices = @transform_2, window_bounds = array<i64: 1, 64>}, {pipeline_mode = #tpu.pipeline_mode<synchronous>, transform_indices = @transform_3, window_bounds = array<i64: 64, 32>}, {pipeline_mode = #tpu.pipeline_mode<synchronous>, transform_indices = @transform_4, window_bounds = array<i64: 1, 32>}, {pipeline_mode = #tpu.pipeline_mode<synchronous>, transform_indices = @transform_5, window_bounds = array<i64: 32, 64>}, {pipeline_mode = #tpu.pipeline_mode<synchronous>, transform_indices = @transform_6, window_bounds = array<i64: 1, 64>}, {pipeline_mode = #tpu.pipeline_mode<synchronous>, transform_indices = @transform_7, window_bounds = array<i64: 2, 64>}]} {
    %c0 = arith.constant 0 : index
    %c3 = arith.constant 3 : index
    %c0_0 = arith.constant 0 : index
    %0 = vector.load %arg1[%c0, %c3, %c0_0] : memref<2x4x32xf32, #tpu.memory_space<vmem>>, vector<2x1x32xf32>
    %1 = vector.shape_cast %0 : vector<2x1x32xf32> to vector<2x32xf32>
    %c0_1 = arith.constant 0 : index
    %c0_2 = arith.constant 0 : index
    %2 = vector.load %arg2[%c0_1, %c0_2] : memref<32x64xf32, #tpu.memory_space<vmem>>, vector<32x64xf32>
    %cst = arith.constant dense<0.000000e+00> : vector<2x64xf32>
    %3 = tpu.matmul %1, %2, %cst {dimension_numbers = #tpu.dot_dimension_numbers<[1], [0], [0], [1], [0, 0, 1, 1], [], []>} : vector<2x32xf32>, vector<32x64xf32>, vector<2x64xf32> -> vector<2x64xf32>
    %c0_3 = arith.constant 0 : index
    %c0_4 = arith.constant 0 : index
    %4 = vector.load %arg3[%c0_3, %c0_4] : memref<1x64xf32, #tpu.memory_space<vmem>>, vector<1x64xf32>
    %5 = vector.broadcast %4 : vector<1x64xf32> to vector<2x64xf32>
    %6 = arith.addf %3, %5 : vector<2x64xf32>
    %cst_5 = arith.constant 0.000000e+00 : f32
    %7 = vector.broadcast %cst_5 : f32 to vector<2x64xf32>
    %8 = arith.maximumf %6, %7 : vector<2x64xf32>
    %c0_6 = arith.constant 0 : index
    %c0_7 = arith.constant 0 : index
    %9 = vector.load %arg4[%c0_6, %c0_7] : memref<64x32xf32, #tpu.memory_space<vmem>>, vector<64x32xf32>
    %cst_8 = arith.constant dense<0.000000e+00> : vector<2x32xf32>
    %10 = tpu.matmul %8, %9, %cst_8 {dimension_numbers = #tpu.dot_dimension_numbers<[1], [0], [0], [1], [0, 0, 1, 1], [], []>} : vector<2x64xf32>, vector<64x32xf32>, vector<2x32xf32> -> vector<2x32xf32>
    %c0_9 = arith.constant 0 : index
    %c0_10 = arith.constant 0 : index
    %11 = vector.load %arg5[%c0_9, %c0_10] : memref<1x32xf32, #tpu.memory_space<vmem>>, vector<1x32xf32>
    %12 = vector.broadcast %11 : vector<1x32xf32> to vector<2x32xf32>
    %13 = arith.addf %10, %12 : vector<2x32xf32>
    %c0_11 = arith.constant 0 : index
    %c0_12 = arith.constant 0 : index
    %14 = vector.load %arg6[%c0_11, %c0_12] : memref<32x64xf32, #tpu.memory_space<vmem>>, vector<32x64xf32>
    %cst_13 = arith.constant dense<0.000000e+00> : vector<2x64xf32>
    %15 = tpu.matmul %13, %14, %cst_13 {dimension_numbers = #tpu.dot_dimension_numbers<[1], [0], [0], [1], [0, 0, 1, 1], [], []>} : vector<2x32xf32>, vector<32x64xf32>, vector<2x64xf32> -> vector<2x64xf32>
    %c0_14 = arith.constant 0 : index
    %c0_15 = arith.constant 0 : index
    %16 = vector.load %arg7[%c0_14, %c0_15] : memref<1x64xf32, #tpu.memory_space<vmem>>, vector<1x64xf32>
    %17 = vector.broadcast %16 : vector<1x64xf32> to vector<2x64xf32>
    %18 = arith.addf %15, %17 : vector<2x64xf32>
    %c0_16 = arith.constant 0 : index
    %c0_17 = arith.constant 0 : index
    %19 = vector.load %arg8[%c0_16, %c0_17] : memref<2x64xf32, #tpu.memory_space<vmem>>, vector<2x64xf32>
    tpu.vector_store %arg8[%c0_16, %c0_17], %18 {strides = array<i32>} : memref<2x64xf32, #tpu.memory_space<vmem>>, vector<2x64xf32>,
    return
  }
  func.func @transform_0(%arg0: i32) -> (i32, i32, i32) {
    %c0_i32 = arith.constant 0 : i32
    %c0_i32_0 = arith.constant 0 : i32
    %c0_i32_1 = arith.constant 0 : i32
    %c0_i32_2 = arith.constant 0 : i32
    return %c0_i32, %c0_i32_0, %c0_i32_1 : i32, i32, i32
  }
  func.func @transform_1(%arg0: i32) -> (i32, i32) {
    %c0_i32 = arith.constant 0 : i32
    %c0_i32_0 = arith.constant 0 : i32
    %c0_i32_1 = arith.constant 0 : i32
    return %c0_i32, %c0_i32_0 : i32, i32
  }
  func.func @transform_2(%arg0: i32) -> (i32, i32) {
    %c0_i32 = arith.constant 0 : i32
    %c0_i32_0 = arith.constant 0 : i32
    %c0_i32_1 = arith.constant 0 : i32
    return %c0_i32, %c0_i32_0 : i32, i32
  }
  func.func @transform_3(%arg0: i32) -> (i32, i32) {
    %c0_i32 = arith.constant 0 : i32
    %c0_i32_0 = arith.constant 0 : i32
    %c0_i32_1 = arith.constant 0 : i32
    return %c0_i32, %c0_i32_0 : i32, i32
  }
  func.func @transform_4(%arg0: i32) -> (i32, i32) {
    %c0_i32 = arith.constant 0 : i32
    %c0_i32_0 = arith.constant 0 : i32
    %c0_i32_1 = arith.constant 0 : i32
    return %c0_i32, %c0_i32_0 : i32, i32
  }
  func.func @transform_5(%arg0: i32) -> (i32, i32) {
    %c0_i32 = arith.constant 0 : i32
    %c0_i32_0 = arith.constant 0 : i32
    %c0_i32_1 = arith.constant 0 : i32
    return %c0_i32, %c0_i32_0 : i32, i32
  }
  func.func @transform_6(%arg0: i32) -> (i32, i32) {
    %c0_i32 = arith.constant 0 : i32
    %c0_i32_0 = arith.constant 0 : i32
    %c0_i32_1 = arith.constant 0 : i32
    return %c0_i32, %c0_i32_0 : i32, i32
  }
  func.func @transform_7(%arg0: i32) -> (i32, i32) {
    %c0_i32 = arith.constant 0 : i32
    %c0_i32_0 = arith.constant 0 : i32
    %c0_i32_1 = arith.constant 0 : i32
    return %c0_i32, %c0_i32_0 : i32, i32
  }
}

module attributes {stable_mosaic.version = 11 : i64} {
  func.func @_mm_bias_kernel(%arg0: i32, %arg1: memref<2x32xf32, #tpu.memory_space<vmem>>, %arg2: memref<32x32xf32, #tpu.memory_space<vmem>>, %arg3: memref<1x32xf32, #tpu.memory_space<vmem>>, %arg4: memref<2x32xf32, #tpu.memory_space<vmem>>) attributes {dimension_semantics = [#tpu.dimension_semantics<arbitrary>], iteration_bounds = array<i64: 1>, scalar_prefetch = 0 : i64, scratch_operands = 0 : i64, tpu.core_type = #tpu.core_type<tc>, window_params = [{pipeline_mode = #tpu.pipeline_mode<synchronous>, transform_indices = @transform_0, window_bounds = array<i64: 2, 32>}, {pipeline_mode = #tpu.pipeline_mode<synchronous>, transform_indices = @transform_1, window_bounds = array<i64: 32, 32>}, {pipeline_mode = #tpu.pipeline_mode<synchronous>, transform_indices = @transform_2, window_bounds = array<i64: 1, 32>}, {pipeline_mode = #tpu.pipeline_mode<synchronous>, transform_indices = @transform_3, window_bounds = array<i64: 2, 32>}]} {
    %c0 = arith.constant 0 : index
    %c0_0 = arith.constant 0 : index
    %0 = vector.load %arg1[%c0, %c0_0] : memref<2x32xf32, #tpu.memory_space<vmem>>, vector<2x32xf32>
    %c0_1 = arith.constant 0 : index
    %c0_2 = arith.constant 0 : index
    %1 = vector.load %arg2[%c0_1, %c0_2] : memref<32x32xf32, #tpu.memory_space<vmem>>, vector<32x32xf32>
    %cst = arith.constant dense<0.000000e+00> : vector<2x32xf32>
    %2 = tpu.matmul %0, %1, %cst {dimension_numbers = #tpu.dot_dimension_numbers<[1], [0], [0], [1], [0, 0, 1, 1], [], []>} : vector<2x32xf32>, vector<32x32xf32>, vector<2x32xf32> -> vector<2x32xf32>
    %c0_3 = arith.constant 0 : index
    %c0_4 = arith.constant 0 : index
    %3 = vector.load %arg3[%c0_3, %c0_4] : memref<1x32xf32, #tpu.memory_space<vmem>>, vector<1x32xf32>
    %4 = vector.broadcast %3 : vector<1x32xf32> to vector<2x32xf32>
    %5 = arith.addf %2, %4 : vector<2x32xf32>
    %c0_5 = arith.constant 0 : index
    %c0_6 = arith.constant 0 : index
    %6 = vector.load %arg4[%c0_5, %c0_6] : memref<2x32xf32, #tpu.memory_space<vmem>>, vector<2x32xf32>
    tpu.vector_store %arg4[%c0_5, %c0_6], %5 {strides = array<i32>} : memref<2x32xf32, #tpu.memory_space<vmem>>, vector<2x32xf32>,
    return
  }
  func.func @transform_0(%arg0: i32) -> (i32, i32) {
    %c0_i32 = arith.constant 0 : i32
    %c0_i32_0 = arith.constant 0 : i32
    %c0_i32_1 = arith.constant 0 : i32
    return %c0_i32, %c0_i32_0 : i32, i32
  }
  func.func @transform_1(%arg0: i32) -> (i32, i32) {
    %c0_i32 = arith.constant 0 : i32
    %c0_i32_0 = arith.constant 0 : i32
    %c0_i32_1 = arith.constant 0 : i32
    return %c0_i32, %c0_i32_0 : i32, i32
  }
  func.func @transform_2(%arg0: i32) -> (i32, i32) {
    %c0_i32 = arith.constant 0 : i32
    %c0_i32_0 = arith.constant 0 : i32
    %c0_i32_1 = arith.constant 0 : i32
    return %c0_i32, %c0_i32_0 : i32, i32
  }
  func.func @transform_3(%arg0: i32) -> (i32, i32) {
    %c0_i32 = arith.constant 0 : i32
    %c0_i32_0 = arith.constant 0 : i32
    %c0_i32_1 = arith.constant 0 : i32
    return %c0_i32, %c0_i32_0 : i32, i32
  }
}

module attributes {stable_mosaic.version = 11 : i64} {
  func.func @_mha_ln_kernel(%arg0: i32, %arg1: memref<1x8x32xf32, #tpu.memory_space<vmem>>, %arg2: memref<1x4x32xf32, #tpu.memory_space<vmem>>, %arg3: memref<32x96xf32, #tpu.memory_space<vmem>>, %arg4: memref<1x96xf32, #tpu.memory_space<vmem>>, %arg5: memref<32x32xf32, #tpu.memory_space<vmem>>, %arg6: memref<1x32xf32, #tpu.memory_space<vmem>>, %arg7: memref<1x32xf32, #tpu.memory_space<vmem>>, %arg8: memref<1x32xf32, #tpu.memory_space<vmem>>, %arg9: memref<8x4xf32, #tpu.memory_space<vmem>>, %arg10: memref<1x8x32xf32, #tpu.memory_space<vmem>>) attributes {dimension_semantics = [#tpu.dimension_semantics<parallel>], iteration_bounds = array<i64: 2>, scalar_prefetch = 0 : i64, scratch_operands = 0 : i64, tpu.core_type = #tpu.core_type<tc>, window_params = [{transform_indices = @transform_0, window_bounds = array<i64: 1, 8, 32>}, {transform_indices = @transform_1, window_bounds = array<i64: 1, 4, 32>}, {pipeline_mode = #tpu.pipeline_mode<synchronous>, transform_indices = @transform_2, window_bounds = array<i64: 32, 96>}, {pipeline_mode = #tpu.pipeline_mode<synchronous>, transform_indices = @transform_3, window_bounds = array<i64: 1, 96>}, {pipeline_mode = #tpu.pipeline_mode<synchronous>, transform_indices = @transform_4, window_bounds = array<i64: 32, 32>}, {pipeline_mode = #tpu.pipeline_mode<synchronous>, transform_indices = @transform_5, window_bounds = array<i64: 1, 32>}, {pipeline_mode = #tpu.pipeline_mode<synchronous>, transform_indices = @transform_6, window_bounds = array<i64: 1, 32>}, {pipeline_mode = #tpu.pipeline_mode<synchronous>, transform_indices = @transform_7, window_bounds = array<i64: 1, 32>}, {pipeline_mode = #tpu.pipeline_mode<synchronous>, transform_indices = @transform_8, window_bounds = array<i64: 8, 4>}, {transform_indices = @transform_9, window_bounds = array<i64: 1, 8, 32>}]} {
    %c0 = arith.constant 0 : index
    %c0_0 = arith.constant 0 : index
    %c0_1 = arith.constant 0 : index
    %0 = vector.load %arg1[%c0, %c0_0, %c0_1] : memref<1x8x32xf32, #tpu.memory_space<vmem>>, vector<1x8x32xf32>
    %1 = vector.shape_cast %0 : vector<1x8x32xf32> to vector<8x32xf32>
    %c0_2 = arith.constant 0 : index
    %c0_3 = arith.constant 0 : index
    %2 = vector.load %arg3[%c0_2, %c0_3] : memref<32x96xf32, #tpu.memory_space<vmem>>, vector<32x96xf32>
    %c0_4 = arith.constant 0 : index
    %c0_5 = arith.constant 0 : index
    %3 = vector.load %arg4[%c0_4, %c0_5] : memref<1x96xf32, #tpu.memory_space<vmem>>, vector<1x96xf32>
    %c0_6 = arith.constant 0 : index
    %c0_7 = arith.constant 0 : index
    %c0_8 = arith.constant 0 : index
    %4 = vector.load %arg2[%c0_6, %c0_7, %c0_8] : memref<1x4x32xf32, #tpu.memory_space<vmem>>, vector<1x4x32xf32>
    %5 = vector.shape_cast %4 : vector<1x4x32xf32> to vector<4x32xf32>
    %6 = vector.extract_strided_slice %2 {offsets = [0, 0], sizes = [32, 32], strides = [1, 1]} : vector<32x96xf32> to vector<32x32xf32>
    %cst = arith.constant dense<0.000000e+00> : vector<8x32xf32>
    %7 = tpu.matmul %1, %6, %cst {dimension_numbers = #tpu.dot_dimension_numbers<[1], [0], [0], [1], [0, 0, 1, 1], [], []>} : vector<8x32xf32>, vector<32x32xf32>, vector<8x32xf32> -> vector<8x32xf32>
    %8 = vector.extract_strided_slice %3 {offsets = [0, 0], sizes = [1, 32], strides = [1, 1]} : vector<1x96xf32> to vector<1x32xf32>
    %9 = vector.broadcast %8 : vector<1x32xf32> to vector<8x32xf32>
    %10 = arith.addf %7, %9 : vector<8x32xf32>
    %11 = vector.extract_strided_slice %2 {offsets = [0, 32], sizes = [32, 64], strides = [1, 1]} : vector<32x96xf32> to vector<32x64xf32>
    %cst_9 = arith.constant dense<0.000000e+00> : vector<4x64xf32>
    %12 = tpu.matmul %5, %11, %cst_9 {dimension_numbers = #tpu.dot_dimension_numbers<[1], [0], [0], [1], [0, 0, 1, 1], [], []>} : vector<4x32xf32>, vector<32x64xf32>, vector<4x64xf32> -> vector<4x64xf32>
    %13 = vector.extract_strided_slice %3 {offsets = [0, 32], sizes = [1, 64], strides = [1, 1]} : vector<1x96xf32> to vector<1x64xf32>
    %14 = vector.broadcast %13 : vector<1x64xf32> to vector<4x64xf32>
    %15 = arith.addf %12, %14 : vector<4x64xf32>
    %16 = vector.extract_strided_slice %15 {offsets = [0, 0], sizes = [4, 32], strides = [1, 1]} : vector<4x64xf32> to vector<4x32xf32>
    %17 = vector.extract_strided_slice %15 {offsets = [0, 32], sizes = [4, 32], strides = [1, 1]} : vector<4x64xf32> to vector<4x32xf32>
    %c0_10 = arith.constant 0 : index
    %c0_11 = arith.constant 0 : index
    %18 = vector.load %arg9[%c0_10, %c0_11] : memref<8x4xf32, #tpu.memory_space<vmem>>, vector<8x4xf32>
    %19 = vector.extract_strided_slice %10 {offsets = [0, 0], sizes = [8, 8], strides = [1, 1]} : vector<8x32xf32> to vector<8x8xf32>
    %20 = vector.extract_strided_slice %16 {offsets = [0, 0], sizes = [4, 8], strides = [1, 1]} : vector<4x32xf32> to vector<4x8xf32>
    %cst_12 = arith.constant dense<0.000000e+00> : vector<8x4xf32>
    %21 = tpu.matmul %19, %20, %cst_12 {dimension_numbers = #tpu.dot_dimension_numbers<[1], [1], [0], [0], [0, 0, 1, 0], [], []>} : vector<8x8xf32>, vector<4x8xf32>, vector<8x4xf32> -> vector<8x4xf32>
    %cst_13 = arith.constant 0.353553385 : f32
    %22 = vector.broadcast %cst_13 : f32 to vector<8x4xf32>
    %23 = arith.mulf %21, %22 : vector<8x4xf32>
    %24 = arith.addf %23, %18 : vector<8x4xf32>
    %cst_14 = arith.constant dense<0xFF800000> : vector<8xf32>
    %25 = vector.multi_reduction <maximumf>, %24, %cst_14 [1] : vector<8x4xf32> to vector<8xf32>
    %26 = vector.shape_cast %25 : vector<8xf32> to vector<8x1xf32>
    %27 = vector.broadcast %26 : vector<8x1xf32> to vector<8x4xf32>
    %28 = arith.subf %24, %27 : vector<8x4xf32>
    %29 = math.exp %28 : vector<8x4xf32>
    %cst_15 = arith.constant dense<0.000000e+00> : vector<8xf32>
    %30 = vector.multi_reduction <add>, %29, %cst_15 [1] : vector<8x4xf32> to vector<8xf32>
    %31 = vector.shape_cast %30 : vector<8xf32> to vector<8x1xf32>
    %32 = tpu.reciprocal %31 {approx = true} : vector<8x1xf32> -> vector<8x1xf32>
    %33 = vector.broadcast %32 : vector<8x1xf32> to vector<8x4xf32>
    %34 = arith.mulf %29, %33 : vector<8x4xf32>
    %35 = vector.extract_strided_slice %17 {offsets = [0, 0], sizes = [4, 8], strides = [1, 1]} : vector<4x32xf32> to vector<4x8xf32>
    %cst_16 = arith.constant dense<0.000000e+00> : vector<8x8xf32>
    %36 = tpu.matmul %34, %35, %cst_16 {dimension_numbers = #tpu.dot_dimension_numbers<[1], [0], [0], [1], [0, 0, 1, 1], [], []>} : vector<8x4xf32>, vector<4x8xf32>, vector<8x8xf32> -> vector<8x8xf32>
    %37 = vector.extract_strided_slice %10 {offsets = [0, 8], sizes = [8, 8], strides = [1, 1]} : vector<8x32xf32> to vector<8x8xf32>
    %38 = vector.extract_strided_slice %16 {offsets = [0, 8], sizes = [4, 8], strides = [1, 1]} : vector<4x32xf32> to vector<4x8xf32>
    %cst_17 = arith.constant dense<0.000000e+00> : vector<8x4xf32>
    %39 = tpu.matmul %37, %38, %cst_17 {dimension_numbers = #tpu.dot_dimension_numbers<[1], [1], [0], [0], [0, 0, 1, 0], [], []>} : vector<8x8xf32>, vector<4x8xf32>, vector<8x4xf32> -> vector<8x4xf32>
    %cst_18 = arith.constant 0.353553385 : f32
    %40 = vector.broadcast %cst_18 : f32 to vector<8x4xf32>
    %41 = arith.mulf %39, %40 : vector<8x4xf32>
    %42 = arith.addf %41, %18 : vector<8x4xf32>
    %cst_19 = arith.constant dense<0xFF800000> : vector<8xf32>
    %43 = vector.multi_reduction <maximumf>, %42, %cst_19 [1] : vector<8x4xf32> to vector<8xf32>
    %44 = vector.shape_cast %43 : vector<8xf32> to vector<8x1xf32>
    %45 = vector.broadcast %44 : vector<8x1xf32> to vector<8x4xf32>
    %46 = arith.subf %42, %45 : vector<8x4xf32>
    %47 = math.exp %46 : vector<8x4xf32>
    %cst_20 = arith.constant dense<0.000000e+00> : vector<8xf32>
    %48 = vector.multi_reduction <add>, %47, %cst_20 [1] : vector<8x4xf32> to vector<8xf32>
    %49 = vector.shape_cast %48 : vector<8xf32> to vector<8x1xf32>
    %50 = tpu.reciprocal %49 {approx = true} : vector<8x1xf32> -> vector<8x1xf32>
    %51 = vector.broadcast %50 : vector<8x1xf32> to vector<8x4xf32>
    %52 = arith.mulf %47, %51 : vector<8x4xf32>
    %53 = vector.extract_strided_slice %17 {offsets = [0, 8], sizes = [4, 8], strides = [1, 1]} : vector<4x32xf32> to vector<4x8xf32>
    %cst_21 = arith.constant dense<0.000000e+00> : vector<8x8xf32>
    %54 = tpu.matmul %52, %53, %cst_21 {dimension_numbers = #tpu.dot_dimension_numbers<[1], [0], [0], [1], [0, 0, 1, 1], [], []>} : vector<8x4xf32>, vector<4x8xf32>, vector<8x8xf32> -> vector<8x8xf32>
    %55 = vector.extract_strided_slice %10 {offsets = [0, 16], sizes = [8, 8], strides = [1, 1]} : vector<8x32xf32> to vector<8x8xf32>
    %56 = vector.extract_strided_slice %16 {offsets = [0, 16], sizes = [4, 8], strides = [1, 1]} : vector<4x32xf32> to vector<4x8xf32>
    %cst_22 = arith.constant dense<0.000000e+00> : vector<8x4xf32>
    %57 = tpu.matmul %55, %56, %cst_22 {dimension_numbers = #tpu.dot_dimension_numbers<[1], [1], [0], [0], [0, 0, 1, 0], [], []>} : vector<8x8xf32>, vector<4x8xf32>, vector<8x4xf32> -> vector<8x4xf32>
    %cst_23 = arith.constant 0.353553385 : f32
    %58 = vector.broadcast %cst_23 : f32 to vector<8x4xf32>
    %59 = arith.mulf %57, %58 : vector<8x4xf32>
    %60 = arith.addf %59, %18 : vector<8x4xf32>
    %cst_24 = arith.constant dense<0xFF800000> : vector<8xf32>
    %61 = vector.multi_reduction <maximumf>, %60, %cst_24 [1] : vector<8x4xf32> to vector<8xf32>
    %62 = vector.shape_cast %61 : vector<8xf32> to vector<8x1xf32>
    %63 = vector.broadcast %62 : vector<8x1xf32> to vector<8x4xf32>
    %64 = arith.subf %60, %63 : vector<8x4xf32>
    %65 = math.exp %64 : vector<8x4xf32>
    %cst_25 = arith.constant dense<0.000000e+00> : vector<8xf32>
    %66 = vector.multi_reduction <add>, %65, %cst_25 [1] : vector<8x4xf32> to vector<8xf32>
    %67 = vector.shape_cast %66 : vector<8xf32> to vector<8x1xf32>
    %68 = tpu.reciprocal %67 {approx = true} : vector<8x1xf32> -> vector<8x1xf32>
    %69 = vector.broadcast %68 : vector<8x1xf32> to vector<8x4xf32>
    %70 = arith.mulf %65, %69 : vector<8x4xf32>
    %71 = vector.extract_strided_slice %17 {offsets = [0, 16], sizes = [4, 8], strides = [1, 1]} : vector<4x32xf32> to vector<4x8xf32>
    %cst_26 = arith.constant dense<0.000000e+00> : vector<8x8xf32>
    %72 = tpu.matmul %70, %71, %cst_26 {dimension_numbers = #tpu.dot_dimension_numbers<[1], [0], [0], [1], [0, 0, 1, 1], [], []>} : vector<8x4xf32>, vector<4x8xf32>, vector<8x8xf32> -> vector<8x8xf32>
    %73 = vector.extract_strided_slice %10 {offsets = [0, 24], sizes = [8, 8], strides = [1, 1]} : vector<8x32xf32> to vector<8x8xf32>
    %74 = vector.extract_strided_slice %16 {offsets = [0, 24], sizes = [4, 8], strides = [1, 1]} : vector<4x32xf32> to vector<4x8xf32>
    %cst_27 = arith.constant dense<0.000000e+00> : vector<8x4xf32>
    %75 = tpu.matmul %73, %74, %cst_27 {dimension_numbers = #tpu.dot_dimension_numbers<[1], [1], [0], [0], [0, 0, 1, 0], [], []>} : vector<8x8xf32>, vector<4x8xf32>, vector<8x4xf32> -> vector<8x4xf32>
    %cst_28 = arith.constant 0.353553385 : f32
    %76 = vector.broadcast %cst_28 : f32 to vector<8x4xf32>
    %77 = arith.mulf %75, %76 : vector<8x4xf32>
    %78 = arith.addf %77, %18 : vector<8x4xf32>
    %cst_29 = arith.constant dense<0xFF800000> : vector<8xf32>
    %79 = vector.multi_reduction <maximumf>, %78, %cst_29 [1] : vector<8x4xf32> to vector<8xf32>
    %80 = vector.shape_cast %79 : vector<8xf32> to vector<8x1xf32>
    %81 = vector.broadcast %80 : vector<8x1xf32> to vector<8x4xf32>
    %82 = arith.subf %78, %81 : vector<8x4xf32>
    %83 = math.exp %82 : vector<8x4xf32>
    %cst_30 = arith.constant dense<0.000000e+00> : vector<8xf32>
    %84 = vector.multi_reduction <add>, %83, %cst_30 [1] : vector<8x4xf32> to vector<8xf32>
    %85 = vector.shape_cast %84 : vector<8xf32> to vector<8x1xf32>
    %86 = tpu.reciprocal %85 {approx = true} : vector<8x1xf32> -> vector<8x1xf32>
    %87 = vector.broadcast %86 : vector<8x1xf32> to vector<8x4xf32>
    %88 = arith.mulf %83, %87 : vector<8x4xf32>
    %89 = vector.extract_strided_slice %17 {offsets = [0, 24], sizes = [4, 8], strides = [1, 1]} : vector<4x32xf32> to vector<4x8xf32>
    %cst_31 = arith.constant dense<0.000000e+00> : vector<8x8xf32>
    %90 = tpu.matmul %88, %89, %cst_31 {dimension_numbers = #tpu.dot_dimension_numbers<[1], [0], [0], [1], [0, 0, 1, 1], [], []>} : vector<8x4xf32>, vector<4x8xf32>, vector<8x8xf32> -> vector<8x8xf32>
    %91 = tpu.concatenate %36, %54, %72, %90 in 1 : vector<8x8xf32>, vector<8x8xf32>, vector<8x8xf32>, vector<8x8xf32> -> vector<8x32xf32>
    %c0_32 = arith.constant 0 : index
    %c0_33 = arith.constant 0 : index
    %92 = vector.load %arg5[%c0_32, %c0_33] : memref<32x32xf32, #tpu.memory_space<vmem>>, vector<32x32xf32>
    %cst_34 = arith.constant dense<0.000000e+00> : vector<8x32xf32>
    %93 = tpu.matmul %91, %92, %cst_34 {dimension_numbers = #tpu.dot_dimension_numbers<[1], [0], [0], [1], [0, 0, 1, 1], [], []>} : vector<8x32xf32>, vector<32x32xf32>, vector<8x32xf32> -> vector<8x32xf32>
    %c0_35 = arith.constant 0 : index
    %c0_36 = arith.constant 0 : index
    %94 = vector.load %arg6[%c0_35, %c0_36] : memref<1x32xf32, #tpu.memory_space<vmem>>, vector<1x32xf32>
    %95 = vector.broadcast %94 : vector<1x32xf32> to vector<8x32xf32>
    %96 = arith.addf %93, %95 : vector<8x32xf32>
    %97 = arith.addf %1, %96 : vector<8x32xf32>
    %c0_37 = arith.constant 0 : index
    %c0_38 = arith.constant 0 : index
    %98 = vector.load %arg7[%c0_37, %c0_38] : memref<1x32xf32, #tpu.memory_space<vmem>>, vector<1x32xf32>
    %c0_39 = arith.constant 0 : index
    %c0_40 = arith.constant 0 : index
    %99 = vector.load %arg8[%c0_39, %c0_40] : memref<1x32xf32, #tpu.memory_space<vmem>>, vector<1x32xf32>
    %cst_41 = arith.constant dense<0.000000e+00> : vector<8xf32>
    %100 = vector.multi_reduction <add>, %97, %cst_41 [1] : vector<8x32xf32> to vector<8xf32>
    %101 = vector.shape_cast %100 : vector<8xf32> to vector<8x1xf32>
    %cst_42 = arith.constant 3.200000e+01 : f32
    %102 = vector.broadcast %cst_42 : f32 to vector<8x1xf32>
    %103 = arith.divf %101, %102 : vector<8x1xf32>
    %104 = vector.broadcast %103 : vector<8x1xf32> to vector<8x32xf32>
    %105 = arith.subf %97, %104 : vector<8x32xf32>
    %106 = arith.mulf %105, %105 : vector<8x32xf32>
    %cst_43 = arith.constant dense<0.000000e+00> : vector<8xf32>
    %107 = vector.multi_reduction <add>, %106, %cst_43 [1] : vector<8x32xf32> to vector<8xf32>
    %108 = vector.shape_cast %107 : vector<8xf32> to vector<8x1xf32>
    %cst_44 = arith.constant 3.200000e+01 : f32
    %109 = vector.broadcast %cst_44 : f32 to vector<8x1xf32>
    %110 = arith.divf %108, %109 : vector<8x1xf32>
    %111 = vector.broadcast %103 : vector<8x1xf32> to vector<8x32xf32>
    %112 = arith.subf %97, %111 : vector<8x32xf32>
    %cst_45 = arith.constant 9.99999974E-6 : f32
    %113 = vector.broadcast %cst_45 : f32 to vector<8x1xf32>
    %114 = arith.addf %110, %113 : vector<8x1xf32>
    %115 = math.rsqrt %114 : vector<8x1xf32>
    %116 = vector.broadcast %115 : vector<8x1xf32> to vector<8x32xf32>
    %117 = arith.mulf %112, %116 : vector<8x32xf32>
    %118 = vector.broadcast %98 : vector<1x32xf32> to vector<8x32xf32>
    %119 = arith.mulf %117, %118 : vector<8x32xf32>
    %120 = vector.broadcast %99 : vector<1x32xf32> to vector<8x32xf32>
    %121 = arith.addf %119, %120 : vector<8x32xf32>
    %c0_46 = arith.constant 0 : index
    %c0_47 = arith.constant 0 : index
    %c0_48 = arith.constant 0 : index
    %122 = vector.load %arg10[%c0_46, %c0_47, %c0_48] : memref<1x8x32xf32, #tpu.memory_space<vmem>>, vector<1x8x32xf32>
    %123 = vector.shape_cast %122 : vector<1x8x32xf32> to vector<8x32xf32>
    %124 = vector.shape_cast %121 : vector<8x32xf32> to vector<1x8x32xf32>
    tpu.vector_store %arg10[%c0_46, %c0_47, %c0_48], %124 {strides = array<i32>} : memref<1x8x32xf32, #tpu.memory_space<vmem>>, vector<1x8x32xf32>,
    return
  }
  func.func @transform_0(%arg0: i32) -> (i32, i32, i32) {
    %c0_i32 = arith.constant 0 : i32
    %c0_i32_0 = arith.constant 0 : i32
    %c0_i32_1 = arith.constant 0 : i32
    return %arg0, %c0_i32, %c0_i32_0 : i32, i32, i32
  }
  func.func @transform_1(%arg0: i32) -> (i32, i32, i32) {
    %c0_i32 = arith.constant 0 : i32
    %c0_i32_0 = arith.constant 0 : i32
    %c0_i32_1 = arith.constant 0 : i32
    return %arg0, %c0_i32, %c0_i32_0 : i32, i32, i32
  }
  func.func @transform_2(%arg0: i32) -> (i32, i32) {
    %c0_i32 = arith.constant 0 : i32
    %c0_i32_0 = arith.constant 0 : i32
    %c0_i32_1 = arith.constant 0 : i32
    return %c0_i32, %c0_i32_0 : i32, i32
  }
  func.func @transform_3(%arg0: i32) -> (i32, i32) {
    %c0_i32 = arith.constant 0 : i32
    %c0_i32_0 = arith.constant 0 : i32
    %c0_i32_1 = arith.constant 0 : i32
    return %c0_i32, %c0_i32_0 : i32, i32
  }
  func.func @transform_4(%arg0: i32) -> (i32, i32) {
    %c0_i32 = arith.constant 0 : i32
    %c0_i32_0 = arith.constant 0 : i32
    %c0_i32_1 = arith.constant 0 : i32
    return %c0_i32, %c0_i32_0 : i32, i32
  }
  func.func @transform_5(%arg0: i32) -> (i32, i32) {
    %c0_i32 = arith.constant 0 : i32
    %c0_i32_0 = arith.constant 0 : i32
    %c0_i32_1 = arith.constant 0 : i32
    return %c0_i32, %c0_i32_0 : i32, i32
  }
  func.func @transform_6(%arg0: i32) -> (i32, i32) {
    %c0_i32 = arith.constant 0 : i32
    %c0_i32_0 = arith.constant 0 : i32
    %c0_i32_1 = arith.constant 0 : i32
    return %c0_i32, %c0_i32_0 : i32, i32
  }
  func.func @transform_7(%arg0: i32) -> (i32, i32) {
    %c0_i32 = arith.constant 0 : i32
    %c0_i32_0 = arith.constant 0 : i32
    %c0_i32_1 = arith.constant 0 : i32
    return %c0_i32, %c0_i32_0 : i32, i32
  }
  func.func @transform_8(%arg0: i32) -> (i32, i32) {
    %c0_i32 = arith.constant 0 : i32
    %c0_i32_0 = arith.constant 0 : i32
    %c0_i32_1 = arith.constant 0 : i32
    return %c0_i32, %c0_i32_0 : i32, i32
  }
  func.func @transform_9(%arg0: i32) -> (i32, i32, i32) {
    %c0_i32 = arith.constant 0 : i32
    %c0_i32_0 = arith.constant 0 : i32
    %c0_i32_1 = arith.constant 0 : i32
    return %arg0, %c0_i32, %c0_i32_0 : i32, i32, i32
  }
}

module attributes {stable_mosaic.version = 11 : i64} {
  func.func @_lstm_kernel(%arg0: i32, %arg1: memref<1x8x32xf32, #tpu.memory_space<vmem>>, %arg2: memref<32x128xf32, #tpu.memory_space<vmem>>, %arg3: memref<32x128xf32, #tpu.memory_space<vmem>>, %arg4: memref<1x128xf32, #tpu.memory_space<vmem>>, %arg5: memref<1x8x32xf32, #tpu.memory_space<vmem>>) attributes {dimension_semantics = [#tpu.dimension_semantics<parallel>], iteration_bounds = array<i64: 2>, scalar_prefetch = 0 : i64, scratch_operands = 0 : i64, tpu.core_type = #tpu.core_type<tc>, window_params = [{transform_indices = @transform_0, window_bounds = array<i64: 1, 8, 32>}, {pipeline_mode = #tpu.pipeline_mode<synchronous>, transform_indices = @transform_1, window_bounds = array<i64: 32, 128>}, {pipeline_mode = #tpu.pipeline_mode<synchronous>, transform_indices = @transform_2, window_bounds = array<i64: 32, 128>}, {pipeline_mode = #tpu.pipeline_mode<synchronous>, transform_indices = @transform_3, window_bounds = array<i64: 1, 128>}, {transform_indices = @transform_4, window_bounds = array<i64: 1, 8, 32>}]} {
    %c0 = arith.constant 0 : index
    %c0_0 = arith.constant 0 : index
    %c0_1 = arith.constant 0 : index
    %0 = vector.load %arg1[%c0, %c0_0, %c0_1] : memref<1x8x32xf32, #tpu.memory_space<vmem>>, vector<1x8x32xf32>
    %1 = vector.shape_cast %0 : vector<1x8x32xf32> to vector<8x32xf32>
    %c0_2 = arith.constant 0 : index
    %c0_3 = arith.constant 0 : index
    %2 = vector.load %arg2[%c0_2, %c0_3] : memref<32x128xf32, #tpu.memory_space<vmem>>, vector<32x128xf32>
    %cst = arith.constant dense<0.000000e+00> : vector<8x128xf32>
    %3 = tpu.matmul %1, %2, %cst {dimension_numbers = #tpu.dot_dimension_numbers<[1], [0], [0], [1], [0, 0, 1, 1], [], []>} : vector<8x32xf32>, vector<32x128xf32>, vector<8x128xf32> -> vector<8x128xf32>
    %c0_4 = arith.constant 0 : index
    %c0_5 = arith.constant 0 : index
    %4 = vector.load %arg4[%c0_4, %c0_5] : memref<1x128xf32, #tpu.memory_space<vmem>>, vector<1x128xf32>
    %5 = vector.broadcast %4 : vector<1x128xf32> to vector<8x128xf32>
    %6 = arith.addf %3, %5 : vector<8x128xf32>
    %c0_6 = arith.constant 0 : index
    %c0_7 = arith.constant 0 : index
    %7 = vector.load %arg3[%c0_6, %c0_7] : memref<32x128xf32, #tpu.memory_space<vmem>>, vector<32x128xf32>
    %cst_8 = arith.constant 0.000000e+00 : f32
    %8 = vector.broadcast %cst_8 : f32 to vector<1x32xf32>
    %cst_9 = arith.constant 0.000000e+00 : f32
    %9 = vector.broadcast %cst_9 : f32 to vector<1x32xf32>
    %10 = vector.extract_strided_slice %6 {offsets = [0, 0], sizes = [1, 128], strides = [1, 1]} : vector<8x128xf32> to vector<1x128xf32>
    %cst_10 = arith.constant dense<0.000000e+00> : vector<1x128xf32>
    %11 = tpu.matmul %8, %7, %cst_10 {dimension_numbers = #tpu.dot_dimension_numbers<[1], [0], [0], [1], [0, 0, 1, 1], [], []>} : vector<1x32xf32>, vector<32x128xf32>, vector<1x128xf32> -> vector<1x128xf32>
    %12 = arith.addf %10, %11 : vector<1x128xf32>
    %13 = vector.extract_strided_slice %12 {offsets = [0, 0], sizes = [1, 32], strides = [1, 1]} : vector<1x128xf32> to vector<1x32xf32>
    %14 = arith.negf %13 : vector<1x32xf32>
    %15 = math.exp %14 : vector<1x32xf32>
    %cst_11 = arith.constant 1.000000e+00 : f32
    %16 = vector.broadcast %cst_11 : f32 to vector<1x32xf32>
    %17 = arith.addf %16, %15 : vector<1x32xf32>
    %18 = arith.divf %16, %17 : vector<1x32xf32>
    %19 = vector.extract_strided_slice %12 {offsets = [0, 32], sizes = [1, 32], strides = [1, 1]} : vector<1x128xf32> to vector<1x32xf32>
    %20 = arith.negf %19 : vector<1x32xf32>
    %21 = math.exp %20 : vector<1x32xf32>
    %cst_12 = arith.constant 1.000000e+00 : f32
    %22 = vector.broadcast %cst_12 : f32 to vector<1x32xf32>
    %23 = arith.addf %22, %21 : vector<1x32xf32>
    %24 = arith.divf %22, %23 : vector<1x32xf32>
    %25 = vector.extract_strided_slice %12 {offsets = [0, 64], sizes = [1, 32], strides = [1, 1]} : vector<1x128xf32> to vector<1x32xf32>
    %26 = math.tanh %25 : vector<1x32xf32>
    %27 = vector.extract_strided_slice %12 {offsets = [0, 96], sizes = [1, 32], strides = [1, 1]} : vector<1x128xf32> to vector<1x32xf32>
    %28 = arith.negf %27 : vector<1x32xf32>
    %29 = math.exp %28 : vector<1x32xf32>
    %cst_13 = arith.constant 1.000000e+00 : f32
    %30 = vector.broadcast %cst_13 : f32 to vector<1x32xf32>
    %31 = arith.addf %30, %29 : vector<1x32xf32>
    %32 = arith.divf %30, %31 : vector<1x32xf32>
    %33 = arith.mulf %24, %9 : vector<1x32xf32>
    %34 = arith.mulf %18, %26 : vector<1x32xf32>
    %35 = arith.addf %33, %34 : vector<1x32xf32>
    %36 = math.tanh %35 : vector<1x32xf32>
    %37 = arith.mulf %32, %36 : vector<1x32xf32>
    %38 = vector.extract_strided_slice %6 {offsets = [1, 0], sizes = [1, 128], strides = [1, 1]} : vector<8x128xf32> to vector<1x128xf32>
    %cst_14 = arith.constant dense<0.000000e+00> : vector<1x128xf32>
    %39 = tpu.matmul %37, %7, %cst_14 {dimension_numbers = #tpu.dot_dimension_numbers<[1], [0], [0], [1], [0, 0, 1, 1], [], []>} : vector<1x32xf32>, vector<32x128xf32>, vector<1x128xf32> -> vector<1x128xf32>
    %40 = arith.addf %38, %39 : vector<1x128xf32>
    %41 = vector.extract_strided_slice %40 {offsets = [0, 0], sizes = [1, 32], strides = [1, 1]} : vector<1x128xf32> to vector<1x32xf32>
    %42 = arith.negf %41 : vector<1x32xf32>
    %43 = math.exp %42 : vector<1x32xf32>
    %cst_15 = arith.constant 1.000000e+00 : f32
    %44 = vector.broadcast %cst_15 : f32 to vector<1x32xf32>
    %45 = arith.addf %44, %43 : vector<1x32xf32>
    %46 = arith.divf %44, %45 : vector<1x32xf32>
    %47 = vector.extract_strided_slice %40 {offsets = [0, 32], sizes = [1, 32], strides = [1, 1]} : vector<1x128xf32> to vector<1x32xf32>
    %48 = arith.negf %47 : vector<1x32xf32>
    %49 = math.exp %48 : vector<1x32xf32>
    %cst_16 = arith.constant 1.000000e+00 : f32
    %50 = vector.broadcast %cst_16 : f32 to vector<1x32xf32>
    %51 = arith.addf %50, %49 : vector<1x32xf32>
    %52 = arith.divf %50, %51 : vector<1x32xf32>
    %53 = vector.extract_strided_slice %40 {offsets = [0, 64], sizes = [1, 32], strides = [1, 1]} : vector<1x128xf32> to vector<1x32xf32>
    %54 = math.tanh %53 : vector<1x32xf32>
    %55 = vector.extract_strided_slice %40 {offsets = [0, 96], sizes = [1, 32], strides = [1, 1]} : vector<1x128xf32> to vector<1x32xf32>
    %56 = arith.negf %55 : vector<1x32xf32>
    %57 = math.exp %56 : vector<1x32xf32>
    %cst_17 = arith.constant 1.000000e+00 : f32
    %58 = vector.broadcast %cst_17 : f32 to vector<1x32xf32>
    %59 = arith.addf %58, %57 : vector<1x32xf32>
    %60 = arith.divf %58, %59 : vector<1x32xf32>
    %61 = arith.mulf %52, %35 : vector<1x32xf32>
    %62 = arith.mulf %46, %54 : vector<1x32xf32>
    %63 = arith.addf %61, %62 : vector<1x32xf32>
    %64 = math.tanh %63 : vector<1x32xf32>
    %65 = arith.mulf %60, %64 : vector<1x32xf32>
    %66 = vector.extract_strided_slice %6 {offsets = [2, 0], sizes = [1, 128], strides = [1, 1]} : vector<8x128xf32> to vector<1x128xf32>
    %cst_18 = arith.constant dense<0.000000e+00> : vector<1x128xf32>
    %67 = tpu.matmul %65, %7, %cst_18 {dimension_numbers = #tpu.dot_dimension_numbers<[1], [0], [0], [1], [0, 0, 1, 1], [], []>} : vector<1x32xf32>, vector<32x128xf32>, vector<1x128xf32> -> vector<1x128xf32>
    %68 = arith.addf %66, %67 : vector<1x128xf32>
    %69 = vector.extract_strided_slice %68 {offsets = [0, 0], sizes = [1, 32], strides = [1, 1]} : vector<1x128xf32> to vector<1x32xf32>
    %70 = arith.negf %69 : vector<1x32xf32>
    %71 = math.exp %70 : vector<1x32xf32>
    %cst_19 = arith.constant 1.000000e+00 : f32
    %72 = vector.broadcast %cst_19 : f32 to vector<1x32xf32>
    %73 = arith.addf %72, %71 : vector<1x32xf32>
    %74 = arith.divf %72, %73 : vector<1x32xf32>
    %75 = vector.extract_strided_slice %68 {offsets = [0, 32], sizes = [1, 32], strides = [1, 1]} : vector<1x128xf32> to vector<1x32xf32>
    %76 = arith.negf %75 : vector<1x32xf32>
    %77 = math.exp %76 : vector<1x32xf32>
    %cst_20 = arith.constant 1.000000e+00 : f32
    %78 = vector.broadcast %cst_20 : f32 to vector<1x32xf32>
    %79 = arith.addf %78, %77 : vector<1x32xf32>
    %80 = arith.divf %78, %79 : vector<1x32xf32>
    %81 = vector.extract_strided_slice %68 {offsets = [0, 64], sizes = [1, 32], strides = [1, 1]} : vector<1x128xf32> to vector<1x32xf32>
    %82 = math.tanh %81 : vector<1x32xf32>
    %83 = vector.extract_strided_slice %68 {offsets = [0, 96], sizes = [1, 32], strides = [1, 1]} : vector<1x128xf32> to vector<1x32xf32>
    %84 = arith.negf %83 : vector<1x32xf32>
    %85 = math.exp %84 : vector<1x32xf32>
    %cst_21 = arith.constant 1.000000e+00 : f32
    %86 = vector.broadcast %cst_21 : f32 to vector<1x32xf32>
    %87 = arith.addf %86, %85 : vector<1x32xf32>
    %88 = arith.divf %86, %87 : vector<1x32xf32>
    %89 = arith.mulf %80, %63 : vector<1x32xf32>
    %90 = arith.mulf %74, %82 : vector<1x32xf32>
    %91 = arith.addf %89, %90 : vector<1x32xf32>
    %92 = math.tanh %91 : vector<1x32xf32>
    %93 = arith.mulf %88, %92 : vector<1x32xf32>
    %94 = vector.extract_strided_slice %6 {offsets = [3, 0], sizes = [1, 128], strides = [1, 1]} : vector<8x128xf32> to vector<1x128xf32>
    %cst_22 = arith.constant dense<0.000000e+00> : vector<1x128xf32>
    %95 = tpu.matmul %93, %7, %cst_22 {dimension_numbers = #tpu.dot_dimension_numbers<[1], [0], [0], [1], [0, 0, 1, 1], [], []>} : vector<1x32xf32>, vector<32x128xf32>, vector<1x128xf32> -> vector<1x128xf32>
    %96 = arith.addf %94, %95 : vector<1x128xf32>
    %97 = vector.extract_strided_slice %96 {offsets = [0, 0], sizes = [1, 32], strides = [1, 1]} : vector<1x128xf32> to vector<1x32xf32>
    %98 = arith.negf %97 : vector<1x32xf32>
    %99 = math.exp %98 : vector<1x32xf32>
    %cst_23 = arith.constant 1.000000e+00 : f32
    %100 = vector.broadcast %cst_23 : f32 to vector<1x32xf32>
    %101 = arith.addf %100, %99 : vector<1x32xf32>
    %102 = arith.divf %100, %101 : vector<1x32xf32>
    %103 = vector.extract_strided_slice %96 {offsets = [0, 32], sizes = [1, 32], strides = [1, 1]} : vector<1x128xf32> to vector<1x32xf32>
    %104 = arith.negf %103 : vector<1x32xf32>
    %105 = math.exp %104 : vector<1x32xf32>
    %cst_24 = arith.constant 1.000000e+00 : f32
    %106 = vector.broadcast %cst_24 : f32 to vector<1x32xf32>
    %107 = arith.addf %106, %105 : vector<1x32xf32>
    %108 = arith.divf %106, %107 : vector<1x32xf32>
    %109 = vector.extract_strided_slice %96 {offsets = [0, 64], sizes = [1, 32], strides = [1, 1]} : vector<1x128xf32> to vector<1x32xf32>
    %110 = math.tanh %109 : vector<1x32xf32>
    %111 = vector.extract_strided_slice %96 {offsets = [0, 96], sizes = [1, 32], strides = [1, 1]} : vector<1x128xf32> to vector<1x32xf32>
    %112 = arith.negf %111 : vector<1x32xf32>
    %113 = math.exp %112 : vector<1x32xf32>
    %cst_25 = arith.constant 1.000000e+00 : f32
    %114 = vector.broadcast %cst_25 : f32 to vector<1x32xf32>
    %115 = arith.addf %114, %113 : vector<1x32xf32>
    %116 = arith.divf %114, %115 : vector<1x32xf32>
    %117 = arith.mulf %108, %91 : vector<1x32xf32>
    %118 = arith.mulf %102, %110 : vector<1x32xf32>
    %119 = arith.addf %117, %118 : vector<1x32xf32>
    %120 = math.tanh %119 : vector<1x32xf32>
    %121 = arith.mulf %116, %120 : vector<1x32xf32>
    %122 = vector.extract_strided_slice %6 {offsets = [4, 0], sizes = [1, 128], strides = [1, 1]} : vector<8x128xf32> to vector<1x128xf32>
    %cst_26 = arith.constant dense<0.000000e+00> : vector<1x128xf32>
    %123 = tpu.matmul %121, %7, %cst_26 {dimension_numbers = #tpu.dot_dimension_numbers<[1], [0], [0], [1], [0, 0, 1, 1], [], []>} : vector<1x32xf32>, vector<32x128xf32>, vector<1x128xf32> -> vector<1x128xf32>
    %124 = arith.addf %122, %123 : vector<1x128xf32>
    %125 = vector.extract_strided_slice %124 {offsets = [0, 0], sizes = [1, 32], strides = [1, 1]} : vector<1x128xf32> to vector<1x32xf32>
    %126 = arith.negf %125 : vector<1x32xf32>
    %127 = math.exp %126 : vector<1x32xf32>
    %cst_27 = arith.constant 1.000000e+00 : f32
    %128 = vector.broadcast %cst_27 : f32 to vector<1x32xf32>
    %129 = arith.addf %128, %127 : vector<1x32xf32>
    %130 = arith.divf %128, %129 : vector<1x32xf32>
    %131 = vector.extract_strided_slice %124 {offsets = [0, 32], sizes = [1, 32], strides = [1, 1]} : vector<1x128xf32> to vector<1x32xf32>
    %132 = arith.negf %131 : vector<1x32xf32>
    %133 = math.exp %132 : vector<1x32xf32>
    %cst_28 = arith.constant 1.000000e+00 : f32
    %134 = vector.broadcast %cst_28 : f32 to vector<1x32xf32>
    %135 = arith.addf %134, %133 : vector<1x32xf32>
    %136 = arith.divf %134, %135 : vector<1x32xf32>
    %137 = vector.extract_strided_slice %124 {offsets = [0, 64], sizes = [1, 32], strides = [1, 1]} : vector<1x128xf32> to vector<1x32xf32>
    %138 = math.tanh %137 : vector<1x32xf32>
    %139 = vector.extract_strided_slice %124 {offsets = [0, 96], sizes = [1, 32], strides = [1, 1]} : vector<1x128xf32> to vector<1x32xf32>
    %140 = arith.negf %139 : vector<1x32xf32>
    %141 = math.exp %140 : vector<1x32xf32>
    %cst_29 = arith.constant 1.000000e+00 : f32
    %142 = vector.broadcast %cst_29 : f32 to vector<1x32xf32>
    %143 = arith.addf %142, %141 : vector<1x32xf32>
    %144 = arith.divf %142, %143 : vector<1x32xf32>
    %145 = arith.mulf %136, %119 : vector<1x32xf32>
    %146 = arith.mulf %130, %138 : vector<1x32xf32>
    %147 = arith.addf %145, %146 : vector<1x32xf32>
    %148 = math.tanh %147 : vector<1x32xf32>
    %149 = arith.mulf %144, %148 : vector<1x32xf32>
    %150 = vector.extract_strided_slice %6 {offsets = [5, 0], sizes = [1, 128], strides = [1, 1]} : vector<8x128xf32> to vector<1x128xf32>
    %cst_30 = arith.constant dense<0.000000e+00> : vector<1x128xf32>
    %151 = tpu.matmul %149, %7, %cst_30 {dimension_numbers = #tpu.dot_dimension_numbers<[1], [0], [0], [1], [0, 0, 1, 1], [], []>} : vector<1x32xf32>, vector<32x128xf32>, vector<1x128xf32> -> vector<1x128xf32>
    %152 = arith.addf %150, %151 : vector<1x128xf32>
    %153 = vector.extract_strided_slice %152 {offsets = [0, 0], sizes = [1, 32], strides = [1, 1]} : vector<1x128xf32> to vector<1x32xf32>
    %154 = arith.negf %153 : vector<1x32xf32>
    %155 = math.exp %154 : vector<1x32xf32>
    %cst_31 = arith.constant 1.000000e+00 : f32
    %156 = vector.broadcast %cst_31 : f32 to vector<1x32xf32>
    %157 = arith.addf %156, %155 : vector<1x32xf32>
    %158 = arith.divf %156, %157 : vector<1x32xf32>
    %159 = vector.extract_strided_slice %152 {offsets = [0, 32], sizes = [1, 32], strides = [1, 1]} : vector<1x128xf32> to vector<1x32xf32>
    %160 = arith.negf %159 : vector<1x32xf32>
    %161 = math.exp %160 : vector<1x32xf32>
    %cst_32 = arith.constant 1.000000e+00 : f32
    %162 = vector.broadcast %cst_32 : f32 to vector<1x32xf32>
    %163 = arith.addf %162, %161 : vector<1x32xf32>
    %164 = arith.divf %162, %163 : vector<1x32xf32>
    %165 = vector.extract_strided_slice %152 {offsets = [0, 64], sizes = [1, 32], strides = [1, 1]} : vector<1x128xf32> to vector<1x32xf32>
    %166 = math.tanh %165 : vector<1x32xf32>
    %167 = vector.extract_strided_slice %152 {offsets = [0, 96], sizes = [1, 32], strides = [1, 1]} : vector<1x128xf32> to vector<1x32xf32>
    %168 = arith.negf %167 : vector<1x32xf32>
    %169 = math.exp %168 : vector<1x32xf32>
    %cst_33 = arith.constant 1.000000e+00 : f32
    %170 = vector.broadcast %cst_33 : f32 to vector<1x32xf32>
    %171 = arith.addf %170, %169 : vector<1x32xf32>
    %172 = arith.divf %170, %171 : vector<1x32xf32>
    %173 = arith.mulf %164, %147 : vector<1x32xf32>
    %174 = arith.mulf %158, %166 : vector<1x32xf32>
    %175 = arith.addf %173, %174 : vector<1x32xf32>
    %176 = math.tanh %175 : vector<1x32xf32>
    %177 = arith.mulf %172, %176 : vector<1x32xf32>
    %178 = vector.extract_strided_slice %6 {offsets = [6, 0], sizes = [1, 128], strides = [1, 1]} : vector<8x128xf32> to vector<1x128xf32>
    %cst_34 = arith.constant dense<0.000000e+00> : vector<1x128xf32>
    %179 = tpu.matmul %177, %7, %cst_34 {dimension_numbers = #tpu.dot_dimension_numbers<[1], [0], [0], [1], [0, 0, 1, 1], [], []>} : vector<1x32xf32>, vector<32x128xf32>, vector<1x128xf32> -> vector<1x128xf32>
    %180 = arith.addf %178, %179 : vector<1x128xf32>
    %181 = vector.extract_strided_slice %180 {offsets = [0, 0], sizes = [1, 32], strides = [1, 1]} : vector<1x128xf32> to vector<1x32xf32>
    %182 = arith.negf %181 : vector<1x32xf32>
    %183 = math.exp %182 : vector<1x32xf32>
    %cst_35 = arith.constant 1.000000e+00 : f32
    %184 = vector.broadcast %cst_35 : f32 to vector<1x32xf32>
    %185 = arith.addf %184, %183 : vector<1x32xf32>
    %186 = arith.divf %184, %185 : vector<1x32xf32>
    %187 = vector.extract_strided_slice %180 {offsets = [0, 32], sizes = [1, 32], strides = [1, 1]} : vector<1x128xf32> to vector<1x32xf32>
    %188 = arith.negf %187 : vector<1x32xf32>
    %189 = math.exp %188 : vector<1x32xf32>
    %cst_36 = arith.constant 1.000000e+00 : f32
    %190 = vector.broadcast %cst_36 : f32 to vector<1x32xf32>
    %191 = arith.addf %190, %189 : vector<1x32xf32>
    %192 = arith.divf %190, %191 : vector<1x32xf32>
    %193 = vector.extract_strided_slice %180 {offsets = [0, 64], sizes = [1, 32], strides = [1, 1]} : vector<1x128xf32> to vector<1x32xf32>
    %194 = math.tanh %193 : vector<1x32xf32>
    %195 = vector.extract_strided_slice %180 {offsets = [0, 96], sizes = [1, 32], strides = [1, 1]} : vector<1x128xf32> to vector<1x32xf32>
    %196 = arith.negf %195 : vector<1x32xf32>
    %197 = math.exp %196 : vector<1x32xf32>
    %cst_37 = arith.constant 1.000000e+00 : f32
    %198 = vector.broadcast %cst_37 : f32 to vector<1x32xf32>
    %199 = arith.addf %198, %197 : vector<1x32xf32>
    %200 = arith.divf %198, %199 : vector<1x32xf32>
    %201 = arith.mulf %192, %175 : vector<1x32xf32>
    %202 = arith.mulf %186, %194 : vector<1x32xf32>
    %203 = arith.addf %201, %202 : vector<1x32xf32>
    %204 = math.tanh %203 : vector<1x32xf32>
    %205 = arith.mulf %200, %204 : vector<1x32xf32>
    %206 = vector.extract_strided_slice %6 {offsets = [7, 0], sizes = [1, 128], strides = [1, 1]} : vector<8x128xf32> to vector<1x128xf32>
    %cst_38 = arith.constant dense<0.000000e+00> : vector<1x128xf32>
    %207 = tpu.matmul %205, %7, %cst_38 {dimension_numbers = #tpu.dot_dimension_numbers<[1], [0], [0], [1], [0, 0, 1, 1], [], []>} : vector<1x32xf32>, vector<32x128xf32>, vector<1x128xf32> -> vector<1x128xf32>
    %208 = arith.addf %206, %207 : vector<1x128xf32>
    %209 = vector.extract_strided_slice %208 {offsets = [0, 0], sizes = [1, 32], strides = [1, 1]} : vector<1x128xf32> to vector<1x32xf32>
    %210 = arith.negf %209 : vector<1x32xf32>
    %211 = math.exp %210 : vector<1x32xf32>
    %cst_39 = arith.constant 1.000000e+00 : f32
    %212 = vector.broadcast %cst_39 : f32 to vector<1x32xf32>
    %213 = arith.addf %212, %211 : vector<1x32xf32>
    %214 = arith.divf %212, %213 : vector<1x32xf32>
    %215 = vector.extract_strided_slice %208 {offsets = [0, 32], sizes = [1, 32], strides = [1, 1]} : vector<1x128xf32> to vector<1x32xf32>
    %216 = arith.negf %215 : vector<1x32xf32>
    %217 = math.exp %216 : vector<1x32xf32>
    %cst_40 = arith.constant 1.000000e+00 : f32
    %218 = vector.broadcast %cst_40 : f32 to vector<1x32xf32>
    %219 = arith.addf %218, %217 : vector<1x32xf32>
    %220 = arith.divf %218, %219 : vector<1x32xf32>
    %221 = vector.extract_strided_slice %208 {offsets = [0, 64], sizes = [1, 32], strides = [1, 1]} : vector<1x128xf32> to vector<1x32xf32>
    %222 = math.tanh %221 : vector<1x32xf32>
    %223 = vector.extract_strided_slice %208 {offsets = [0, 96], sizes = [1, 32], strides = [1, 1]} : vector<1x128xf32> to vector<1x32xf32>
    %224 = arith.negf %223 : vector<1x32xf32>
    %225 = math.exp %224 : vector<1x32xf32>
    %cst_41 = arith.constant 1.000000e+00 : f32
    %226 = vector.broadcast %cst_41 : f32 to vector<1x32xf32>
    %227 = arith.addf %226, %225 : vector<1x32xf32>
    %228 = arith.divf %226, %227 : vector<1x32xf32>
    %229 = arith.mulf %220, %203 : vector<1x32xf32>
    %230 = arith.mulf %214, %222 : vector<1x32xf32>
    %231 = arith.addf %229, %230 : vector<1x32xf32>
    %232 = math.tanh %231 : vector<1x32xf32>
    %233 = arith.mulf %228, %232 : vector<1x32xf32>
    %234 = tpu.concatenate %37, %65, %93, %121, %149, %177, %205, %233 in 0 : vector<1x32xf32>, vector<1x32xf32>, vector<1x32xf32>, vector<1x32xf32>, vector<1x32xf32>, vector<1x32xf32>, vector<1x32xf32>, vector<1x32xf32> -> vector<8x32xf32>
    %c0_42 = arith.constant 0 : index
    %c0_43 = arith.constant 0 : index
    %c0_44 = arith.constant 0 : index
    %235 = vector.load %arg5[%c0_42, %c0_43, %c0_44] : memref<1x8x32xf32, #tpu.memory_space<vmem>>, vector<1x8x32xf32>
    %236 = vector.shape_cast %235 : vector<1x8x32xf32> to vector<8x32xf32>
    %237 = vector.shape_cast %234 : vector<8x32xf32> to vector<1x8x32xf32>
    tpu.vector_store %arg5[%c0_42, %c0_43, %c0_44], %237 {strides = array<i32>} : memref<1x8x32xf32, #tpu.memory_space<vmem>>, vector<1x8x32xf32>,
    return
  }
  func.func @transform_0(%arg0: i32) -> (i32, i32, i32) {
    %c0_i32 = arith.constant 0 : i32
    %c0_i32_0 = arith.constant 0 : i32
    %c0_i32_1 = arith.constant 0 : i32
    return %arg0, %c0_i32, %c0_i32_0 : i32, i32, i32
  }
  func.func @transform_1(%arg0: i32) -> (i32, i32) {
    %c0_i32 = arith.constant 0 : i32
    %c0_i32_0 = arith.constant 0 : i32
    %c0_i32_1 = arith.constant 0 : i32
    return %c0_i32, %c0_i32_0 : i32, i32
  }
  func.func @transform_2(%arg0: i32) -> (i32, i32) {
    %c0_i32 = arith.constant 0 : i32
    %c0_i32_0 = arith.constant 0 : i32
    %c0_i32_1 = arith.constant 0 : i32
    return %c0_i32, %c0_i32_0 : i32, i32
  }
  func.func @transform_3(%arg0: i32) -> (i32, i32) {
    %c0_i32 = arith.constant 0 : i32
    %c0_i32_0 = arith.constant 0 : i32
    %c0_i32_1 = arith.constant 0 : i32
    return %c0_i32, %c0_i32_0 : i32, i32
  }
  func.func @transform_4(%arg0: i32) -> (i32, i32, i32) {
    %c0_i32 = arith.constant 0 : i32
    %c0_i32_0 = arith.constant 0 : i32
    %c0_i32_1 = arith.constant 0 : i32
    return %arg0, %c0_i32, %c0_i32_0 : i32, i32, i32
  }
}

module attributes {stable_mosaic.version = 11 : i64} {
  func.func @_ffn_res_ln_kernel(%arg0: i32, %arg1: memref<1x4x32xf32, #tpu.memory_space<vmem>>, %arg2: memref<32x64xf32, #tpu.memory_space<vmem>>, %arg3: memref<1x64xf32, #tpu.memory_space<vmem>>, %arg4: memref<64x32xf32, #tpu.memory_space<vmem>>, %arg5: memref<1x32xf32, #tpu.memory_space<vmem>>, %arg6: memref<1x32xf32, #tpu.memory_space<vmem>>, %arg7: memref<1x32xf32, #tpu.memory_space<vmem>>, %arg8: memref<1x4x32xf32, #tpu.memory_space<vmem>>) attributes {dimension_semantics = [#tpu.dimension_semantics<parallel>], iteration_bounds = array<i64: 2>, scalar_prefetch = 0 : i64, scratch_operands = 0 : i64, tpu.core_type = #tpu.core_type<tc>, window_params = [{transform_indices = @transform_0, window_bounds = array<i64: 1, 4, 32>}, {pipeline_mode = #tpu.pipeline_mode<synchronous>, transform_indices = @transform_1, window_bounds = array<i64: 32, 64>}, {pipeline_mode = #tpu.pipeline_mode<synchronous>, transform_indices = @transform_2, window_bounds = array<i64: 1, 64>}, {pipeline_mode = #tpu.pipeline_mode<synchronous>, transform_indices = @transform_3, window_bounds = array<i64: 64, 32>}, {pipeline_mode = #tpu.pipeline_mode<synchronous>, transform_indices = @transform_4, window_bounds = array<i64: 1, 32>}, {pipeline_mode = #tpu.pipeline_mode<synchronous>, transform_indices = @transform_5, window_bounds = array<i64: 1, 32>}, {pipeline_mode = #tpu.pipeline_mode<synchronous>, transform_indices = @transform_6, window_bounds = array<i64: 1, 32>}, {transform_indices = @transform_7, window_bounds = array<i64: 1, 4, 32>}]} {
    %c0 = arith.constant 0 : index
    %c0_0 = arith.constant 0 : index
    %c0_1 = arith.constant 0 : index
    %0 = vector.load %arg1[%c0, %c0_0, %c0_1] : memref<1x4x32xf32, #tpu.memory_space<vmem>>, vector<1x4x32xf32>
    %1 = vector.shape_cast %0 : vector<1x4x32xf32> to vector<4x32xf32>
    %c0_2 = arith.constant 0 : index
    %c0_3 = arith.constant 0 : index
    %2 = vector.load %arg2[%c0_2, %c0_3] : memref<32x64xf32, #tpu.memory_space<vmem>>, vector<32x64xf32>
    %cst = arith.constant dense<0.000000e+00> : vector<4x64xf32>
    %3 = tpu.matmul %1, %2, %cst {dimension_numbers = #tpu.dot_dimension_numbers<[1], [0], [0], [1], [0, 0, 1, 1], [], []>} : vector<4x32xf32>, vector<32x64xf32>, vector<4x64xf32> -> vector<4x64xf32>
    %c0_4 = arith.constant 0 : index
    %c0_5 = arith.constant 0 : index
    %4 = vector.load %arg3[%c0_4, %c0_5] : memref<1x64xf32, #tpu.memory_space<vmem>>, vector<1x64xf32>
    %5 = vector.broadcast %4 : vector<1x64xf32> to vector<4x64xf32>
    %6 = arith.addf %3, %5 : vector<4x64xf32>
    %cst_6 = arith.constant 0.000000e+00 : f32
    %7 = vector.broadcast %cst_6 : f32 to vector<4x64xf32>
    %8 = arith.maximumf %6, %7 : vector<4x64xf32>
    %c0_7 = arith.constant 0 : index
    %c0_8 = arith.constant 0 : index
    %9 = vector.load %arg4[%c0_7, %c0_8] : memref<64x32xf32, #tpu.memory_space<vmem>>, vector<64x32xf32>
    %cst_9 = arith.constant dense<0.000000e+00> : vector<4x32xf32>
    %10 = tpu.matmul %8, %9, %cst_9 {dimension_numbers = #tpu.dot_dimension_numbers<[1], [0], [0], [1], [0, 0, 1, 1], [], []>} : vector<4x64xf32>, vector<64x32xf32>, vector<4x32xf32> -> vector<4x32xf32>
    %c0_10 = arith.constant 0 : index
    %c0_11 = arith.constant 0 : index
    %11 = vector.load %arg5[%c0_10, %c0_11] : memref<1x32xf32, #tpu.memory_space<vmem>>, vector<1x32xf32>
    %12 = vector.broadcast %11 : vector<1x32xf32> to vector<4x32xf32>
    %13 = arith.addf %10, %12 : vector<4x32xf32>
    %14 = arith.addf %1, %13 : vector<4x32xf32>
    %c0_12 = arith.constant 0 : index
    %c0_13 = arith.constant 0 : index
    %15 = vector.load %arg6[%c0_12, %c0_13] : memref<1x32xf32, #tpu.memory_space<vmem>>, vector<1x32xf32>
    %c0_14 = arith.constant 0 : index
    %c0_15 = arith.constant 0 : index
    %16 = vector.load %arg7[%c0_14, %c0_15] : memref<1x32xf32, #tpu.memory_space<vmem>>, vector<1x32xf32>
    %cst_16 = arith.constant dense<0.000000e+00> : vector<4xf32>
    %17 = vector.multi_reduction <add>, %14, %cst_16 [1] : vector<4x32xf32> to vector<4xf32>
    %18 = vector.shape_cast %17 : vector<4xf32> to vector<4x1xf32>
    %cst_17 = arith.constant 3.200000e+01 : f32
    %19 = vector.broadcast %cst_17 : f32 to vector<4x1xf32>
    %20 = arith.divf %18, %19 : vector<4x1xf32>
    %21 = vector.broadcast %20 : vector<4x1xf32> to vector<4x32xf32>
    %22 = arith.subf %14, %21 : vector<4x32xf32>
    %23 = arith.mulf %22, %22 : vector<4x32xf32>
    %cst_18 = arith.constant dense<0.000000e+00> : vector<4xf32>
    %24 = vector.multi_reduction <add>, %23, %cst_18 [1] : vector<4x32xf32> to vector<4xf32>
    %25 = vector.shape_cast %24 : vector<4xf32> to vector<4x1xf32>
    %cst_19 = arith.constant 3.200000e+01 : f32
    %26 = vector.broadcast %cst_19 : f32 to vector<4x1xf32>
    %27 = arith.divf %25, %26 : vector<4x1xf32>
    %28 = vector.broadcast %20 : vector<4x1xf32> to vector<4x32xf32>
    %29 = arith.subf %14, %28 : vector<4x32xf32>
    %cst_20 = arith.constant 9.99999974E-6 : f32
    %30 = vector.broadcast %cst_20 : f32 to vector<4x1xf32>
    %31 = arith.addf %27, %30 : vector<4x1xf32>
    %32 = math.rsqrt %31 : vector<4x1xf32>
    %33 = vector.broadcast %32 : vector<4x1xf32> to vector<4x32xf32>
    %34 = arith.mulf %29, %33 : vector<4x32xf32>
    %35 = vector.broadcast %15 : vector<1x32xf32> to vector<4x32xf32>
    %36 = arith.mulf %34, %35 : vector<4x32xf32>
    %37 = vector.broadcast %16 : vector<1x32xf32> to vector<4x32xf32>
    %38 = arith.addf %36, %37 : vector<4x32xf32>
    %c0_21 = arith.constant 0 : index
    %c0_22 = arith.constant 0 : index
    %c0_23 = arith.constant 0 : index
    %39 = vector.load %arg8[%c0_21, %c0_22, %c0_23] : memref<1x4x32xf32, #tpu.memory_space<vmem>>, vector<1x4x32xf32>
    %40 = vector.shape_cast %39 : vector<1x4x32xf32> to vector<4x32xf32>
    %41 = vector.shape_cast %38 : vector<4x32xf32> to vector<1x4x32xf32>
    tpu.vector_store %arg8[%c0_21, %c0_22, %c0_23], %41 {strides = array<i32>} : memref<1x4x32xf32, #tpu.memory_space<vmem>>, vector<1x4x32xf32>,
    return
  }
  func.func @transform_0(%arg0: i32) -> (i32, i32, i32) {
    %c0_i32 = arith.constant 0 : i32
    %c0_i32_0 = arith.constant 0 : i32
    %c0_i32_1 = arith.constant 0 : i32
    return %arg0, %c0_i32, %c0_i32_0 : i32, i32, i32
  }
  func.func @transform_1(%arg0: i32) -> (i32, i32) {
    %c0_i32 = arith.constant 0 : i32
    %c0_i32_0 = arith.constant 0 : i32
    %c0_i32_1 = arith.constant 0 : i32
    return %c0_i32, %c0_i32_0 : i32, i32
  }
  func.func @transform_2(%arg0: i32) -> (i32, i32) {
    %c0_i32 = arith.constant 0 : i32
    %c0_i32_0 = arith.constant 0 : i32
    %c0_i32_1 = arith.constant 0 : i32
    return %c0_i32, %c0_i32_0 : i32, i32
  }
  func.func @transform_3(%arg0: i32) -> (i32, i32) {
    %c0_i32 = arith.constant 0 : i32
    %c0_i32_0 = arith.constant 0 : i32
    %c0_i32_1 = arith.constant 0 : i32
    return %c0_i32, %c0_i32_0 : i32, i32
  }
  func.func @transform_4(%arg0: i32) -> (i32, i32) {
    %c0_i32 = arith.constant 0 : i32
    %c0_i32_0 = arith.constant 0 : i32
    %c0_i32_1 = arith.constant 0 : i32
    return %c0_i32, %c0_i32_0 : i32, i32
  }
  func.func @transform_5(%arg0: i32) -> (i32, i32) {
    %c0_i32 = arith.constant 0 : i32
    %c0_i32_0 = arith.constant 0 : i32
    %c0_i32_1 = arith.constant 0 : i32
    return %c0_i32, %c0_i32_0 : i32, i32
  }
  func.func @transform_6(%arg0: i32) -> (i32, i32) {
    %c0_i32 = arith.constant 0 : i32
    %c0_i32_0 = arith.constant 0 : i32
    %c0_i32_1 = arith.constant 0 : i32
    return %c0_i32, %c0_i32_0 : i32, i32
  }
  func.func @transform_7(%arg0: i32) -> (i32, i32, i32) {
    %c0_i32 = arith.constant 0 : i32
    %c0_i32_0 = arith.constant 0 : i32
    %c0_i32_1 = arith.constant 0 : i32
    return %arg0, %c0_i32, %c0_i32_0 : i32, i32, i32
  }
}

module attributes {stable_mosaic.version = 11 : i64} {
  func.func @_ffn_res_ln_kernel(%arg0: i32, %arg1: memref<1x8x32xf32, #tpu.memory_space<vmem>>, %arg2: memref<32x64xf32, #tpu.memory_space<vmem>>, %arg3: memref<1x64xf32, #tpu.memory_space<vmem>>, %arg4: memref<64x32xf32, #tpu.memory_space<vmem>>, %arg5: memref<1x32xf32, #tpu.memory_space<vmem>>, %arg6: memref<1x32xf32, #tpu.memory_space<vmem>>, %arg7: memref<1x32xf32, #tpu.memory_space<vmem>>, %arg8: memref<1x8x32xf32, #tpu.memory_space<vmem>>) attributes {dimension_semantics = [#tpu.dimension_semantics<parallel>], iteration_bounds = array<i64: 2>, scalar_prefetch = 0 : i64, scratch_operands = 0 : i64, tpu.core_type = #tpu.core_type<tc>, window_params = [{transform_indices = @transform_0, window_bounds = array<i64: 1, 8, 32>}, {pipeline_mode = #tpu.pipeline_mode<synchronous>, transform_indices = @transform_1, window_bounds = array<i64: 32, 64>}, {pipeline_mode = #tpu.pipeline_mode<synchronous>, transform_indices = @transform_2, window_bounds = array<i64: 1, 64>}, {pipeline_mode = #tpu.pipeline_mode<synchronous>, transform_indices = @transform_3, window_bounds = array<i64: 64, 32>}, {pipeline_mode = #tpu.pipeline_mode<synchronous>, transform_indices = @transform_4, window_bounds = array<i64: 1, 32>}, {pipeline_mode = #tpu.pipeline_mode<synchronous>, transform_indices = @transform_5, window_bounds = array<i64: 1, 32>}, {pipeline_mode = #tpu.pipeline_mode<synchronous>, transform_indices = @transform_6, window_bounds = array<i64: 1, 32>}, {transform_indices = @transform_7, window_bounds = array<i64: 1, 8, 32>}]} {
    %c0 = arith.constant 0 : index
    %c0_0 = arith.constant 0 : index
    %c0_1 = arith.constant 0 : index
    %0 = vector.load %arg1[%c0, %c0_0, %c0_1] : memref<1x8x32xf32, #tpu.memory_space<vmem>>, vector<1x8x32xf32>
    %1 = vector.shape_cast %0 : vector<1x8x32xf32> to vector<8x32xf32>
    %c0_2 = arith.constant 0 : index
    %c0_3 = arith.constant 0 : index
    %2 = vector.load %arg2[%c0_2, %c0_3] : memref<32x64xf32, #tpu.memory_space<vmem>>, vector<32x64xf32>
    %cst = arith.constant dense<0.000000e+00> : vector<8x64xf32>
    %3 = tpu.matmul %1, %2, %cst {dimension_numbers = #tpu.dot_dimension_numbers<[1], [0], [0], [1], [0, 0, 1, 1], [], []>} : vector<8x32xf32>, vector<32x64xf32>, vector<8x64xf32> -> vector<8x64xf32>
    %c0_4 = arith.constant 0 : index
    %c0_5 = arith.constant 0 : index
    %4 = vector.load %arg3[%c0_4, %c0_5] : memref<1x64xf32, #tpu.memory_space<vmem>>, vector<1x64xf32>
    %5 = vector.broadcast %4 : vector<1x64xf32> to vector<8x64xf32>
    %6 = arith.addf %3, %5 : vector<8x64xf32>
    %cst_6 = arith.constant 0.000000e+00 : f32
    %7 = vector.broadcast %cst_6 : f32 to vector<8x64xf32>
    %8 = arith.maximumf %6, %7 : vector<8x64xf32>
    %c0_7 = arith.constant 0 : index
    %c0_8 = arith.constant 0 : index
    %9 = vector.load %arg4[%c0_7, %c0_8] : memref<64x32xf32, #tpu.memory_space<vmem>>, vector<64x32xf32>
    %cst_9 = arith.constant dense<0.000000e+00> : vector<8x32xf32>
    %10 = tpu.matmul %8, %9, %cst_9 {dimension_numbers = #tpu.dot_dimension_numbers<[1], [0], [0], [1], [0, 0, 1, 1], [], []>} : vector<8x64xf32>, vector<64x32xf32>, vector<8x32xf32> -> vector<8x32xf32>
    %c0_10 = arith.constant 0 : index
    %c0_11 = arith.constant 0 : index
    %11 = vector.load %arg5[%c0_10, %c0_11] : memref<1x32xf32, #tpu.memory_space<vmem>>, vector<1x32xf32>
    %12 = vector.broadcast %11 : vector<1x32xf32> to vector<8x32xf32>
    %13 = arith.addf %10, %12 : vector<8x32xf32>
    %14 = arith.addf %1, %13 : vector<8x32xf32>
    %c0_12 = arith.constant 0 : index
    %c0_13 = arith.constant 0 : index
    %15 = vector.load %arg6[%c0_12, %c0_13] : memref<1x32xf32, #tpu.memory_space<vmem>>, vector<1x32xf32>
    %c0_14 = arith.constant 0 : index
    %c0_15 = arith.constant 0 : index
    %16 = vector.load %arg7[%c0_14, %c0_15] : memref<1x32xf32, #tpu.memory_space<vmem>>, vector<1x32xf32>
    %cst_16 = arith.constant dense<0.000000e+00> : vector<8xf32>
    %17 = vector.multi_reduction <add>, %14, %cst_16 [1] : vector<8x32xf32> to vector<8xf32>
    %18 = vector.shape_cast %17 : vector<8xf32> to vector<8x1xf32>
    %cst_17 = arith.constant 3.200000e+01 : f32
    %19 = vector.broadcast %cst_17 : f32 to vector<8x1xf32>
    %20 = arith.divf %18, %19 : vector<8x1xf32>
    %21 = vector.broadcast %20 : vector<8x1xf32> to vector<8x32xf32>
    %22 = arith.subf %14, %21 : vector<8x32xf32>
    %23 = arith.mulf %22, %22 : vector<8x32xf32>
    %cst_18 = arith.constant dense<0.000000e+00> : vector<8xf32>
    %24 = vector.multi_reduction <add>, %23, %cst_18 [1] : vector<8x32xf32> to vector<8xf32>
    %25 = vector.shape_cast %24 : vector<8xf32> to vector<8x1xf32>
    %cst_19 = arith.constant 3.200000e+01 : f32
    %26 = vector.broadcast %cst_19 : f32 to vector<8x1xf32>
    %27 = arith.divf %25, %26 : vector<8x1xf32>
    %28 = vector.broadcast %20 : vector<8x1xf32> to vector<8x32xf32>
    %29 = arith.subf %14, %28 : vector<8x32xf32>
    %cst_20 = arith.constant 9.99999974E-6 : f32
    %30 = vector.broadcast %cst_20 : f32 to vector<8x1xf32>
    %31 = arith.addf %27, %30 : vector<8x1xf32>
    %32 = math.rsqrt %31 : vector<8x1xf32>
    %33 = vector.broadcast %32 : vector<8x1xf32> to vector<8x32xf32>
    %34 = arith.mulf %29, %33 : vector<8x32xf32>
    %35 = vector.broadcast %15 : vector<1x32xf32> to vector<8x32xf32>
    %36 = arith.mulf %34, %35 : vector<8x32xf32>
    %37 = vector.broadcast %16 : vector<1x32xf32> to vector<8x32xf32>
    %38 = arith.addf %36, %37 : vector<8x32xf32>
    %c0_21 = arith.constant 0 : index
    %c0_22 = arith.constant 0 : index
    %c0_23 = arith.constant 0 : index
    %39 = vector.load %arg8[%c0_21, %c0_22, %c0_23] : memref<1x8x32xf32, #tpu.memory_space<vmem>>, vector<1x8x32xf32>
    %40 = vector.shape_cast %39 : vector<1x8x32xf32> to vector<8x32xf32>
    %41 = vector.shape_cast %38 : vector<8x32xf32> to vector<1x8x32xf32>
    tpu.vector_store %arg8[%c0_21, %c0_22, %c0_23], %41 {strides = array<i32>} : memref<1x8x32xf32, #tpu.memory_space<vmem>>, vector<1x8x32xf32>,
    return
  }
  func.func @transform_0(%arg0: i32) -> (i32, i32, i32) {
    %c0_i32 = arith.constant 0 : i32
    %c0_i32_0 = arith.constant 0 : i32
    %c0_i32_1 = arith.constant 0 : i32
    return %arg0, %c0_i32, %c0_i32_0 : i32, i32, i32
  }
  func.func @transform_1(%arg0: i32) -> (i32, i32) {
    %c0_i32 = arith.constant 0 : i32
    %c0_i32_0 = arith.constant 0 : i32
    %c0_i32_1 = arith.constant 0 : i32
    return %c0_i32, %c0_i32_0 : i32, i32
  }
  func.func @transform_2(%arg0: i32) -> (i32, i32) {
    %c0_i32 = arith.constant 0 : i32
    %c0_i32_0 = arith.constant 0 : i32
    %c0_i32_1 = arith.constant 0 : i32
    return %c0_i32, %c0_i32_0 : i32, i32
  }
  func.func @transform_3(%arg0: i32) -> (i32, i32) {
    %c0_i32 = arith.constant 0 : i32
    %c0_i32_0 = arith.constant 0 : i32
    %c0_i32_1 = arith.constant 0 : i32
    return %c0_i32, %c0_i32_0 : i32, i32
  }
  func.func @transform_4(%arg0: i32) -> (i32, i32) {
    %c0_i32 = arith.constant 0 : i32
    %c0_i32_0 = arith.constant 0 : i32
    %c0_i32_1 = arith.constant 0 : i32
    return %c0_i32, %c0_i32_0 : i32, i32
  }
  func.func @transform_5(%arg0: i32) -> (i32, i32) {
    %c0_i32 = arith.constant 0 : i32
    %c0_i32_0 = arith.constant 0 : i32
    %c0_i32_1 = arith.constant 0 : i32
    return %c0_i32, %c0_i32_0 : i32, i32
  }
  func.func @transform_6(%arg0: i32) -> (i32, i32) {
    %c0_i32 = arith.constant 0 : i32
    %c0_i32_0 = arith.constant 0 : i32
    %c0_i32_1 = arith.constant 0 : i32
    return %c0_i32, %c0_i32_0 : i32, i32
  }
  func.func @transform_7(%arg0: i32) -> (i32, i32, i32) {
    %c0_i32 = arith.constant 0 : i32
    %c0_i32_0 = arith.constant 0 : i32
    %c0_i32_1 = arith.constant 0 : i32
    return %arg0, %c0_i32, %c0_i32_0 : i32, i32, i32
  }
}

module attributes {stable_mosaic.version = 11 : i64} {
  func.func @_mha_ln_kernel(%arg0: i32, %arg1: memref<1x7x32xf32, #tpu.memory_space<vmem>>, %arg2: memref<1x17x32xf32, #tpu.memory_space<vmem>>, %arg3: memref<32x96xf32, #tpu.memory_space<vmem>>, %arg4: memref<1x96xf32, #tpu.memory_space<vmem>>, %arg5: memref<32x32xf32, #tpu.memory_space<vmem>>, %arg6: memref<1x32xf32, #tpu.memory_space<vmem>>, %arg7: memref<1x32xf32, #tpu.memory_space<vmem>>, %arg8: memref<1x32xf32, #tpu.memory_space<vmem>>, %arg9: memref<7x17xf32, #tpu.memory_space<vmem>>, %arg10: memref<1x7x32xf32, #tpu.memory_space<vmem>>) attributes {dimension_semantics = [#tpu.dimension_semantics<parallel>], iteration_bounds = array<i64: 2>, scalar_prefetch = 0 : i64, scratch_operands = 0 : i64, tpu.core_type = #tpu.core_type<tc>, window_params = [{transform_indices = @transform_0, window_bounds = array<i64: 1, 7, 32>}, {transform_indices = @transform_1, window_bounds = array<i64: 1, 17, 32>}, {pipeline_mode = #tpu.pipeline_mode<synchronous>, transform_indices = @transform_2, window_bounds = array<i64: 32, 96>}, {pipeline_mode = #tpu.pipeline_mode<synchronous>, transform_indices = @transform_3, window_bounds = array<i64: 1, 96>}, {pipeline_mode = #tpu.pipeline_mode<synchronous>, transform_indices = @transform_4, window_bounds = array<i64: 32, 32>}, {pipeline_mode = #tpu.pipeline_mode<synchronous>, transform_indices = @transform_5, window_bounds = array<i64: 1, 32>}, {pipeline_mode = #tpu.pipeline_mode<synchronous>, transform_indices = @transform_6, window_bounds = array<i64: 1, 32>}, {pipeline_mode = #tpu.pipeline_mode<synchronous>, transform_indices = @transform_7, window_bounds = array<i64: 1, 32>}, {pipeline_mode = #tpu.pipeline_mode<synchronous>, transform_indices = @transform_8, window_bounds = array<i64: 7, 17>}, {transform_indices = @transform_9, window_bounds = array<i64: 1, 7, 32>}]} {
    %c0 = arith.constant 0 : index
    %c0_0 = arith.constant 0 : index
    %c0_1 = arith.constant 0 : index
    %0 = vector.load %arg1[%c0, %c0_0, %c0_1] : memref<1x7x32xf32, #tpu.memory_space<vmem>>, vector<1x7x32xf32>
    %1 = vector.shape_cast %0 : vector<1x7x32xf32> to vector<7x32xf32>
    %c0_2 = arith.constant 0 : index
    %c0_3 = arith.constant 0 : index
    %2 = vector.load %arg3[%c0_2, %c0_3] : memref<32x96xf32, #tpu.memory_space<vmem>>, vector<32x96xf32>
    %c0_4 = arith.constant 0 : index
    %c0_5 = arith.constant 0 : index
    %3 = vector.load %arg4[%c0_4, %c0_5] : memref<1x96xf32, #tpu.memory_space<vmem>>, vector<1x96xf32>
    %c0_6 = arith.constant 0 : index
    %c0_7 = arith.constant 0 : index
    %c0_8 = arith.constant 0 : index
    %4 = vector.load %arg2[%c0_6, %c0_7, %c0_8] : memref<1x17x32xf32, #tpu.memory_space<vmem>>, vector<1x17x32xf32>
    %5 = vector.shape_cast %4 : vector<1x17x32xf32> to vector<17x32xf32>
    %6 = vector.extract_strided_slice %2 {offsets = [0, 0], sizes = [32, 32], strides = [1, 1]} : vector<32x96xf32> to vector<32x32xf32>
    %cst = arith.constant dense<0.000000e+00> : vector<7x32xf32>
    %7 = tpu.matmul %1, %6, %cst {dimension_numbers = #tpu.dot_dimension_numbers<[1], [0], [0], [1], [0, 0, 1, 1], [], []>} : vector<7x32xf32>, vector<32x32xf32>, vector<7x32xf32> -> vector<7x32xf32>
    %8 = vector.extract_strided_slice %3 {offsets = [0, 0], sizes = [1, 32], strides = [1, 1]} : vector<1x96xf32> to vector<1x32xf32>
    %9 = vector.broadcast %8 : vector<1x32xf32> to vector<7x32xf32>
    %10 = arith.addf %7, %9 : vector<7x32xf32>
    %11 = vector.extract_strided_slice %2 {offsets = [0, 32], sizes = [32, 64], strides = [1, 1]} : vector<32x96xf32> to vector<32x64xf32>
    %cst_9 = arith.constant dense<0.000000e+00> : vector<17x64xf32>
    %12 = tpu.matmul %5, %11, %cst_9 {dimension_numbers = #tpu.dot_dimension_numbers<[1], [0], [0], [1], [0, 0, 1, 1], [], []>} : vector<17x32xf32>, vector<32x64xf32>, vector<17x64xf32> -> vector<17x64xf32>
    %13 = vector.extract_strided_slice %3 {offsets = [0, 32], sizes = [1, 64], strides = [1, 1]} : vector<1x96xf32> to vector<1x64xf32>
    %14 = vector.broadcast %13 : vector<1x64xf32> to vector<17x64xf32>
    %15 = arith.addf %12, %14 : vector<17x64xf32>
    %16 = vector.extract_strided_slice %15 {offsets = [0, 0], sizes = [17, 32], strides = [1, 1]} : vector<17x64xf32> to vector<17x32xf32>
    %17 = vector.extract_strided_slice %15 {offsets = [0, 32], sizes = [17, 32], strides = [1, 1]} : vector<17x64xf32> to vector<17x32xf32>
    %c0_10 = arith.constant 0 : index
    %c0_11 = arith.constant 0 : index
    %18 = vector.load %arg9[%c0_10, %c0_11] : memref<7x17xf32, #tpu.memory_space<vmem>>, vector<7x17xf32>
    %19 = vector.extract_strided_slice %10 {offsets = [0, 0], sizes = [7, 8], strides = [1, 1]} : vector<7x32xf32> to vector<7x8xf32>
    %20 = vector.extract_strided_slice %16 {offsets = [0, 0], sizes = [17, 8], strides = [1, 1]} : vector<17x32xf32> to vector<17x8xf32>
    %cst_12 = arith.constant dense<0.000000e+00> : vector<7x17xf32>
    %21 = tpu.matmul %19, %20, %cst_12 {dimension_numbers = #tpu.dot_dimension_numbers<[1], [1], [0], [0], [0, 0, 1, 0], [], []>} : vector<7x8xf32>, vector<17x8xf32>, vector<7x17xf32> -> vector<7x17xf32>
    %cst_13 = arith.constant 0.353553385 : f32
    %22 = vector.broadcast %cst_13 : f32 to vector<7x17xf32>
    %23 = arith.mulf %21, %22 : vector<7x17xf32>
    %24 = arith.addf %23, %18 : vector<7x17xf32>
    %cst_14 = arith.constant dense<0xFF800000> : vector<7xf32>
    %25 = vector.multi_reduction <maximumf>, %24, %cst_14 [1] : vector<7x17xf32> to vector<7xf32>
    %26 = vector.shape_cast %25 : vector<7xf32> to vector<7x1xf32>
    %27 = vector.broadcast %26 : vector<7x1xf32> to vector<7x17xf32>
    %28 = arith.subf %24, %27 : vector<7x17xf32>
    %29 = math.exp %28 : vector<7x17xf32>
    %cst_15 = arith.constant dense<0.000000e+00> : vector<7xf32>
    %30 = vector.multi_reduction <add>, %29, %cst_15 [1] : vector<7x17xf32> to vector<7xf32>
    %31 = vector.shape_cast %30 : vector<7xf32> to vector<7x1xf32>
    %32 = tpu.reciprocal %31 {approx = true} : vector<7x1xf32> -> vector<7x1xf32>
    %33 = vector.broadcast %32 : vector<7x1xf32> to vector<7x17xf32>
    %34 = arith.mulf %29, %33 : vector<7x17xf32>
    %35 = vector.extract_strided_slice %17 {offsets = [0, 0], sizes = [17, 8], strides = [1, 1]} : vector<17x32xf32> to vector<17x8xf32>
    %cst_16 = arith.constant dense<0.000000e+00> : vector<7x8xf32>
    %36 = tpu.matmul %34, %35, %cst_16 {dimension_numbers = #tpu.dot_dimension_numbers<[1], [0], [0], [1], [0, 0, 1, 1], [], []>} : vector<7x17xf32>, vector<17x8xf32>, vector<7x8xf32> -> vector<7x8xf32>
    %37 = vector.extract_strided_slice %10 {offsets = [0, 8], sizes = [7, 8], strides = [1, 1]} : vector<7x32xf32> to vector<7x8xf32>
    %38 = vector.extract_strided_slice %16 {offsets = [0, 8], sizes = [17, 8], strides = [1, 1]} : vector<17x32xf32> to vector<17x8xf32>
    %cst_17 = arith.constant dense<0.000000e+00> : vector<7x17xf32>
    %39 = tpu.matmul %37, %38, %cst_17 {dimension_numbers = #tpu.dot_dimension_numbers<[1], [1], [0], [0], [0, 0, 1, 0], [], []>} : vector<7x8xf32>, vector<17x8xf32>, vector<7x17xf32> -> vector<7x17xf32>
    %cst_18 = arith.constant 0.353553385 : f32
    %40 = vector.broadcast %cst_18 : f32 to vector<7x17xf32>
    %41 = arith.mulf %39, %40 : vector<7x17xf32>
    %42 = arith.addf %41, %18 : vector<7x17xf32>
    %cst_19 = arith.constant dense<0xFF800000> : vector<7xf32>
    %43 = vector.multi_reduction <maximumf>, %42, %cst_19 [1] : vector<7x17xf32> to vector<7xf32>
    %44 = vector.shape_cast %43 : vector<7xf32> to vector<7x1xf32>
    %45 = vector.broadcast %44 : vector<7x1xf32> to vector<7x17xf32>
    %46 = arith.subf %42, %45 : vector<7x17xf32>
    %47 = math.exp %46 : vector<7x17xf32>
    %cst_20 = arith.constant dense<0.000000e+00> : vector<7xf32>
    %48 = vector.multi_reduction <add>, %47, %cst_20 [1] : vector<7x17xf32> to vector<7xf32>
    %49 = vector.shape_cast %48 : vector<7xf32> to vector<7x1xf32>
    %50 = tpu.reciprocal %49 {approx = true} : vector<7x1xf32> -> vector<7x1xf32>
    %51 = vector.broadcast %50 : vector<7x1xf32> to vector<7x17xf32>
    %52 = arith.mulf %47, %51 : vector<7x17xf32>
    %53 = vector.extract_strided_slice %17 {offsets = [0, 8], sizes = [17, 8], strides = [1, 1]} : vector<17x32xf32> to vector<17x8xf32>
    %cst_21 = arith.constant dense<0.000000e+00> : vector<7x8xf32>
    %54 = tpu.matmul %52, %53, %cst_21 {dimension_numbers = #tpu.dot_dimension_numbers<[1], [0], [0], [1], [0, 0, 1, 1], [], []>} : vector<7x17xf32>, vector<17x8xf32>, vector<7x8xf32> -> vector<7x8xf32>
    %55 = vector.extract_strided_slice %10 {offsets = [0, 16], sizes = [7, 8], strides = [1, 1]} : vector<7x32xf32> to vector<7x8xf32>
    %56 = vector.extract_strided_slice %16 {offsets = [0, 16], sizes = [17, 8], strides = [1, 1]} : vector<17x32xf32> to vector<17x8xf32>
    %cst_22 = arith.constant dense<0.000000e+00> : vector<7x17xf32>
    %57 = tpu.matmul %55, %56, %cst_22 {dimension_numbers = #tpu.dot_dimension_numbers<[1], [1], [0], [0], [0, 0, 1, 0], [], []>} : vector<7x8xf32>, vector<17x8xf32>, vector<7x17xf32> -> vector<7x17xf32>
    %cst_23 = arith.constant 0.353553385 : f32
    %58 = vector.broadcast %cst_23 : f32 to vector<7x17xf32>
    %59 = arith.mulf %57, %58 : vector<7x17xf32>
    %60 = arith.addf %59, %18 : vector<7x17xf32>
    %cst_24 = arith.constant dense<0xFF800000> : vector<7xf32>
    %61 = vector.multi_reduction <maximumf>, %60, %cst_24 [1] : vector<7x17xf32> to vector<7xf32>
    %62 = vector.shape_cast %61 : vector<7xf32> to vector<7x1xf32>
    %63 = vector.broadcast %62 : vector<7x1xf32> to vector<7x17xf32>
    %64 = arith.subf %60, %63 : vector<7x17xf32>
    %65 = math.exp %64 : vector<7x17xf32>
    %cst_25 = arith.constant dense<0.000000e+00> : vector<7xf32>
    %66 = vector.multi_reduction <add>, %65, %cst_25 [1] : vector<7x17xf32> to vector<7xf32>
    %67 = vector.shape_cast %66 : vector<7xf32> to vector<7x1xf32>
    %68 = tpu.reciprocal %67 {approx = true} : vector<7x1xf32> -> vector<7x1xf32>
    %69 = vector.broadcast %68 : vector<7x1xf32> to vector<7x17xf32>
    %70 = arith.mulf %65, %69 : vector<7x17xf32>
    %71 = vector.extract_strided_slice %17 {offsets = [0, 16], sizes = [17, 8], strides = [1, 1]} : vector<17x32xf32> to vector<17x8xf32>
    %cst_26 = arith.constant dense<0.000000e+00> : vector<7x8xf32>
    %72 = tpu.matmul %70, %71, %cst_26 {dimension_numbers = #tpu.dot_dimension_numbers<[1], [0], [0], [1], [0, 0, 1, 1], [], []>} : vector<7x17xf32>, vector<17x8xf32>, vector<7x8xf32> -> vector<7x8xf32>
    %73 = vector.extract_strided_slice %10 {offsets = [0, 24], sizes = [7, 8], strides = [1, 1]} : vector<7x32xf32> to vector<7x8xf32>
    %74 = vector.extract_strided_slice %16 {offsets = [0, 24], sizes = [17, 8], strides = [1, 1]} : vector<17x32xf32> to vector<17x8xf32>
    %cst_27 = arith.constant dense<0.000000e+00> : vector<7x17xf32>
    %75 = tpu.matmul %73, %74, %cst_27 {dimension_numbers = #tpu.dot_dimension_numbers<[1], [1], [0], [0], [0, 0, 1, 0], [], []>} : vector<7x8xf32>, vector<17x8xf32>, vector<7x17xf32> -> vector<7x17xf32>
    %cst_28 = arith.constant 0.353553385 : f32
    %76 = vector.broadcast %cst_28 : f32 to vector<7x17xf32>
    %77 = arith.mulf %75, %76 : vector<7x17xf32>
    %78 = arith.addf %77, %18 : vector<7x17xf32>
    %cst_29 = arith.constant dense<0xFF800000> : vector<7xf32>
    %79 = vector.multi_reduction <maximumf>, %78, %cst_29 [1] : vector<7x17xf32> to vector<7xf32>
    %80 = vector.shape_cast %79 : vector<7xf32> to vector<7x1xf32>
    %81 = vector.broadcast %80 : vector<7x1xf32> to vector<7x17xf32>
    %82 = arith.subf %78, %81 : vector<7x17xf32>
    %83 = math.exp %82 : vector<7x17xf32>
    %cst_30 = arith.constant dense<0.000000e+00> : vector<7xf32>
    %84 = vector.multi_reduction <add>, %83, %cst_30 [1] : vector<7x17xf32> to vector<7xf32>
    %85 = vector.shape_cast %84 : vector<7xf32> to vector<7x1xf32>
    %86 = tpu.reciprocal %85 {approx = true} : vector<7x1xf32> -> vector<7x1xf32>
    %87 = vector.broadcast %86 : vector<7x1xf32> to vector<7x17xf32>
    %88 = arith.mulf %83, %87 : vector<7x17xf32>
    %89 = vector.extract_strided_slice %17 {offsets = [0, 24], sizes = [17, 8], strides = [1, 1]} : vector<17x32xf32> to vector<17x8xf32>
    %cst_31 = arith.constant dense<0.000000e+00> : vector<7x8xf32>
    %90 = tpu.matmul %88, %89, %cst_31 {dimension_numbers = #tpu.dot_dimension_numbers<[1], [0], [0], [1], [0, 0, 1, 1], [], []>} : vector<7x17xf32>, vector<17x8xf32>, vector<7x8xf32> -> vector<7x8xf32>
    %91 = tpu.concatenate %36, %54, %72, %90 in 1 : vector<7x8xf32>, vector<7x8xf32>, vector<7x8xf32>, vector<7x8xf32> -> vector<7x32xf32>
    %c0_32 = arith.constant 0 : index
    %c0_33 = arith.constant 0 : index
    %92 = vector.load %arg5[%c0_32, %c0_33] : memref<32x32xf32, #tpu.memory_space<vmem>>, vector<32x32xf32>
    %cst_34 = arith.constant dense<0.000000e+00> : vector<7x32xf32>
    %93 = tpu.matmul %91, %92, %cst_34 {dimension_numbers = #tpu.dot_dimension_numbers<[1], [0], [0], [1], [0, 0, 1, 1], [], []>} : vector<7x32xf32>, vector<32x32xf32>, vector<7x32xf32> -> vector<7x32xf32>
    %c0_35 = arith.constant 0 : index
    %c0_36 = arith.constant 0 : index
    %94 = vector.load %arg6[%c0_35, %c0_36] : memref<1x32xf32, #tpu.memory_space<vmem>>, vector<1x32xf32>
    %95 = vector.broadcast %94 : vector<1x32xf32> to vector<7x32xf32>
    %96 = arith.addf %93, %95 : vector<7x32xf32>
    %97 = arith.addf %1, %96 : vector<7x32xf32>
    %c0_37 = arith.constant 0 : index
    %c0_38 = arith.constant 0 : index
    %98 = vector.load %arg7[%c0_37, %c0_38] : memref<1x32xf32, #tpu.memory_space<vmem>>, vector<1x32xf32>
    %c0_39 = arith.constant 0 : index
    %c0_40 = arith.constant 0 : index
    %99 = vector.load %arg8[%c0_39, %c0_40] : memref<1x32xf32, #tpu.memory_space<vmem>>, vector<1x32xf32>
    %cst_41 = arith.constant dense<0.000000e+00> : vector<7xf32>
    %100 = vector.multi_reduction <add>, %97, %cst_41 [1] : vector<7x32xf32> to vector<7xf32>
    %101 = vector.shape_cast %100 : vector<7xf32> to vector<7x1xf32>
    %cst_42 = arith.constant 3.200000e+01 : f32
    %102 = vector.broadcast %cst_42 : f32 to vector<7x1xf32>
    %103 = arith.divf %101, %102 : vector<7x1xf32>
    %104 = vector.broadcast %103 : vector<7x1xf32> to vector<7x32xf32>
    %105 = arith.subf %97, %104 : vector<7x32xf32>
    %106 = arith.mulf %105, %105 : vector<7x32xf32>
    %cst_43 = arith.constant dense<0.000000e+00> : vector<7xf32>
    %107 = vector.multi_reduction <add>, %106, %cst_43 [1] : vector<7x32xf32> to vector<7xf32>
    %108 = vector.shape_cast %107 : vector<7xf32> to vector<7x1xf32>
    %cst_44 = arith.constant 3.200000e+01 : f32
    %109 = vector.broadcast %cst_44 : f32 to vector<7x1xf32>
    %110 = arith.divf %108, %109 : vector<7x1xf32>
    %111 = vector.broadcast %103 : vector<7x1xf32> to vector<7x32xf32>
    %112 = arith.subf %97, %111 : vector<7x32xf32>
    %cst_45 = arith.constant 9.99999974E-6 : f32
    %113 = vector.broadcast %cst_45 : f32 to vector<7x1xf32>
    %114 = arith.addf %110, %113 : vector<7x1xf32>
    %115 = math.rsqrt %114 : vector<7x1xf32>
    %116 = vector.broadcast %115 : vector<7x1xf32> to vector<7x32xf32>
    %117 = arith.mulf %112, %116 : vector<7x32xf32>
    %118 = vector.broadcast %98 : vector<1x32xf32> to vector<7x32xf32>
    %119 = arith.mulf %117, %118 : vector<7x32xf32>
    %120 = vector.broadcast %99 : vector<1x32xf32> to vector<7x32xf32>
    %121 = arith.addf %119, %120 : vector<7x32xf32>
    %c0_46 = arith.constant 0 : index
    %c0_47 = arith.constant 0 : index
    %c0_48 = arith.constant 0 : index
    %122 = vector.load %arg10[%c0_46, %c0_47, %c0_48] : memref<1x7x32xf32, #tpu.memory_space<vmem>>, vector<1x7x32xf32>
    %123 = vector.shape_cast %122 : vector<1x7x32xf32> to vector<7x32xf32>
    %124 = vector.shape_cast %121 : vector<7x32xf32> to vector<1x7x32xf32>
    tpu.vector_store %arg10[%c0_46, %c0_47, %c0_48], %124 {strides = array<i32>} : memref<1x7x32xf32, #tpu.memory_space<vmem>>, vector<1x7x32xf32>,
    return
  }
  func.func @transform_0(%arg0: i32) -> (i32, i32, i32) {
    %c0_i32 = arith.constant 0 : i32
    %c0_i32_0 = arith.constant 0 : i32
    %c0_i32_1 = arith.constant 0 : i32
    return %arg0, %c0_i32, %c0_i32_0 : i32, i32, i32
  }
  func.func @transform_1(%arg0: i32) -> (i32, i32, i32) {
    %c0_i32 = arith.constant 0 : i32
    %c0_i32_0 = arith.constant 0 : i32
    %c0_i32_1 = arith.constant 0 : i32
    return %arg0, %c0_i32, %c0_i32_0 : i32, i32, i32
  }
  func.func @transform_2(%arg0: i32) -> (i32, i32) {
    %c0_i32 = arith.constant 0 : i32
    %c0_i32_0 = arith.constant 0 : i32
    %c0_i32_1 = arith.constant 0 : i32
    return %c0_i32, %c0_i32_0 : i32, i32
  }
  func.func @transform_3(%arg0: i32) -> (i32, i32) {
    %c0_i32 = arith.constant 0 : i32
    %c0_i32_0 = arith.constant 0 : i32
    %c0_i32_1 = arith.constant 0 : i32
    return %c0_i32, %c0_i32_0 : i32, i32
  }
  func.func @transform_4(%arg0: i32) -> (i32, i32) {
    %c0_i32 = arith.constant 0 : i32
    %c0_i32_0 = arith.constant 0 : i32
    %c0_i32_1 = arith.constant 0 : i32
    return %c0_i32, %c0_i32_0 : i32, i32
  }
  func.func @transform_5(%arg0: i32) -> (i32, i32) {
    %c0_i32 = arith.constant 0 : i32
    %c0_i32_0 = arith.constant 0 : i32
    %c0_i32_1 = arith.constant 0 : i32
    return %c0_i32, %c0_i32_0 : i32, i32
  }
  func.func @transform_6(%arg0: i32) -> (i32, i32) {
    %c0_i32 = arith.constant 0 : i32
    %c0_i32_0 = arith.constant 0 : i32
    %c0_i32_1 = arith.constant 0 : i32
    return %c0_i32, %c0_i32_0 : i32, i32
  }
  func.func @transform_7(%arg0: i32) -> (i32, i32) {
    %c0_i32 = arith.constant 0 : i32
    %c0_i32_0 = arith.constant 0 : i32
    %c0_i32_1 = arith.constant 0 : i32
    return %c0_i32, %c0_i32_0 : i32, i32
  }
  func.func @transform_8(%arg0: i32) -> (i32, i32) {
    %c0_i32 = arith.constant 0 : i32
    %c0_i32_0 = arith.constant 0 : i32
    %c0_i32_1 = arith.constant 0 : i32
    return %c0_i32, %c0_i32_0 : i32, i32
  }
  func.func @transform_9(%arg0: i32) -> (i32, i32, i32) {
    %c0_i32 = arith.constant 0 : i32
    %c0_i32_0 = arith.constant 0 : i32
    %c0_i32_1 = arith.constant 0 : i32
    return %arg0, %c0_i32, %c0_i32_0 : i32, i32, i32
  }
}

module attributes {stable_mosaic.version = 11 : i64} {
  func.func @_ffn_res_ln_kernel(%arg0: i32, %arg1: memref<1x7x32xf32, #tpu.memory_space<vmem>>, %arg2: memref<32x64xf32, #tpu.memory_space<vmem>>, %arg3: memref<1x64xf32, #tpu.memory_space<vmem>>, %arg4: memref<64x32xf32, #tpu.memory_space<vmem>>, %arg5: memref<1x32xf32, #tpu.memory_space<vmem>>, %arg6: memref<1x32xf32, #tpu.memory_space<vmem>>, %arg7: memref<1x32xf32, #tpu.memory_space<vmem>>, %arg8: memref<1x7x32xf32, #tpu.memory_space<vmem>>) attributes {dimension_semantics = [#tpu.dimension_semantics<parallel>], iteration_bounds = array<i64: 2>, scalar_prefetch = 0 : i64, scratch_operands = 0 : i64, tpu.core_type = #tpu.core_type<tc>, window_params = [{transform_indices = @transform_0, window_bounds = array<i64: 1, 7, 32>}, {pipeline_mode = #tpu.pipeline_mode<synchronous>, transform_indices = @transform_1, window_bounds = array<i64: 32, 64>}, {pipeline_mode = #tpu.pipeline_mode<synchronous>, transform_indices = @transform_2, window_bounds = array<i64: 1, 64>}, {pipeline_mode = #tpu.pipeline_mode<synchronous>, transform_indices = @transform_3, window_bounds = array<i64: 64, 32>}, {pipeline_mode = #tpu.pipeline_mode<synchronous>, transform_indices = @transform_4, window_bounds = array<i64: 1, 32>}, {pipeline_mode = #tpu.pipeline_mode<synchronous>, transform_indices = @transform_5, window_bounds = array<i64: 1, 32>}, {pipeline_mode = #tpu.pipeline_mode<synchronous>, transform_indices = @transform_6, window_bounds = array<i64: 1, 32>}, {transform_indices = @transform_7, window_bounds = array<i64: 1, 7, 32>}]} {
    %c0 = arith.constant 0 : index
    %c0_0 = arith.constant 0 : index
    %c0_1 = arith.constant 0 : index
    %0 = vector.load %arg1[%c0, %c0_0, %c0_1] : memref<1x7x32xf32, #tpu.memory_space<vmem>>, vector<1x7x32xf32>
    %1 = vector.shape_cast %0 : vector<1x7x32xf32> to vector<7x32xf32>
    %c0_2 = arith.constant 0 : index
    %c0_3 = arith.constant 0 : index
    %2 = vector.load %arg2[%c0_2, %c0_3] : memref<32x64xf32, #tpu.memory_space<vmem>>, vector<32x64xf32>
    %cst = arith.constant dense<0.000000e+00> : vector<7x64xf32>
    %3 = tpu.matmul %1, %2, %cst {dimension_numbers = #tpu.dot_dimension_numbers<[1], [0], [0], [1], [0, 0, 1, 1], [], []>} : vector<7x32xf32>, vector<32x64xf32>, vector<7x64xf32> -> vector<7x64xf32>
    %c0_4 = arith.constant 0 : index
    %c0_5 = arith.constant 0 : index
    %4 = vector.load %arg3[%c0_4, %c0_5] : memref<1x64xf32, #tpu.memory_space<vmem>>, vector<1x64xf32>
    %5 = vector.broadcast %4 : vector<1x64xf32> to vector<7x64xf32>
    %6 = arith.addf %3, %5 : vector<7x64xf32>
    %cst_6 = arith.constant 0.000000e+00 : f32
    %7 = vector.broadcast %cst_6 : f32 to vector<7x64xf32>
    %8 = arith.maximumf %6, %7 : vector<7x64xf32>
    %c0_7 = arith.constant 0 : index
    %c0_8 = arith.constant 0 : index
    %9 = vector.load %arg4[%c0_7, %c0_8] : memref<64x32xf32, #tpu.memory_space<vmem>>, vector<64x32xf32>
    %cst_9 = arith.constant dense<0.000000e+00> : vector<7x32xf32>
    %10 = tpu.matmul %8, %9, %cst_9 {dimension_numbers = #tpu.dot_dimension_numbers<[1], [0], [0], [1], [0, 0, 1, 1], [], []>} : vector<7x64xf32>, vector<64x32xf32>, vector<7x32xf32> -> vector<7x32xf32>
    %c0_10 = arith.constant 0 : index
    %c0_11 = arith.constant 0 : index
    %11 = vector.load %arg5[%c0_10, %c0_11] : memref<1x32xf32, #tpu.memory_space<vmem>>, vector<1x32xf32>
    %12 = vector.broadcast %11 : vector<1x32xf32> to vector<7x32xf32>
    %13 = arith.addf %10, %12 : vector<7x32xf32>
    %14 = arith.addf %1, %13 : vector<7x32xf32>
    %c0_12 = arith.constant 0 : index
    %c0_13 = arith.constant 0 : index
    %15 = vector.load %arg6[%c0_12, %c0_13] : memref<1x32xf32, #tpu.memory_space<vmem>>, vector<1x32xf32>
    %c0_14 = arith.constant 0 : index
    %c0_15 = arith.constant 0 : index
    %16 = vector.load %arg7[%c0_14, %c0_15] : memref<1x32xf32, #tpu.memory_space<vmem>>, vector<1x32xf32>
    %cst_16 = arith.constant dense<0.000000e+00> : vector<7xf32>
    %17 = vector.multi_reduction <add>, %14, %cst_16 [1] : vector<7x32xf32> to vector<7xf32>
    %18 = vector.shape_cast %17 : vector<7xf32> to vector<7x1xf32>
    %cst_17 = arith.constant 3.200000e+01 : f32
    %19 = vector.broadcast %cst_17 : f32 to vector<7x1xf32>
    %20 = arith.divf %18, %19 : vector<7x1xf32>
    %21 = vector.broadcast %20 : vector<7x1xf32> to vector<7x32xf32>
    %22 = arith.subf %14, %21 : vector<7x32xf32>
    %23 = arith.mulf %22, %22 : vector<7x32xf32>
    %cst_18 = arith.constant dense<0.000000e+00> : vector<7xf32>
    %24 = vector.multi_reduction <add>, %23, %cst_18 [1] : vector<7x32xf32> to vector<7xf32>
    %25 = vector.shape_cast %24 : vector<7xf32> to vector<7x1xf32>
    %cst_19 = arith.constant 3.200000e+01 : f32
    %26 = vector.broadcast %cst_19 : f32 to vector<7x1xf32>
    %27 = arith.divf %25, %26 : vector<7x1xf32>
    %28 = vector.broadcast %20 : vector<7x1xf32> to vector<7x32xf32>
    %29 = arith.subf %14, %28 : vector<7x32xf32>
    %cst_20 = arith.constant 9.99999974E-6 : f32
    %30 = vector.broadcast %cst_20 : f32 to vector<7x1xf32>
    %31 = arith.addf %27, %30 : vector<7x1xf32>
    %32 = math.rsqrt %31 : vector<7x1xf32>
    %33 = vector.broadcast %32 : vector<7x1xf32> to vector<7x32xf32>
    %34 = arith.mulf %29, %33 : vector<7x32xf32>
    %35 = vector.broadcast %15 : vector<1x32xf32> to vector<7x32xf32>
    %36 = arith.mulf %34, %35 : vector<7x32xf32>
    %37 = vector.broadcast %16 : vector<1x32xf32> to vector<7x32xf32>
    %38 = arith.addf %36, %37 : vector<7x32xf32>
    %c0_21 = arith.constant 0 : index
    %c0_22 = arith.constant 0 : index
    %c0_23 = arith.constant 0 : index
    %39 = vector.load %arg8[%c0_21, %c0_22, %c0_23] : memref<1x7x32xf32, #tpu.memory_space<vmem>>, vector<1x7x32xf32>
    %40 = vector.shape_cast %39 : vector<1x7x32xf32> to vector<7x32xf32>
    %41 = vector.shape_cast %38 : vector<7x32xf32> to vector<1x7x32xf32>
    tpu.vector_store %arg8[%c0_21, %c0_22, %c0_23], %41 {strides = array<i32>} : memref<1x7x32xf32, #tpu.memory_space<vmem>>, vector<1x7x32xf32>,
    return
  }
  func.func @transform_0(%arg0: i32) -> (i32, i32, i32) {
    %c0_i32 = arith.constant 0 : i32
    %c0_i32_0 = arith.constant 0 : i32
    %c0_i32_1 = arith.constant 0 : i32
    return %arg0, %c0_i32, %c0_i32_0 : i32, i32, i32
  }
  func.func @transform_1(%arg0: i32) -> (i32, i32) {
    %c0_i32 = arith.constant 0 : i32
    %c0_i32_0 = arith.constant 0 : i32
    %c0_i32_1 = arith.constant 0 : i32
    return %c0_i32, %c0_i32_0 : i32, i32
  }
  func.func @transform_2(%arg0: i32) -> (i32, i32) {
    %c0_i32 = arith.constant 0 : i32
    %c0_i32_0 = arith.constant 0 : i32
    %c0_i32_1 = arith.constant 0 : i32
    return %c0_i32, %c0_i32_0 : i32, i32
  }
  func.func @transform_3(%arg0: i32) -> (i32, i32) {
    %c0_i32 = arith.constant 0 : i32
    %c0_i32_0 = arith.constant 0 : i32
    %c0_i32_1 = arith.constant 0 : i32
    return %c0_i32, %c0_i32_0 : i32, i32
  }
  func.func @transform_4(%arg0: i32) -> (i32, i32) {
    %c0_i32 = arith.constant 0 : i32
    %c0_i32_0 = arith.constant 0 : i32
    %c0_i32_1 = arith.constant 0 : i32
    return %c0_i32, %c0_i32_0 : i32, i32
  }
  func.func @transform_5(%arg0: i32) -> (i32, i32) {
    %c0_i32 = arith.constant 0 : i32
    %c0_i32_0 = arith.constant 0 : i32
    %c0_i32_1 = arith.constant 0 : i32
    return %c0_i32, %c0_i32_0 : i32, i32
  }
  func.func @transform_6(%arg0: i32) -> (i32, i32) {
    %c0_i32 = arith.constant 0 : i32
    %c0_i32_0 = arith.constant 0 : i32
    %c0_i32_1 = arith.constant 0 : i32
    return %c0_i32, %c0_i32_0 : i32, i32
  }
  func.func @transform_7(%arg0: i32) -> (i32, i32, i32) {
    %c0_i32 = arith.constant 0 : i32
    %c0_i32_0 = arith.constant 0 : i32
    %c0_i32_1 = arith.constant 0 : i32
    return %arg0, %c0_i32, %c0_i32_0 : i32, i32, i32
  }
}

module attributes {stable_mosaic.version = 11 : i64} {
  func.func @_proj_ce_kernel(%arg0: i32, %arg1: memref<14x64xf32, #tpu.memory_space<vmem>>, %arg2: memref<64x64xf32, #tpu.memory_space<vmem>>, %arg3: memref<1x64xf32, #tpu.memory_space<vmem>>, %arg4: memref<14x1xi32, #tpu.memory_space<vmem>>, %arg5: memref<1x1xf32, #tpu.memory_space<vmem>>) attributes {dimension_semantics = [#tpu.dimension_semantics<arbitrary>], iteration_bounds = array<i64: 1>, scalar_prefetch = 0 : i64, scratch_operands = 0 : i64, tpu.core_type = #tpu.core_type<tc>, window_params = [{pipeline_mode = #tpu.pipeline_mode<synchronous>, transform_indices = @transform_0, window_bounds = array<i64: 14, 64>}, {pipeline_mode = #tpu.pipeline_mode<synchronous>, transform_indices = @transform_1, window_bounds = array<i64: 64, 64>}, {pipeline_mode = #tpu.pipeline_mode<synchronous>, transform_indices = @transform_2, window_bounds = array<i64: 1, 64>}, {pipeline_mode = #tpu.pipeline_mode<synchronous>, transform_indices = @transform_3, window_bounds = array<i64: 14, 1>}, {pipeline_mode = #tpu.pipeline_mode<synchronous>, transform_indices = @transform_4, window_bounds = array<i64: 1, 1>}]} {
    %c0 = arith.constant 0 : index
    %c0_0 = arith.constant 0 : index
    %0 = vector.load %arg1[%c0, %c0_0] : memref<14x64xf32, #tpu.memory_space<vmem>>, vector<14x64xf32>
    %c0_1 = arith.constant 0 : index
    %c0_2 = arith.constant 0 : index
    %1 = vector.load %arg2[%c0_1, %c0_2] : memref<64x64xf32, #tpu.memory_space<vmem>>, vector<64x64xf32>
    %cst = arith.constant dense<0.000000e+00> : vector<14x64xf32>
    %2 = tpu.matmul %0, %1, %cst {dimension_numbers = #tpu.dot_dimension_numbers<[1], [0], [0], [1], [0, 0, 1, 1], [], []>} : vector<14x64xf32>, vector<64x64xf32>, vector<14x64xf32> -> vector<14x64xf32>
    %c0_3 = arith.constant 0 : index
    %c0_4 = arith.constant 0 : index
    %3 = vector.load %arg3[%c0_3, %c0_4] : memref<1x64xf32, #tpu.memory_space<vmem>>, vector<1x64xf32>
    %4 = vector.broadcast %3 : vector<1x64xf32> to vector<14x64xf32>
    %5 = arith.addf %2, %4 : vector<14x64xf32>
    %c0_5 = arith.constant 0 : index
    %c0_6 = arith.constant 0 : index
    %6 = vector.load %arg4[%c0_5, %c0_6] : memref<14x1xi32, #tpu.memory_space<vmem>>, vector<14x1xi32>
    %cst_7 = arith.constant dense<0xFF800000> : vector<14xf32>
    %7 = vector.multi_reduction <maximumf>, %5, %cst_7 [1] : vector<14x64xf32> to vector<14xf32>
    %8 = vector.shape_cast %7 : vector<14xf32> to vector<14x1xf32>
    %9 = vector.broadcast %8 : vector<14x1xf32> to vector<14x64xf32>
    %10 = arith.subf %5, %9 : vector<14x64xf32>
    %11 = math.exp %10 : vector<14x64xf32>
    %cst_8 = arith.constant dense<0.000000e+00> : vector<14xf32>
    %12 = vector.multi_reduction <add>, %11, %cst_8 [1] : vector<14x64xf32> to vector<14xf32>
    %13 = vector.shape_cast %12 : vector<14xf32> to vector<14x1xf32>
    %14 = math.log %13 : vector<14x1xf32>
    %15 = arith.addf %14, %8 : vector<14x1xf32>
    %16 = tpu.iota {dimensions = array<i32: 1>} : vector<14x64xi32>
    %17 = vector.broadcast %6 : vector<14x1xi32> to vector<14x64xi32>
    %18 = arith.cmpi eq, %16, %17 : vector<14x64xi32>
    %cst_9 = arith.constant 0.000000e+00 : f32
    %19 = vector.broadcast %cst_9 : f32 to vector<14x64xf32>
    %20 = arith.select %18, %5, %19 : vector<14x64xi1>, vector<14x64xf32>
    %cst_10 = arith.constant dense<0.000000e+00> : vector<14xf32>
    %21 = vector.multi_reduction <add>, %20, %cst_10 [1] : vector<14x64xf32> to vector<14xf32>
    %22 = vector.shape_cast %21 : vector<14xf32> to vector<14x1xf32>
    %c0_i32 = arith.constant 0 : i32
    %23 = vector.broadcast %c0_i32 : i32 to vector<14x1xi32>
    %24 = arith.cmpi eq, %6, %23 : vector<14x1xi32>
    %25 = arith.subf %15, %22 : vector<14x1xf32>
    %cst_11 = arith.constant 0.000000e+00 : f32
    %26 = vector.broadcast %cst_11 : f32 to vector<14x1xf32>
    %27 = arith.select %24, %26, %25 : vector<14x1xi1>, vector<14x1xf32>
    %c0_i32_12 = arith.constant 0 : i32
    %28 = vector.broadcast %c0_i32_12 : i32 to vector<14x1xi32>
    %29 = arith.cmpi ne, %6, %28 : vector<14x1xi32>
    %30 = arith.extui %29 : vector<14x1xi1> to vector<14x1xi32>
    %31 = arith.sitofp %30 : vector<14x1xi32> to vector<14x1xf32>
    %32 = vector.shape_cast %31 : vector<14x1xf32> to vector<1x14x1xf32>
    %cst_13 = arith.constant dense<0.000000e+00> : vector<1xf32>
    %33 = vector.multi_reduction <add>, %32, %cst_13 [1, 2] : vector<1x14x1xf32> to vector<1xf32>
    %34 = vector.shape_cast %33 : vector<1xf32> to vector<1x1x1xf32>
    %35 = vector.extract %34[0, 0, 0] : f32 from vector<1x1x1xf32>
    %36 = vector.broadcast %35 : f32 to vector<1x1xf32>
    %37 = vector.shape_cast %27 : vector<14x1xf32> to vector<1x14x1xf32>
    %cst_14 = arith.constant dense<0.000000e+00> : vector<1xf32>
    %38 = vector.multi_reduction <add>, %37, %cst_14 [1, 2] : vector<1x14x1xf32> to vector<1xf32>
    %39 = vector.shape_cast %38 : vector<1xf32> to vector<1x1x1xf32>
    %40 = vector.extract %39[0, 0, 0] : f32 from vector<1x1x1xf32>
    %41 = vector.broadcast %40 : f32 to vector<1x1xf32>
    %cst_15 = arith.constant 1.000000e+00 : f32
    %42 = vector.broadcast %cst_15 : f32 to vector<1x1xf32>
    %43 = arith.maximumf %36, %42 : vector<1x1xf32>
    %44 = arith.divf %41, %43 : vector<1x1xf32>
    %c0_16 = arith.constant 0 : index
    %c0_17 = arith.constant 0 : index
    %45 = vector.load %arg5[%c0_16, %c0_17] : memref<1x1xf32, #tpu.memory_space<vmem>>, vector<1x1xf32>
    tpu.vector_store %arg5[%c0_16, %c0_17], %44 {strides = array<i32>} : memref<1x1xf32, #tpu.memory_space<vmem>>, vector<1x1xf32>,
    return
  }
  func.func @transform_0(%arg0: i32) -> (i32, i32) {
    %c0_i32 = arith.constant 0 : i32
    %c0_i32_0 = arith.constant 0 : i32
    %c0_i32_1 = arith.constant 0 : i32
    return %c0_i32, %c0_i32_0 : i32, i32
  }
  func.func @transform_1(%arg0: i32) -> (i32, i32) {
    %c0_i32 = arith.constant 0 : i32
    %c0_i32_0 = arith.constant 0 : i32
    %c0_i32_1 = arith.constant 0 : i32
    return %c0_i32, %c0_i32_0 : i32, i32
  }
  func.func @transform_2(%arg0: i32) -> (i32, i32) {
    %c0_i32 = arith.constant 0 : i32
    %c0_i32_0 = arith.constant 0 : i32
    %c0_i32_1 = arith.constant 0 : i32
    return %c0_i32, %c0_i32_0 : i32, i32
  }
  func.func @transform_3(%arg0: i32) -> (i32, i32) {
    %c0_i32 = arith.constant 0 : i32
    %c0_i32_0 = arith.constant 0 : i32
    %c0_i32_1 = arith.constant 0 : i32
    return %c0_i32, %c0_i32_0 : i32, i32
  }
  func.func @transform_4(%arg0: i32) -> (i32, i32) {
    %c0_i32 = arith.constant 0 : i32
    %c0_i32_0 = arith.constant 0 : i32
    %c0_i32_1 = arith.constant 0 : i32
    return %c0_i32, %c0_i32_0 : i32, i32
  }
}

module attributes {stable_mosaic.version = 11 : i64} {
  func.func @_pool_ce_kernel(%arg0: i32, %arg1: memref<2x8x32xf32, #tpu.memory_space<vmem>>, %arg2: memref<32x4xf32, #tpu.memory_space<vmem>>, %arg3: memref<1x4xf32, #tpu.memory_space<vmem>>, %arg4: memref<2x1xi32, #tpu.memory_space<vmem>>, %arg5: memref<1x1xf32, #tpu.memory_space<vmem>>) attributes {dimension_semantics = [#tpu.dimension_semantics<arbitrary>], iteration_bounds = array<i64: 1>, scalar_prefetch = 0 : i64, scratch_operands = 0 : i64, tpu.core_type = #tpu.core_type<tc>, window_params = [{pipeline_mode = #tpu.pipeline_mode<synchronous>, transform_indices = @transform_0, window_bounds = array<i64: 2, 8, 32>}, {pipeline_mode = #tpu.pipeline_mode<synchronous>, transform_indices = @transform_1, window_bounds = array<i64: 32, 4>}, {pipeline_mode = #tpu.pipeline_mode<synchronous>, transform_indices = @transform_2, window_bounds = array<i64: 1, 4>}, {pipeline_mode = #tpu.pipeline_mode<synchronous>, transform_indices = @transform_3, window_bounds = array<i64: 2, 1>}, {pipeline_mode = #tpu.pipeline_mode<synchronous>, transform_indices = @transform_4, window_bounds = array<i64: 1, 1>}]} {
    %c0 = arith.constant 0 : index
    %c0_0 = arith.constant 0 : index
    %c0_1 = arith.constant 0 : index
    %0 = vector.load %arg1[%c0, %c0_0, %c0_1] : memref<2x8x32xf32, #tpu.memory_space<vmem>>, vector<2x8x32xf32>
    %cst = arith.constant dense<0.000000e+00> : vector<2x32xf32>
    %1 = vector.multi_reduction <add>, %0, %cst [1] : vector<2x8x32xf32> to vector<2x32xf32>
    %cst_2 = arith.constant 8.000000e+00 : f32
    %2 = vector.broadcast %cst_2 : f32 to vector<2x32xf32>
    %3 = arith.divf %1, %2 : vector<2x32xf32>
    %c0_3 = arith.constant 0 : index
    %c0_4 = arith.constant 0 : index
    %4 = vector.load %arg2[%c0_3, %c0_4] : memref<32x4xf32, #tpu.memory_space<vmem>>, vector<32x4xf32>
    %cst_5 = arith.constant dense<0.000000e+00> : vector<2x4xf32>
    %5 = tpu.matmul %3, %4, %cst_5 {dimension_numbers = #tpu.dot_dimension_numbers<[1], [0], [0], [1], [0, 0, 1, 1], [], []>} : vector<2x32xf32>, vector<32x4xf32>, vector<2x4xf32> -> vector<2x4xf32>
    %c0_6 = arith.constant 0 : index
    %c0_7 = arith.constant 0 : index
    %6 = vector.load %arg3[%c0_6, %c0_7] : memref<1x4xf32, #tpu.memory_space<vmem>>, vector<1x4xf32>
    %7 = vector.broadcast %6 : vector<1x4xf32> to vector<2x4xf32>
    %8 = arith.addf %5, %7 : vector<2x4xf32>
    %c0_8 = arith.constant 0 : index
    %c0_9 = arith.constant 0 : index
    %9 = vector.load %arg4[%c0_8, %c0_9] : memref<2x1xi32, #tpu.memory_space<vmem>>, vector<2x1xi32>
    %cst_10 = arith.constant dense<0xFF800000> : vector<2xf32>
    %10 = vector.multi_reduction <maximumf>, %8, %cst_10 [1] : vector<2x4xf32> to vector<2xf32>
    %11 = vector.shape_cast %10 : vector<2xf32> to vector<2x1xf32>
    %12 = vector.broadcast %11 : vector<2x1xf32> to vector<2x4xf32>
    %13 = arith.subf %8, %12 : vector<2x4xf32>
    %14 = math.exp %13 : vector<2x4xf32>
    %cst_11 = arith.constant dense<0.000000e+00> : vector<2xf32>
    %15 = vector.multi_reduction <add>, %14, %cst_11 [1] : vector<2x4xf32> to vector<2xf32>
    %16 = vector.shape_cast %15 : vector<2xf32> to vector<2x1xf32>
    %17 = math.log %16 : vector<2x1xf32>
    %18 = arith.addf %17, %11 : vector<2x1xf32>
    %19 = tpu.iota {dimensions = array<i32: 1>} : vector<2x4xi32>
    %20 = vector.broadcast %9 : vector<2x1xi32> to vector<2x4xi32>
    %21 = arith.cmpi eq, %19, %20 : vector<2x4xi32>
    %cst_12 = arith.constant 0.000000e+00 : f32
    %22 = vector.broadcast %cst_12 : f32 to vector<2x4xf32>
    %23 = arith.select %21, %8, %22 : vector<2x4xi1>, vector<2x4xf32>
    %cst_13 = arith.constant dense<0.000000e+00> : vector<2xf32>
    %24 = vector.multi_reduction <add>, %23, %cst_13 [1] : vector<2x4xf32> to vector<2xf32>
    %25 = vector.shape_cast %24 : vector<2xf32> to vector<2x1xf32>
    %26 = arith.subf %18, %25 : vector<2x1xf32>
    %27 = vector.shape_cast %26 : vector<2x1xf32> to vector<1x2x1xf32>
    %cst_14 = arith.constant dense<0.000000e+00> : vector<1xf32>
    %28 = vector.multi_reduction <add>, %27, %cst_14 [1, 2] : vector<1x2x1xf32> to vector<1xf32>
    %29 = vector.shape_cast %28 : vector<1xf32> to vector<1x1x1xf32>
    %30 = vector.extract %29[0, 0, 0] : f32 from vector<1x1x1xf32>
    %31 = vector.broadcast %30 : f32 to vector<1x1xf32>
    %cst_15 = arith.constant 2.000000e+00 : f32
    %32 = vector.broadcast %cst_15 : f32 to vector<1x1xf32>
    %33 = arith.divf %31, %32 : vector<1x1xf32>
    %c0_16 = arith.constant 0 : index
    %c0_17 = arith.constant 0 : index
    %34 = vector.load %arg5[%c0_16, %c0_17] : memref<1x1xf32, #tpu.memory_space<vmem>>, vector<1x1xf32>
    tpu.vector_store %arg5[%c0_16, %c0_17], %33 {strides = array<i32>} : memref<1x1xf32, #tpu.memory_space<vmem>>, vector<1x1xf32>,
    return
  }
  func.func @transform_0(%arg0: i32) -> (i32, i32, i32) {
    %c0_i32 = arith.constant 0 : i32
    %c0_i32_0 = arith.constant 0 : i32
    %c0_i32_1 = arith.constant 0 : i32
    %c0_i32_2 = arith.constant 0 : i32
    return %c0_i32, %c0_i32_0, %c0_i32_1 : i32, i32, i32
  }
  func.func @transform_1(%arg0: i32) -> (i32, i32) {
    %c0_i32 = arith.constant 0 : i32
    %c0_i32_0 = arith.constant 0 : i32
    %c0_i32_1 = arith.constant 0 : i32
    return %c0_i32, %c0_i32_0 : i32, i32
  }
  func.func @transform_2(%arg0: i32) -> (i32, i32) {
    %c0_i32 = arith.constant 0 : i32
    %c0_i32_0 = arith.constant 0 : i32
    %c0_i32_1 = arith.constant 0 : i32
    return %c0_i32, %c0_i32_0 : i32, i32
  }
  func.func @transform_3(%arg0: i32) -> (i32, i32) {
    %c0_i32 = arith.constant 0 : i32
    %c0_i32_0 = arith.constant 0 : i32
    %c0_i32_1 = arith.constant 0 : i32
    return %c0_i32, %c0_i32_0 : i32, i32
  }
  func.func @transform_4(%arg0: i32) -> (i32, i32) {
    %c0_i32 = arith.constant 0 : i32
    %c0_i32_0 = arith.constant 0 : i32
    %c0_i32_1 = arith.constant 0 : i32
    return %c0_i32, %c0_i32_0 : i32, i32
  }
}

</mosaic_0001>

<bundles_post_ra>
// kernel: model_forward.24
= control target key start
LH: loop header
LB: loop body
LE: loop exit
PB: predicated region body
PF: predicated region fallthrough
CT: control target
= control target key end

     0   :  { %s1555_s29 = smov 0   ;;  %s1701_s0 = inlined_call_operand.vmem [shape: f32[2,4,32], index: 0, kind: input, shape index: {}, may-alias: {0,1}]   ;;  %s1702_s1 = inlined_call_operand.vmem [shape: f32[2,4,32], index: 1, kind: input, shape index: {}, may-alias: {0,1}]   ;;  %s1703_s2 = inlined_call_operand.vmem [shape: f32[32,96], index: 2, kind: input, shape index: {}]   ;;  %s1704_s3 = inlined_call_operand.vmem [shape: f32[1,96], index: 3, kind: input, shape index: {}]   ;;  %s1705_s4 = inlined_call_operand.vmem [shape: f32[32,32], index: 4, kind: input, shape index: {}]   ;;  %s1706_s5 = inlined_call_operand.vmem [shape: f32[1,32], index: 5, kind: input, shape index: {}]   ;;  %s1707_s6 = inlined_call_operand.vmem [shape: f32[1,32], index: 6, kind: input, shape index: {}]   ;;  %s1708_s7 = inlined_call_operand.vmem [shape: f32[1,32], index: 7, kind: input, shape index: {}]   ;;  %s1709_s8 = inlined_call_operand.vmem [shape: f32[4,4], index: 8, kind: input, shape index: {}]   ;;  %s1710_s9 = inlined_call_operand.vmem [shape: f32[2,4,32], index: 9, kind: output, shape index: {}]  }
   0x1 LB: > { %s1306_s30 = sadd.s32 4294967295, %s1486_s29   ;;  %p1310_p0 = scmp.ge.s32.totalorder %s1486_s29, 1  ;;  %s1486_s29 = sphi %s1555_s29, %s19_s29  }
   0x2   : > { %p295_p1 = scmp.lt.s32.totalorder %s1486_s29, 3 }
   0x4   : > { %p296_p2 = pnand %p1310_p0, %p295_p1 }
   0x5   : > { %v346_v0 = vld [vmem:[%s1703_s2] sm:$0xff] (!%p296_p2)  ;;  %v347_v1 = vld [vmem:[%s1703_s2 + $0x8] sm:$0xff] (!%p296_p2)  ;;  %v348_v2 = vld [vmem:[%s1703_s2 + $0x10] sm:$0xff] (!%p296_p2)  ;;  %v1488_v3 = vmov (!%p296_p2), 0.0|0.0   ;;  %vm1489_vm0 = vmmov (!%p296_p2), 0   ;;  %v1490_v6 = vmov (!%p296_p2), 0.0  }
   0x6   : > { %299 = sbr.rel (%p296_p2) target bundleno = 2319 (0x90f), region = 56  ;;  %1425 = vmatprep.subr.bf16.mxu0 (!%p296_p2), %v1488_v3  ;;  %v1426_v4 = vpack.c.bf16 (!%p296_p2), %v347_v1, %v346_v0  ;;  %v349_v5 = vld [vmem:[%s1703_s2 + $0x18] sm:$0xff] (!%p296_p2)  ;;  %1371 = vmatprep.mubr.msk.f32.mxu0 (!%p296_p2), %vm1489_vm0, %v1490_v6  ;;  %p333_p3 = scmp.lt.s32.totalorder (!%p296_p2), %s1306_s30, 1  ;;  %vm357_vm1 = vcmask (!%p296_p2), 261120   ;;  %v1313_v9 = vld [vmem:[%s1704_s3] ss:$0 sm:$0xff] (!%p296_p2) }
   0x7   : > { %1374 = vmatprep.subr.mxu1 (!%p296_p2), %v1490_v6  ;;  %1376 = vmatprep.mubr.msk.f32.mxu1 (!%p296_p2), %vm1489_vm0, %v1490_v6  ;;  %v1429_v7 = vpack.c.bf16 (!%p296_p2), %v349_v5, %v348_v2  ;;  %s1491_s24 = smov (!%p296_p2), 64   ;;  %s1492_s25 = smov (!%p296_p2), 96   ;;  %vm435_vm2 = vcmask (!%p296_p2), 64512   ;;  %vm530_vm3 = vcmask (!%p296_p2), 1043456   ;;  %v431_v19 = vld [vmem:[%s1709_s8] sm:$0xf] (!%p296_p2) }
   0x8   : > { %1427 = vmatpush3.bf16.msra.mxu0 (!%p296_p2), %v1426_v4  ;;  %s1493_s26 = smov (!%p296_p2), 88   ;;  %s1494_s1 = smov (!%p296_p2), 120   ;;  %vm512_vm4 = vcmask (!%p296_p2), 27648   ;;  %vm526_vm5 = vcmask (!%p296_p2), 31744   ;;  %vm1120_vm6 = vcmask (!%p296_p2), 130048   ;;  %vm1122_vm7 = vcmask (!%p296_p2), 195584  }
   0x9   : > { %1428 = vmatprep.subr.bf16.mxu0 (!%p296_p2), %v1488_v3  ;;  %s1495_s27 = smov (!%p296_p2), 80   ;;  %s1496_s11 = smov (!%p296_p2), 72   ;;  %vm1211_vm8 = vcmask (!%p296_p2), 257024  }
   0xa   : > { %s1497_s12 = smov (!%p296_p2), 112   ;;  %s1498_s13 = smov (!%p296_p2), 104  }
   0xb   : > { %s1499_s14 = smov (!%p296_p2), 56   ;;  %s1500_s15 = smov (!%p296_p2), 48  }
   0xc   : > { %1430 = vmatpush3.bf16.msra.mxu0 (!%p296_p2), %v1429_v7  ;;  %s1501_s16 = smov (!%p296_p2), 40  }
   0xd   : > { %s1712_s30 = smov (!%p333_p3, %s1306_s30), 1  ;;  %1394 = vmatprep.subr.mxu0 %v1490_v6 }
   0xe   : > { %s1311_s18 = sshll.u32 %s1712_s30, 2 }
   0xf   : > { %s336_s21 = scalar_lea.vmem %s1701_s0, %s1311_s18  ;;  %s344_s17 = scalar_lea.vmem %s1710_s9, %s1311_s18 }
  0x10   : > { %v1590_v8 = vld [vmem:[%s336_s21] sm:$0xf] }
  0x11   : > { %1372 = vmatmul.mubr.msk.f32.vlgmr.msra.gmra.mrb[0].mxu0 %vm357_vm1, %v1590_v8 }
  0x12   : > { %1396 = vmatprep.mubr.msk.f32.mxu0 %vm1489_vm0, %v1490_v6 }
  0xe4   : > { %v427_v10 = vpop.f32.mrb[0].mxu0 }
  0xe5   : > { %v1600_v11 = vadd.f32 %v1313_v9, %v427_v10  ;;  %v1373_v12 = vpop.f32.mrb[1].mxu0 }
  0xe7   : > { %524 = vrot.lane.b32.xlu1 %v1600_v11, %s1491_s24  ;;  %433 = vrot.lane.b32.xlu0 %v1600_v11, %s1492_s25 }
  0xeb   : > { %605 = vrot.lane.b32.xlu1 %v1600_v11, %s1493_s26  ;;  %s1502_s26 = smov 8  }
  0xef   : > { %603 = vrot.lane.b32.xlu1 %v1600_v11, %s1494_s1  ;;  %s1503_s1 = smov 16  }
  0xf3   : > { %773 = vrot.lane.b32.xlu1 %v1600_v11, %s1495_s27  ;;  %s1504_s27 = smov 24  }
 0x159   : > { %v525_v13 = vpop.permute.xlu1 %524  ;;  %v434_v14 = vpop.permute.xlu0 %433 }
 0x15a   : > { %1375 = vmatpush3.xpose.msk.msra.mxu1 %vm435_vm2, %v434_v14 }
 0x15b   : > { %1379 = vmatprep.subr.mxu1 %v1490_v6 }
 0x15d   : > { %v606_v15 = vpop.permute.xlu1 %605  ;;  %1377 = vmatmul.mubr.msk.f32.vlgmr.msra.gmra.mrb[0].mxu1 %vm435_vm2, %v1600_v11 }
 0x15e   : > { %1380 = vmatpush3.msk.msra.mxu1 %vm530_vm3, %v525_v13  ;;  %1381 = vmatprep.mubr.msk.f32.mxu1 %vm1489_vm0, %v1490_v6 }
 0x15f   : > { %1384 = vmatprep.subr.mxu1 %v1490_v6 }
 0x161   : > { %v604_v16 = vpop.permute.xlu1 %603 }
 0x165   : > { %v774_v17 = vpop.permute.xlu1 %773 }
 0x166   : > { %1395 = vmatpush3.xpose.msk.msra.mxu0 %vm435_vm2, %v774_v17 }
 0x167   : > { %1404 = vmatprep.subr.mxu0 %v1490_v6 }
 0x230   : > { %v506_v18 = vpop.f32.mrb[0].mxu1 }
 0x231   : > { %v510_v20 = vmul.f32 0.35355338, %v506_v18  ;;  %v1378_v21 = vpop.f32.mrb[1].mxu1  ;;  %v1124_v18 = vld [vmem:[%s1705_s4] sm:$0xff] }
 0x232   : > { %v1126_v21 = vld [vmem:[%s1705_s4 + $0x10] sm:$0xff] }
 0x233   : > { %v511_v22 = vadd.f32 %v510_v20, %v431_v19 }
 0x235   : > { %v513_v23 = vsel %vm512_vm4, %v511_v22, -inf }
 0x236   : > { %514 = vmax.xlane.f32.xlu0 %v513_v23 }
 0x24c   : > { %941 = vrot.lane.b32.xlu0 %v1600_v11, %s1496_s11 }
 0x2c3   : > { %v515_v24 = vpop.xlane.xlu0 %514 }
 0x2c4   : > { %v516_v25 = vsub.f32 %v511_v22, %v515_v24 }
 0x2c6   : > { %v517_v26 = vmul.f32 1.442695, %v516_v25 }
 0x2c7   : > { %v942_v31 = vpop.permute.xlu0 %941 }
 0x2c8   : > { %1462 = vpow2.f32 %v517_v26 }
 0x2d2   : > { %v1463_v27 = vpop.eup %1462 }
 0x2d3   : > { %v519_v28 = vsel %vm512_vm4, %v1463_v27, 0.0 }
 0x2d4   : > { %520 = vadd.xlane.f32.xlu1 %v519_v28 }
 0x2e5   : > { %771 = vrot.lane.b32.xlu1 %v1600_v11, %s1497_s12 }
 0x2e9   : > { %939 = vrot.lane.b32.xlu1 %v1600_v11, %s1498_s13 }
 0x361   : > { %v521_v29 = vpop.xlane.xlu1 %520 }
 0x362   : > { %1464 = vrcp.f32 %v521_v29 }
 0x365   : > { %v772_v30 = vpop.permute.xlu1 %771 }
 0x366   : > { %1397 = vmatmul.mubr.msk.f32.vlgmr.msra.gmra.mrb[2].mxu0 %vm435_vm2, %v772_v30 }
 0x367   : > { %1405 = vmatpush3.xpose.msk.msra.mxu0 %vm435_vm2, %v942_v31  ;;  %1406 = vmatprep.mubr.msk.f32.mxu0 %vm1489_vm0, %v1490_v6 }
 0x368   : > { %1431 = vmatprep.subr.bf16.mxu0 %v1488_v3 }
 0x369   : > { %v940_v32 = vpop.permute.xlu1 %939 }
 0x36a   : > { %1407 = vmatmul.mubr.msk.f32.vlgmr.msra.gmra.mrb[4].mxu0 %vm435_vm2, %v940_v32 }
 0x36b   : > { %1422 = vmatprep.mubr.msk.f32.mxu0 %vm1489_vm0, %v1490_v6 }
 0x36c   : > { %v1465_v33 = vpop.eup %1464 }
 0x36d   : > { %v523_v34 = vmul.f32 %v1465_v33, %v1463_v27 }
 0x36f   : > { %1382 = vmatmul.mubr.msk.f32.vlgmr.msra.gmra.mrb[2].mxu1 %vm526_vm5, %v523_v34  ;;  %v1331_v34 = vld [vmem:[%s1706_s5] ss:$0 sm:$0xff] }
 0x370   : > { %1385 = vmatpush3.xpose.msk.msra.mxu1 %vm435_vm2, %v606_v15  ;;  %1386 = vmatprep.mubr.msk.f32.mxu1 %vm1489_vm0, %v1490_v6 }
 0x371   : > { %1389 = vmatprep.subr.mxu1 %v1490_v6 }
 0x373   : > { %1387 = vmatmul.mubr.msk.f32.vlgmr.msra.gmra.mrb[4].mxu1 %vm435_vm2, %v604_v16 }
 0x374   : > { %1391 = vmatprep.mubr.msk.f32.mxu1 %vm1489_vm0, %v1490_v6 }
 0x439   : > { %v845_v35 = vpop.f32.mrb[2].mxu0 }
 0x43a   : > { %v849_v36 = vmul.f32 0.35355338, %v845_v35  ;;  %v1398_v37 = vpop.f32.mrb[3].mxu0 }
 0x43c   : > { %v850_v38 = vadd.f32 %v849_v36, %v431_v19 }
 0x43d   : > { %v1013_v39 = vpop.f32.mrb[4].mxu0 }
 0x43e   : > { %v1408_v40 = vpop.f32.mrb[5].mxu0  ;;  %v851_v41 = vsel %vm512_vm4, %v850_v38, -inf  ;;  %v1017_v45 = vmul.f32 0.35355338, %v1013_v39 }
 0x43f   : > { %852 = vmax.xlane.f32.xlu0 %v851_v41 }
 0x440   : > { %v1018_v50 = vadd.f32 %v1017_v45, %v431_v19 }
 0x442   : > { %v1642_v42 = vpop.f32.mrb[2].mxu1  ;;  %v1019_v51 = vsel %vm512_vm4, %v1018_v50, -inf }
 0x443   : > { %v1383_v43 = vpop.f32.mrb[3].mxu1 }
 0x446   : > { %v677_v44 = vpop.f32.mrb[4].mxu1 }
 0x447   : > { %v681_v46 = vmul.f32 0.35355338, %v677_v44  ;;  %v1388_v47 = vpop.f32.mrb[5].mxu1 }
 0x449   : > { %v682_v48 = vadd.f32 %v681_v46, %v431_v19  ;;  %v1125_v19 = vld [vmem:[%s1705_s4 + $0x8] sm:$0xff] }
 0x44a   : > { %v1432_v20 = vpack.c.bf16 %v1125_v19, %v1124_v18 }
 0x44b   : > { %v683_v49 = vsel %vm512_vm4, %v682_v48, -inf }
 0x44c   : > { %684 = vmax.xlane.f32.xlu1 %v683_v49  ;;  %1433 = vmatpush3.bf16.msra.mxu0 %v1432_v20 }
 0x44d   : > { %1434 = vmatprep.subr.bf16.mxu0 %v1488_v3 }
 0x450   : > { %1020 = vmax.xlane.f32.xlu1 %v1019_v51 }
 0x4cc   : > { %v853_v52 = vpop.xlane.xlu0 %852 }
 0x4cd   : > { %v854_v53 = vsub.f32 %v850_v38, %v853_v52 }
 0x4cf   : > { %v855_v54 = vmul.f32 1.442695, %v854_v53 }
 0x4d1   : > { %1466 = vpow2.f32 %v855_v54 }
 0x4d9   : > { %v685_v55 = vpop.xlane.xlu1 %684 }
 0x4da   : > { %v686_v63 = vsub.f32 %v682_v48, %v685_v55 }
 0x4db   : > { %v1467_v56 = vpop.eup %1466 }
 0x4dc   : > { %v857_v57 = vsel %vm512_vm4, %v1467_v56, 0.0  ;;  %v687_v0 = vmul.f32 1.442695, %v686_v63 }
 0x4dd   : > { %858 = vadd.xlane.f32.xlu1 %v857_v57  ;;  %v1021_v58 = vpop.xlane.xlu1 %1020 }
 0x4de   : > { %v1022_v59 = vsub.f32 %v1018_v50, %v1021_v58  ;;  %v1334_v50 = vld [vmem:[%s1708_s7] ss:$0 sm:$0xff] }
 0x4e0   : > { %v1023_v60 = vmul.f32 1.442695, %v1022_v59 }
 0x4e2   : > { %1468 = vpow2.f32 %v1023_v60 }
 0x4e3   : > { %1470 = vpow2.f32 %v687_v0 }
 0x4ec   : > { %v1469_v61 = vpop.eup %1468 }
 0x4ed   : > { %v1025_v62 = vsel %vm512_vm4, %v1469_v61, 0.0  ;;  %v1471_v1 = vpop.eup %1470 }
 0x4ee   : > { %694 = vrot.lane.b32.xlu1 %v1600_v11, %s1499_s14  ;;  %1026 = vadd.xlane.f32.xlu0 %v1025_v62  ;;  %v689_v2 = vsel %vm512_vm4, %v1471_v1, 0.0 }
 0x504   : > { %862 = vrot.lane.b32.xlu0 %v1600_v11, %s1500_s15 }
 0x512   : > { %690 = vadd.xlane.f32.xlu1 %v689_v2 }
 0x523   : > { %1030 = vrot.lane.b32.xlu1 %v1600_v11, %s1501_s16 }
 0x56a   : > { %v859_v4 = vpop.xlane.xlu1 %858 }
 0x56e   : > { %v695_v5 = vpop.permute.xlu1 %694 }
 0x56f   : > { %1390 = vmatpush3.msk.msra.mxu1 %vm530_vm3, %v695_v5 }
 0x570   : > { %1399 = vmatprep.subr.mxu1 %v1490_v6 }
 0x57b   : > { %v1027_v9 = vpop.xlane.xlu0 %1026 }
 0x57f   : > { %v863_v14 = vpop.permute.xlu0 %862 }
 0x59f   : > { %v691_v7 = vpop.xlane.xlu1 %690 }
 0x5a0   : > { %1472 = vrcp.f32 %v691_v7 }
 0x5a1   : > { %1474 = vrcp.f32 %v859_v4 }
 0x5a2   : > { %1476 = vrcp.f32 %v1027_v9 }
 0x5a3   : > { %v1031_v16 = vpop.permute.xlu1 %1030 }
 0x5aa   : > { %v1473_v10 = vpop.eup %1472 }
 0x5ab   : > { %v693_v12 = vmul.f32 %v1473_v10, %v1471_v1  ;;  %v1475_v13 = vpop.eup %1474 }
 0x5ac   : > { %v861_v11 = vmul.f32 %v1475_v13, %v1467_v56  ;;  %v1477_v15 = vpop.eup %1476 }
 0x5ad   : > { %1392 = vmatmul.mubr.msk.f32.vlgmr.msra.gmra.mrb[6].mxu1 %vm526_vm5, %v693_v12  ;;  %v1029_v17 = vmul.f32 %v1477_v15, %v1469_v61 }
 0x5ae   : > { %1400 = vmatpush3.msk.msra.mxu1 %vm530_vm3, %v863_v14  ;;  %1401 = vmatprep.mubr.msk.f32.mxu1 %vm1489_vm0, %v1490_v6 }
 0x5af   : > { %1409 = vmatprep.subr.mxu1 %v1490_v6 }
 0x5b1   : > { %1402 = vmatmul.mubr.msk.f32.vlgmr.msra.gmra.mrb[8].mxu1 %vm526_vm5, %v861_v11 }
 0x5b2   : > { %1410 = vmatpush3.msk.msra.mxu1 %vm530_vm3, %v1031_v16  ;;  %1411 = vmatprep.mubr.msk.f32.mxu1 %vm1489_vm0, %v1490_v6  ;;  %v1127_v6 = vld [vmem:[%s1705_s4 + $0x18] sm:$0xff] }
 0x5b3   : > { %v1435_v22 = vpack.c.bf16 %v1127_v6, %v1126_v21 }
 0x5b5   : > { %1412 = vmatmul.mubr.msk.f32.vlgmr.msra.gmra.mrb[10].mxu1 %vm526_vm5, %v1029_v17  ;;  %1436 = vmatpush3.bf16.msra.mxu0 %v1435_v22 }
 0x680   : > { %v767_v23 = vpop.f32.mrb[6].mxu1 }
 0x681   : > { %1108 = vrot.lane.b32.xlu1 %v767_v23, %s1502_s26  ;;  %v1393_v24 = vpop.f32.mrb[7].mxu1 }
 0x684   : > { %v935_v25 = vpop.f32.mrb[8].mxu1 }
 0x685   : > { %1112 = vrot.lane.b32.xlu0 %v935_v25, %s1503_s1  ;;  %v1403_v26 = vpop.f32.mrb[9].mxu1 }
 0x688   : > { %v1103_v27 = vpop.f32.mrb[10].mxu1 }
 0x689   : > { %1116 = vrot.lane.b32.xlu1 %v1103_v27, %s1504_s27  ;;  %v1413_v3 = vpop.f32.mrb[11].mxu1 }
 0x6f3   : > { %v1109_v28 = vpop.permute.xlu1 %1108 }
 0x6f4   : > { %v1119_v30 = vsel %vm435_vm2, %v1642_v42, %v1109_v28 }
 0x6f7   : > { %v1113_v29 = vpop.permute.xlu0 %1112 }
 0x6f8   : > { %v1121_v31 = vsel %vm1120_vm6, %v1119_v30, %v1113_v29 }
 0x6fb   : > { %v1117_v32 = vpop.permute.xlu1 %1116 }
 0x6fc   : > { %v1123_v33 = vsel %vm1122_vm7, %v1121_v31, %v1117_v32 }
 0x6fd   : > { %1423 = vmatmul.mubr.msk.f32.vlgmr.msra.gmra.mrb[6].mxu0 %vm357_vm1, %v1123_v33 }
 0x7d0   : > { %v1204_v35 = vpop.f32.mrb[6].mxu0 }
 0x7d1   : > { %v1205_v36 = vadd.f32 %v1331_v34, %v1204_v35  ;;  %v1424_v37 = vpop.f32.mrb[7].mxu0 }
 0x7d3   : > { %v1208_v38 = vadd.f32 %v1205_v36, %v1590_v8  ;;  %v1333_v8 = vld [vmem:[%s1707_s6] ss:$0 sm:$0xff] }
 0x7d5   : > { %v1212_v39 = vsel %vm1211_vm8, %v1208_v38, 0.0 }
 0x7d6   : > { %1213 = vadd.xlane.f32.xlu0 %v1212_v39 }
 0x863   : > { %v1214_v40 = vpop.xlane.xlu0 %1213 }
 0x864   : > { %v1216_v41 = vmul.f32 0.03125, %v1214_v40 }
 0x866   : > { %v1217_v42 = vsub.f32 %v1208_v38, %v1216_v41 }
 0x868   : > { %v1218_v43 = vmul.f32 %v1217_v42, %v1217_v42 }
 0x86a   : > { %v1219_v44 = vsel %vm1211_vm8, %v1218_v43, 0.0 }
 0x86b   : > { %1220 = vadd.xlane.f32.xlu1 %v1219_v44 }
 0x8f8   : > { %v1221_v45 = vpop.xlane.xlu1 %1220 }
 0x8f9   : > { %v1222_v46 = vmul.f32 0.03125, %v1221_v45 }
 0x8fb   : > { %v1223_v47 = vadd.f32 1e-05, %v1222_v46 }
 0x8fd   : > { %1478 = vrsqrt.f32 %v1223_v47 }
 0x907   : > { %v1479_v48 = vpop.eup %1478 }
 0x908   : > { %v1225_v49 = vmul.f32 %v1479_v48, %v1217_v42 }
 0x90a   : > { %v1232_v51 = vmul.f32 %v1333_v8, %v1225_v49 }
 0x90c   : > { %v1239_v52 = vadd.f32 %v1334_v50, %v1232_v51 }
 0x90e   : > { %1240 = vst.msk [vmem:[%s344_s17] sm:$0xf] %vm1211_vm8, %v1239_v52 }
 0x90f PF: > { %s19_s29 = sadd.s32 1, %s1486_s29  }
 0x910   : > { %p16_p4 = scmp.ge.s32.totalorder %s19_s29, 4  }
 0x912   :  { %18 = sbr.rel (!%p16_p4) target bundleno = 1 (0x1), region = 89 }

// kernel: model_forward.18
= control target key start
LH: loop header
LB: loop body
LE: loop exit
PB: predicated region body
PF: predicated region fallthrough
CT: control target
= control target key end

     0   :  { %s1555_s29 = smov 0   ;;  %s1701_s0 = inlined_call_operand.vmem [shape: f32[2,7,32], index: 0, kind: input, shape index: {}, may-alias: {0,1}]   ;;  %s1702_s1 = inlined_call_operand.vmem [shape: f32[2,7,32], index: 1, kind: input, shape index: {}, may-alias: {0,1}]   ;;  %s1703_s2 = inlined_call_operand.vmem [shape: f32[32,96], index: 2, kind: input, shape index: {}]   ;;  %s1704_s3 = inlined_call_operand.vmem [shape: f32[1,96], index: 3, kind: input, shape index: {}]   ;;  %s1705_s4 = inlined_call_operand.vmem [shape: f32[32,32], index: 4, kind: input, shape index: {}]   ;;  %s1706_s5 = inlined_call_operand.vmem [shape: f32[1,32], index: 5, kind: input, shape index: {}]   ;;  %s1707_s6 = inlined_call_operand.vmem [shape: f32[1,32], index: 6, kind: input, shape index: {}]   ;;  %s1708_s7 = inlined_call_operand.vmem [shape: f32[1,32], index: 7, kind: input, shape index: {}]   ;;  %s1709_s8 = inlined_call_operand.vmem [shape: f32[7,7], index: 8, kind: input, shape index: {}]   ;;  %s1710_s9 = inlined_call_operand.vmem [shape: f32[2,7,32], index: 9, kind: output, shape index: {}]  }
   0x1 LB: > { %s1306_s30 = sadd.s32 4294967295, %s1486_s29   ;;  %p1310_p0 = scmp.ge.s32.totalorder %s1486_s29, 1  ;;  %s1486_s29 = sphi %s1555_s29, %s19_s29  }
   0x2   : > { %p295_p1 = scmp.lt.s32.totalorder %s1486_s29, 3 }
   0x4   : > { %p296_p2 = pnand %p1310_p0, %p295_p1 }
   0x5   : > { %v346_v0 = vld [vmem:[%s1703_s2] sm:$0xff] (!%p296_p2)  ;;  %v347_v1 = vld [vmem:[%s1703_s2 + $0x8] sm:$0xff] (!%p296_p2)  ;;  %v348_v2 = vld [vmem:[%s1703_s2 + $0x10] sm:$0xff] (!%p296_p2)  ;;  %v1488_v3 = vmov (!%p296_p2), 0.0|0.0   ;;  %vm1489_vm0 = vmmov (!%p296_p2), 0   ;;  %v1490_v6 = vmov (!%p296_p2), 0.0  }
   0x6   : > { %299 = sbr.rel (%p296_p2) target bundleno = 2319 (0x90f), region = 56  ;;  %1425 = vmatprep.subr.bf16.mxu0 (!%p296_p2), %v1488_v3  ;;  %v1426_v4 = vpack.c.bf16 (!%p296_p2), %v347_v1, %v346_v0  ;;  %v349_v5 = vld [vmem:[%s1703_s2 + $0x18] sm:$0xff] (!%p296_p2)  ;;  %1371 = vmatprep.mubr.msk.f32.mxu0 (!%p296_p2), %vm1489_vm0, %v1490_v6  ;;  %p333_p3 = scmp.lt.s32.totalorder (!%p296_p2), %s1306_s30, 1  ;;  %vm357_vm1 = vcmask (!%p296_p2), 261120   ;;  %v1313_v9 = vld [vmem:[%s1704_s3] ss:$0 sm:$0xff] (!%p296_p2) }
   0x7   : > { %1374 = vmatprep.subr.mxu1 (!%p296_p2), %v1490_v6  ;;  %1376 = vmatprep.mubr.msk.f32.mxu1 (!%p296_p2), %vm1489_vm0, %v1490_v6  ;;  %v1429_v7 = vpack.c.bf16 (!%p296_p2), %v349_v5, %v348_v2  ;;  %s1491_s24 = smov (!%p296_p2), 64   ;;  %s1492_s25 = smov (!%p296_p2), 96   ;;  %vm435_vm2 = vcmask (!%p296_p2), 64512   ;;  %vm530_vm3 = vcmask (!%p296_p2), 1046528   ;;  %v431_v19 = vld [vmem:[%s1709_s8] sm:$0x7f] (!%p296_p2) }
   0x8   : > { %1427 = vmatpush3.bf16.msra.mxu0 (!%p296_p2), %v1426_v4  ;;  %s1493_s26 = smov (!%p296_p2), 88   ;;  %s1494_s1 = smov (!%p296_p2), 120   ;;  %vm512_vm4 = vcmask (!%p296_p2), 55296   ;;  %vm526_vm5 = vcmask (!%p296_p2), 56320   ;;  %vm1120_vm6 = vcmask (!%p296_p2), 130048   ;;  %vm1122_vm7 = vcmask (!%p296_p2), 195584  }
   0x9   : > { %1428 = vmatprep.subr.bf16.mxu0 (!%p296_p2), %v1488_v3  ;;  %s1495_s27 = smov (!%p296_p2), 80   ;;  %s1496_s11 = smov (!%p296_p2), 72   ;;  %vm1211_vm8 = vcmask (!%p296_p2), 260096  }
   0xa   : > { %s1497_s12 = smov (!%p296_p2), 112   ;;  %s1498_s13 = smov (!%p296_p2), 104  }
   0xb   : > { %s1499_s14 = smov (!%p296_p2), 56   ;;  %s1500_s15 = smov (!%p296_p2), 48  }
   0xc   : > { %1430 = vmatpush3.bf16.msra.mxu0 (!%p296_p2), %v1429_v7  ;;  %s1501_s16 = smov (!%p296_p2), 40  }
   0xd   : > { %s1712_s30 = smov (!%p333_p3, %s1306_s30), 1  ;;  %1394 = vmatprep.subr.mxu0 %v1490_v6 }
   0xe   : > { %s1311_s18 = sshll.u32 %s1712_s30, 3 }
   0xf   : > { %s336_s21 = scalar_lea.vmem %s1701_s0, %s1311_s18  ;;  %s344_s17 = scalar_lea.vmem %s1710_s9, %s1311_s18 }
  0x10   : > { %v1590_v8 = vld [vmem:[%s336_s21] sm:$0x7f] }
  0x11   : > { %1372 = vmatmul.mubr.msk.f32.vlgmr.msra.gmra.mrb[0].mxu0 %vm357_vm1, %v1590_v8 }
  0x12   : > { %1396 = vmatprep.mubr.msk.f32.mxu0 %vm1489_vm0, %v1490_v6 }
  0xe4   : > { %v427_v10 = vpop.f32.mrb[0].mxu0 }
  0xe5   : > { %v1600_v11 = vadd.f32 %v1313_v9, %v427_v10  ;;  %v1373_v12 = vpop.f32.mrb[1].mxu0 }
  0xe7   : > { %524 = vrot.lane.b32.xlu1 %v1600_v11, %s1491_s24  ;;  %433 = vrot.lane.b32.xlu0 %v1600_v11, %s1492_s25 }
  0xeb   : > { %605 = vrot.lane.b32.xlu1 %v1600_v11, %s1493_s26  ;;  %s1502_s26 = smov 8  }
  0xef   : > { %603 = vrot.lane.b32.xlu1 %v1600_v11, %s1494_s1  ;;  %s1503_s1 = smov 16  }
  0xf3   : > { %773 = vrot.lane.b32.xlu1 %v1600_v11, %s1495_s27  ;;  %s1504_s27 = smov 24  }
 0x159   : > { %v525_v13 = vpop.permute.xlu1 %524  ;;  %v434_v14 = vpop.permute.xlu0 %433 }
 0x15a   : > { %1375 = vmatpush3.xpose.msk.msra.mxu1 %vm435_vm2, %v434_v14 }
 0x15b   : > { %1379 = vmatprep.subr.mxu1 %v1490_v6 }
 0x15d   : > { %v606_v15 = vpop.permute.xlu1 %605  ;;  %1377 = vmatmul.mubr.msk.f32.vlgmr.msra.gmra.mrb[0].mxu1 %vm435_vm2, %v1600_v11 }
 0x15e   : > { %1380 = vmatpush3.msk.msra.mxu1 %vm530_vm3, %v525_v13  ;;  %1381 = vmatprep.mubr.msk.f32.mxu1 %vm1489_vm0, %v1490_v6 }
 0x15f   : > { %1384 = vmatprep.subr.mxu1 %v1490_v6 }
 0x161   : > { %v604_v16 = vpop.permute.xlu1 %603 }
 0x165   : > { %v774_v17 = vpop.permute.xlu1 %773 }
 0x166   : > { %1395 = vmatpush3.xpose.msk.msra.mxu0 %vm435_vm2, %v774_v17 }
 0x167   : > { %1404 = vmatprep.subr.mxu0 %v1490_v6 }
 0x230   : > { %v506_v18 = vpop.f32.mrb[0].mxu1 }
 0x231   : > { %v510_v20 = vmul.f32 0.35355338, %v506_v18  ;;  %v1378_v21 = vpop.f32.mrb[1].mxu1  ;;  %v1124_v18 = vld [vmem:[%s1705_s4] sm:$0xff] }
 0x232   : > { %v1126_v21 = vld [vmem:[%s1705_s4 + $0x10] sm:$0xff] }
 0x233   : > { %v511_v22 = vadd.f32 %v510_v20, %v431_v19 }
 0x235   : > { %v513_v23 = vsel %vm512_vm4, %v511_v22, -inf }
 0x236   : > { %514 = vmax.xlane.f32.xlu0 %v513_v23 }
 0x24c   : > { %941 = vrot.lane.b32.xlu0 %v1600_v11, %s1496_s11 }
 0x2c3   : > { %v515_v24 = vpop.xlane.xlu0 %514 }
 0x2c4   : > { %v516_v25 = vsub.f32 %v511_v22, %v515_v24 }
 0x2c6   : > { %v517_v26 = vmul.f32 1.442695, %v516_v25 }
 0x2c7   : > { %v942_v31 = vpop.permute.xlu0 %941 }
 0x2c8   : > { %1462 = vpow2.f32 %v517_v26 }
 0x2d2   : > { %v1463_v27 = vpop.eup %1462 }
 0x2d3   : > { %v519_v28 = vsel %vm512_vm4, %v1463_v27, 0.0 }
 0x2d4   : > { %520 = vadd.xlane.f32.xlu1 %v519_v28 }
 0x2e5   : > { %771 = vrot.lane.b32.xlu1 %v1600_v11, %s1497_s12 }
 0x2e9   : > { %939 = vrot.lane.b32.xlu1 %v1600_v11, %s1498_s13 }
 0x361   : > { %v521_v29 = vpop.xlane.xlu1 %520 }
 0x362   : > { %1464 = vrcp.f32 %v521_v29 }
 0x365   : > { %v772_v30 = vpop.permute.xlu1 %771 }
 0x366   : > { %1397 = vmatmul.mubr.msk.f32.vlgmr.msra.gmra.mrb[2].mxu0 %vm435_vm2, %v772_v30 }
 0x367   : > { %1405 = vmatpush3.xpose.msk.msra.mxu0 %vm435_vm2, %v942_v31  ;;  %1406 = vmatprep.mubr.msk.f32.mxu0 %vm1489_vm0, %v1490_v6 }
 0x368   : > { %1431 = vmatprep.subr.bf16.mxu0 %v1488_v3 }
 0x369   : > { %v940_v32 = vpop.permute.xlu1 %939 }
 0x36a   : > { %1407 = vmatmul.mubr.msk.f32.vlgmr.msra.gmra.mrb[4].mxu0 %vm435_vm2, %v940_v32 }
 0x36b   : > { %1422 = vmatprep.mubr.msk.f32.mxu0 %vm1489_vm0, %v1490_v6 }
 0x36c   : > { %v1465_v33 = vpop.eup %1464 }
 0x36d   : > { %v523_v34 = vmul.f32 %v1465_v33, %v1463_v27 }
 0x36f   : > { %1382 = vmatmul.mubr.msk.f32.vlgmr.msra.gmra.mrb[2].mxu1 %vm526_vm5, %v523_v34  ;;  %v1331_v34 = vld [vmem:[%s1706_s5] ss:$0 sm:$0xff] }
 0x370   : > { %1385 = vmatpush3.xpose.msk.msra.mxu1 %vm435_vm2, %v606_v15  ;;  %1386 = vmatprep.mubr.msk.f32.mxu1 %vm1489_vm0, %v1490_v6 }
 0x371   : > { %1389 = vmatprep.subr.mxu1 %v1490_v6 }
 0x373   : > { %1387 = vmatmul.mubr.msk.f32.vlgmr.msra.gmra.mrb[4].mxu1 %vm435_vm2, %v604_v16 }
 0x374   : > { %1391 = vmatprep.mubr.msk.f32.mxu1 %vm1489_vm0, %v1490_v6 }
 0x439   : > { %v845_v35 = vpop.f32.mrb[2].mxu0 }
 0x43a   : > { %v849_v36 = vmul.f32 0.35355338, %v845_v35  ;;  %v1398_v37 = vpop.f32.mrb[3].mxu0 }
 0x43c   : > { %v850_v38 = vadd.f32 %v849_v36, %v431_v19 }
 0x43d   : > { %v1013_v39 = vpop.f32.mrb[4].mxu0 }
 0x43e   : > { %v1408_v40 = vpop.f32.mrb[5].mxu0  ;;  %v851_v41 = vsel %vm512_vm4, %v850_v38, -inf  ;;  %v1017_v45 = vmul.f32 0.35355338, %v1013_v39 }
 0x43f   : > { %852 = vmax.xlane.f32.xlu0 %v851_v41 }
 0x440   : > { %v1018_v50 = vadd.f32 %v1017_v45, %v431_v19 }
 0x442   : > { %v1642_v42 = vpop.f32.mrb[2].mxu1  ;;  %v1019_v51 = vsel %vm512_vm4, %v1018_v50, -inf }
 0x443   : > { %v1383_v43 = vpop.f32.mrb[3].mxu1 }
 0x446   : > { %v677_v44 = vpop.f32.mrb[4].mxu1 }
 0x447   : > { %v681_v46 = vmul.f32 0.35355338, %v677_v44  ;;  %v1388_v47 = vpop.f32.mrb[5].mxu1 }
 0x449   : > { %v682_v48 = vadd.f32 %v681_v46, %v431_v19  ;;  %v1125_v19 = vld [vmem:[%s1705_s4 + $0x8] sm:$0xff] }
 0x44a   : > { %v1432_v20 = vpack.c.bf16 %v1125_v19, %v1124_v18 }
 0x44b   : > { %v683_v49 = vsel %vm512_vm4, %v682_v48, -inf }
 0x44c   : > { %684 = vmax.xlane.f32.xlu1 %v683_v49  ;;  %1433 = vmatpush3.bf16.msra.mxu0 %v1432_v20 }
 0x44d   : > { %1434 = vmatprep.subr.bf16.mxu0 %v1488_v3 }
 0x450   : > { %1020 = vmax.xlane.f32.xlu1 %v1019_v51 }
 0x4cc   : > { %v853_v52 = vpop.xlane.xlu0 %852 }
 0x4cd   : > { %v854_v53 = vsub.f32 %v850_v38, %v853_v52 }
 0x4cf   : > { %v855_v54 = vmul.f32 1.442695, %v854_v53 }
 0x4d1   : > { %1466 = vpow2.f32 %v855_v54 }
 0x4d9   : > { %v685_v55 = vpop.xlane.xlu1 %684 }
 0x4da   : > { %v686_v63 = vsub.f32 %v682_v48, %v685_v55 }
 0x4db   : > { %v1467_v56 = vpop.eup %1466 }
 0x4dc   : > { %v857_v57 = vsel %vm512_vm4, %v1467_v56, 0.0  ;;  %v687_v0 = vmul.f32 1.442695, %v686_v63 }
 0x4dd   : > { %858 = vadd.xlane.f32.xlu1 %v857_v57  ;;  %v1021_v58 = vpop.xlane.xlu1 %1020 }
 0x4de   : > { %v1022_v59 = vsub.f32 %v1018_v50, %v1021_v58  ;;  %v1334_v50 = vld [vmem:[%s1708_s7] ss:$0 sm:$0xff] }
 0x4e0   : > { %v1023_v60 = vmul.f32 1.442695, %v1022_v59 }
 0x4e2   : > { %1468 = vpow2.f32 %v1023_v60 }
 0x4e3   : > { %1470 = vpow2.f32 %v687_v0 }
 0x4ec   : > { %v1469_v61 = vpop.eup %1468 }
 0x4ed   : > { %v1025_v62 = vsel %vm512_vm4, %v1469_v61, 0.0  ;;  %v1471_v1 = vpop.eup %1470 }
 0x4ee   : > { %694 = vrot.lane.b32.xlu1 %v1600_v11, %s1499_s14  ;;  %1026 = vadd.xlane.f32.xlu0 %v1025_v62  ;;  %v689_v2 = vsel %vm512_vm4, %v1471_v1, 0.0 }
 0x504   : > { %862 = vrot.lane.b32.xlu0 %v1600_v11, %s1500_s15 }
 0x512   : > { %690 = vadd.xlane.f32.xlu1 %v689_v2 }
 0x523   : > { %1030 = vrot.lane.b32.xlu1 %v1600_v11, %s1501_s16 }
 0x56a   : > { %v859_v4 = vpop.xlane.xlu1 %858 }
 0x56e   : > { %v695_v5 = vpop.permute.xlu1 %694 }
 0x56f   : > { %1390 = vmatpush3.msk.msra.mxu1 %vm530_vm3, %v695_v5 }
 0x570   : > { %1399 = vmatprep.subr.mxu1 %v1490_v6 }
 0x57b   : > { %v1027_v9 = vpop.xlane.xlu0 %1026 }
 0x57f   : > { %v863_v14 = vpop.permute.xlu0 %862 }
 0x59f   : > { %v691_v7 = vpop.xlane.xlu1 %690 }
 0x5a0   : > { %1472 = vrcp.f32 %v691_v7 }
 0x5a1   : > { %1474 = vrcp.f32 %v859_v4 }
 0x5a2   : > { %1476 = vrcp.f32 %v1027_v9 }
 0x5a3   : > { %v1031_v16 = vpop.permute.xlu1 %1030 }
 0x5aa   : > { %v1473_v10 = vpop.eup %1472 }
 0x5ab   : > { %v693_v12 = vmul.f32 %v1473_v10, %v1471_v1  ;;  %v1475_v13 = vpop.eup %1474 }
 0x5ac   : > { %v861_v11 = vmul.f32 %v1475_v13, %v1467_v56  ;;  %v1477_v15 = vpop.eup %1476 }
 0x5ad   : > { %1392 = vmatmul.mubr.msk.f32.vlgmr.msra.gmra.mrb[6].mxu1 %vm526_vm5, %v693_v12  ;;  %v1029_v17 = vmul.f32 %v1477_v15, %v1469_v61 }
 0x5ae   : > { %1400 = vmatpush3.msk.msra.mxu1 %vm530_vm3, %v863_v14  ;;  %1401 = vmatprep.mubr.msk.f32.mxu1 %vm1489_vm0, %v1490_v6 }
 0x5af   : > { %1409 = vmatprep.subr.mxu1 %v1490_v6 }
 0x5b1   : > { %1402 = vmatmul.mubr.msk.f32.vlgmr.msra.gmra.mrb[8].mxu1 %vm526_vm5, %v861_v11 }
 0x5b2   : > { %1410 = vmatpush3.msk.msra.mxu1 %vm530_vm3, %v1031_v16  ;;  %1411 = vmatprep.mubr.msk.f32.mxu1 %vm1489_vm0, %v1490_v6  ;;  %v1127_v6 = vld [vmem:[%s1705_s4 + $0x18] sm:$0xff] }
 0x5b3   : > { %v1435_v22 = vpack.c.bf16 %v1127_v6, %v1126_v21 }
 0x5b5   : > { %1412 = vmatmul.mubr.msk.f32.vlgmr.msra.gmra.mrb[10].mxu1 %vm526_vm5, %v1029_v17  ;;  %1436 = vmatpush3.bf16.msra.mxu0 %v1435_v22 }
 0x680   : > { %v767_v23 = vpop.f32.mrb[6].mxu1 }
 0x681   : > { %1108 = vrot.lane.b32.xlu1 %v767_v23, %s1502_s26  ;;  %v1393_v24 = vpop.f32.mrb[7].mxu1 }
 0x684   : > { %v935_v25 = vpop.f32.mrb[8].mxu1 }
 0x685   : > { %1112 = vrot.lane.b32.xlu0 %v935_v25, %s1503_s1  ;;  %v1403_v26 = vpop.f32.mrb[9].mxu1 }
 0x688   : > { %v1103_v27 = vpop.f32.mrb[10].mxu1 }
 0x689   : > { %1116 = vrot.lane.b32.xlu1 %v1103_v27, %s1504_s27  ;;  %v1413_v3 = vpop.f32.mrb[11].mxu1 }
 0x6f3   : > { %v1109_v28 = vpop.permute.xlu1 %1108 }
 0x6f4   : > { %v1119_v30 = vsel %vm435_vm2, %v1642_v42, %v1109_v28 }
 0x6f7   : > { %v1113_v29 = vpop.permute.xlu0 %1112 }
 0x6f8   : > { %v1121_v31 = vsel %vm1120_vm6, %v1119_v30, %v1113_v29 }
 0x6fb   : > { %v1117_v32 = vpop.permute.xlu1 %1116 }
 0x6fc   : > { %v1123_v33 = vsel %vm1122_vm7, %v1121_v31, %v1117_v32 }
 0x6fd   : > { %1423 = vmatmul.mubr.msk.f32.vlgmr.msra.gmra.mrb[6].mxu0 %vm357_vm1, %v1123_v33 }
 0x7d0   : > { %v1204_v35 = vpop.f32.mrb[6].mxu0 }
 0x7d1   : > { %v1205_v36 = vadd.f32 %v1331_v34, %v1204_v35  ;;  %v1424_v37 = vpop.f32.mrb[7].mxu0 }
 0x7d3   : > { %v1208_v38 = vadd.f32 %v1205_v36, %v1590_v8  ;;  %v1333_v8 = vld [vmem:[%s1707_s6] ss:$0 sm:$0xff] }
 0x7d5   : > { %v1212_v39 = vsel %vm1211_vm8, %v1208_v38, 0.0 }
 0x7d6   : > { %1213 = vadd.xlane.f32.xlu0 %v1212_v39 }
 0x863   : > { %v1214_v40 = vpop.xlane.xlu0 %1213 }
 0x864   : > { %v1216_v41 = vmul.f32 0.03125, %v1214_v40 }
 0x866   : > { %v1217_v42 = vsub.f32 %v1208_v38, %v1216_v41 }
 0x868   : > { %v1218_v43 = vmul.f32 %v1217_v42, %v1217_v42 }
 0x86a   : > { %v1219_v44 = vsel %vm1211_vm8, %v1218_v43, 0.0 }
 0x86b   : > { %1220 = vadd.xlane.f32.xlu1 %v1219_v44 }
 0x8f8   : > { %v1221_v45 = vpop.xlane.xlu1 %1220 }
 0x8f9   : > { %v1222_v46 = vmul.f32 0.03125, %v1221_v45 }
 0x8fb   : > { %v1223_v47 = vadd.f32 1e-05, %v1222_v46 }
 0x8fd   : > { %1478 = vrsqrt.f32 %v1223_v47 }
 0x907   : > { %v1479_v48 = vpop.eup %1478 }
 0x908   : > { %v1225_v49 = vmul.f32 %v1479_v48, %v1217_v42 }
 0x90a   : > { %v1232_v51 = vmul.f32 %v1333_v8, %v1225_v49 }
 0x90c   : > { %v1239_v52 = vadd.f32 %v1334_v50, %v1232_v51 }
 0x90e   : > { %1240 = vst.msk [vmem:[%s344_s17] sm:$0x7f] %vm1211_vm8, %v1239_v52 }
 0x90f PF: > { %s19_s29 = sadd.s32 1, %s1486_s29  }
 0x910   : > { %p16_p4 = scmp.ge.s32.totalorder %s19_s29, 4  }
 0x912   :  { %18 = sbr.rel (!%p16_p4) target bundleno = 1 (0x1), region = 89 }

// kernel: model_forward.26
= control target key start
LH: loop header
LB: loop body
LE: loop exit
PB: predicated region body
PF: predicated region fallthrough
CT: control target
= control target key end

     0   :  { %v390_v0 = vmov 0.0|0.0   ;;  %vm391_vm0 = vmmov 0   ;;  %v392_v4 = vmov 0.0   ;;  %vm42_vm1 = vcmask 1041409   ;;  %s504_s1 = inlined_call_operand.vmem [shape: f32[32,64], index: 1, kind: input, shape index: {}]   ;;  %s505_s0 = inlined_call_operand.vmem [shape: f32[2,4,32], index: 0, kind: input, shape index: {}]   ;;  %s506_s3 = inlined_call_operand.vmem [shape: f32[64,32], index: 3, kind: input, shape index: {}]   ;;  %s507_s5 = inlined_call_operand.vmem [shape: f32[32,64], index: 5, kind: input, shape index: {}]   ;;  %s508_s2 = inlined_call_operand.vmem [shape: f32[1,64], index: 2, kind: input, shape index: {}]   ;;  %s509_s4 = inlined_call_operand.vmem [shape: f32[1,32], index: 4, kind: input, shape index: {}]   ;;  %s510_s6 = inlined_call_operand.vmem [shape: f32[1,64], index: 6, kind: input, shape index: {}]   ;;  %s511_s7 = inlined_call_operand.vmem [shape: f32[2,64], index: 7, kind: output, shape index: {}]  }
   0x1   :  { %363 = vmatprep.subr.bf16.mxu0 %v390_v0  ;;  %v28_v1 = vld [vmem:[%s504_s1] sm:$0xff]  ;;  %v29_v2 = vld [vmem:[%s504_s1 + $0x8] sm:$0xff]  ;;  %v30_v3 = vld [vmem:[%s504_s1 + $0x10] sm:$0xff]  ;;  %330 = vmatprep.mubr.msk.f32.mxu0 %vm391_vm0, %v392_v4  ;;  %vm44_vm2 = vcmask 261120   ;;  %vm133_vm3 = vcmask 523264   ;;  %vm291_vm4 = vcmask 517120  }
   0x2   :  { %v364_v5 = vpack.c.bf16 %v29_v2, %v28_v1  ;;  %v31_v6 = vld [vmem:[%s504_s1 + $0x18] sm:$0xff]  ;;  %v27_v7 = vld [vmem:[%s505_s0 + $0x7] sm:$0x1]  ;;  %369 = vmatprep.subr.bf16.mxu1 %v390_v0  ;;  %349 = vmatprep.mubr.msk.f32.mxu1 %vm391_vm0, %v392_v4  ;;  %v119_v9 = vld [vmem:[%s506_s3 + $0x8] sm:$0xff] }
   0x3   :  { %v118_v8 = vld [vmem:[%s506_s3] sm:$0xff]  ;;  %v120_v10 = vld [vmem:[%s506_s3 + $0x10] sm:$0xff]  ;;  %v367_v11 = vpack.c.bf16 %v31_v6, %v30_v3  ;;  %v41_v12 = vrot.slane %v27_v7, 7  ;;  %v121_v14 = vld [vmem:[%s506_s3 + $0x18] sm:$0xff] }
   0x4   :  { %365 = vmatpush3.bf16.msra.mxu0 %v364_v5  ;;  %v370_v13 = vpack.c.bf16 %v119_v9, %v118_v8  ;;  %v26_v15 = vld [vmem:[%s505_s0 + $0x3] sm:$0x1]  ;;  %v373_v16 = vpack.c.bf16 %v121_v14, %v120_v10  ;;  %v123_v18 = vld [vmem:[%s506_s3 + $0x28] sm:$0xff]  ;;  %v124_v21 = vld [vmem:[%s506_s3 + $0x30] sm:$0xff] }
   0x5   :  { %366 = vmatprep.subr.bf16.mxu0 %v390_v0  ;;  %v122_v17 = vld [vmem:[%s506_s3 + $0x20] sm:$0xff]  ;;  %v43_v19 = vsel %vm42_vm1, %v41_v12, %v26_v15  ;;  %v125_v22 = vld [vmem:[%s506_s3 + $0x38] sm:$0xff]  ;;  %v208_v25 = vld [vmem:[%s507_s5 + $0x8] sm:$0xff] }
   0x6   :  { %371 = vmatpush3.bf16.msra.mxu1 %v370_v13  ;;  %v376_v20 = vpack.c.bf16 %v123_v18, %v122_v17  ;;  %v379_v23 = vpack.c.bf16 %v125_v22, %v124_v21  ;;  %v207_v24 = vld [vmem:[%s507_s5] sm:$0xff]  ;;  %v209_v32 = vld [vmem:[%s507_s5 + $0x10] sm:$0xff]  ;;  %v210_v33 = vld [vmem:[%s507_s5 + $0x18] sm:$0xff] }
   0x7   :  { %372 = vmatprep.subr.bf16.mxu1 %v390_v0  ;;  %v382_v26 = vpack.c.bf16 %v208_v25, %v207_v24  ;;  %v297_v27 = vld [vmem:[%s508_s2] ss:$0 sm:$0xff]  ;;  %v385_v34 = vpack.c.bf16 %v210_v33, %v209_v32 }
   0x8   :  { %368 = vmatpush3.bf16.msra.mxu0 %v367_v11  ;;  %v299_v35 = vld [vmem:[%s509_s4] ss:$0 sm:$0xff] }
   0x9   :  { %381 = vmatprep.subr.bf16.mxu0 %v390_v0  ;;  %v301_v39 = vld [vmem:[%s510_s6] ss:$0 sm:$0xff] }
   0xa   :  { %374 = vmatpush3.bf16.msra.mxu1 %v373_v16 }
   0xb   :  { %331 = vmatmul.mubr.msk.f32.vlgmr.msra.gmra.mrb[0].mxu0 %vm44_vm2, %v43_v19  ;;  %375 = vmatprep.subr.bf16.mxu1 %v390_v0 }
   0xc   :  { %360 = vmatprep.mubr.msk.f32.mxu0 %vm391_vm0, %v392_v4  ;;  %383 = vmatpush3.bf16.msra.mxu0 %v382_v26 }
   0xd   :  { %384 = vmatprep.subr.bf16.mxu0 %v390_v0 }
   0xe   :  { %377 = vmatpush3.bf16.msra.mxu1 %v376_v20 }
   0xf   :  { %378 = vmatprep.subr.bf16.mxu1 %v390_v0 }
  0x10   :  { %386 = vmatpush3.bf16.msra.mxu0 %v385_v34 }
  0x12   :  { %380 = vmatpush3.bf16.msra.mxu1 %v379_v23 }
  0xde   :  { %v113_v28 = vpop.f32.mrb[0].mxu0 }
  0xdf   :  { %v114_v29 = vadd.f32 %v297_v27, %v113_v28  ;;  %v332_v30 = vpop.f32.mrb[1].mxu0 }
  0xe1   :  { %v117_v31 = vmax.f32 %v114_v29, 0.0 }
  0xe3   :  { %350 = vmatmul.mubr.msk.f32.vlgmr.msra.gmra.mrb[0].mxu1 %vm133_vm3, %v117_v31 }
 0x1b6   :  { %v203_v36 = vpop.f32.mrb[0].mxu1 }
 0x1b7   :  { %v204_v37 = vadd.f32 %v299_v35, %v203_v36  ;;  %v351_v38 = vpop.f32.mrb[1].mxu1 }
 0x1b9   :  { %361 = vmatmul.mubr.msk.f32.vlgmr.msra.gmra.mrb[2].mxu0 %vm44_vm2, %v204_v37 }
 0x28c   :  { %v287_v40 = vpop.f32.mrb[2].mxu0 }
 0x28d   :  { %v288_v41 = vadd.f32 %v301_v39, %v287_v40  ;;  %v362_v42 = vpop.f32.mrb[3].mxu0 }
 0x28f   :  { %292 = vst.msk [vmem:[%s511_s7] sm:$0x3] %vm291_vm4, %v288_v41 }

// kernel: model_forward.25
= control target key start
LH: loop header
LB: loop body
LE: loop exit
PB: predicated region body
PF: predicated region fallthrough
CT: control target
= control target key end

     0   :  { %s1663_s30 = smov 0   ;;  %s1811_s0 = inlined_call_operand.vmem [shape: f32[2,4,32], index: 0, kind: input, shape index: {}]   ;;  %s1812_s1 = inlined_call_operand.vmem [shape: f32[2,8,32], index: 1, kind: input, shape index: {}]   ;;  %s1813_s2 = inlined_call_operand.vmem [shape: f32[32,96], index: 2, kind: input, shape index: {}]   ;;  %s1814_s3 = inlined_call_operand.vmem [shape: f32[1,96], index: 3, kind: input, shape index: {}]   ;;  %s1815_s4 = inlined_call_operand.vmem [shape: f32[32,32], index: 4, kind: input, shape index: {}]   ;;  %s1816_s5 = inlined_call_operand.vmem [shape: f32[1,32], index: 5, kind: input, shape index: {}]   ;;  %s1817_s6 = inlined_call_operand.vmem [shape: f32[1,32], index: 6, kind: input, shape index: {}]   ;;  %s1818_s7 = inlined_call_operand.vmem [shape: f32[1,32], index: 7, kind: input, shape index: {}]   ;;  %s1819_s8 = inlined_call_operand.vmem [shape: f32[4,8], index: 8, kind: input, shape index: {}]   ;;  %s1820_s9 = inlined_call_operand.vmem [shape: f32[2,4,32], index: 9, kind: output, shape index: {}]  }
   0x1 LB: > { %s1392_s10 = sadd.s32 4294967295, %s1598_s30   ;;  %p1396_p0 = scmp.ge.s32.totalorder %s1598_s30, 1  ;;  %s1598_s30 = sphi %s1663_s30, %s19_s30  }
   0x2   : > { %p295_p1 = scmp.lt.s32.totalorder %s1598_s30, 3 }
   0x4   : > { %p296_p2 = pnand %p1396_p0, %p295_p1 }
   0x5   : > { %v346_v0 = vld [vmem:[%s1813_s2] sm:$0xff] (!%p296_p2)  ;;  %v347_v1 = vld [vmem:[%s1813_s2 + $0x8] sm:$0xff] (!%p296_p2)  ;;  %v348_v2 = vld [vmem:[%s1813_s2 + $0x10] sm:$0xff] (!%p296_p2)  ;;  %v1600_v5 = vmov (!%p296_p2), 0.0|0.0   ;;  %p333_p3 = scmp.lt.s32.totalorder (!%p296_p2), %s1392_s10, 1  ;;  %vm1601_vm0 = vmmov (!%p296_p2), 0  }
   0x6   : > { %299 = sbr.rel (%p296_p2) target bundleno = 1862 (0x746), region = 56  ;;  %v1564_v3 = vpack.i.bf16 (!%p296_p2), %v347_v1, %v346_v0  ;;  %v349_v4 = vld [vmem:[%s1813_s2 + $0x18] sm:$0xff] (!%p296_p2)  ;;  %1525 = vmatprep.subr.bf16.mxu0 (!%p296_p2), %v1600_v5  ;;  %v1526_v6 = vpack.c.bf16 (!%p296_p2), %v347_v1, %v346_v0  ;;  %1531 = vmatprep.subr.bf16.mxu1 (!%p296_p2), %v1600_v5  ;;  %v1400_v7 = vld [vmem:[%s1814_s3] ss:$0 sm:$0xff] (!%p296_p2)  ;;  %v1602_v8 = vmov (!%p296_p2), 0.0   ;;  %s1603_s21 = smov (!%p296_p2), 96  }
   0x7   : > { %1460 = vmatprep.mubr.msk.f32.mxu0 (!%p296_p2), %vm1601_vm0, %v1602_v8  ;;  %1471 = vmatprep.mubr.msk.f32.mxu1 (!%p296_p2), %vm1601_vm0, %v1602_v8  ;;  %v1569_v9 = vpack.i.bf16 (!%p296_p2), %v349_v4, %v348_v2  ;;  %v1529_v10 = vpack.c.bf16 (!%p296_p2), %v349_v4, %v348_v2  ;;  %vm358_vm1 = vcmask (!%p296_p2), 261120   ;;  %s1604_s11 = smov (!%p296_p2), 120   ;;  %s1605_s12 = smov (!%p296_p2), 112   ;;  %vm525_vm2 = vcmask (!%p296_p2), 64512   ;;  %v524_v35 = vld [vmem:[%s1819_s8] sm:$0xf] (!%p296_p2) }
   0x8   : > { %1565 = vrot.lane.b32.xlu0 (!%p296_p2), %v1564_v3, %s1603_s21  ;;  %1527 = vmatpush3.bf16.msra.mxu0 (!%p296_p2), %v1526_v6  ;;  %s1606_s13 = smov (!%p296_p2), 104   ;;  %vm604_vm3 = vcmask (!%p296_p2), 60416   ;;  %s1607_s16 = smov (!%p296_p2), 88   ;;  %vm1206_vm4 = vcmask (!%p296_p2), 130048   ;;  %vm1208_vm5 = vcmask (!%p296_p2), 195584   ;;  %vm1297_vm6 = vcmask (!%p296_p2), 257024  }
   0x9   : > { %1528 = vmatprep.subr.bf16.mxu0 (!%p296_p2), %v1600_v5  ;;  %448 = vrot.lane.b32.xlu1 (!%p296_p2), %v1400_v7, %s1603_s21  ;;  %s1608_s17 = smov (!%p296_p2), 80   ;;  %s1609_s18 = smov (!%p296_p2), 72  }
   0xa   : > { %s1610_s28 = smov (!%p296_p2), 8  }
   0xc   : > { %1570 = vrot.lane.b32.xlu0 (!%p296_p2), %v1569_v9, %s1603_s21  ;;  %1530 = vmatpush3.bf16.msra.mxu0 (!%p296_p2), %v1529_v10 }
   0xd   : > { %s1822_s10 = smov (!%p333_p3, %s1392_s10), 1  ;;  %1484 = vmatprep.subr.mxu0 %v1602_v8 }
   0xe   : > { %s1397_s22 = sshll.u32 %s1822_s10, 2  ;;  %s1398_s26 = sshll.u32 %s1822_s10, 3 }
   0xf   : > { %s336_s25 = scalar_lea.vmem %s1811_s0, %s1397_s22  ;;  %s340_s29 = scalar_lea.vmem %s1812_s1, %s1398_s26 }
  0x10   : > { %v1704_v11 = vld [vmem:[%s336_s25] sm:$0xf]  ;;  %s344_s20 = scalar_lea.vmem %s1820_s9, %s1397_s22 }
  0x11   : > { %1461 = vmatmul.mubr.msk.f32.vlgmr.msra.gmra.mrb[0].mxu0 %vm358_vm1, %v1704_v11  ;;  %v351_v20 = vld [vmem:[%s340_s29] sm:$0xff]  ;;  %s1611_s29 = smov 16  }
  0x12   : > { %1486 = vmatprep.mubr.msk.f32.mxu0 %vm1601_vm0, %v1602_v8 }
  0x7a   : > { %v1566_v12 = vpop.permute.xlu0 %1565 }
  0x7b   : > { %v1568_v13 = vunpack.i.h.bf16 %v1566_v12  ;;  %v1567_v14 = vunpack.i.l.bf16 %v1566_v12  ;;  %v449_v24 = vpop.permute.xlu1 %448 }
  0x7d   : > { %v1532_v15 = vpack.c.bf16 %v1568_v13, %v1567_v14 }
  0x7e   : > { %v1571_v16 = vpop.permute.xlu0 %1570 }
  0x7f   : > { %v1573_v17 = vunpack.i.h.bf16 %v1571_v16  ;;  %v1572_v18 = vunpack.i.l.bf16 %v1571_v16  ;;  %1533 = vmatpush3.bf16.msra.mxu1 %v1532_v15 }
  0x80   : > { %1534 = vmatprep.subr.bf16.mxu1 %v1600_v5 }
  0x81   : > { %v1535_v19 = vpack.c.bf16 %v1573_v17, %v1572_v18 }
  0x83   : > { %1536 = vmatpush3.bf16.msra.mxu1 %v1535_v19 }
  0x84   : > { %1474 = vmatprep.subr.mxu1 %v1602_v8 }
  0x86   : > { %1472 = vmatmul.mubr.msk.f32.vlgmr.msra.gmra.mrb[0].mxu1 %vm358_vm1, %v351_v20 }
  0x87   : > { %1476 = vmatprep.mubr.msk.f32.mxu1 %vm1601_vm0, %v1602_v8 }
  0xe4   : > { %v428_v21 = vpop.f32.mrb[0].mxu0 }
  0xe5   : > { %v429_v22 = vadd.f32 %v1400_v7, %v428_v21  ;;  %v1462_v23 = vpop.f32.mrb[1].mxu0 }
  0xe7   : > { %692 = vrot.lane.b32.xlu0 %v429_v22, %s1604_s11 }
  0xeb   : > { %859 = vrot.lane.b32.xlu0 %v429_v22, %s1605_s12 }
  0xef   : > { %1026 = vrot.lane.b32.xlu0 %v429_v22, %s1606_s13 }
 0x159   : > { %v520_v25 = vpop.f32.mrb[0].mxu1  ;;  %v693_v28 = vpop.permute.xlu0 %692 }
 0x15a   : > { %v1720_v26 = vadd.f32 %v520_v25, %v449_v24  ;;  %v1473_v27 = vpop.f32.mrb[1].mxu1 }
 0x15c   : > { %694 = vrot.lane.b32.xlu1 %v1720_v26, %s1604_s11  ;;  %1475 = vmatpush3.xpose.msk.msra.mxu1 %vm525_vm2, %v1720_v26  ;;  %s1612_s11 = smov 24  }
 0x15d   : > { %1479 = vmatprep.subr.mxu1 %v1602_v8  ;;  %v860_v31 = vpop.permute.xlu0 %859 }
 0x15f   : > { %1477 = vmatmul.mubr.msk.f32.vlgmr.msra.gmra.mrb[2].mxu1 %vm525_vm2, %v429_v22 }
 0x160   : > { %861 = vrot.lane.b32.xlu1 %v1720_v26, %s1605_s12  ;;  %1481 = vmatprep.mubr.msk.f32.mxu1 %vm1601_vm0, %v1602_v8 }
 0x161   : > { %v1027_v33 = vpop.permute.xlu0 %1026 }
 0x164   : > { %1028 = vrot.lane.b32.xlu1 %v1720_v26, %s1606_s13 }
 0x1ce   : > { %v695_v29 = vpop.permute.xlu1 %694 }
 0x1cf   : > { %1485 = vmatpush3.xpose.msk.msra.mxu0 %vm525_vm2, %v695_v29 }
 0x1d0   : > { %1494 = vmatprep.subr.mxu0 %v1602_v8 }
 0x1d2   : > { %v862_v30 = vpop.permute.xlu1 %861  ;;  %1487 = vmatmul.mubr.msk.f32.vlgmr.msra.gmra.mrb[2].mxu0 %vm525_vm2, %v693_v28 }
 0x1d3   : > { %1495 = vmatpush3.xpose.msk.msra.mxu0 %vm525_vm2, %v862_v30  ;;  %1496 = vmatprep.mubr.msk.f32.mxu0 %vm1601_vm0, %v1602_v8 }
 0x1d4   : > { %1504 = vmatprep.subr.mxu0 %v1602_v8 }
 0x1d6   : > { %v1029_v32 = vpop.permute.xlu1 %1028  ;;  %1497 = vmatmul.mubr.msk.f32.vlgmr.msra.gmra.mrb[4].mxu0 %vm525_vm2, %v860_v31 }
 0x1d7   : > { %1505 = vmatpush3.xpose.msk.msra.mxu0 %vm525_vm2, %v1029_v32  ;;  %1506 = vmatprep.mubr.msk.f32.mxu0 %vm1601_vm0, %v1602_v8  ;;  %v1210_v32 = vld [vmem:[%s1815_s4] sm:$0xff] }
 0x1d8   : > { %1537 = vmatprep.subr.bf16.mxu0 %v1600_v5 }
 0x1da   : > { %1507 = vmatmul.mubr.msk.f32.vlgmr.msra.gmra.mrb[6].mxu0 %vm525_vm2, %v1027_v33  ;;  %v1211_v33 = vld [vmem:[%s1815_s4 + $0x8] sm:$0xff] }
 0x1db   : > { %1522 = vmatprep.mubr.msk.f32.mxu0 %vm1601_vm0, %v1602_v8 }
 0x232   : > { %v598_v34 = vpop.f32.mrb[2].mxu1 }
 0x233   : > { %v602_v36 = vmul.f32 0.35355338, %v598_v34  ;;  %v1478_v37 = vpop.f32.mrb[3].mxu1  ;;  %v1538_v34 = vpack.c.bf16 %v1211_v33, %v1210_v32 }
 0x235   : > { %v603_v38 = vadd.f32 %v602_v36, %v524_v35  ;;  %1539 = vmatpush3.bf16.msra.mxu0 %v1538_v34 }
 0x236   : > { %1540 = vmatprep.subr.bf16.mxu0 %v1600_v5 }
 0x237   : > { %v605_v39 = vsel %vm604_vm3, %v603_v38, -inf }
 0x238   : > { %606 = vmax.xlane.f32.xlu1 %v605_v39 }
 0x2a5   : > { %v766_v40 = vpop.f32.mrb[2].mxu0 }
 0x2a6   : > { %v770_v41 = vmul.f32 0.35355338, %v766_v40  ;;  %v1488_v42 = vpop.f32.mrb[3].mxu0 }
 0x2a8   : > { %v771_v43 = vadd.f32 %v770_v41, %v524_v35 }
 0x2a9   : > { %v933_v44 = vpop.f32.mrb[4].mxu0 }
 0x2aa   : > { %v937_v45 = vmul.f32 0.35355338, %v933_v44  ;;  %v1498_v46 = vpop.f32.mrb[5].mxu0  ;;  %v772_v47 = vsel %vm604_vm3, %v771_v43, -inf }
 0x2ab   : > { %773 = vmax.xlane.f32.xlu0 %v772_v47 }
 0x2ac   : > { %v938_v48 = vadd.f32 %v937_v45, %v524_v35 }
 0x2ad   : > { %v1100_v49 = vpop.f32.mrb[6].mxu0 }
 0x2ae   : > { %v1104_v50 = vmul.f32 0.35355338, %v1100_v49  ;;  %v1508_v51 = vpop.f32.mrb[7].mxu0  ;;  %v939_v52 = vsel %vm604_vm3, %v938_v48, -inf }
 0x2af   : > { %940 = vmax.xlane.f32.xlu0 %v939_v52 }
 0x2b0   : > { %v1105_v53 = vadd.f32 %v1104_v50, %v524_v35  ;;  %v1213_v35 = vld [vmem:[%s1815_s4 + $0x18] sm:$0xff] }
 0x2b2   : > { %v1106_v54 = vsel %vm604_vm3, %v1105_v53, -inf }
 0x2b3   : > { %1107 = vmax.xlane.f32.xlu1 %v1106_v54 }
 0x2c4   : > { %783 = vrot.lane.b32.xlu1 %v1720_v26, %s1607_s16 }
 0x2c5   : > { %v607_v55 = vpop.xlane.xlu1 %606 }
 0x2c6   : > { %v608_v56 = vsub.f32 %v603_v38, %v607_v55 }
 0x2c8   : > { %v609_v57 = vmul.f32 1.442695, %v608_v56 }
 0x2ca   : > { %1574 = vpow2.f32 %v609_v57 }
 0x2d4   : > { %v1575_v58 = vpop.eup %1574 }
 0x2d5   : > { %v611_v59 = vsel %vm604_vm3, %v1575_v58, 0.0 }
 0x2d6   : > { %612 = vadd.xlane.f32.xlu0 %v611_v59 }
 0x2ec   : > { %616 = vrot.lane.b32.xlu0 %v1720_v26, %s1603_s21 }
 0x338   : > { %v774_v60 = vpop.xlane.xlu0 %773 }
 0x339   : > { %v775_v61 = vsub.f32 %v771_v43, %v774_v60 }
 0x33b   : > { %v776_v62 = vmul.f32 1.442695, %v775_v61 }
 0x33c   : > { %v941_v63 = vpop.xlane.xlu0 %940 }
 0x33d   : > { %1576 = vpow2.f32 %v776_v62  ;;  %v942_v0 = vsub.f32 %v938_v48, %v941_v63  ;;  %v1415_v48 = vld [vmem:[%s1816_s5] ss:$0 sm:$0xff] }
 0x33f   : > { %v943_v1 = vmul.f32 1.442695, %v942_v0  ;;  %v1418_v0 = vld [vmem:[%s1818_s7] ss:$0 sm:$0xff] }
 0x340   : > { %v1108_v2 = vpop.xlane.xlu1 %1107 }
 0x341   : > { %1578 = vpow2.f32 %v943_v1  ;;  %v1109_v3 = vsub.f32 %v1105_v53, %v1108_v2 }
 0x343   : > { %v1110_v4 = vmul.f32 1.442695, %v1109_v3 }
 0x344   : > { %v784_v18 = vpop.permute.xlu1 %783 }
 0x345   : > { %1580 = vpow2.f32 %v1110_v4 }
 0x347   : > { %v1577_v6 = vpop.eup %1576 }
 0x348   : > { %v778_v7 = vsel %vm604_vm3, %v1577_v6, 0.0 }
 0x349   : > { %779 = vadd.xlane.f32.xlu1 %v778_v7 }
 0x34b   : > { %v1579_v9 = vpop.eup %1578 }
 0x34c   : > { %v945_v10 = vsel %vm604_vm3, %v1579_v9, 0.0 }
 0x34d   : > { %946 = vadd.xlane.f32.xlu0 %v945_v10 }
 0x34f   : > { %v1581_v12 = vpop.eup %1580 }
 0x350   : > { %v1112_v13 = vsel %vm604_vm3, %v1581_v12, 0.0 }
 0x351   : > { %1113 = vadd.xlane.f32.xlu1 %v1112_v13 }
 0x362   : > { %950 = vrot.lane.b32.xlu1 %v1720_v26, %s1608_s17 }
 0x363   : > { %1117 = vrot.lane.b32.xlu0 %v1720_v26, %s1609_s18  ;;  %v613_v14 = vpop.xlane.xlu0 %612 }
 0x364   : > { %1582 = vrcp.f32 %v613_v14 }
 0x367   : > { %v617_v15 = vpop.permute.xlu0 %616 }
 0x368   : > { %1480 = vmatpush3.msra.mxu1 %v617_v15 }
 0x369   : > { %1489 = vmatprep.subr.mxu1 %v1602_v8 }
 0x36e   : > { %v1583_v16 = vpop.eup %1582 }
 0x36f   : > { %v615_v17 = vmul.f32 %v1583_v16, %v1575_v58 }
 0x371   : > { %1482 = vmatmul.mubr.msk.f32.vlgmr.msra.gmra.mrb[4].mxu1 %vm525_vm2, %v615_v17 }
 0x372   : > { %1490 = vmatpush3.msra.mxu1 %v784_v18  ;;  %1491 = vmatprep.mubr.msk.f32.mxu1 %vm1601_vm0, %v1602_v8 }
 0x373   : > { %1499 = vmatprep.subr.mxu1 %v1602_v8 }
 0x3d6   : > { %v780_v19 = vpop.xlane.xlu1 %779 }
 0x3d7   : > { %1584 = vrcp.f32 %v780_v19 }
 0x3da   : > { %v947_v20 = vpop.xlane.xlu0 %946 }
 0x3db   : > { %1586 = vrcp.f32 %v947_v20 }
 0x3de   : > { %v1114_v21 = vpop.xlane.xlu1 %1113  ;;  %v1118_v27 = vpop.permute.xlu0 %1117 }
 0x3df   : > { %1588 = vrcp.f32 %v1114_v21 }
 0x3e1   : > { %v1585_v22 = vpop.eup %1584 }
 0x3e2   : > { %v782_v23 = vmul.f32 %v1585_v22, %v1577_v6  ;;  %v951_v24 = vpop.permute.xlu1 %950 }
 0x3e4   : > { %1492 = vmatmul.mubr.msk.f32.vlgmr.msra.gmra.mrb[6].mxu1 %vm525_vm2, %v782_v23 }
 0x3e5   : > { %v1587_v25 = vpop.eup %1586  ;;  %1500 = vmatpush3.msra.mxu1 %v951_v24  ;;  %1501 = vmatprep.mubr.msk.f32.mxu1 %vm1601_vm0, %v1602_v8 }
 0x3e6   : > { %v949_v26 = vmul.f32 %v1587_v25, %v1579_v9  ;;  %1509 = vmatprep.subr.mxu1 %v1602_v8 }
 0x3e8   : > { %1502 = vmatmul.mubr.msk.f32.vlgmr.msra.gmra.mrb[8].mxu1 %vm525_vm2, %v949_v26 }
 0x3e9   : > { %v1589_v28 = vpop.eup %1588  ;;  %1510 = vmatpush3.msra.mxu1 %v1118_v27  ;;  %1511 = vmatprep.mubr.msk.f32.mxu1 %vm1601_vm0, %v1602_v8  ;;  %v1212_v8 = vld [vmem:[%s1815_s4 + $0x10] sm:$0xff] }
 0x3ea   : > { %v1116_v29 = vmul.f32 %v1589_v28, %v1581_v12  ;;  %v1541_v36 = vpack.c.bf16 %v1213_v35, %v1212_v8 }
 0x3ec   : > { %1512 = vmatmul.mubr.msk.f32.vlgmr.msra.gmra.mrb[10].mxu1 %vm525_vm2, %v1116_v29  ;;  %1542 = vmatpush3.bf16.msra.mxu0 %v1541_v36 }
 0x444   : > { %v688_v30 = vpop.f32.mrb[4].mxu1 }
 0x445   : > { %v1483_v31 = vpop.f32.mrb[5].mxu1 }
 0x4b7   : > { %v855_v37 = vpop.f32.mrb[6].mxu1 }
 0x4b8   : > { %1194 = vrot.lane.b32.xlu1 %v855_v37, %s1610_s28  ;;  %v1493_v38 = vpop.f32.mrb[7].mxu1 }
 0x4bb   : > { %v1022_v39 = vpop.f32.mrb[8].mxu1 }
 0x4bc   : > { %1198 = vrot.lane.b32.xlu0 %v1022_v39, %s1611_s29  ;;  %v1503_v40 = vpop.f32.mrb[9].mxu1 }
 0x4bf   : > { %v1189_v41 = vpop.f32.mrb[10].mxu1 }
 0x4c0   : > { %1202 = vrot.lane.b32.xlu1 %v1189_v41, %s1612_s11  ;;  %v1513_v5 = vpop.f32.mrb[11].mxu1 }
 0x52a   : > { %v1195_v42 = vpop.permute.xlu1 %1194 }
 0x52b   : > { %v1205_v44 = vsel %vm525_vm2, %v688_v30, %v1195_v42 }
 0x52e   : > { %v1199_v43 = vpop.permute.xlu0 %1198 }
 0x52f   : > { %v1207_v45 = vsel %vm1206_vm4, %v1205_v44, %v1199_v43 }
 0x532   : > { %v1203_v46 = vpop.permute.xlu1 %1202 }
 0x533   : > { %v1209_v47 = vsel %vm1208_vm5, %v1207_v45, %v1203_v46 }
 0x534   : > { %1523 = vmatmul.mubr.msk.f32.vlgmr.msra.gmra.mrb[8].mxu0 %vm358_vm1, %v1209_v47 }
 0x607   : > { %v1290_v49 = vpop.f32.mrb[8].mxu0 }
 0x608   : > { %v1291_v50 = vadd.f32 %v1415_v48, %v1290_v49  ;;  %v1524_v51 = vpop.f32.mrb[9].mxu0 }
 0x60a   : > { %v1294_v52 = vadd.f32 %v1291_v50, %v1704_v11  ;;  %v1417_v11 = vld [vmem:[%s1817_s6] ss:$0 sm:$0xff] }
 0x60c   : > { %v1298_v53 = vsel %vm1297_vm6, %v1294_v52, 0.0 }
 0x60d   : > { %1299 = vadd.xlane.f32.xlu0 %v1298_v53 }
 0x69a   : > { %v1300_v54 = vpop.xlane.xlu0 %1299 }
 0x69b   : > { %v1302_v55 = vmul.f32 0.03125, %v1300_v54 }
 0x69d   : > { %v1303_v56 = vsub.f32 %v1294_v52, %v1302_v55 }
 0x69f   : > { %v1304_v57 = vmul.f32 %v1303_v56, %v1303_v56 }
 0x6a1   : > { %v1305_v58 = vsel %vm1297_vm6, %v1304_v57, 0.0 }
 0x6a2   : > { %1306 = vadd.xlane.f32.xlu1 %v1305_v58 }
 0x72f   : > { %v1307_v59 = vpop.xlane.xlu1 %1306 }
 0x730   : > { %v1308_v60 = vmul.f32 0.03125, %v1307_v59 }
 0x732   : > { %v1309_v61 = vadd.f32 1e-05, %v1308_v60 }
 0x734   : > { %1590 = vrsqrt.f32 %v1309_v61 }
 0x73e   : > { %v1591_v62 = vpop.eup %1590 }
 0x73f   : > { %v1311_v63 = vmul.f32 %v1591_v62, %v1303_v56 }
 0x741   : > { %v1318_v1 = vmul.f32 %v1417_v11, %v1311_v63 }
 0x743   : > { %v1325_v2 = vadd.f32 %v1418_v0, %v1318_v1 }
 0x745   : > { %1326 = vst.msk [vmem:[%s344_s20] sm:$0xf] %vm1297_vm6, %v1325_v2 }
 0x746 PF: > { %s19_s30 = sadd.s32 1, %s1598_s30  }
 0x747   : > { %p16_p4 = scmp.ge.s32.totalorder %s19_s30, 4  }
 0x749   :  { %18 = sbr.rel (!%p16_p4) target bundleno = 1 (0x1), region = 89 }

// kernel: model_forward.27
= control target key start
LH: loop header
LB: loop body
LE: loop exit
PB: predicated region body
PF: predicated region fallthrough
CT: control target
= control target key end

     0   :  { %v133_v0 = vmov 0.0|0.0   ;;  %vm134_vm0 = vmmov 0   ;;  %v135_v4 = vmov 0.0   ;;  %vm26_vm1 = vcmask 261120   ;;  %s177_s1 = inlined_call_operand.vmem [shape: f32[32,32], index: 1, kind: input, shape index: {}]   ;;  %s178_s0 = inlined_call_operand.vmem [shape: f32[2,32], index: 0, kind: input, shape index: {}]   ;;  %s179_s2 = inlined_call_operand.vmem [shape: f32[1,32], index: 2, kind: input, shape index: {}]   ;;  %s180_s3 = inlined_call_operand.vmem [shape: f32[2,32], index: 3, kind: output, shape index: {}]  }
   0x1   :  { %124 = vmatprep.subr.bf16.mxu0 %v133_v0  ;;  %v15_v1 = vld [vmem:[%s177_s1] sm:$0xff]  ;;  %v16_v2 = vld [vmem:[%s177_s1 + $0x8] sm:$0xff]  ;;  %v17_v3 = vld [vmem:[%s177_s1 + $0x10] sm:$0xff]  ;;  %121 = vmatprep.mubr.msk.f32.mxu0 %vm134_vm0, %v135_v4  ;;  %vm100_vm2 = vcmask 254976  }
   0x2   :  { %v125_v5 = vpack.c.bf16 %v16_v2, %v15_v1  ;;  %v18_v6 = vld [vmem:[%s177_s1 + $0x18] sm:$0xff]  ;;  %v14_v8 = vld [vmem:[%s178_s0] sm:$0x3] }
   0x3   :  { %v128_v7 = vpack.c.bf16 %v18_v6, %v17_v3  ;;  %v106_v9 = vld [vmem:[%s179_s2] ss:$0 sm:$0xff] }
   0x4   :  { %126 = vmatpush3.bf16.msra.mxu0 %v125_v5 }
   0x5   :  { %127 = vmatprep.subr.bf16.mxu0 %v133_v0 }
   0x8   :  { %129 = vmatpush3.bf16.msra.mxu0 %v128_v7 }
   0xb   :  { %122 = vmatmul.mubr.msk.f32.vlgmr.msra.gmra.mrb[0].mxu0 %vm26_vm1, %v14_v8 }
  0xde   :  { %v96_v10 = vpop.f32.mrb[0].mxu0 }
  0xdf   :  { %v97_v11 = vadd.f32 %v106_v9, %v96_v10  ;;  %v123_v12 = vpop.f32.mrb[1].mxu0 }
  0xe1   :  { %101 = vst.msk [vmem:[%s180_s3] sm:$0x3] %vm100_vm2, %v97_v11 }

// kernel: model_forward.22
= control target key start
LH: loop header
LB: loop body
LE: loop exit
PB: predicated region body
PF: predicated region fallthrough
CT: control target
= control target key end

     0   :  { %s1671_s30 = smov 0   ;;  %s1823_s0 = inlined_call_operand.vmem [shape: f32[2,8,32], index: 0, kind: input, shape index: {}]   ;;  %s1824_s1 = inlined_call_operand.vmem [shape: f32[2,4,32], index: 1, kind: input, shape index: {}]   ;;  %s1825_s2 = inlined_call_operand.vmem [shape: f32[32,96], index: 2, kind: input, shape index: {}]   ;;  %s1826_s3 = inlined_call_operand.vmem [shape: f32[1,96], index: 3, kind: input, shape index: {}]   ;;  %s1827_s4 = inlined_call_operand.vmem [shape: f32[32,32], index: 4, kind: input, shape index: {}]   ;;  %s1828_s5 = inlined_call_operand.vmem [shape: f32[1,32], index: 5, kind: input, shape index: {}]   ;;  %s1829_s6 = inlined_call_operand.vmem [shape: f32[1,32], index: 6, kind: input, shape index: {}]   ;;  %s1830_s7 = inlined_call_operand.vmem [shape: f32[1,32], index: 7, kind: input, shape index: {}]   ;;  %s1831_s8 = inlined_call_operand.vmem [shape: f32[8,4], index: 8, kind: input, shape index: {}]   ;;  %s1832_s9 = inlined_call_operand.vmem [shape: f32[2,8,32], index: 9, kind: output, shape index: {}]  }
   0x1 LB: > { %s1396_s10 = sadd.s32 4294967295, %s1606_s30   ;;  %p1400_p0 = scmp.ge.s32.totalorder %s1606_s30, 1  ;;  %s1606_s30 = sphi %s1671_s30, %s19_s30  }
   0x2   : > { %p295_p1 = scmp.lt.s32.totalorder %s1606_s30, 3 }
   0x4   : > { %p296_p2 = pnand %p1400_p0, %p295_p1 }
   0x5   : > { %v346_v0 = vld [vmem:[%s1825_s2] sm:$0xff] (!%p296_p2)  ;;  %v347_v1 = vld [vmem:[%s1825_s2 + $0x8] sm:$0xff] (!%p296_p2)  ;;  %v348_v2 = vld [vmem:[%s1825_s2 + $0x10] sm:$0xff] (!%p296_p2)  ;;  %v1608_v5 = vmov (!%p296_p2), 0.0|0.0   ;;  %p333_p3 = scmp.lt.s32.totalorder (!%p296_p2), %s1396_s10, 1  ;;  %vm1609_vm0 = vmmov (!%p296_p2), 0  }
   0x6   : > { %299 = sbr.rel (%p296_p2) target bundleno = 1862 (0x746), region = 56  ;;  %v1572_v3 = vpack.i.bf16 (!%p296_p2), %v347_v1, %v346_v0  ;;  %v349_v4 = vld [vmem:[%s1825_s2 + $0x18] sm:$0xff] (!%p296_p2)  ;;  %1533 = vmatprep.subr.bf16.mxu0 (!%p296_p2), %v1608_v5  ;;  %v1534_v6 = vpack.c.bf16 (!%p296_p2), %v347_v1, %v346_v0  ;;  %1539 = vmatprep.subr.bf16.mxu1 (!%p296_p2), %v1608_v5  ;;  %v1404_v7 = vld [vmem:[%s1826_s3] ss:$0 sm:$0xff] (!%p296_p2)  ;;  %v1610_v8 = vmov (!%p296_p2), 0.0   ;;  %s1611_s21 = smov (!%p296_p2), 96  }
   0x7   : > { %1468 = vmatprep.mubr.msk.f32.mxu0 (!%p296_p2), %vm1609_vm0, %v1610_v8  ;;  %1479 = vmatprep.mubr.msk.f32.mxu1 (!%p296_p2), %vm1609_vm0, %v1610_v8  ;;  %v1577_v9 = vpack.i.bf16 (!%p296_p2), %v349_v4, %v348_v2  ;;  %v1537_v10 = vpack.c.bf16 (!%p296_p2), %v349_v4, %v348_v2  ;;  %vm358_vm1 = vcmask (!%p296_p2), 261120   ;;  %s1612_s11 = smov (!%p296_p2), 120   ;;  %s1613_s12 = smov (!%p296_p2), 112   ;;  %vm525_vm2 = vcmask (!%p296_p2), 64512   ;;  %v524_v35 = vld [vmem:[%s1831_s8] sm:$0xff] (!%p296_p2) }
   0x8   : > { %1573 = vrot.lane.b32.xlu0 (!%p296_p2), %v1572_v3, %s1611_s21  ;;  %1535 = vmatpush3.bf16.msra.mxu0 (!%p296_p2), %v1534_v6  ;;  %s1614_s13 = smov (!%p296_p2), 104   ;;  %vm604_vm3 = vcmask (!%p296_p2), 31744   ;;  %s1615_s16 = smov (!%p296_p2), 88   ;;  %vm621_vm4 = vcmask (!%p296_p2), 1043456   ;;  %vm1211_vm5 = vcmask (!%p296_p2), 130048   ;;  %vm1213_vm6 = vcmask (!%p296_p2), 195584  }
   0x9   : > { %1536 = vmatprep.subr.bf16.mxu0 (!%p296_p2), %v1608_v5  ;;  %448 = vrot.lane.b32.xlu1 (!%p296_p2), %v1404_v7, %s1611_s21  ;;  %s1616_s17 = smov (!%p296_p2), 80   ;;  %s1617_s18 = smov (!%p296_p2), 72  }
   0xa   : > { %s1618_s28 = smov (!%p296_p2), 8  }
   0xc   : > { %1578 = vrot.lane.b32.xlu0 (!%p296_p2), %v1577_v9, %s1611_s21  ;;  %1538 = vmatpush3.bf16.msra.mxu0 (!%p296_p2), %v1537_v10 }
   0xd   : > { %s1834_s10 = smov (!%p333_p3, %s1396_s10), 1  ;;  %1492 = vmatprep.subr.mxu0 %v1610_v8 }
   0xe   : > { %s1401_s22 = sshll.u32 %s1834_s10, 3  ;;  %s1402_s26 = sshll.u32 %s1834_s10, 2 }
   0xf   : > { %s336_s25 = scalar_lea.vmem %s1823_s0, %s1401_s22  ;;  %s340_s29 = scalar_lea.vmem %s1824_s1, %s1402_s26 }
  0x10   : > { %v1712_v11 = vld [vmem:[%s336_s25] sm:$0xff]  ;;  %s344_s20 = scalar_lea.vmem %s1832_s9, %s1401_s22 }
  0x11   : > { %1469 = vmatmul.mubr.msk.f32.vlgmr.msra.gmra.mrb[0].mxu0 %vm358_vm1, %v1712_v11  ;;  %v351_v20 = vld [vmem:[%s340_s29] sm:$0xf]  ;;  %s1619_s29 = smov 16  }
  0x12   : > { %1494 = vmatprep.mubr.msk.f32.mxu0 %vm1609_vm0, %v1610_v8 }
  0x7a   : > { %v1574_v12 = vpop.permute.xlu0 %1573 }
  0x7b   : > { %v1576_v13 = vunpack.i.h.bf16 %v1574_v12  ;;  %v1575_v14 = vunpack.i.l.bf16 %v1574_v12  ;;  %v449_v24 = vpop.permute.xlu1 %448 }
  0x7d   : > { %v1540_v15 = vpack.c.bf16 %v1576_v13, %v1575_v14 }
  0x7e   : > { %v1579_v16 = vpop.permute.xlu0 %1578 }
  0x7f   : > { %v1581_v17 = vunpack.i.h.bf16 %v1579_v16  ;;  %v1580_v18 = vunpack.i.l.bf16 %v1579_v16  ;;  %1541 = vmatpush3.bf16.msra.mxu1 %v1540_v15 }
  0x80   : > { %1542 = vmatprep.subr.bf16.mxu1 %v1608_v5 }
  0x81   : > { %v1543_v19 = vpack.c.bf16 %v1581_v17, %v1580_v18 }
  0x83   : > { %1544 = vmatpush3.bf16.msra.mxu1 %v1543_v19 }
  0x84   : > { %1482 = vmatprep.subr.mxu1 %v1610_v8 }
  0x86   : > { %1480 = vmatmul.mubr.msk.f32.vlgmr.msra.gmra.mrb[0].mxu1 %vm358_vm1, %v351_v20 }
  0x87   : > { %1484 = vmatprep.mubr.msk.f32.mxu1 %vm1609_vm0, %v1610_v8 }
  0xe4   : > { %v428_v21 = vpop.f32.mrb[0].mxu0 }
  0xe5   : > { %v429_v22 = vadd.f32 %v1404_v7, %v428_v21  ;;  %v1470_v23 = vpop.f32.mrb[1].mxu0 }
  0xe7   : > { %694 = vrot.lane.b32.xlu0 %v429_v22, %s1612_s11 }
  0xeb   : > { %862 = vrot.lane.b32.xlu0 %v429_v22, %s1613_s12 }
  0xef   : > { %1030 = vrot.lane.b32.xlu0 %v429_v22, %s1614_s13 }
 0x159   : > { %v520_v25 = vpop.f32.mrb[0].mxu1  ;;  %v695_v28 = vpop.permute.xlu0 %694 }
 0x15a   : > { %v1728_v26 = vadd.f32 %v520_v25, %v449_v24  ;;  %v1481_v27 = vpop.f32.mrb[1].mxu1 }
 0x15c   : > { %696 = vrot.lane.b32.xlu1 %v1728_v26, %s1612_s11  ;;  %1483 = vmatpush3.xpose.msk.msra.mxu1 %vm525_vm2, %v1728_v26  ;;  %s1620_s11 = smov 24  }
 0x15d   : > { %1487 = vmatprep.subr.mxu1 %v1610_v8  ;;  %v863_v31 = vpop.permute.xlu0 %862 }
 0x15f   : > { %1485 = vmatmul.mubr.msk.f32.vlgmr.msra.gmra.mrb[2].mxu1 %vm525_vm2, %v429_v22 }
 0x160   : > { %864 = vrot.lane.b32.xlu1 %v1728_v26, %s1613_s12  ;;  %1489 = vmatprep.mubr.msk.f32.mxu1 %vm1609_vm0, %v1610_v8 }
 0x161   : > { %v1031_v33 = vpop.permute.xlu0 %1030 }
 0x164   : > { %1032 = vrot.lane.b32.xlu1 %v1728_v26, %s1614_s13 }
 0x1ce   : > { %v697_v29 = vpop.permute.xlu1 %696 }
 0x1cf   : > { %1493 = vmatpush3.xpose.msk.msra.mxu0 %vm525_vm2, %v697_v29 }
 0x1d0   : > { %1502 = vmatprep.subr.mxu0 %v1610_v8 }
 0x1d2   : > { %v865_v30 = vpop.permute.xlu1 %864  ;;  %1495 = vmatmul.mubr.msk.f32.vlgmr.msra.gmra.mrb[2].mxu0 %vm525_vm2, %v695_v28 }
 0x1d3   : > { %1503 = vmatpush3.xpose.msk.msra.mxu0 %vm525_vm2, %v865_v30  ;;  %1504 = vmatprep.mubr.msk.f32.mxu0 %vm1609_vm0, %v1610_v8 }
 0x1d4   : > { %1512 = vmatprep.subr.mxu0 %v1610_v8 }
 0x1d6   : > { %v1033_v32 = vpop.permute.xlu1 %1032  ;;  %1505 = vmatmul.mubr.msk.f32.vlgmr.msra.gmra.mrb[4].mxu0 %vm525_vm2, %v863_v31 }
 0x1d7   : > { %1513 = vmatpush3.xpose.msk.msra.mxu0 %vm525_vm2, %v1033_v32  ;;  %1514 = vmatprep.mubr.msk.f32.mxu0 %vm1609_vm0, %v1610_v8  ;;  %v1215_v32 = vld [vmem:[%s1827_s4] sm:$0xff] }
 0x1d8   : > { %1545 = vmatprep.subr.bf16.mxu0 %v1608_v5 }
 0x1da   : > { %1515 = vmatmul.mubr.msk.f32.vlgmr.msra.gmra.mrb[6].mxu0 %vm525_vm2, %v1031_v33  ;;  %v1216_v33 = vld [vmem:[%s1827_s4 + $0x8] sm:$0xff] }
 0x1db   : > { %1530 = vmatprep.mubr.msk.f32.mxu0 %vm1609_vm0, %v1610_v8 }
 0x232   : > { %v598_v34 = vpop.f32.mrb[2].mxu1 }
 0x233   : > { %v602_v36 = vmul.f32 0.35355338, %v598_v34  ;;  %v1486_v37 = vpop.f32.mrb[3].mxu1  ;;  %v1546_v34 = vpack.c.bf16 %v1216_v33, %v1215_v32 }
 0x235   : > { %v603_v38 = vadd.f32 %v602_v36, %v524_v35  ;;  %1547 = vmatpush3.bf16.msra.mxu0 %v1546_v34 }
 0x236   : > { %1548 = vmatprep.subr.bf16.mxu0 %v1608_v5 }
 0x237   : > { %v605_v39 = vsel %vm604_vm3, %v603_v38, -inf }
 0x238   : > { %606 = vmax.xlane.f32.xlu1 %v605_v39 }
 0x2a5   : > { %v768_v40 = vpop.f32.mrb[2].mxu0 }
 0x2a6   : > { %v772_v41 = vmul.f32 0.35355338, %v768_v40  ;;  %v1496_v42 = vpop.f32.mrb[3].mxu0 }
 0x2a8   : > { %v773_v43 = vadd.f32 %v772_v41, %v524_v35 }
 0x2a9   : > { %v936_v44 = vpop.f32.mrb[4].mxu0 }
 0x2aa   : > { %v940_v45 = vmul.f32 0.35355338, %v936_v44  ;;  %v1506_v46 = vpop.f32.mrb[5].mxu0  ;;  %v774_v47 = vsel %vm604_vm3, %v773_v43, -inf }
 0x2ab   : > { %775 = vmax.xlane.f32.xlu0 %v774_v47 }
 0x2ac   : > { %v941_v48 = vadd.f32 %v940_v45, %v524_v35 }
 0x2ad   : > { %v1104_v49 = vpop.f32.mrb[6].mxu0 }
 0x2ae   : > { %v1108_v50 = vmul.f32 0.35355338, %v1104_v49  ;;  %v1516_v51 = vpop.f32.mrb[7].mxu0  ;;  %v942_v52 = vsel %vm604_vm3, %v941_v48, -inf }
 0x2af   : > { %943 = vmax.xlane.f32.xlu0 %v942_v52 }
 0x2b0   : > { %v1109_v53 = vadd.f32 %v1108_v50, %v524_v35  ;;  %v1218_v35 = vld [vmem:[%s1827_s4 + $0x18] sm:$0xff] }
 0x2b2   : > { %v1110_v54 = vsel %vm604_vm3, %v1109_v53, -inf }
 0x2b3   : > { %1111 = vmax.xlane.f32.xlu1 %v1110_v54 }
 0x2c4   : > { %785 = vrot.lane.b32.xlu1 %v1728_v26, %s1615_s16 }
 0x2c5   : > { %v607_v55 = vpop.xlane.xlu1 %606 }
 0x2c6   : > { %v608_v56 = vsub.f32 %v603_v38, %v607_v55 }
 0x2c8   : > { %v609_v57 = vmul.f32 1.442695, %v608_v56 }
 0x2ca   : > { %1582 = vpow2.f32 %v609_v57 }
 0x2d4   : > { %v1583_v58 = vpop.eup %1582 }
 0x2d5   : > { %v611_v59 = vsel %vm604_vm3, %v1583_v58, 0.0 }
 0x2d6   : > { %612 = vadd.xlane.f32.xlu0 %v611_v59 }
 0x2ec   : > { %616 = vrot.lane.b32.xlu0 %v1728_v26, %s1611_s21 }
 0x338   : > { %v776_v60 = vpop.xlane.xlu0 %775 }
 0x339   : > { %v777_v61 = vsub.f32 %v773_v43, %v776_v60 }
 0x33b   : > { %v778_v62 = vmul.f32 1.442695, %v777_v61 }
 0x33c   : > { %v944_v63 = vpop.xlane.xlu0 %943 }
 0x33d   : > { %1584 = vpow2.f32 %v778_v62  ;;  %v945_v0 = vsub.f32 %v941_v48, %v944_v63  ;;  %v1423_v48 = vld [vmem:[%s1828_s5] ss:$0 sm:$0xff] }
 0x33f   : > { %v946_v1 = vmul.f32 1.442695, %v945_v0  ;;  %v1426_v0 = vld [vmem:[%s1830_s7] ss:$0 sm:$0xff] }
 0x340   : > { %v1112_v2 = vpop.xlane.xlu1 %1111 }
 0x341   : > { %1586 = vpow2.f32 %v946_v1  ;;  %v1113_v3 = vsub.f32 %v1109_v53, %v1112_v2 }
 0x343   : > { %v1114_v4 = vmul.f32 1.442695, %v1113_v3 }
 0x344   : > { %v786_v18 = vpop.permute.xlu1 %785 }
 0x345   : > { %1588 = vpow2.f32 %v1114_v4 }
 0x347   : > { %v1585_v6 = vpop.eup %1584 }
 0x348   : > { %v780_v7 = vsel %vm604_vm3, %v1585_v6, 0.0 }
 0x349   : > { %781 = vadd.xlane.f32.xlu1 %v780_v7 }
 0x34b   : > { %v1587_v9 = vpop.eup %1586 }
 0x34c   : > { %v948_v10 = vsel %vm604_vm3, %v1587_v9, 0.0 }
 0x34d   : > { %949 = vadd.xlane.f32.xlu0 %v948_v10 }
 0x34f   : > { %v1589_v12 = vpop.eup %1588 }
 0x350   : > { %v1116_v13 = vsel %vm604_vm3, %v1589_v12, 0.0 }
 0x351   : > { %1117 = vadd.xlane.f32.xlu1 %v1116_v13 }
 0x362   : > { %953 = vrot.lane.b32.xlu1 %v1728_v26, %s1616_s17 }
 0x363   : > { %1121 = vrot.lane.b32.xlu0 %v1728_v26, %s1617_s18  ;;  %v613_v14 = vpop.xlane.xlu0 %612 }
 0x364   : > { %1590 = vrcp.f32 %v613_v14 }
 0x367   : > { %v617_v15 = vpop.permute.xlu0 %616 }
 0x368   : > { %1488 = vmatpush3.msk.msra.mxu1 %vm621_vm4, %v617_v15 }
 0x369   : > { %1497 = vmatprep.subr.mxu1 %v1610_v8 }
 0x36e   : > { %v1591_v16 = vpop.eup %1590 }
 0x36f   : > { %v615_v17 = vmul.f32 %v1591_v16, %v1583_v58 }
 0x371   : > { %1490 = vmatmul.mubr.msk.f32.vlgmr.msra.gmra.mrb[4].mxu1 %vm604_vm3, %v615_v17 }
 0x372   : > { %1498 = vmatpush3.msk.msra.mxu1 %vm621_vm4, %v786_v18  ;;  %1499 = vmatprep.mubr.msk.f32.mxu1 %vm1609_vm0, %v1610_v8 }
 0x373   : > { %1507 = vmatprep.subr.mxu1 %v1610_v8 }
 0x3d6   : > { %v782_v19 = vpop.xlane.xlu1 %781 }
 0x3d7   : > { %1592 = vrcp.f32 %v782_v19 }
 0x3da   : > { %v950_v20 = vpop.xlane.xlu0 %949 }
 0x3db   : > { %1594 = vrcp.f32 %v950_v20 }
 0x3de   : > { %v1118_v21 = vpop.xlane.xlu1 %1117  ;;  %v1122_v27 = vpop.permute.xlu0 %1121 }
 0x3df   : > { %1596 = vrcp.f32 %v1118_v21 }
 0x3e1   : > { %v1593_v22 = vpop.eup %1592 }
 0x3e2   : > { %v784_v23 = vmul.f32 %v1593_v22, %v1585_v6  ;;  %v954_v24 = vpop.permute.xlu1 %953 }
 0x3e4   : > { %1500 = vmatmul.mubr.msk.f32.vlgmr.msra.gmra.mrb[6].mxu1 %vm604_vm3, %v784_v23 }
 0x3e5   : > { %v1595_v25 = vpop.eup %1594  ;;  %1508 = vmatpush3.msk.msra.mxu1 %vm621_vm4, %v954_v24  ;;  %1509 = vmatprep.mubr.msk.f32.mxu1 %vm1609_vm0, %v1610_v8 }
 0x3e6   : > { %v952_v26 = vmul.f32 %v1595_v25, %v1587_v9  ;;  %1517 = vmatprep.subr.mxu1 %v1610_v8 }
 0x3e8   : > { %1510 = vmatmul.mubr.msk.f32.vlgmr.msra.gmra.mrb[8].mxu1 %vm604_vm3, %v952_v26 }
 0x3e9   : > { %v1597_v28 = vpop.eup %1596  ;;  %1518 = vmatpush3.msk.msra.mxu1 %vm621_vm4, %v1122_v27  ;;  %1519 = vmatprep.mubr.msk.f32.mxu1 %vm1609_vm0, %v1610_v8  ;;  %v1217_v8 = vld [vmem:[%s1827_s4 + $0x10] sm:$0xff] }
 0x3ea   : > { %v1120_v29 = vmul.f32 %v1597_v28, %v1589_v12  ;;  %v1549_v36 = vpack.c.bf16 %v1218_v35, %v1217_v8 }
 0x3ec   : > { %1520 = vmatmul.mubr.msk.f32.vlgmr.msra.gmra.mrb[10].mxu1 %vm604_vm3, %v1120_v29  ;;  %1550 = vmatpush3.bf16.msra.mxu0 %v1549_v36 }
 0x444   : > { %v690_v30 = vpop.f32.mrb[4].mxu1 }
 0x445   : > { %v1491_v31 = vpop.f32.mrb[5].mxu1 }
 0x4b7   : > { %v858_v37 = vpop.f32.mrb[6].mxu1 }
 0x4b8   : > { %1199 = vrot.lane.b32.xlu1 %v858_v37, %s1618_s28  ;;  %v1501_v38 = vpop.f32.mrb[7].mxu1 }
 0x4bb   : > { %v1026_v39 = vpop.f32.mrb[8].mxu1 }
 0x4bc   : > { %1203 = vrot.lane.b32.xlu0 %v1026_v39, %s1619_s29  ;;  %v1511_v40 = vpop.f32.mrb[9].mxu1 }
 0x4bf   : > { %v1194_v41 = vpop.f32.mrb[10].mxu1 }
 0x4c0   : > { %1207 = vrot.lane.b32.xlu1 %v1194_v41, %s1620_s11  ;;  %v1521_v5 = vpop.f32.mrb[11].mxu1 }
 0x52a   : > { %v1200_v42 = vpop.permute.xlu1 %1199 }
 0x52b   : > { %v1210_v44 = vsel %vm525_vm2, %v690_v30, %v1200_v42 }
 0x52e   : > { %v1204_v43 = vpop.permute.xlu0 %1203 }
 0x52f   : > { %v1212_v45 = vsel %vm1211_vm5, %v1210_v44, %v1204_v43 }
 0x532   : > { %v1208_v46 = vpop.permute.xlu1 %1207 }
 0x533   : > { %v1214_v47 = vsel %vm1213_vm6, %v1212_v45, %v1208_v46 }
 0x534   : > { %1531 = vmatmul.mubr.msk.f32.vlgmr.msra.gmra.mrb[8].mxu0 %vm358_vm1, %v1214_v47 }
 0x607   : > { %v1295_v49 = vpop.f32.mrb[8].mxu0 }
 0x608   : > { %v1296_v50 = vadd.f32 %v1423_v48, %v1295_v49  ;;  %v1532_v51 = vpop.f32.mrb[9].mxu0 }
 0x60a   : > { %v1299_v52 = vadd.f32 %v1296_v50, %v1712_v11  ;;  %v1425_v11 = vld [vmem:[%s1829_s6] ss:$0 sm:$0xff] }
 0x60c   : > { %v1302_v53 = vsel %vm358_vm1, %v1299_v52, 0.0 }
 0x60d   : > { %1303 = vadd.xlane.f32.xlu0 %v1302_v53 }
 0x69a   : > { %v1304_v54 = vpop.xlane.xlu0 %1303 }
 0x69b   : > { %v1306_v55 = vmul.f32 0.03125, %v1304_v54 }
 0x69d   : > { %v1307_v56 = vsub.f32 %v1299_v52, %v1306_v55 }
 0x69f   : > { %v1308_v57 = vmul.f32 %v1307_v56, %v1307_v56 }
 0x6a1   : > { %v1309_v58 = vsel %vm358_vm1, %v1308_v57, 0.0 }
 0x6a2   : > { %1310 = vadd.xlane.f32.xlu1 %v1309_v58 }
 0x72f   : > { %v1311_v59 = vpop.xlane.xlu1 %1310 }
 0x730   : > { %v1312_v60 = vmul.f32 0.03125, %v1311_v59 }
 0x732   : > { %v1313_v61 = vadd.f32 1e-05, %v1312_v60 }
 0x734   : > { %1598 = vrsqrt.f32 %v1313_v61 }
 0x73e   : > { %v1599_v62 = vpop.eup %1598 }
 0x73f   : > { %v1315_v63 = vmul.f32 %v1599_v62, %v1307_v56 }
 0x741   : > { %v1322_v1 = vmul.f32 %v1425_v11, %v1315_v63 }
 0x743   : > { %v1329_v2 = vadd.f32 %v1426_v0, %v1322_v1 }
 0x745   : > { %1330 = vst.msk [vmem:[%s344_s20] sm:$0xff] %vm358_vm1, %v1329_v2 }
 0x746 PF: > { %s19_s30 = sadd.s32 1, %s1606_s30  }
 0x747   : > { %p16_p4 = scmp.ge.s32.totalorder %s19_s30, 4  }
 0x749   :  { %18 = sbr.rel (!%p16_p4) target bundleno = 1 (0x1), region = 89 }

// kernel: model_forward.21
= control target key start
LH: loop header
LB: loop body
LE: loop exit
PB: predicated region body
PF: predicated region fallthrough
CT: control target
= control target key end

     0   :  { %s677_s24 = smov 0   ;;  %s752_s0 = inlined_call_operand.vmem [shape: f32[2,4,32], index: 0, kind: input, shape index: {}]   ;;  %s753_s1 = inlined_call_operand.vmem [shape: f32[32,64], index: 1, kind: input, shape index: {}]   ;;  %s754_s2 = inlined_call_operand.vmem [shape: f32[1,64], index: 2, kind: input, shape index: {}]   ;;  %s755_s3 = inlined_call_operand.vmem [shape: f32[64,32], index: 3, kind: input, shape index: {}]   ;;  %s756_s4 = inlined_call_operand.vmem [shape: f32[1,32], index: 4, kind: input, shape index: {}]   ;;  %s757_s5 = inlined_call_operand.vmem [shape: f32[1,32], index: 5, kind: input, shape index: {}]   ;;  %s758_s6 = inlined_call_operand.vmem [shape: f32[1,32], index: 6, kind: input, shape index: {}]   ;;  %s759_s7 = inlined_call_operand.vmem [shape: f32[2,4,32], index: 7, kind: output, shape index: {}]  }
   0x1 LB: > { %s536_s25 = sadd.s32 4294967295, %s632_s24   ;;  %p540_p0 = scmp.ge.s32.totalorder %s632_s24, 1  ;;  %s632_s24 = sphi %s677_s24, %s17_s24  }
   0x2   : > { %p236_p1 = scmp.lt.s32.totalorder %s632_s24, 3 }
   0x4   : > { %p237_p2 = pnand %p540_p0, %p236_p1 }
   0x5   : > { %v275_v0 = vld [vmem:[%s753_s1] sm:$0xff] (!%p237_p2)  ;;  %v276_v1 = vld [vmem:[%s753_s1 + $0x8] sm:$0xff] (!%p237_p2)  ;;  %v277_v2 = vld [vmem:[%s753_s1 + $0x10] sm:$0xff] (!%p237_p2)  ;;  %v634_v3 = vmov (!%p237_p2), 0.0|0.0   ;;  %vm635_vm0 = vmmov (!%p237_p2), 0   ;;  %v636_v6 = vmov (!%p237_p2), 0.0  }
   0x6   : > { %240 = sbr.rel (%p237_p2) target bundleno = 763 (0x2fb), region = 48  ;;  %595 = vmatprep.subr.bf16.mxu0 (!%p237_p2), %v634_v3  ;;  %v596_v4 = vpack.c.bf16 (!%p237_p2), %v276_v1, %v275_v0  ;;  %v278_v5 = vld [vmem:[%s753_s1 + $0x18] sm:$0xff] (!%p237_p2)  ;;  %573 = vmatprep.mubr.msk.f32.mxu0 (!%p237_p2), %vm635_vm0, %v636_v6  ;;  %p266_p3 = scmp.lt.s32.totalorder (!%p237_p2), %s536_s25, 1  ;;  %v361_v7 = vld [vmem:[%s755_s3] sm:$0xff] (!%p237_p2)  ;;  %v362_v8 = vld [vmem:[%s755_s3 + $0x8] sm:$0xff] (!%p237_p2)  ;;  %vm286_vm1 = vcmask (!%p237_p2), 261120  }
   0x7   : > { %601 = vmatprep.subr.bf16.mxu1 (!%p237_p2), %v634_v3  ;;  %v602_v9 = vpack.c.bf16 (!%p237_p2), %v362_v8, %v361_v7  ;;  %v363_v10 = vld [vmem:[%s755_s3 + $0x10] sm:$0xff] (!%p237_p2)  ;;  %v364_v11 = vld [vmem:[%s755_s3 + $0x18] sm:$0xff] (!%p237_p2)  ;;  %592 = vmatprep.mubr.msk.f32.mxu1 (!%p237_p2), %vm635_vm0, %v636_v6  ;;  %v599_v12 = vpack.c.bf16 (!%p237_p2), %v278_v5, %v277_v2  ;;  %v365_v14 = vld [vmem:[%s755_s3 + $0x20] sm:$0xff] (!%p237_p2)  ;;  %vm376_vm2 = vcmask (!%p237_p2), 523264   ;;  %vm453_vm3 = vcmask (!%p237_p2), 257024  }
   0x8   : > { %597 = vmatpush3.bf16.msra.mxu0 (!%p237_p2), %v596_v4  ;;  %v605_v13 = vpack.c.bf16 (!%p237_p2), %v364_v11, %v363_v10  ;;  %v366_v15 = vld [vmem:[%s755_s3 + $0x28] sm:$0xff] (!%p237_p2)  ;;  %v367_v18 = vld [vmem:[%s755_s3 + $0x30] sm:$0xff] (!%p237_p2)  ;;  %v368_v19 = vld [vmem:[%s755_s3 + $0x38] sm:$0xff] (!%p237_p2) }
   0x9   : > { %598 = vmatprep.subr.bf16.mxu0 (!%p237_p2), %v634_v3  ;;  %603 = vmatpush3.bf16.msra.mxu1 (!%p237_p2), %v602_v9  ;;  %v608_v17 = vpack.c.bf16 (!%p237_p2), %v366_v15, %v365_v14  ;;  %v611_v20 = vpack.c.bf16 (!%p237_p2), %v368_v19, %v367_v18  ;;  %v543_v21 = vld [vmem:[%s754_s2] ss:$0 sm:$0xff] (!%p237_p2) }
   0xa   : > { %604 = vmatprep.subr.bf16.mxu1 (!%p237_p2), %v634_v3  ;;  %v545_v26 = vld [vmem:[%s756_s4] ss:$0 sm:$0xff] (!%p237_p2) }
   0xb   : > { %v547_v41 = vld [vmem:[%s757_s5] ss:$0 sm:$0xff] (!%p237_p2) }
   0xc   : > { %600 = vmatpush3.bf16.msra.mxu0 (!%p237_p2), %v599_v12  ;;  %v548_v43 = vld [vmem:[%s758_s6] ss:$0 sm:$0xff] (!%p237_p2) }
   0xd   : > { %s761_s25 = smov (!%p266_p3, %s536_s25), 1  ;;  %606 = vmatpush3.bf16.msra.mxu1 %v605_v13 }
   0xe   : > { %s541_s19 = sshll.u32 %s761_s25, 2  ;;  %607 = vmatprep.subr.bf16.mxu1 %v634_v3 }
   0xf   : > { %s269_s28 = scalar_lea.vmem %s752_s0, %s541_s19  ;;  %s273_s21 = scalar_lea.vmem %s759_s7, %s541_s19 }
  0x10   : > { %v274_v16 = vld [vmem:[%s269_s28] sm:$0xf] }
  0x11   : > { %574 = vmatmul.mubr.msk.f32.vlgmr.msra.gmra.mrb[0].mxu0 %vm286_vm1, %v274_v16  ;;  %609 = vmatpush3.bf16.msra.mxu1 %v608_v17 }
  0x12   : > { %610 = vmatprep.subr.bf16.mxu1 %v634_v3 }
  0x15   : > { %612 = vmatpush3.bf16.msra.mxu1 %v611_v20 }
  0xe4   : > { %v356_v22 = vpop.f32.mrb[0].mxu0 }
  0xe5   : > { %v357_v23 = vadd.f32 %v543_v21, %v356_v22  ;;  %v575_v24 = vpop.f32.mrb[1].mxu0 }
  0xe7   : > { %v360_v25 = vmax.f32 %v357_v23, 0.0 }
  0xe9   : > { %593 = vmatmul.mubr.msk.f32.vlgmr.msra.gmra.mrb[0].mxu1 %vm376_vm2, %v360_v25 }
 0x1bc   : > { %v446_v27 = vpop.f32.mrb[0].mxu1 }
 0x1bd   : > { %v447_v28 = vadd.f32 %v545_v26, %v446_v27  ;;  %v594_v29 = vpop.f32.mrb[1].mxu1 }
 0x1bf   : > { %v450_v30 = vadd.f32 %v447_v28, %v274_v16 }
 0x1c1   : > { %v454_v31 = vsel %vm453_vm3, %v450_v30, 0.0 }
 0x1c2   : > { %455 = vadd.xlane.f32.xlu0 %v454_v31 }
 0x24f   : > { %v456_v32 = vpop.xlane.xlu0 %455 }
 0x250   : > { %v458_v33 = vmul.f32 0.03125, %v456_v32 }
 0x252   : > { %v459_v34 = vsub.f32 %v450_v30, %v458_v33 }
 0x254   : > { %v460_v35 = vmul.f32 %v459_v34, %v459_v34 }
 0x256   : > { %v461_v36 = vsel %vm453_vm3, %v460_v35, 0.0 }
 0x257   : > { %462 = vadd.xlane.f32.xlu0 %v461_v36 }
 0x2e4   : > { %v463_v37 = vpop.xlane.xlu0 %462 }
 0x2e5   : > { %v464_v38 = vmul.f32 0.03125, %v463_v37 }
 0x2e7   : > { %v465_v39 = vadd.f32 1e-05, %v464_v38 }
 0x2e9   : > { %624 = vrsqrt.f32 %v465_v39 }
 0x2f3   : > { %v625_v40 = vpop.eup %624 }
 0x2f4   : > { %v467_v42 = vmul.f32 %v625_v40, %v459_v34 }
 0x2f6   : > { %v474_v44 = vmul.f32 %v547_v41, %v467_v42 }
 0x2f8   : > { %v481_v45 = vadd.f32 %v548_v43, %v474_v44 }
 0x2fa   : > { %482 = vst.msk [vmem:[%s273_s21] sm:$0xf] %vm453_vm3, %v481_v45 }
 0x2fb PF: > { %s17_s24 = sadd.s32 1, %s632_s24  }
 0x2fc   : > { %p14_p4 = scmp.ge.s32.totalorder %s17_s24, 4  }
 0x2fe   :  { %16 = sbr.rel (!%p14_p4) target bundleno = 1 (0x1), region = 78 }

// kernel: model_forward.19
= control target key start
LH: loop header
LB: loop body
LE: loop exit
PB: predicated region body
PF: predicated region fallthrough
CT: control target
= control target key end

     0   :  { %s1540_s15 = smov 0   ;;  %s1703_s0 = inlined_call_operand.vmem [shape: f32[2,8,32], index: 0, kind: input, shape index: {}]   ;;  %s1704_s1 = inlined_call_operand.vmem [shape: f32[32,128], index: 1, kind: input, shape index: {}]   ;;  %s1705_s2 = inlined_call_operand.vmem [shape: f32[32,128], index: 2, kind: input, shape index: {}]   ;;  %s1706_s3 = inlined_call_operand.vmem [shape: f32[1,128], index: 3, kind: input, shape index: {}]   ;;  %s1707_s4 = inlined_call_operand.vmem [shape: f32[2,8,32], index: 4, kind: output, shape index: {}]  }
   0x1 LB: > { %s1201_s16 = sadd.s32 4294967295, %s1508_s15   ;;  %p1205_p0 = scmp.ge.s32.totalorder %s1508_s15, 1  ;;  %s1508_s15 = sphi %s1540_s15, %s14_s15  }
   0x2   : > { %p161_p1 = scmp.lt.s32.totalorder %s1508_s15, 3 }
   0x4   : > { %p162_p2 = pnand %p1205_p0, %p161_p1 }
   0x5   : > { %v194_v0 = vld [vmem:[%s1704_s1] sm:$0xff] (!%p162_p2)  ;;  %v195_v1 = vld [vmem:[%s1704_s1 + $0x8] sm:$0xff] (!%p162_p2)  ;;  %v1510_v3 = vmov (!%p162_p2), 0.0|0.0   ;;  %v196_v6 = vld [vmem:[%s1704_s1 + $0x10] sm:$0xff] (!%p162_p2)  ;;  %p185_p3 = scmp.lt.s32.totalorder (!%p162_p2), %s1201_s16, 1  ;;  %vm1511_vm0 = vmmov (!%p162_p2), 0  }
   0x6   : > { %165 = sbr.rel (%p162_p2) target bundleno = 5663 (0x161f), region = 36  ;;  %v279_v2 = vld [vmem:[%s1705_s2] sm:$0xff] (!%p162_p2)  ;;  %1371 = vmatprep.subr.bf16.mxu0 (!%p162_p2), %v1510_v3  ;;  %v1372_v4 = vpack.c.bf16 (!%p162_p2), %v195_v1, %v194_v0  ;;  %1377 = vmatprep.subr.bf16.mxu1 (!%p162_p2), %v1510_v3  ;;  %v280_v5 = vld [vmem:[%s1705_s2 + $0x8] sm:$0xff] (!%p162_p2)  ;;  %v197_v7 = vld [vmem:[%s1704_s1 + $0x18] sm:$0xff] (!%p162_p2)  ;;  %v1512_v11 = vmov (!%p162_p2), 0.0   ;;  %vm205_vm1 = vcmask (!%p162_p2), 261120  }
   0x7   : > { %v1568_v8 = vpack.c.bf16 (!%p162_p2), %v280_v5, %v279_v2  ;;  %v281_v9 = vld [vmem:[%s1705_s2 + $0x10] sm:$0xff] (!%p162_p2)  ;;  %v282_v10 = vld [vmem:[%s1705_s2 + $0x18] sm:$0xff] (!%p162_p2)  ;;  %1280 = vmatprep.mubr.msk.f32.mxu0 (!%p162_p2), %vm1511_vm0, %v1512_v11  ;;  %1291 = vmatprep.mubr.msk.f32.mxu1 (!%p162_p2), %vm1511_vm0, %v1512_v11  ;;  %v1375_v12 = vpack.c.bf16 (!%p162_p2), %v197_v7, %v196_v6  ;;  %v1208_v15 = vld [vmem:[%s1706_s3] ss:$0 sm:$0xff] (!%p162_p2)  ;;  %s1513_s13 = smov (!%p162_p2), 64   ;;  %s1514_s14 = smov (!%p162_p2), 32  }
   0x8   : > { %1373 = vmatpush3.bf16.msra.mxu0 (!%p162_p2), %v1372_v4  ;;  %v1584_v13 = vpack.c.bf16 (!%p162_p2), %v282_v10, %v281_v9  ;;  %vm1129_vm2 = vcmask (!%p162_p2), 1040384   ;;  %vm1131_vm3 = vcmask (!%p162_p2), 1041408   ;;  %vm1133_vm4 = vcmask (!%p162_p2), 1042432  }
   0x9   : > { %1379 = vmatpush3.bf16.msra.mxu1 (!%p162_p2), %v1568_v8  ;;  %1374 = vmatprep.subr.bf16.mxu0 (!%p162_p2), %v1510_v3  ;;  %vm1135_vm5 = vcmask (!%p162_p2), 1043456   ;;  %vm1137_vm6 = vcmask (!%p162_p2), 1044480   ;;  %vm1139_vm7 = vcmask (!%p162_p2), 1045504   ;;  %vm1141_vm8 = vcmask (!%p162_p2), 1046528  }
   0xa   : > { %1380 = vmatprep.subr.bf16.mxu1 (!%p162_p2), %v1510_v3 }
   0xc   : > { %1376 = vmatpush3.bf16.msra.mxu0 (!%p162_p2), %v1375_v12 }
   0xd   : > { %s1709_s16 = smov (!%p185_p3, %s1201_s16), 1  ;;  %1382 = vmatpush3.bf16.msra.mxu1 %v1584_v13  ;;  %1383 = vmatprep.subr.bf16.mxu0 %v1510_v3 }
   0xe   : > { %s1206_s7 = sshll.u32 %s1709_s16, 3  ;;  %1389 = vmatprep.subr.bf16.mxu1 %v1510_v3 }
   0xf   : > { %s188_s10 = scalar_lea.vmem %s1703_s0, %s1206_s7  ;;  %s192_s19 = scalar_lea.vmem %s1707_s4, %s1206_s7 }
  0x10   : > { %v193_v14 = vld [vmem:[%s188_s10] sm:$0xff]  ;;  %1292 = vmatmul.mubr.f32.vlgmr.msra.gmra.mrb[0].mxu1 %v1512_v11 }
  0x11   : > { %1281 = vmatmul.mubr.msk.f32.vlgmr.msra.gmra.mrb[0].mxu0 %vm205_vm1, %v193_v14  ;;  %1391 = vmatpush3.bf16.msra.mxu1 %v1568_v8 }
  0x12   : > { %1385 = vmatpush3.bf16.msra.mxu0 %v1568_v8  ;;  %1302 = vmatprep.mubr.msk.f32.mxu0 %vm1511_vm0, %v1512_v11 }
  0x13   : > { %1386 = vmatprep.subr.bf16.mxu0 %v1510_v3  ;;  %1313 = vmatprep.mubr.msk.f32.mxu1 %vm1511_vm0, %v1512_v11 }
  0x14   : > { %1392 = vmatprep.subr.bf16.mxu1 %v1510_v3 }
  0x15   : > { %1394 = vmatpush3.bf16.msra.mxu1 %v1584_v13 }
  0x16   : > { %1388 = vmatpush3.bf16.msra.mxu0 %v1584_v13  ;;  %1401 = vmatprep.subr.bf16.mxu1 %v1510_v3 }
  0x17   : > { %1395 = vmatprep.subr.bf16.mxu0 %v1510_v3 }
  0xe3   : > { %v352_v19 = vpop.f32.mrb[0].mxu1 }
  0xe4   : > { %v275_v16 = vpop.f32.mrb[0].mxu0  ;;  %v1293_v20 = vpop.f32.mrb[1].mxu1 }
  0xe5   : > { %v1613_v17 = vadd.f32 %v1208_v15, %v275_v16  ;;  %v1282_v18 = vpop.f32.mrb[1].mxu0 }
  0xe7   : > { %v356_v21 = vadd.f32 %v352_v19, %v1613_v17 }
  0xe9   : > { %1438 = vtanh.f32 %v356_v21  ;;  %v1210_v23 = vmul.f32 -1.442695, %v356_v21 }
  0xeb   : > { %1440 = vpow2.f32 %v1210_v23 }
  0xf3   : > { %v1439_v22 = vpop.eup %1438 }
  0xf4   : > { %366 = vrot.lane.b32.xlu0 %v1439_v22, %s1513_s13 }
  0xf5   : > { %v1441_v24 = vpop.eup %1440 }
  0xf6   : > { %v360_v25 = vadd.f32 1.0, %v1441_v24 }
  0xf8   : > { %1442 = vrcp.f32 %v360_v25 }
 0x102   : > { %v1443_v26 = vpop.eup %1442 }
 0x103   : > { %v364_v29 = vmul.f32 0.0, %v1443_v26 }
 0x166   : > { %v367_v27 = vpop.permute.xlu0 %366 }
 0x167   : > { %v369_v28 = vmul.f32 %v1443_v26, %v367_v27 }
 0x169   : > { %371 = vrot.lane.b32.xlu0 %v369_v28, %s1514_s14 }
 0x1db   : > { %v372_v30 = vpop.permute.xlu0 %371 }
 0x1dc   : > { %v374_v31 = vadd.f32 %v372_v30, %v364_v29 }
 0x1de   : > { %1444 = vtanh.f32 %v374_v31  ;;  %v468_v47 = vrot.slane %v374_v31, 7 }
 0x1e8   : > { %v1445_v32 = vpop.eup %1444 }
 0x1e9   : > { %377 = vrot.lane.b32.xlu1 %v1445_v32, %s1513_s13 }
 0x25b   : > { %v378_v33 = vpop.permute.xlu1 %377 }
 0x25c   : > { %v1619_v34 = vmul.f32 %v1443_v26, %v378_v33 }
 0x25e   : > { %382 = vrot.lane.b32.xlu1 %v1619_v34, %s1514_s14 }
 0x2d0   : > { %v383_v35 = vpop.permute.xlu1 %382 }
 0x2d1   : > { %1303 = vmatmul.mubr.msk.f32.vlgmr.msra.gmra.mrb[2].mxu0 %vm205_vm1, %v383_v35 }
 0x2d2   : > { %1397 = vmatpush3.bf16.msra.mxu0 %v1568_v8  ;;  %1324 = vmatprep.mubr.msk.f32.mxu0 %vm1511_vm0, %v1512_v11 }
 0x2d3   : > { %1398 = vmatprep.subr.bf16.mxu0 %v1510_v3 }
 0x2d6   : > { %1400 = vmatpush3.bf16.msra.mxu0 %v1584_v13 }
 0x2d7   : > { %1407 = vmatprep.subr.bf16.mxu0 %v1510_v3 }
 0x3a4   : > { %v452_v36 = vpop.f32.mrb[2].mxu0 }
 0x3a5   : > { %v457_v37 = vrot.slane %v452_v36, 7  ;;  %v1304_v38 = vpop.f32.mrb[3].mxu0 }
 0x3a7   : > { %v459_v39 = vadd.f32 %v457_v37, %v1613_v17 }
 0x3a9   : > { %1446 = vtanh.f32 %v459_v39  ;;  %v1212_v41 = vmul.f32 -1.442695, %v459_v39 }
 0x3ab   : > { %1448 = vpow2.f32 %v1212_v41 }
 0x3b3   : > { %v1447_v40 = vpop.eup %1446 }
 0x3b4   : > { %472 = vrot.lane.b32.xlu0 %v1447_v40, %s1513_s13 }
 0x3b5   : > { %v1449_v42 = vpop.eup %1448 }
 0x3b6   : > { %v463_v43 = vadd.f32 1.0, %v1449_v42 }
 0x3b8   : > { %1450 = vrcp.f32 %v463_v43 }
 0x3c2   : > { %v1451_v44 = vpop.eup %1450 }
 0x3c3   : > { %v470_v48 = vmul.f32 %v1451_v44, %v468_v47 }
 0x426   : > { %v473_v45 = vpop.permute.xlu0 %472 }
 0x427   : > { %v475_v46 = vmul.f32 %v1451_v44, %v473_v45 }
 0x429   : > { %477 = vrot.lane.b32.xlu1 %v475_v46, %s1514_s14 }
 0x49b   : > { %v478_v49 = vpop.permute.xlu1 %477 }
 0x49c   : > { %v480_v50 = vadd.f32 %v478_v49, %v470_v48 }
 0x49e   : > { %1452 = vtanh.f32 %v480_v50  ;;  %v575_v4 = vrot.slane %v480_v50, 7 }
 0x4a8   : > { %v1453_v51 = vpop.eup %1452 }
 0x4a9   : > { %483 = vrot.lane.b32.xlu0 %v1453_v51, %s1513_s13 }
 0x51b   : > { %v484_v52 = vpop.permute.xlu0 %483 }
 0x51c   : > { %v486_v53 = vmul.f32 %v1451_v44, %v484_v52 }
 0x51e   : > { %v488_v54 = vrot.slane %v486_v53, 1  ;;  %v1130_v14 = vsel %vm1129_vm2, %v1619_v34, %v486_v53 }
 0x520   : > { %489 = vrot.lane.b32.xlu1 %v488_v54, %s1514_s14 }
 0x592   : > { %v490_v55 = vpop.permute.xlu1 %489 }
 0x593   : > { %1314 = vmatmul.mubr.msk.f32.vlgmr.msra.gmra.mrb[2].mxu1 %vm205_vm1, %v490_v55 }
 0x594   : > { %1403 = vmatpush3.bf16.msra.mxu1 %v1568_v8  ;;  %1335 = vmatprep.mubr.msk.f32.mxu1 %vm1511_vm0, %v1512_v11 }
 0x595   : > { %1404 = vmatprep.subr.bf16.mxu1 %v1510_v3 }
 0x598   : > { %1406 = vmatpush3.bf16.msra.mxu1 %v1584_v13 }
 0x599   : > { %1413 = vmatprep.subr.bf16.mxu1 %v1510_v3 }
 0x666   : > { %v559_v56 = vpop.f32.mrb[2].mxu1 }
 0x667   : > { %v564_v57 = vrot.slane %v559_v56, 6  ;;  %v1315_v58 = vpop.f32.mrb[3].mxu1 }
 0x669   : > { %v566_v59 = vadd.f32 %v564_v57, %v1613_v17 }
 0x66b   : > { %1454 = vtanh.f32 %v566_v59  ;;  %v1214_v61 = vmul.f32 -1.442695, %v566_v59 }
 0x66d   : > { %1456 = vpow2.f32 %v1214_v61 }
 0x675   : > { %v1455_v60 = vpop.eup %1454 }
 0x676   : > { %579 = vrot.lane.b32.xlu0 %v1455_v60, %s1513_s13 }
 0x677   : > { %v1457_v62 = vpop.eup %1456 }
 0x678   : > { %v570_v63 = vadd.f32 1.0, %v1457_v62 }
 0x67a   : > { %1458 = vrcp.f32 %v570_v63 }
 0x684   : > { %v1459_v0 = vpop.eup %1458 }
 0x685   : > { %v577_v5 = vmul.f32 %v1459_v0, %v575_v4 }
 0x6e8   : > { %v580_v1 = vpop.permute.xlu0 %579 }
 0x6e9   : > { %v582_v2 = vmul.f32 %v1459_v0, %v580_v1 }
 0x6eb   : > { %584 = vrot.lane.b32.xlu1 %v582_v2, %s1514_s14 }
 0x75d   : > { %v585_v6 = vpop.permute.xlu1 %584 }
 0x75e   : > { %v587_v7 = vadd.f32 %v585_v6, %v577_v5 }
 0x760   : > { %1460 = vtanh.f32 %v587_v7  ;;  %v682_v30 = vrot.slane %v587_v7, 7 }
 0x76a   : > { %v1461_v9 = vpop.eup %1460 }
 0x76b   : > { %590 = vrot.lane.b32.xlu0 %v1461_v9, %s1513_s13 }
 0x7dd   : > { %v591_v10 = vpop.permute.xlu0 %590 }
 0x7de   : > { %v593_v12 = vmul.f32 %v1459_v0, %v591_v10 }
 0x7e0   : > { %v595_v15 = vrot.slane %v593_v12, 2  ;;  %v1132_v16 = vsel %vm1131_vm3, %v1130_v14, %v593_v12 }
 0x7e2   : > { %596 = vrot.lane.b32.xlu1 %v595_v15, %s1514_s14 }
 0x854   : > { %v597_v18 = vpop.permute.xlu1 %596 }
 0x855   : > { %1325 = vmatmul.mubr.msk.f32.vlgmr.msra.gmra.mrb[4].mxu0 %vm205_vm1, %v597_v18 }
 0x856   : > { %1409 = vmatpush3.bf16.msra.mxu0 %v1568_v8  ;;  %1346 = vmatprep.mubr.msk.f32.mxu0 %vm1511_vm0, %v1512_v11 }
 0x857   : > { %1410 = vmatprep.subr.bf16.mxu0 %v1510_v3 }
 0x85a   : > { %1412 = vmatpush3.bf16.msra.mxu0 %v1584_v13 }
 0x85b   : > { %1419 = vmatprep.subr.bf16.mxu0 %v1510_v3 }
 0x928   : > { %v666_v19 = vpop.f32.mrb[4].mxu0 }
 0x929   : > { %v671_v20 = vrot.slane %v666_v19, 5  ;;  %v1326_v21 = vpop.f32.mrb[5].mxu0 }
 0x92b   : > { %v673_v22 = vadd.f32 %v671_v20, %v1613_v17 }
 0x92d   : > { %1462 = vtanh.f32 %v673_v22  ;;  %v1216_v24 = vmul.f32 -1.442695, %v673_v22 }
 0x92f   : > { %1464 = vpow2.f32 %v1216_v24 }
 0x937   : > { %v1463_v23 = vpop.eup %1462 }
 0x938   : > { %686 = vrot.lane.b32.xlu0 %v1463_v23, %s1513_s13 }
 0x939   : > { %v1465_v25 = vpop.eup %1464 }
 0x93a   : > { %v677_v26 = vadd.f32 1.0, %v1465_v25 }
 0x93c   : > { %1466 = vrcp.f32 %v677_v26 }
 0x946   : > { %v1467_v27 = vpop.eup %1466 }
 0x947   : > { %v684_v31 = vmul.f32 %v1467_v27, %v682_v30 }
 0x9aa   : > { %v687_v28 = vpop.permute.xlu0 %686 }
 0x9ab   : > { %v689_v29 = vmul.f32 %v1467_v27, %v687_v28 }
 0x9ad   : > { %691 = vrot.lane.b32.xlu1 %v689_v29, %s1514_s14 }
 0xa1f   : > { %v692_v32 = vpop.permute.xlu1 %691 }
 0xa20   : > { %v694_v33 = vadd.f32 %v692_v32, %v684_v31 }
 0xa22   : > { %1468 = vtanh.f32 %v694_v33  ;;  %v789_v51 = vrot.slane %v694_v33, 7 }
 0xa2c   : > { %v1469_v34 = vpop.eup %1468 }
 0xa2d   : > { %697 = vrot.lane.b32.xlu0 %v1469_v34, %s1513_s13 }
 0xa9f   : > { %v698_v35 = vpop.permute.xlu0 %697 }
 0xaa0   : > { %v700_v36 = vmul.f32 %v1467_v27, %v698_v35 }
 0xaa2   : > { %v702_v37 = vrot.slane %v700_v36, 3  ;;  %v1134_v38 = vsel %vm1133_vm4, %v1132_v16, %v700_v36 }
 0xaa4   : > { %703 = vrot.lane.b32.xlu1 %v702_v37, %s1514_s14 }
 0xb16   : > { %v704_v39 = vpop.permute.xlu1 %703 }
 0xb17   : > { %1336 = vmatmul.mubr.msk.f32.vlgmr.msra.gmra.mrb[4].mxu1 %vm205_vm1, %v704_v39 }
 0xb18   : > { %1415 = vmatpush3.bf16.msra.mxu1 %v1568_v8  ;;  %1357 = vmatprep.mubr.msk.f32.mxu1 %vm1511_vm0, %v1512_v11 }
 0xb19   : > { %1416 = vmatprep.subr.bf16.mxu1 %v1510_v3 }
 0xb1c   : > { %1418 = vmatpush3.bf16.msra.mxu1 %v1584_v13 }
 0xbea   : > { %v773_v40 = vpop.f32.mrb[4].mxu1 }
 0xbeb   : > { %v778_v41 = vrot.slane %v773_v40, 4  ;;  %v1337_v42 = vpop.f32.mrb[5].mxu1 }
 0xbed   : > { %v780_v43 = vadd.f32 %v778_v41, %v1613_v17 }
 0xbef   : > { %1470 = vtanh.f32 %v780_v43  ;;  %v1218_v45 = vmul.f32 -1.442695, %v780_v43 }
 0xbf1   : > { %1472 = vpow2.f32 %v1218_v45 }
 0xbf9   : > { %v1471_v44 = vpop.eup %1470 }
 0xbfa   : > { %793 = vrot.lane.b32.xlu0 %v1471_v44, %s1513_s13 }
 0xbfb   : > { %v1473_v46 = vpop.eup %1472 }
 0xbfc   : > { %v784_v47 = vadd.f32 1.0, %v1473_v46 }
 0xbfe   : > { %1474 = vrcp.f32 %v784_v47 }
 0xc08   : > { %v1475_v48 = vpop.eup %1474 }
 0xc09   : > { %v791_v52 = vmul.f32 %v1475_v48, %v789_v51 }
 0xc6c   : > { %v794_v49 = vpop.permute.xlu0 %793 }
 0xc6d   : > { %v796_v50 = vmul.f32 %v1475_v48, %v794_v49 }
 0xc6f   : > { %798 = vrot.lane.b32.xlu1 %v796_v50, %s1514_s14 }
 0xce1   : > { %v799_v53 = vpop.permute.xlu1 %798 }
 0xce2   : > { %v801_v54 = vadd.f32 %v799_v53, %v791_v52 }
 0xce4   : > { %1476 = vtanh.f32 %v801_v54 }
 0xcee   : > { %v1477_v55 = vpop.eup %1476 }
 0xcef   : > { %804 = vrot.lane.b32.xlu0 %v1477_v55, %s1513_s13 }
 0xd61   : > { %v805_v56 = vpop.permute.xlu0 %804 }
 0xd62   : > { %v807_v57 = vmul.f32 %v1475_v48, %v805_v56 }
 0xd64   : > { %v809_v58 = vrot.slane %v807_v57, 4  ;;  %v1136_v59 = vsel %vm1135_vm5, %v1134_v38, %v807_v57 }
 0xd66   : > { %810 = vrot.lane.b32.xlu1 %v809_v58, %s1514_s14 }
 0xdd8   : > { %v811_v60 = vpop.permute.xlu1 %810 }
 0xdd9   : > { %1347 = vmatmul.mubr.msk.f32.vlgmr.msra.gmra.mrb[6].mxu0 %vm205_vm1, %v811_v60 }
 0xdda   : > { %1421 = vmatpush3.bf16.msra.mxu0 %v1568_v8  ;;  %1368 = vmatprep.mubr.msk.f32.mxu0 %vm1511_vm0, %v1512_v11 }
 0xddb   : > { %1422 = vmatprep.subr.bf16.mxu0 %v1510_v3  ;;  %v896_v3 = vrot.slane %v801_v54, 7 }
 0xdde   : > { %1424 = vmatpush3.bf16.msra.mxu0 %v1584_v13 }
 0xeac   : > { %v880_v61 = vpop.f32.mrb[6].mxu0 }
 0xead   : > { %v885_v62 = vrot.slane %v880_v61, 3  ;;  %v1348_v63 = vpop.f32.mrb[7].mxu0 }
 0xeaf   : > { %v887_v0 = vadd.f32 %v885_v62, %v1613_v17 }
 0xeb1   : > { %1478 = vtanh.f32 %v887_v0  ;;  %v1220_v2 = vmul.f32 -1.442695, %v887_v0 }
 0xeb3   : > { %1480 = vpow2.f32 %v1220_v2 }
 0xebb   : > { %v1479_v1 = vpop.eup %1478 }
 0xebc   : > { %900 = vrot.lane.b32.xlu0 %v1479_v1, %s1513_s13 }
 0xebd   : > { %v1481_v4 = vpop.eup %1480 }
 0xebe   : > { %v891_v8 = vadd.f32 1.0, %v1481_v4 }
 0xec0   : > { %1482 = vrcp.f32 %v891_v8 }
 0xeca   : > { %v1483_v5 = vpop.eup %1482 }
 0xecb   : > { %v898_v13 = vmul.f32 %v1483_v5, %v896_v3 }
 0xf2e   : > { %v901_v11 = vpop.permute.xlu0 %900 }
 0xf2f   : > { %v903_v6 = vmul.f32 %v1483_v5, %v901_v11 }
 0xf31   : > { %905 = vrot.lane.b32.xlu1 %v903_v6, %s1514_s14 }
 0xfa3   : > { %v906_v7 = vpop.permute.xlu1 %905 }
 0xfa4   : > { %v908_v9 = vadd.f32 %v906_v7, %v898_v13 }
 0xfa6   : > { %1484 = vtanh.f32 %v908_v9  ;;  %v1003_v30 = vrot.slane %v908_v9, 7 }
 0xfb0   : > { %v1485_v10 = vpop.eup %1484 }
 0xfb1   : > { %911 = vrot.lane.b32.xlu0 %v1485_v10, %s1513_s13 }
0x1023   : > { %v912_v12 = vpop.permute.xlu0 %911 }
0x1024   : > { %v914_v14 = vmul.f32 %v1483_v5, %v912_v12 }
0x1026   : > { %v916_v15 = vrot.slane %v914_v14, 5  ;;  %v1138_v16 = vsel %vm1137_vm6, %v1136_v59, %v914_v14 }
0x1028   : > { %917 = vrot.lane.b32.xlu1 %v916_v15, %s1514_s14 }
0x109a   : > { %v918_v18 = vpop.permute.xlu1 %917 }
0x109b   : > { %1358 = vmatmul.mubr.msk.f32.vlgmr.msra.gmra.mrb[6].mxu1 %vm205_vm1, %v918_v18 }
0x116e   : > { %v987_v19 = vpop.f32.mrb[6].mxu1 }
0x116f   : > { %v992_v20 = vrot.slane %v987_v19, 2  ;;  %v1359_v21 = vpop.f32.mrb[7].mxu1 }
0x1171   : > { %v994_v22 = vadd.f32 %v992_v20, %v1613_v17 }
0x1173   : > { %1486 = vtanh.f32 %v994_v22  ;;  %v1222_v24 = vmul.f32 -1.442695, %v994_v22 }
0x1175   : > { %1488 = vpow2.f32 %v1222_v24 }
0x117d   : > { %v1487_v23 = vpop.eup %1486 }
0x117e   : > { %1007 = vrot.lane.b32.xlu0 %v1487_v23, %s1513_s13 }
0x117f   : > { %v1489_v25 = vpop.eup %1488 }
0x1180   : > { %v998_v26 = vadd.f32 1.0, %v1489_v25 }
0x1182   : > { %1490 = vrcp.f32 %v998_v26 }
0x118c   : > { %v1491_v27 = vpop.eup %1490 }
0x118d   : > { %v1005_v31 = vmul.f32 %v1491_v27, %v1003_v30 }
0x11f0   : > { %v1008_v28 = vpop.permute.xlu0 %1007 }
0x11f1   : > { %v1010_v29 = vmul.f32 %v1491_v27, %v1008_v28 }
0x11f3   : > { %1012 = vrot.lane.b32.xlu1 %v1010_v29, %s1514_s14 }
0x1265   : > { %v1013_v32 = vpop.permute.xlu1 %1012 }
0x1266   : > { %v1015_v33 = vadd.f32 %v1013_v32, %v1005_v31 }
0x1268   : > { %1492 = vtanh.f32 %v1015_v33  ;;  %v1110_v51 = vrot.slane %v1015_v33, 7 }
0x1272   : > { %v1493_v34 = vpop.eup %1492 }
0x1273   : > { %1018 = vrot.lane.b32.xlu0 %v1493_v34, %s1513_s13 }
0x12e5   : > { %v1019_v35 = vpop.permute.xlu0 %1018 }
0x12e6   : > { %v1021_v36 = vmul.f32 %v1491_v27, %v1019_v35 }
0x12e8   : > { %v1023_v37 = vrot.slane %v1021_v36, 6  ;;  %v1140_v38 = vsel %vm1139_vm7, %v1138_v16, %v1021_v36 }
0x12ea   : > { %1024 = vrot.lane.b32.xlu1 %v1023_v37, %s1514_s14 }
0x135c   : > { %v1025_v39 = vpop.permute.xlu1 %1024 }
0x135d   : > { %1369 = vmatmul.mubr.msk.f32.vlgmr.msra.gmra.mrb[8].mxu0 %vm205_vm1, %v1025_v39 }
0x1430   : > { %v1094_v40 = vpop.f32.mrb[8].mxu0 }
0x1431   : > { %v1099_v41 = vrot.slane %v1094_v40, 1  ;;  %v1370_v42 = vpop.f32.mrb[9].mxu0 }
0x1433   : > { %v1101_v43 = vadd.f32 %v1099_v41, %v1613_v17 }
0x1435   : > { %1494 = vtanh.f32 %v1101_v43  ;;  %v1224_v45 = vmul.f32 -1.442695, %v1101_v43 }
0x1437   : > { %1496 = vpow2.f32 %v1224_v45 }
0x143f   : > { %v1495_v44 = vpop.eup %1494 }
0x1440   : > { %1114 = vrot.lane.b32.xlu0 %v1495_v44, %s1513_s13 }
0x1441   : > { %v1497_v46 = vpop.eup %1496 }
0x1442   : > { %v1105_v47 = vadd.f32 1.0, %v1497_v46 }
0x1444   : > { %1498 = vrcp.f32 %v1105_v47 }
0x144e   : > { %v1499_v48 = vpop.eup %1498 }
0x144f   : > { %v1112_v52 = vmul.f32 %v1499_v48, %v1110_v51 }
0x14b2   : > { %v1115_v49 = vpop.permute.xlu0 %1114 }
0x14b3   : > { %v1117_v50 = vmul.f32 %v1499_v48, %v1115_v49 }
0x14b5   : > { %1119 = vrot.lane.b32.xlu1 %v1117_v50, %s1514_s14 }
0x1527   : > { %v1120_v53 = vpop.permute.xlu1 %1119 }
0x1528   : > { %v1122_v54 = vadd.f32 %v1120_v53, %v1112_v52 }
0x152a   : > { %1500 = vtanh.f32 %v1122_v54 }
0x1534   : > { %v1501_v17 = vpop.eup %1500 }
0x1535   : > { %1125 = vrot.lane.b32.xlu0 %v1501_v17, %s1513_s13 }
0x15a7   : > { %v1126_v55 = vpop.permute.xlu0 %1125 }
0x15a8   : > { %v1128_v56 = vmul.f32 %v1499_v48, %v1126_v55 }
0x15aa   : > { %v1142_v57 = vsel %vm1141_vm8, %v1140_v38, %v1128_v56 }
0x15ab   : > { %1144 = vrot.lane.b32.xlu1 %v1142_v57, %s1514_s14 }
0x161d   : > { %v1145_v58 = vpop.permute.xlu1 %1144 }
0x161e   : > { %1147 = vst.msk [vmem:[%s192_s19] sm:$0xff] %vm205_vm1, %v1145_v58 }
0x161f PF: > { %s14_s15 = sadd.s32 1, %s1508_s15  }
0x1620   : > { %p11_p4 = scmp.ge.s32.totalorder %s14_s15, 4  }
0x1622   :  { %13 = sbr.rel (!%p11_p4) target bundleno = 1 (0x1), region = 66 }

// kernel: model_forward.23
= control target key start
LH: loop header
LB: loop body
LE: loop exit
PB: predicated region body
PF: predicated region fallthrough
CT: control target
= control target key end

     0   :  { %s676_s24 = smov 0   ;;  %s752_s0 = inlined_call_operand.vmem [shape: f32[2,8,32], index: 0, kind: input, shape index: {}]   ;;  %s753_s1 = inlined_call_operand.vmem [shape: f32[32,64], index: 1, kind: input, shape index: {}]   ;;  %s754_s2 = inlined_call_operand.vmem [shape: f32[1,64], index: 2, kind: input, shape index: {}]   ;;  %s755_s3 = inlined_call_operand.vmem [shape: f32[64,32], index: 3, kind: input, shape index: {}]   ;;  %s756_s4 = inlined_call_operand.vmem [shape: f32[1,32], index: 4, kind: input, shape index: {}]   ;;  %s757_s5 = inlined_call_operand.vmem [shape: f32[1,32], index: 5, kind: input, shape index: {}]   ;;  %s758_s6 = inlined_call_operand.vmem [shape: f32[1,32], index: 6, kind: input, shape index: {}]   ;;  %s759_s7 = inlined_call_operand.vmem [shape: f32[2,8,32], index: 7, kind: output, shape index: {}]  }
   0x1 LB: > { %s535_s25 = sadd.s32 4294967295, %s631_s24   ;;  %p539_p0 = scmp.ge.s32.totalorder %s631_s24, 1  ;;  %s631_s24 = sphi %s676_s24, %s17_s24  }
   0x2   : > { %p236_p1 = scmp.lt.s32.totalorder %s631_s24, 3 }
   0x4   : > { %p237_p2 = pnand %p539_p0, %p236_p1 }
   0x5   : > { %v275_v0 = vld [vmem:[%s753_s1] sm:$0xff] (!%p237_p2)  ;;  %v276_v1 = vld [vmem:[%s753_s1 + $0x8] sm:$0xff] (!%p237_p2)  ;;  %v277_v2 = vld [vmem:[%s753_s1 + $0x10] sm:$0xff] (!%p237_p2)  ;;  %v633_v3 = vmov (!%p237_p2), 0.0|0.0   ;;  %vm634_vm0 = vmmov (!%p237_p2), 0   ;;  %v635_v6 = vmov (!%p237_p2), 0.0  }
   0x6   : > { %240 = sbr.rel (%p237_p2) target bundleno = 763 (0x2fb), region = 48  ;;  %594 = vmatprep.subr.bf16.mxu0 (!%p237_p2), %v633_v3  ;;  %v595_v4 = vpack.c.bf16 (!%p237_p2), %v276_v1, %v275_v0  ;;  %v278_v5 = vld [vmem:[%s753_s1 + $0x18] sm:$0xff] (!%p237_p2)  ;;  %572 = vmatprep.mubr.msk.f32.mxu0 (!%p237_p2), %vm634_vm0, %v635_v6  ;;  %p266_p3 = scmp.lt.s32.totalorder (!%p237_p2), %s535_s25, 1  ;;  %v361_v7 = vld [vmem:[%s755_s3] sm:$0xff] (!%p237_p2)  ;;  %v362_v8 = vld [vmem:[%s755_s3 + $0x8] sm:$0xff] (!%p237_p2)  ;;  %vm286_vm1 = vcmask (!%p237_p2), 261120  }
   0x7   : > { %600 = vmatprep.subr.bf16.mxu1 (!%p237_p2), %v633_v3  ;;  %v601_v9 = vpack.c.bf16 (!%p237_p2), %v362_v8, %v361_v7  ;;  %v363_v10 = vld [vmem:[%s755_s3 + $0x10] sm:$0xff] (!%p237_p2)  ;;  %v364_v11 = vld [vmem:[%s755_s3 + $0x18] sm:$0xff] (!%p237_p2)  ;;  %591 = vmatprep.mubr.msk.f32.mxu1 (!%p237_p2), %vm634_vm0, %v635_v6  ;;  %v598_v12 = vpack.c.bf16 (!%p237_p2), %v278_v5, %v277_v2  ;;  %v365_v14 = vld [vmem:[%s755_s3 + $0x20] sm:$0xff] (!%p237_p2)  ;;  %vm376_vm2 = vcmask (!%p237_p2), 523264  }
   0x8   : > { %596 = vmatpush3.bf16.msra.mxu0 (!%p237_p2), %v595_v4  ;;  %v604_v13 = vpack.c.bf16 (!%p237_p2), %v364_v11, %v363_v10  ;;  %v366_v15 = vld [vmem:[%s755_s3 + $0x28] sm:$0xff] (!%p237_p2)  ;;  %v367_v18 = vld [vmem:[%s755_s3 + $0x30] sm:$0xff] (!%p237_p2)  ;;  %v368_v19 = vld [vmem:[%s755_s3 + $0x38] sm:$0xff] (!%p237_p2) }
   0x9   : > { %597 = vmatprep.subr.bf16.mxu0 (!%p237_p2), %v633_v3  ;;  %602 = vmatpush3.bf16.msra.mxu1 (!%p237_p2), %v601_v9  ;;  %v607_v17 = vpack.c.bf16 (!%p237_p2), %v366_v15, %v365_v14  ;;  %v610_v20 = vpack.c.bf16 (!%p237_p2), %v368_v19, %v367_v18  ;;  %v542_v21 = vld [vmem:[%s754_s2] ss:$0 sm:$0xff] (!%p237_p2) }
   0xa   : > { %603 = vmatprep.subr.bf16.mxu1 (!%p237_p2), %v633_v3  ;;  %v544_v26 = vld [vmem:[%s756_s4] ss:$0 sm:$0xff] (!%p237_p2) }
   0xb   : > { %v546_v41 = vld [vmem:[%s757_s5] ss:$0 sm:$0xff] (!%p237_p2) }
   0xc   : > { %599 = vmatpush3.bf16.msra.mxu0 (!%p237_p2), %v598_v12  ;;  %v547_v43 = vld [vmem:[%s758_s6] ss:$0 sm:$0xff] (!%p237_p2) }
   0xd   : > { %s761_s25 = smov (!%p266_p3, %s535_s25), 1  ;;  %605 = vmatpush3.bf16.msra.mxu1 %v604_v13 }
   0xe   : > { %s540_s19 = sshll.u32 %s761_s25, 3  ;;  %606 = vmatprep.subr.bf16.mxu1 %v633_v3 }
   0xf   : > { %s269_s28 = scalar_lea.vmem %s752_s0, %s540_s19  ;;  %s273_s21 = scalar_lea.vmem %s759_s7, %s540_s19 }
  0x10   : > { %v274_v16 = vld [vmem:[%s269_s28] sm:$0xff] }
  0x11   : > { %573 = vmatmul.mubr.msk.f32.vlgmr.msra.gmra.mrb[0].mxu0 %vm286_vm1, %v274_v16  ;;  %608 = vmatpush3.bf16.msra.mxu1 %v607_v17 }
  0x12   : > { %609 = vmatprep.subr.bf16.mxu1 %v633_v3 }
  0x15   : > { %611 = vmatpush3.bf16.msra.mxu1 %v610_v20 }
  0xe4   : > { %v356_v22 = vpop.f32.mrb[0].mxu0 }
  0xe5   : > { %v357_v23 = vadd.f32 %v542_v21, %v356_v22  ;;  %v574_v24 = vpop.f32.mrb[1].mxu0 }
  0xe7   : > { %v360_v25 = vmax.f32 %v357_v23, 0.0 }
  0xe9   : > { %592 = vmatmul.mubr.msk.f32.vlgmr.msra.gmra.mrb[0].mxu1 %vm376_vm2, %v360_v25 }
 0x1bc   : > { %v446_v27 = vpop.f32.mrb[0].mxu1 }
 0x1bd   : > { %v447_v28 = vadd.f32 %v544_v26, %v446_v27  ;;  %v593_v29 = vpop.f32.mrb[1].mxu1 }
 0x1bf   : > { %v450_v30 = vadd.f32 %v447_v28, %v274_v16 }
 0x1c1   : > { %v453_v31 = vsel %vm286_vm1, %v450_v30, 0.0 }
 0x1c2   : > { %454 = vadd.xlane.f32.xlu0 %v453_v31 }
 0x24f   : > { %v455_v32 = vpop.xlane.xlu0 %454 }
 0x250   : > { %v457_v33 = vmul.f32 0.03125, %v455_v32 }
 0x252   : > { %v458_v34 = vsub.f32 %v450_v30, %v457_v33 }
 0x254   : > { %v459_v35 = vmul.f32 %v458_v34, %v458_v34 }
 0x256   : > { %v460_v36 = vsel %vm286_vm1, %v459_v35, 0.0 }
 0x257   : > { %461 = vadd.xlane.f32.xlu0 %v460_v36 }
 0x2e4   : > { %v462_v37 = vpop.xlane.xlu0 %461 }
 0x2e5   : > { %v463_v38 = vmul.f32 0.03125, %v462_v37 }
 0x2e7   : > { %v464_v39 = vadd.f32 1e-05, %v463_v38 }
 0x2e9   : > { %623 = vrsqrt.f32 %v464_v39 }
 0x2f3   : > { %v624_v40 = vpop.eup %623 }
 0x2f4   : > { %v466_v42 = vmul.f32 %v624_v40, %v458_v34 }
 0x2f6   : > { %v473_v44 = vmul.f32 %v546_v41, %v466_v42 }
 0x2f8   : > { %v480_v45 = vadd.f32 %v547_v43, %v473_v44 }
 0x2fa   : > { %481 = vst.msk [vmem:[%s273_s21] sm:$0xff] %vm286_vm1, %v480_v45 }
 0x2fb PF: > { %s17_s24 = sadd.s32 1, %s631_s24  }
 0x2fc   : > { %p14_p4 = scmp.ge.s32.totalorder %s17_s24, 4  }
 0x2fe   :  { %16 = sbr.rel (!%p14_p4) target bundleno = 1 (0x1), region = 78 }

// kernel: model_forward.31
= control target key start
LH: loop header
LB: loop body
LE: loop exit
PB: predicated region body
PF: predicated region fallthrough
CT: control target
= control target key end

     0   :  { %s677_s24 = smov 0   ;;  %s752_s0 = inlined_call_operand.vmem [shape: f32[2,7,32], index: 0, kind: input, shape index: {}]   ;;  %s753_s1 = inlined_call_operand.vmem [shape: f32[32,64], index: 1, kind: input, shape index: {}]   ;;  %s754_s2 = inlined_call_operand.vmem [shape: f32[1,64], index: 2, kind: input, shape index: {}]   ;;  %s755_s3 = inlined_call_operand.vmem [shape: f32[64,32], index: 3, kind: input, shape index: {}]   ;;  %s756_s4 = inlined_call_operand.vmem [shape: f32[1,32], index: 4, kind: input, shape index: {}]   ;;  %s757_s5 = inlined_call_operand.vmem [shape: f32[1,32], index: 5, kind: input, shape index: {}]   ;;  %s758_s6 = inlined_call_operand.vmem [shape: f32[1,32], index: 6, kind: input, shape index: {}]   ;;  %s759_s7 = inlined_call_operand.vmem [shape: f32[2,7,32], index: 7, kind: output, shape index: {}]  }
   0x1 LB: > { %s536_s25 = sadd.s32 4294967295, %s632_s24   ;;  %p540_p0 = scmp.ge.s32.totalorder %s632_s24, 1  ;;  %s632_s24 = sphi %s677_s24, %s17_s24  }
   0x2   : > { %p236_p1 = scmp.lt.s32.totalorder %s632_s24, 3 }
   0x4   : > { %p237_p2 = pnand %p540_p0, %p236_p1 }
   0x5   : > { %v275_v0 = vld [vmem:[%s753_s1] sm:$0xff] (!%p237_p2)  ;;  %v276_v1 = vld [vmem:[%s753_s1 + $0x8] sm:$0xff] (!%p237_p2)  ;;  %v277_v2 = vld [vmem:[%s753_s1 + $0x10] sm:$0xff] (!%p237_p2)  ;;  %v634_v3 = vmov (!%p237_p2), 0.0|0.0   ;;  %vm635_vm0 = vmmov (!%p237_p2), 0   ;;  %v636_v6 = vmov (!%p237_p2), 0.0  }
   0x6   : > { %240 = sbr.rel (%p237_p2) target bundleno = 763 (0x2fb), region = 48  ;;  %595 = vmatprep.subr.bf16.mxu0 (!%p237_p2), %v634_v3  ;;  %v596_v4 = vpack.c.bf16 (!%p237_p2), %v276_v1, %v275_v0  ;;  %v278_v5 = vld [vmem:[%s753_s1 + $0x18] sm:$0xff] (!%p237_p2)  ;;  %573 = vmatprep.mubr.msk.f32.mxu0 (!%p237_p2), %vm635_vm0, %v636_v6  ;;  %p266_p3 = scmp.lt.s32.totalorder (!%p237_p2), %s536_s25, 1  ;;  %v361_v7 = vld [vmem:[%s755_s3] sm:$0xff] (!%p237_p2)  ;;  %v362_v8 = vld [vmem:[%s755_s3 + $0x8] sm:$0xff] (!%p237_p2)  ;;  %vm286_vm1 = vcmask (!%p237_p2), 261120  }
   0x7   : > { %601 = vmatprep.subr.bf16.mxu1 (!%p237_p2), %v634_v3  ;;  %v602_v9 = vpack.c.bf16 (!%p237_p2), %v362_v8, %v361_v7  ;;  %v363_v10 = vld [vmem:[%s755_s3 + $0x10] sm:$0xff] (!%p237_p2)  ;;  %v364_v11 = vld [vmem:[%s755_s3 + $0x18] sm:$0xff] (!%p237_p2)  ;;  %592 = vmatprep.mubr.msk.f32.mxu1 (!%p237_p2), %vm635_vm0, %v636_v6  ;;  %v599_v12 = vpack.c.bf16 (!%p237_p2), %v278_v5, %v277_v2  ;;  %v365_v14 = vld [vmem:[%s755_s3 + $0x20] sm:$0xff] (!%p237_p2)  ;;  %vm376_vm2 = vcmask (!%p237_p2), 523264   ;;  %vm453_vm3 = vcmask (!%p237_p2), 260096  }
   0x8   : > { %597 = vmatpush3.bf16.msra.mxu0 (!%p237_p2), %v596_v4  ;;  %v605_v13 = vpack.c.bf16 (!%p237_p2), %v364_v11, %v363_v10  ;;  %v366_v15 = vld [vmem:[%s755_s3 + $0x28] sm:$0xff] (!%p237_p2)  ;;  %v367_v18 = vld [vmem:[%s755_s3 + $0x30] sm:$0xff] (!%p237_p2)  ;;  %v368_v19 = vld [vmem:[%s755_s3 + $0x38] sm:$0xff] (!%p237_p2) }
   0x9   : > { %598 = vmatprep.subr.bf16.mxu0 (!%p237_p2), %v634_v3  ;;  %603 = vmatpush3.bf16.msra.mxu1 (!%p237_p2), %v602_v9  ;;  %v608_v17 = vpack.c.bf16 (!%p237_p2), %v366_v15, %v365_v14  ;;  %v611_v20 = vpack.c.bf16 (!%p237_p2), %v368_v19, %v367_v18  ;;  %v543_v21 = vld [vmem:[%s754_s2] ss:$0 sm:$0xff] (!%p237_p2) }
   0xa   : > { %604 = vmatprep.subr.bf16.mxu1 (!%p237_p2), %v634_v3  ;;  %v545_v26 = vld [vmem:[%s756_s4] ss:$0 sm:$0xff] (!%p237_p2) }
   0xb   : > { %v547_v41 = vld [vmem:[%s757_s5] ss:$0 sm:$0xff] (!%p237_p2) }
   0xc   : > { %600 = vmatpush3.bf16.msra.mxu0 (!%p237_p2), %v599_v12  ;;  %v548_v43 = vld [vmem:[%s758_s6] ss:$0 sm:$0xff] (!%p237_p2) }
   0xd   : > { %s761_s25 = smov (!%p266_p3, %s536_s25), 1  ;;  %606 = vmatpush3.bf16.msra.mxu1 %v605_v13 }
   0xe   : > { %s541_s19 = sshll.u32 %s761_s25, 3  ;;  %607 = vmatprep.subr.bf16.mxu1 %v634_v3 }
   0xf   : > { %s269_s28 = scalar_lea.vmem %s752_s0, %s541_s19  ;;  %s273_s21 = scalar_lea.vmem %s759_s7, %s541_s19 }
  0x10   : > { %v274_v16 = vld [vmem:[%s269_s28] sm:$0x7f] }
  0x11   : > { %574 = vmatmul.mubr.msk.f32.vlgmr.msra.gmra.mrb[0].mxu0 %vm286_vm1, %v274_v16  ;;  %609 = vmatpush3.bf16.msra.mxu1 %v608_v17 }
  0x12   : > { %610 = vmatprep.subr.bf16.mxu1 %v634_v3 }
  0x15   : > { %612 = vmatpush3.bf16.msra.mxu1 %v611_v20 }
  0xe4   : > { %v356_v22 = vpop.f32.mrb[0].mxu0 }
  0xe5   : > { %v357_v23 = vadd.f32 %v543_v21, %v356_v22  ;;  %v575_v24 = vpop.f32.mrb[1].mxu0 }
  0xe7   : > { %v360_v25 = vmax.f32 %v357_v23, 0.0 }
  0xe9   : > { %593 = vmatmul.mubr.msk.f32.vlgmr.msra.gmra.mrb[0].mxu1 %vm376_vm2, %v360_v25 }
 0x1bc   : > { %v446_v27 = vpop.f32.mrb[0].mxu1 }
 0x1bd   : > { %v447_v28 = vadd.f32 %v545_v26, %v446_v27  ;;  %v594_v29 = vpop.f32.mrb[1].mxu1 }
 0x1bf   : > { %v450_v30 = vadd.f32 %v447_v28, %v274_v16 }
 0x1c1   : > { %v454_v31 = vsel %vm453_vm3, %v450_v30, 0.0 }
 0x1c2   : > { %455 = vadd.xlane.f32.xlu0 %v454_v31 }
 0x24f   : > { %v456_v32 = vpop.xlane.xlu0 %455 }
 0x250   : > { %v458_v33 = vmul.f32 0.03125, %v456_v32 }
 0x252   : > { %v459_v34 = vsub.f32 %v450_v30, %v458_v33 }
 0x254   : > { %v460_v35 = vmul.f32 %v459_v34, %v459_v34 }
 0x256   : > { %v461_v36 = vsel %vm453_vm3, %v460_v35, 0.0 }
 0x257   : > { %462 = vadd.xlane.f32.xlu0 %v461_v36 }
 0x2e4   : > { %v463_v37 = vpop.xlane.xlu0 %462 }
 0x2e5   : > { %v464_v38 = vmul.f32 0.03125, %v463_v37 }
 0x2e7   : > { %v465_v39 = vadd.f32 1e-05, %v464_v38 }
 0x2e9   : > { %624 = vrsqrt.f32 %v465_v39 }
 0x2f3   : > { %v625_v40 = vpop.eup %624 }
 0x2f4   : > { %v467_v42 = vmul.f32 %v625_v40, %v459_v34 }
 0x2f6   : > { %v474_v44 = vmul.f32 %v547_v41, %v467_v42 }
 0x2f8   : > { %v481_v45 = vadd.f32 %v548_v43, %v474_v44 }
 0x2fa   : > { %482 = vst.msk [vmem:[%s273_s21] sm:$0x7f] %vm453_vm3, %v481_v45 }
 0x2fb PF: > { %s17_s24 = sadd.s32 1, %s632_s24  }
 0x2fc   : > { %p14_p4 = scmp.ge.s32.totalorder %s17_s24, 4  }
 0x2fe   :  { %16 = sbr.rel (!%p14_p4) target bundleno = 1 (0x1), region = 78 }

// kernel: model_forward.30
= control target key start
LH: loop header
LB: loop body
LE: loop exit
PB: predicated region body
PF: predicated region fallthrough
CT: control target
= control target key end

     0   :  { %s1878_s30 = smov 0   ;;  %s2083_s0 = inlined_call_operand.vmem [shape: f32[2,7,32], index: 0, kind: input, shape index: {}]   ;;  %s2084_s1 = inlined_call_operand.vmem [shape: f32[2,17,32], index: 1, kind: input, shape index: {}]   ;;  %s2085_s2 = inlined_call_operand.vmem [shape: f32[32,96], index: 2, kind: input, shape index: {}]   ;;  %s2086_s3 = inlined_call_operand.vmem [shape: f32[1,96], index: 3, kind: input, shape index: {}]   ;;  %s2087_s4 = inlined_call_operand.vmem [shape: f32[32,32], index: 4, kind: input, shape index: {}]   ;;  %s2088_s5 = inlined_call_operand.vmem [shape: f32[1,32], index: 5, kind: input, shape index: {}]   ;;  %s2089_s6 = inlined_call_operand.vmem [shape: f32[1,32], index: 6, kind: input, shape index: {}]   ;;  %s2090_s7 = inlined_call_operand.vmem [shape: f32[1,32], index: 7, kind: input, shape index: {}]   ;;  %s2091_s8 = inlined_call_operand.vmem [shape: f32[7,17], index: 8, kind: input, shape index: {}]   ;;  %s2092_s9 = inlined_call_operand.vmem [shape: f32[2,7,32], index: 9, kind: output, shape index: {}]  }
   0x1 LB: > { %s1473_s10 = sadd.s32 4294967295, %s1813_s30   ;;  %p1477_p0 = scmp.ge.s32.totalorder %s1813_s30, 1  ;;  %s1813_s30 = sphi %s1878_s30, %s19_s30  }
   0x2   : > { %p296_p1 = scmp.lt.s32.totalorder %s1813_s30, 3 }
   0x4   : > { %p297_p2 = pnand %p1477_p0, %p296_p1 }
   0x5   : > { %v349_v0 = vld [vmem:[%s2085_s2] sm:$0xff] (!%p297_p2)  ;;  %v350_v1 = vld [vmem:[%s2085_s2 + $0x8] sm:$0xff] (!%p297_p2)  ;;  %v351_v2 = vld [vmem:[%s2085_s2 + $0x10] sm:$0xff] (!%p297_p2)  ;;  %v1815_v5 = vmov (!%p297_p2), 0.0|0.0   ;;  %vm1816_vm0 = vmmov (!%p297_p2), 0   ;;  %v1817_v6 = vmov (!%p297_p2), 0.0  }
   0x6   : > { %300 = sbr.rel (%p297_p2) target bundleno = 2961 (0xb91), region = 56  ;;  %v1744_v3 = vpack.i.bf16 (!%p297_p2), %v350_v1, %v349_v0  ;;  %v352_v4 = vld [vmem:[%s2085_s2 + $0x18] sm:$0xff] (!%p297_p2)  ;;  %1682 = vmatprep.subr.bf16.mxu1 (!%p297_p2), %v1815_v5  ;;  %1676 = vmatprep.subr.bf16.mxu0 (!%p297_p2), %v1815_v5  ;;  %s1818_s19 = smov (!%p297_p2), 96   ;;  %v1677_v8 = vpack.c.bf16 (!%p297_p2), %v350_v1, %v349_v0  ;;  %v1481_v9 = vld [vmem:[%s2086_s3] ss:$0 sm:$0xff] (!%p297_p2)  ;;  %vm363_vm1 = vcmask (!%p297_p2), 261120  }
   0x7   : > { %1584 = vmatprep.mubr.msk.f32.mxu1 (!%p297_p2), %vm1816_vm0, %v1817_v6  ;;  %1573 = vmatprep.mubr.msk.f32.mxu0 (!%p297_p2), %vm1816_vm0, %v1817_v6  ;;  %v1749_v7 = vpack.i.bf16 (!%p297_p2), %v352_v4, %v351_v2  ;;  %p335_p3 = scmp.lt.s32.totalorder (!%p297_p2), %s1473_s10, 1  ;;  %v1680_v10 = vpack.c.bf16 (!%p297_p2), %v352_v4, %v351_v2  ;;  %vm546_vm2 = vcmask (!%p297_p2), 64512   ;;  %s1819_s11 = smov (!%p297_p2), 120   ;;  %v1977_v46 = vld [vmem:[%s2091_s8] sm:$0x7f] (!%p297_p2)  ;;  %vm631_vm4 = vcmask (!%p297_p2), 137216  }
   0x8   : > { %1745 = vrot.lane.b32.xlu0 (!%p297_p2), %v1744_v3, %s1818_s19  ;;  %453 = vrot.lane.b32.xlu1 (!%p297_p2), %v1481_v9, %s1818_s19  ;;  %vm1943_vm3 = vmpackc.low (!%p297_p2), %vm546_vm2, %vm546_vm2  ;;  %s1820_s14 = smov (!%p297_p2), 88   ;;  %s1821_s15 = smov (!%p297_p2), 112   ;;  %vm655_vm5 = vcmask (!%p297_p2), 1040384   ;;  %vm651_vm6 = vcmask (!%p297_p2), 138240   ;;  %vm1287_vm7 = vcmask (!%p297_p2), 130048   ;;  %vm1289_vm8 = vcmask (!%p297_p2), 195584  }
   0x9   : > { %1678 = vmatpush3.bf16.msra.mxu0 (!%p297_p2), %v1677_v8  ;;  %s1822_s16 = smov (!%p297_p2), 80   ;;  %s1823_s17 = smov (!%p297_p2), 104   ;;  %vm1378_vm9 = vcmask (!%p297_p2), 260096  }
   0xa   : > { %1679 = vmatprep.subr.bf16.mxu0 (!%p297_p2), %v1815_v5  ;;  %s1824_s18 = smov (!%p297_p2), 72   ;;  %s1826_s21 = smov (!%p297_p2), 16  }
   0xc   : > { %1750 = vrot.lane.b32.xlu0 (!%p297_p2), %v1749_v7, %s1818_s19 }
   0xd   : > { %s2096_s10 = smov (!%p335_p3, %s1473_s10), 1  ;;  %1681 = vmatpush3.bf16.msra.mxu0 %v1680_v10 }
   0xe   : > { %s1478_s20 = sshll.u32 %s2096_s10, 3  ;;  %1688 = vmatprep.subr.bf16.mxu0 %v1815_v5  ;;  %s1722_s26 = smul.u32 24, %s2096_s10 }
   0xf   : > { %s338_s25 = scalar_lea.vmem %s2083_s0, %s1478_s20 }
  0x10   : > { %v1919_v11 = vld [vmem:[%s338_s25] sm:$0x7f]  ;;  %s343_s29 = scalar_lea.vmem %s2084_s1, %s1722_s26 }
  0x11   : > { %1574 = vmatmul.mubr.msk.f32.vlgmr.msra.gmra.mrb[0].mxu0 %vm363_vm1, %v1919_v11  ;;  %v354_v20 = vld [vmem:[%s343_s29] sm:$0xff]  ;;  %v355_v21 = vld [vmem:[%s343_s29 + $0x8] sm:$0xff]  ;;  %v356_v22 = vld [vmem:[%s343_s29 + $0x10] sm:$0x1] }
  0x12   : > { %1599 = vmatprep.mubr.msk.f32.mxu0 %vm1816_vm0, %v1817_v6 }
  0x7a   : > { %v1746_v12 = vpop.permute.xlu0 %1745  ;;  %v454_v27 = vpop.permute.xlu1 %453 }
  0x7b   : > { %v1748_v13 = vunpack.i.h.bf16 %v1746_v12  ;;  %v1747_v14 = vunpack.i.l.bf16 %v1746_v12 }
  0x7d   : > { %v1683_v15 = vpack.c.bf16 %v1748_v13, %v1747_v14 }
  0x7e   : > { %v1751_v16 = vpop.permute.xlu0 %1750 }
  0x7f   : > { %v1753_v17 = vunpack.i.h.bf16 %v1751_v16  ;;  %v1752_v18 = vunpack.i.l.bf16 %v1751_v16  ;;  %1684 = vmatpush3.bf16.msra.mxu1 %v1683_v15 }
  0x80   : > { %1685 = vmatprep.subr.bf16.mxu1 %v1815_v5 }
  0x81   : > { %v1686_v19 = vpack.c.bf16 %v1753_v17, %v1752_v18 }
  0x83   : > { %1687 = vmatpush3.bf16.msra.mxu1 %v1686_v19 }
  0x84   : > { %1692 = vmatprep.subr.bf16.mxu1 %v1815_v5 }
  0x86   : > { %1585 = vmatmul.mubr.msk.f32.vlgmr.msra.gmra.mrb[0].mxu1 %vm363_vm1, %v354_v20 }
  0x87   : > { %1587 = vmatprep.mubr.msk.f32.mxu1 %vm1816_vm0, %v1817_v6 }
  0x8a   : > { %1588 = vmatmul.mubr.msk.f32.gmra.mrb[2].mxu1 %vm363_vm1, %v355_v21 }
  0x8b   : > { %1590 = vmatprep.mubr.msk.f32.mxu1 %vm1816_vm0, %v1817_v6 }
  0x8e   : > { %1591 = vmatmul.mubr.msk.f32.gmra.mrb[4].mxu1 %vm363_vm1, %v356_v22 }
  0x8f   : > { %1608 = vmatprep.mubr.msk.f32.mxu1 %vm1816_vm0, %v1817_v6 }
  0xe4   : > { %v433_v23 = vpop.f32.mrb[0].mxu0 }
  0xe5   : > { %v1575_v24 = vpop.f32.mrb[1].mxu0  ;;  %v1956_v38 = vadd.f32 %v1481_v9, %v433_v23 }
 0x159   : > { %v531_v25 = vpop.f32.mrb[0].mxu1 }
 0x15a   : > { %v1586_v26 = vpop.f32.mrb[1].mxu1  ;;  %v532_v29 = vadd.f32 %v531_v25, %v454_v27 }
 0x15d   : > { %v536_v28 = vpop.f32.mrb[2].mxu1 }
 0x15e   : > { %v537_v30 = vadd.f32 %v536_v28, %v454_v27  ;;  %v1589_v31 = vpop.f32.mrb[3].mxu1 }
 0x160   : > { %v1947_v33 = vpack.i.bf16 %v537_v30, %v532_v29  ;;  %v1689_v34 = vpack.c.bf16 %v537_v30, %v532_v29 }
 0x161   : > { %v541_v35 = vpop.f32.mrb[4].mxu1 }
 0x162   : > { %v1949_v36 = vadd.f32 %v541_v35, %v454_v27  ;;  %1755 = vrot.lane.b32.xlu1 %v1947_v33, %s1819_s11  ;;  %1691 = vmatpush3.bf16.xpose.msk.msra.mxu0 %vm1943_vm3, %v1689_v34  ;;  %v1592_v37 = vpop.f32.mrb[5].mxu1 }
 0x163   : > { %1597 = vmatprep.subr.mxu0 %v1817_v6 }
 0x164   : > { %734 = vrot.lane.b32.xlu0 %v1949_v36, %s1819_s11 }
 0x166   : > { %728 = vrot.lane.b32.xlu1 %v1956_v38, %s1819_s11  ;;  %s1827_s11 = smov 24  }
 0x16a   : > { %1598 = vmatpush3.xpose.msk.msra.mxu0 %vm546_vm2, %v1949_v36 }
 0x16b   : > { %1695 = vmatprep.subr.bf16.mxu0 %v1815_v5 }
 0x16d   : > { %1600 = vmatmul.mubr.msk.f32.vlgmr.msra.gmra.mrb[2].mxu0 %vm546_vm2, %v1956_v38 }
 0x16e   : > { %1617 = vmatprep.mubr.msk.f32.mxu0 %vm1816_vm0, %v1817_v6 }
 0x1d4   : > { %v1756_v39 = vpop.permute.xlu1 %1755 }
 0x1d5   : > { %v1758_v40 = vunpack.i.h.bf16 %v1756_v39  ;;  %v1757_v41 = vunpack.i.l.bf16 %v1756_v39 }
 0x1d6   : > { %v735_v43 = vpop.permute.xlu0 %734 }
 0x1d7   : > { %v1696_v42 = vpack.c.bf16 %v1758_v40, %v1757_v41 }
 0x1d8   : > { %v729_v44 = vpop.permute.xlu1 %728 }
 0x1d9   : > { %1698 = vmatpush3.bf16.xpose.msk.msra.mxu0 %vm1943_vm3, %v1696_v42 }
 0x1da   : > { %1615 = vmatprep.subr.mxu0 %v1817_v6 }
 0x1e1   : > { %1616 = vmatpush3.xpose.msk.msra.mxu0 %vm546_vm2, %v735_v43 }
 0x1e2   : > { %1706 = vmatprep.subr.bf16.mxu0 %v1815_v5 }
 0x1e4   : > { %1618 = vmatmul.mubr.msk.f32.vlgmr.msra.gmra.mrb[4].mxu0 %vm546_vm2, %v729_v44 }
 0x1e5   : > { %1644 = vmatprep.mubr.msk.f32.mxu0 %vm1816_vm0, %v1817_v6 }
 0x240   : > { %v625_v45 = vpop.f32.mrb[2].mxu0 }
 0x241   : > { %v629_v47 = vmul.f32 0.35355338, %v625_v45  ;;  %v1601_v48 = vpop.f32.mrb[3].mxu0 }
 0x243   : > { %v630_v49 = vadd.f32 %v629_v47, %v1977_v46 }
 0x245   : > { %v632_v50 = vsel %vm631_vm4, %v630_v49, -inf }
 0x246   : > { %633 = vmax.xlane.f32.xlu0 %v632_v50 }
 0x2b7   : > { %v810_v51 = vpop.f32.mrb[4].mxu0 }
 0x2b8   : > { %v814_v52 = vmul.f32 0.35355338, %v810_v51  ;;  %v1619_v53 = vpop.f32.mrb[5].mxu0 }
 0x2ba   : > { %v815_v54 = vadd.f32 %v814_v52, %v1977_v46 }
 0x2bc   : > { %v816_v55 = vsel %vm631_vm4, %v815_v54, -inf }
 0x2bd   : > { %817 = vmax.xlane.f32.xlu1 %v816_v55 }
 0x2ce   : > { %1760 = vrot.lane.b32.xlu1 %v1947_v33, %s1818_s19 }
 0x2d2   : > { %1765 = vrot.lane.b32.xlu1 %v1947_v33, %s1820_s14 }
 0x2d3   : > { %v634_v56 = vpop.xlane.xlu0 %633 }
 0x2d4   : > { %v635_v57 = vsub.f32 %v630_v49, %v634_v56 }
 0x2d6   : > { %v636_v58 = vmul.f32 1.442695, %v635_v57  ;;  %831 = vrot.lane.b32.xlu1 %v1949_v36, %s1820_s14 }
 0x2d8   : > { %1789 = vpow2.f32 %v636_v58 }
 0x2da   : > { %916 = vrot.lane.b32.xlu1 %v1949_v36, %s1821_s15 }
 0x2e2   : > { %v1790_v59 = vpop.eup %1789 }
 0x2e3   : > { %v638_v60 = vsel %vm631_vm4, %v1790_v59, 0.0 }
 0x2e4   : > { %639 = vadd.xlane.f32.xlu0 %v638_v60 }
 0x2fa   : > { %647 = vrot.lane.b32.xlu0 %v1949_v36, %s1818_s19  ;;  %s1825_s19 = smov 8  }
 0x34a   : > { %v818_v61 = vpop.xlane.xlu1 %817 }
 0x34b   : > { %v819_v62 = vsub.f32 %v815_v54, %v818_v61 }
 0x34d   : > { %v820_v63 = vmul.f32 1.442695, %v819_v62 }
 0x34e   : > { %v1761_v0 = vpop.permute.xlu1 %1760 }
 0x34f   : > { %1791 = vpow2.f32 %v820_v63  ;;  %v1763_v1 = vunpack.i.h.bf16 %v1761_v0  ;;  %v1762_v2 = vunpack.i.l.bf16 %v1761_v0 }
 0x351   : > { %v1693_v3 = vpack.c.bf16 %v1763_v1, %v1762_v2 }
 0x352   : > { %v1766_v10 = vpop.permute.xlu1 %1765 }
 0x353   : > { %1694 = vmatpush3.bf16.msra.mxu1 %v1693_v3  ;;  %v1768_v12 = vunpack.i.h.bf16 %v1766_v10  ;;  %v1767_v13 = vunpack.i.l.bf16 %v1766_v10 }
 0x354   : > { %1606 = vmatprep.subr.mxu1 %v1817_v6 }
 0x355   : > { %v1700_v16 = vpack.c.bf16 %v1768_v12, %v1767_v13 }
 0x356   : > { %v832_v17 = vpop.permute.xlu1 %831 }
 0x359   : > { %v1792_v4 = vpop.eup %1791 }
 0x35a   : > { %v822_v7 = vsel %vm631_vm4, %v1792_v4, 0.0  ;;  %v917_v25 = vpop.permute.xlu1 %916 }
 0x35b   : > { %823 = vadd.xlane.f32.xlu0 %v822_v7 }
 0x371   : > { %v640_v8 = vpop.xlane.xlu0 %639  ;;  %1770 = vrot.lane.b32.xlu0 %v1947_v33, %s1821_s15 }
 0x372   : > { %1793 = vrcp.f32 %v640_v8 }
 0x375   : > { %v648_v9 = vpop.permute.xlu0 %647  ;;  %910 = vrot.lane.b32.xlu0 %v1956_v38, %s1821_s15 }
 0x376   : > { %1607 = vmatpush3.msk.msra.mxu1 %vm655_vm5, %v648_v9 }
 0x377   : > { %1699 = vmatprep.subr.bf16.mxu1 %v1815_v5 }
 0x37c   : > { %v1794_v14 = vpop.eup %1793 }
 0x37d   : > { %v642_v15 = vmul.f32 %v1794_v14, %v1790_v59 }
 0x37f   : > { %1609 = vmatmul.mubr.msk.f32.vlgmr.msra.gmra.mrb[6].mxu1 %vm651_vm6, %v642_v15  ;;  %v1292_v15 = vld [vmem:[%s2087_s4 + $0x8] sm:$0xff] }
 0x380   : > { %1701 = vmatpush3.bf16.msra.mxu1 %v1700_v16  ;;  %1626 = vmatprep.mubr.msk.f32.mxu1 %vm1816_vm0, %v1817_v6  ;;  %v1293_v16 = vld [vmem:[%s2087_s4 + $0x10] sm:$0xff] }
 0x381   : > { %1624 = vmatprep.subr.mxu1 %v1817_v6 }
 0x384   : > { %1625 = vmatpush3.msk.msra.mxu1 %vm655_vm5, %v832_v17 }
 0x385   : > { %1702 = vmatprep.subr.bf16.mxu1 %v1815_v5 }
 0x3e8   : > { %v824_v18 = vpop.xlane.xlu0 %823 }
 0x3e9   : > { %1795 = vrcp.f32 %v824_v18  ;;  %v1294_v18 = vld [vmem:[%s2087_s4 + $0x18] sm:$0xff] }
 0x3ec   : > { %v1771_v19 = vpop.permute.xlu0 %1770 }
 0x3ed   : > { %v1773_v20 = vunpack.i.h.bf16 %v1771_v19  ;;  %v1772_v21 = vunpack.i.l.bf16 %v1771_v19  ;;  %v1720_v19 = vpack.c.bf16 %v1294_v18, %v1293_v16 }
 0x3ef   : > { %v1703_v24 = vpack.c.bf16 %v1773_v20, %v1772_v21 }
 0x3f0   : > { %v911_v26 = vpop.permute.xlu0 %910 }
 0x3f3   : > { %v1796_v22 = vpop.eup %1795 }
 0x3f4   : > { %v826_v23 = vmul.f32 %v1796_v22, %v1792_v4 }
 0x3f6   : > { %1627 = vmatmul.mubr.msk.f32.vlgmr.msra.gmra.mrb[8].mxu1 %vm651_vm6, %v826_v23 }
 0x3f7   : > { %1705 = vmatpush3.bf16.xpose.msk.msra.mxu1 %vm1943_vm3, %v1703_v24  ;;  %1635 = vmatprep.mubr.msk.f32.mxu1 %vm1816_vm0, %v1817_v6 }
 0x3f8   : > { %1633 = vmatprep.subr.mxu1 %v1817_v6 }
 0x3ff   : > { %1634 = vmatpush3.xpose.msk.msra.mxu1 %vm546_vm2, %v917_v25 }
 0x400   : > { %1713 = vmatprep.subr.bf16.mxu1 %v1815_v5 }
 0x402   : > { %1636 = vmatmul.mubr.msk.f32.vlgmr.msra.gmra.mrb[10].mxu1 %vm546_vm2, %v911_v26 }
 0x403   : > { %1662 = vmatprep.mubr.msk.f32.mxu1 %vm1816_vm0, %v1817_v6 }
 0x452   : > { %v2014_v27 = vpop.f32.mrb[6].mxu1 }
 0x453   : > { %v1610_v28 = vpop.f32.mrb[7].mxu1 }
 0x4c9   : > { %v906_v29 = vpop.f32.mrb[8].mxu1 }
 0x4ca   : > { %v1628_v30 = vpop.f32.mrb[9].mxu1 }
 0x4d5   : > { %v992_v31 = vpop.f32.mrb[10].mxu1 }
 0x4d6   : > { %v996_v34 = vmul.f32 0.35355338, %v992_v31  ;;  %v1637_v35 = vpop.f32.mrb[11].mxu1 }
 0x4d8   : > { %v997_v37 = vadd.f32 %v996_v34, %v1977_v46 }
 0x4da   : > { %v998_v39 = vsel %vm631_vm4, %v997_v37, -inf }
 0x4db   : > { %999 = vmax.xlane.f32.xlu1 %v998_v39 }
 0x4ec   : > { %1013 = vrot.lane.b32.xlu1 %v1949_v36, %s1822_s16 }
 0x4f0   : > { %1780 = vrot.lane.b32.xlu1 %v1947_v33, %s1823_s17 }
 0x4f4   : > { %1092 = vrot.lane.b32.xlu1 %v1956_v38, %s1823_s17 }
 0x568   : > { %v1000_v40 = vpop.xlane.xlu1 %999 }
 0x569   : > { %v1001_v41 = vsub.f32 %v997_v37, %v1000_v40 }
 0x56b   : > { %v1002_v42 = vmul.f32 1.442695, %v1001_v41 }
 0x56c   : > { %v1014_v48 = vpop.permute.xlu1 %1013 }
 0x56d   : > { %1797 = vpow2.f32 %v1002_v42 }
 0x570   : > { %v1781_v52 = vpop.permute.xlu1 %1780 }
 0x571   : > { %v1783_v54 = vunpack.i.h.bf16 %v1781_v52  ;;  %v1782_v55 = vunpack.i.l.bf16 %v1781_v52 }
 0x573   : > { %v1710_v56 = vpack.c.bf16 %v1783_v54, %v1782_v55 }
 0x574   : > { %v1093_v58 = vpop.permute.xlu1 %1092 }
 0x577   : > { %v1798_v43 = vpop.eup %1797 }
 0x578   : > { %v1004_v44 = vsel %vm631_vm4, %v1798_v43, 0.0 }
 0x579   : > { %1005 = vadd.xlane.f32.xlu0 %v1004_v44 }
 0x58f   : > { %1775 = vrot.lane.b32.xlu0 %v1947_v33, %s1822_s16 }
 0x593   : > { %1098 = vrot.lane.b32.xlu0 %v1949_v36, %s1823_s17 }
 0x606   : > { %v1006_v45 = vpop.xlane.xlu0 %1005 }
 0x607   : > { %1799 = vrcp.f32 %v1006_v45 }
 0x60a   : > { %v1776_v47 = vpop.permute.xlu0 %1775 }
 0x60b   : > { %v1778_v49 = vunpack.i.h.bf16 %v1776_v47  ;;  %v1777_v50 = vunpack.i.l.bf16 %v1776_v47  ;;  %v1513_v47 = vld [vmem:[%s2090_s7] ss:$0 sm:$0xff] }
 0x60d   : > { %v1707_v51 = vpack.c.bf16 %v1778_v49, %v1777_v50 }
 0x60e   : > { %v1099_v57 = vpop.permute.xlu0 %1098 }
 0x60f   : > { %1708 = vmatpush3.bf16.msra.mxu0 %v1707_v51 }
 0x610   : > { %1642 = vmatprep.subr.mxu0 %v1817_v6 }
 0x611   : > { %v1800_v38 = vpop.eup %1799 }
 0x612   : > { %v1008_v53 = vmul.f32 %v1800_v38, %v1798_v43 }
 0x613   : > { %1643 = vmatpush3.msk.msra.mxu0 %vm655_vm5, %v1014_v48 }
 0x614   : > { %1645 = vmatmul.mubr.msk.f32.vlgmr.msra.gmra.mrb[6].mxu0 %vm651_vm6, %v1008_v53  ;;  %1709 = vmatprep.subr.bf16.mxu0 %v1815_v5 }
 0x615   : > { %1653 = vmatprep.mubr.msk.f32.mxu0 %vm1816_vm0, %v1817_v6 }
 0x61a   : > { %1712 = vmatpush3.bf16.xpose.msk.msra.mxu0 %vm1943_vm3, %v1710_v56 }
 0x61b   : > { %1651 = vmatprep.subr.mxu0 %v1817_v6 }
 0x622   : > { %1652 = vmatpush3.xpose.msk.msra.mxu0 %vm546_vm2, %v1099_v57 }
 0x625   : > { %1654 = vmatmul.mubr.msk.f32.vlgmr.msra.gmra.mrb[8].mxu0 %vm546_vm2, %v1093_v58 }
 0x6e7   : > { %v1088_v59 = vpop.f32.mrb[6].mxu0 }
 0x6e8   : > { %v1646_v60 = vpop.f32.mrb[7].mxu0 }
 0x6f8   : > { %v1174_v61 = vpop.f32.mrb[8].mxu0 }
 0x6f9   : > { %v1178_v62 = vmul.f32 0.35355338, %v1174_v61  ;;  %v1655_v63 = vpop.f32.mrb[9].mxu0 }
 0x6fb   : > { %v1179_v0 = vadd.f32 %v1178_v62, %v1977_v46 }
 0x6fd   : > { %v1180_v1 = vsel %vm631_vm4, %v1179_v0, -inf }
 0x6fe   : > { %1181 = vmax.xlane.f32.xlu0 %v1180_v1 }
 0x714   : > { %1785 = vrot.lane.b32.xlu0 %v1947_v33, %s1824_s18 }
 0x718   : > { %1275 = vrot.lane.b32.xlu0 %v906_v29, %s1825_s19 }
 0x78b   : > { %v1182_v32 = vpop.xlane.xlu0 %1181 }
 0x78c   : > { %v1183_v2 = vsub.f32 %v1179_v0, %v1182_v32 }
 0x78e   : > { %v1184_v3 = vmul.f32 1.442695, %v1183_v2 }
 0x78f   : > { %v1786_v4 = vpop.permute.xlu0 %1785 }
 0x790   : > { %1801 = vpow2.f32 %v1184_v3  ;;  %v1788_v7 = vunpack.i.h.bf16 %v1786_v4  ;;  %v1787_v8 = vunpack.i.l.bf16 %v1786_v4 }
 0x792   : > { %v1714_v9 = vpack.c.bf16 %v1788_v7, %v1787_v8 }
 0x793   : > { %v1276_v21 = vpop.permute.xlu0 %1275 }
 0x794   : > { %1715 = vmatpush3.bf16.msra.mxu1 %v1714_v9  ;;  %v1286_v23 = vsel %vm546_vm2, %v2014_v27, %v1276_v21 }
 0x795   : > { %1660 = vmatprep.subr.mxu1 %v1817_v6 }
 0x79a   : > { %v1802_v46 = vpop.eup %1801 }
 0x79b   : > { %v1186_v10 = vsel %vm631_vm4, %v1802_v46, 0.0 }
 0x79c   : > { %1187 = vadd.xlane.f32.xlu1 %v1186_v10 }
 0x7ad   : > { %1195 = vrot.lane.b32.xlu1 %v1949_v36, %s1824_s18  ;;  %v1291_v36 = vld [vmem:[%s2087_s4] sm:$0xff] }
 0x7ae   : > { %v1717_v17 = vpack.c.bf16 %v1292_v15, %v1291_v36 }
 0x7b1   : > { %1279 = vrot.lane.b32.xlu1 %v1088_v59, %s1826_s21  ;;  %s347_s21 = scalar_lea.vmem %s2092_s9, %s1478_s20 }
 0x829   : > { %v1188_v33 = vpop.xlane.xlu1 %1187 }
 0x82a   : > { %1803 = vrcp.f32 %v1188_v33 }
 0x82d   : > { %v1196_v12 = vpop.permute.xlu1 %1195 }
 0x82e   : > { %1661 = vmatpush3.msk.msra.mxu1 %vm655_vm5, %v1196_v12 }
 0x82f   : > { %1716 = vmatprep.subr.bf16.mxu1 %v1815_v5 }
 0x831   : > { %v1280_v22 = vpop.permute.xlu1 %1279 }
 0x832   : > { %v1288_v24 = vsel %vm1287_vm7, %v1286_v23, %v1280_v22 }
 0x834   : > { %v1804_v13 = vpop.eup %1803 }
 0x835   : > { %v1190_v14 = vmul.f32 %v1804_v13, %v1802_v46 }
 0x837   : > { %1663 = vmatmul.mubr.msk.f32.vlgmr.msra.gmra.mrb[12].mxu1 %vm651_vm6, %v1190_v14 }
 0x838   : > { %1673 = vmatprep.mubr.msk.f32.mxu1 %vm1816_vm0, %v1817_v6  ;;  %1718 = vmatpush3.bf16.msra.mxu1 %v1717_v17 }
 0x839   : > { %1719 = vmatprep.subr.bf16.mxu1 %v1815_v5  ;;  %v1510_v5 = vld [vmem:[%s2088_s5] ss:$0 sm:$0xff] }
 0x83c   : > { %1721 = vmatpush3.bf16.msra.mxu1 %v1720_v19 }
 0x90a   : > { %v1270_v6 = vpop.f32.mrb[12].mxu1 }
 0x90b   : > { %1283 = vrot.lane.b32.xlu0 %v1270_v6, %s1827_s11  ;;  %v1664_v20 = vpop.f32.mrb[13].mxu1 }
 0x97d   : > { %v1284_v25 = vpop.permute.xlu0 %1283 }
 0x97e   : > { %v1290_v26 = vsel %vm1289_vm8, %v1288_v24, %v1284_v25 }
 0x97f   : > { %1674 = vmatmul.mubr.msk.f32.vlgmr.msra.gmra.mrb[14].mxu1 %vm363_vm1, %v1290_v26 }
 0xa52   : > { %v1371_v28 = vpop.f32.mrb[14].mxu1 }
 0xa53   : > { %v1372_v29 = vadd.f32 %v1510_v5, %v1371_v28  ;;  %v1675_v30 = vpop.f32.mrb[15].mxu1 }
 0xa55   : > { %v1375_v31 = vadd.f32 %v1372_v29, %v1919_v11  ;;  %v1512_v11 = vld [vmem:[%s2089_s6] ss:$0 sm:$0xff] }
 0xa57   : > { %v1379_v34 = vsel %vm1378_vm9, %v1375_v31, 0.0 }
 0xa58   : > { %1380 = vadd.xlane.f32.xlu1 %v1379_v34 }
 0xae5   : > { %v1381_v27 = vpop.xlane.xlu1 %1380 }
 0xae6   : > { %v1383_v35 = vmul.f32 0.03125, %v1381_v27 }
 0xae8   : > { %v1384_v37 = vsub.f32 %v1375_v31, %v1383_v35 }
 0xaea   : > { %v1385_v39 = vmul.f32 %v1384_v37, %v1384_v37 }
 0xaec   : > { %v1386_v40 = vsel %vm1378_vm9, %v1385_v39, 0.0 }
 0xaed   : > { %1387 = vadd.xlane.f32.xlu0 %v1386_v40 }
 0xb7a   : > { %v1388_v41 = vpop.xlane.xlu0 %1387 }
 0xb7b   : > { %v1389_v42 = vmul.f32 0.03125, %v1388_v41 }
 0xb7d   : > { %v1390_v43 = vadd.f32 1e-05, %v1389_v42 }
 0xb7f   : > { %1805 = vrsqrt.f32 %v1390_v43 }
 0xb89   : > { %v1806_v44 = vpop.eup %1805 }
 0xb8a   : > { %v1392_v45 = vmul.f32 %v1806_v44, %v1384_v37 }
 0xb8c   : > { %v1399_v48 = vmul.f32 %v1512_v11, %v1392_v45 }
 0xb8e   : > { %v1406_v49 = vadd.f32 %v1513_v47, %v1399_v48 }
 0xb90   : > { %1407 = vst.msk [vmem:[%s347_s21] sm:$0x7f] %vm1378_vm9, %v1406_v49 }
 0xb91 PF: > { %s19_s30 = sadd.s32 1, %s1813_s30  }
 0xb92   : > { %p16_p4 = scmp.ge.s32.totalorder %s19_s30, 4  }
 0xb94   :  { %18 = sbr.rel (!%p16_p4) target bundleno = 1 (0x1), region = 89 }

// kernel: model_forward.32
= control target key start
LH: loop header
LB: loop body
LE: loop exit
PB: predicated region body
PF: predicated region fallthrough
CT: control target
= control target key end

     0   :  { %vm35_vm0 = vcmask 523264   ;;  %v314_v5 = vmov 0   ;;  %s415_s0 = inlined_call_operand.vmem [shape: f32[14,64], index: 0, kind: input, shape index: {}]   ;;  %s416_s1 = inlined_call_operand.vmem [shape: f32[64,64], index: 1, kind: input, shape index: {}]   ;;  %s417_s2 = inlined_call_operand.vmem [shape: f32[1,64], index: 2, kind: input, shape index: {}]   ;;  %s418_s3 = inlined_call_operand.vmem [shape: s32[14,1], index: 3, kind: input, shape index: {}]   ;;  %s419_s4 = inlined_call_operand.hbm [shape: f32[1,1], index: 4, kind: output, shape index: {}]  }
   0x1   :  { %v20_v0 = vld [vmem:[%s416_s1] sm:$0xff]  ;;  %v21_v1 = vld [vmem:[%s416_s1 + $0x8] sm:$0xff]  ;;  %v22_v2 = vld [vmem:[%s416_s1 + $0x10] sm:$0xff]  ;;  %278 = vset.pattern.permute.xlu1 %v314_v5  ;;  %279 = vset.pattern.permute.xlu0 %v314_v5 }
   0x2   :  { %v255_v3 = vpack.c.bf16 %v21_v1, %v20_v0  ;;  %v23_v4 = vld [vmem:[%s416_s1 + $0x18] sm:$0xff]  ;;  %v24_v7 = vld [vmem:[%s416_s1 + $0x20] sm:$0xff]  ;;  %v25_v8 = vld [vmem:[%s416_s1 + $0x28] sm:$0xff] }
   0x3   :  { %v259_v6 = vpack.c.bf16 %v23_v4, %v22_v2  ;;  %v18_v9 = vld [vmem:[%s415_s0] sm:$0xff] }
   0x4   :  { %256 = vmatprep.subr.bf16.mxu0 %v255_v3  ;;  %252 = vmatprep.mubr.msk.f32.mxu0 %vm35_vm0, %v18_v9  ;;  %v367_v10 = vld [vmem:[%s418_s3] sm:$0xff] }
   0x5   :  { %258 = vmatpush3.bf16.msra.mxu0 %v255_v3  ;;  %147 = vperm.xlu1 %278, %v367_v10  }
   0x6   :  { %9 = vsyncpa [#allocation3], 0  ;;  %260 = vmatprep.subr.bf16.mxu0 %v259_v6  ;;  %v263_v11 = vpack.c.bf16 %v25_v8, %v24_v7  ;;  %v373_v12 = vld [vmem:[%s418_s3 + $0x8] sm:$0x3f]  ;;  %v26_v13 = vld [vmem:[%s416_s1 + $0x30] sm:$0xff]  ;;  %vm122_vm1 = vcmask 521216   ;;  %v144_v29 = vlaneseq }
   0x7   :  { %v27_v14 = vld [vmem:[%s416_s1 + $0x38] sm:$0xff]  ;;  %v19_v16 = vld [vmem:[%s415_s0 + $0x8] sm:$0x3f]  ;;  %v221_v17 = vld [vmem:[%s417_s2] ss:$0 sm:$0xff]  ;;  %vm168_vm4 = vcmp.ne.s32.totalorder %v367_v10, 0 }
   0x8   :  { %v267_v15 = vpack.c.bf16 %v27_v14, %v26_v13  ;;  %v145_v32 = vand.u32 127, %v144_v29  ;;  %vm169_vm5 = vcmp.ne.s32.totalorder %v373_v12, 0  ;;  %v315_v42 = vmov 0.0   ;;  %s316_s1 = smov [#allocation2]  }
   0x9   :  { %262 = vmatpush3.bf16.msra.mxu0 %v259_v6  ;;  %150 = vperm.xlu1 %278, %v373_v12   ;;  %v224_v43 = vsel %vm168_vm4, 1.0, %v315_v42  ;;  %v225_v44 = vsel %vm169_vm5, 1.0, %v315_v42  ;;  %vm174_vm6 = vcmask 7168   ;;  %vm176_vm7 = vcmask 5120   ;;  %s213_s2 = sshll.u32 %s316_s1, 4  ;;  %s214_s2 = int_to_ptr.vmem [resolvable:$true] %s213_s2 }
   0xa   :  { %264 = vmatprep.subr.bf16.mxu0 %v263_v11  ;;  %v175_v45 = vsel %vm174_vm6, %v224_v43, 0.0  ;;  %v177_v46 = vsel %vm176_vm7, %v225_v44, 0.0  ;;  %vm162_vm8 = vcmp.eq.s32.totalorder %v367_v10, 0  ;;  %vm163_vm9 = vcmp.eq.s32.totalorder %v373_v12, 0  ;;  %s290_s15 = scalar_lea.vmem %s214_s2, 16  ;;  %s294_s16 = scalar_lea.vmem %s214_s2, 32 }
   0xb   :  { %v178_v47 = vadd.f32 %v177_v46, %v175_v45  ;;  %vm205_vm10 = vcmask 0   ;;  %p291_p0 = scmp.ne.s32.totalorder %s214_s2, %s290_s15  ;;  %p295_p1 = scmp.lt.s32.totalorder %s214_s2, %s214_s2 }
   0xc   :  { %p296_p2 = scmp.lt.s32.totalorder %s294_s16, %s290_s15 }
   0xd   :  { %266 = vmatpush3.bf16.msra.mxu0 %v263_v11 }
   0xe   :  { %268 = vmatprep.subr.bf16.mxu0 %v267_v15  ;;  %p297_p3 = por %p296_p2, %p295_p1 }
  0x10   :  { %p298_p4 = pnand %p297_p3, %p291_p0 }
  0x11   :  { %270 = vmatpush3.bf16.msra.mxu0 %v267_v15 }
  0x14   :  { %253 = vmatmul.mubr.msk.f32.vlgmr.msra.gmra.mrb[0].mxu0 %vm35_vm0, %v19_v16 }
  0x84   :  { %v148_v31 = vpop.permute.xlu1 %147 }
  0x85   :  { %vm152_vm2 = vcmp.eq.s32.totalorder %v145_v32, %v148_v31 }
  0x88   :  { %v151_v34 = vpop.permute.xlu1 %150 }
  0x89   :  { %vm153_vm3 = vcmp.eq.s32.totalorder %v145_v32, %v151_v34 }
  0xe7   :  { %v254_v18 = vpop.f32.mrb[0].mxu0 }
  0xe8   :  { %v108_v19 = vpop.f32.mrb[1].mxu0  ;;  %v114_v21 = vadd.f32 %v254_v18, %v221_v17 }
  0xe9   :  { %v109_v20 = vadd.f32 %v221_v17, %v108_v19 }
  0xea   :  { %v123_v23 = vsel %vm122_vm1, %v114_v21, -inf  ;;  %v155_v40 = vsel %vm153_vm3, %v114_v21, 0.0 }
  0xeb   :  { %v119_v22 = vsel %vm35_vm0, %v109_v20, -inf  ;;  %v154_v36 = vsel %vm152_vm2, %v109_v20, 0.0  ;;  %v159_v41 = vsel %vm122_vm1, %v155_v40, 0.0 }
  0xec   :  { %120 = vmax.xlane.f32.xlu0 %v119_v22  ;;  %v156_v38 = vsel %vm35_vm0, %v154_v36, 0.0 }
  0xf0   :  { %124 = vmax.xlane.f32.xlu0 %v123_v23 }
 0x179   :  { %v121_v24 = vpop.xlane.xlu0 %120 }
 0x17a   :  { %v126_v25 = vsub.f32 %v109_v20, %v121_v24 }
 0x17c   :  { %v128_v26 = vmul.f32 1.442695, %v126_v25 }
 0x17d   :  { %v125_v27 = vpop.xlane.xlu0 %124 }
 0x17e   :  { %280 = vpow2.f32 %v128_v26  ;;  %v127_v28 = vsub.f32 %v114_v21, %v125_v27 }
 0x180   :  { %v130_v30 = vmul.f32 1.442695, %v127_v28 }
 0x182   :  { %282 = vpow2.f32 %v130_v30 }
 0x188   :  { %v281_v33 = vpop.eup %280 }
 0x189   :  { %v132_v35 = vsel %vm35_vm0, %v281_v33, 0.0 }
 0x18a   :  { %133 = vadd.xlane.f32.xlu0 %v132_v35 }
 0x18c   :  { %v283_v37 = vpop.eup %282 }
 0x18d   :  { %v135_v39 = vsel %vm122_vm1, %v283_v37, 0.0 }
 0x18e   :  { %157 = vadd.xlane.f32.xlu0 %v156_v38  ;;  %136 = vadd.xlane.f32.xlu1 %v135_v39 }
 0x192   :  { %160 = vadd.xlane.f32.xlu0 %v159_v41 }
 0x196   :  { %179 = vadd.xlane.f32.xlu0 %v178_v47 }
 0x217   :  { %v134_v48 = vpop.xlane.xlu0 %133 }
 0x218   :  { %284 = vlog2.f32 %v134_v48 }
 0x21b   :  { %v137_v49 = vpop.xlane.xlu1 %136  ;;  %v158_v50 = vpop.xlane.xlu0 %157 }
 0x21c   :  { %286 = vlog2.f32 %v137_v49 }
 0x21f   :  { %v161_v57 = vpop.xlane.xlu0 %160 }
 0x222   :  { %v285_v51 = vpop.eup %284 }
 0x223   :  { %v139_v52 = vmul.f32 0.6931472, %v285_v51  ;;  %v180_v61 = vpop.xlane.xlu0 %179 }
 0x224   :  { %v181_v62 = vrot.slane %v180_v61, 4 }
 0x225   :  { %v142_v53 = vadd.f32 %v139_v52, %v121_v24 }
 0x226   :  { %v287_v54 = vpop.eup %286  ;;  %v182_v2 = vadd.f32 %v181_v62, %v180_v61 }
 0x227   :  { %v141_v55 = vmul.f32 0.6931472, %v287_v54  ;;  %v164_v56 = vsub.f32 %v142_v53, %v158_v50 }
 0x228   :  { %v183_v4 = vrot.slane %v182_v2, 2 }
 0x229   :  { %v143_v58 = vadd.f32 %v141_v55, %v125_v27  ;;  %v166_v59 = vsel %vm162_vm8, 0.0, %v164_v56 }
 0x22a   :  { %v189_v0 = vsel %vm174_vm6, %v166_v59, 0.0  ;;  %v184_v5 = vadd.f32 %v183_v4, %v182_v2 }
 0x22b   :  { %v165_v60 = vsub.f32 %v143_v58, %v161_v57 }
 0x22c   :  { %v185_v6 = vrot.slane %v184_v5, 1 }
 0x22d   :  { %v167_v63 = vsel %vm163_vm9, 0.0, %v165_v60 }
 0x22e   :  { %v190_v1 = vsel %vm176_vm7, %v167_v63, 0.0  ;;  %v186_v7 = vadd.f32 %v185_v6, %v184_v5 }
 0x22f   :  { %v191_v3 = vadd.f32 %v190_v1, %v189_v0 }
 0x230   :  { %271 = vpush %v186_v7 }
 0x231   :  { %192 = vadd.xlane.f32.xlu0 %v191_v3 }
 0x261   :  { %s272_s0 = spop %271 }
 0x262   :  { %v188_v15 = vstv %s272_s0 }
 0x263   :  { %v202_v16 = vmax.f32 %v188_v15, 1.0 }
 0x265   :  { %288 = vrcp.f32 %v202_v16 }
 0x26f   :  { %v289_v17 = vpop.eup %288 }
 0x2be   :  { %v193_v8 = vpop.xlane.xlu0 %192 }
 0x2bf   :  { %v194_v9 = vrot.slane %v193_v8, 4 }
 0x2c1   :  { %v195_v10 = vadd.f32 %v194_v9, %v193_v8 }
 0x2c3   :  { %v196_v11 = vrot.slane %v195_v10, 2 }
 0x2c5   :  { %v197_v12 = vadd.f32 %v196_v11, %v195_v10 }
 0x2c7   :  { %v198_v13 = vrot.slane %v197_v12, 1 }
 0x2c9   :  { %v199_v14 = vadd.f32 %v198_v13, %v197_v12 }
 0x2cb   :  { %273 = vpush %v199_v14 }
 0x2fc   :  { %s274_s14 = spop %273 }
 0x2fd   :  { %v201_v18 = vstv %s274_s14 }
 0x2fe   :  { %v204_v19 = vmul.f32 %v289_v17, %v201_v18 }
 0x300   :  { %206 = vst.msk [vmem:[#allocation2] sm:$0x1] %vm205_vm10, %v204_v19 }
 0x301   :  { %301 = shalt.err (!%p298_p4)
}
 0x302   :  { %s302_s19 = scalar_lea.hbm %s419_s4, 16 }
 0x303   :  { %p303_p5 = scmp.ne.s32.totalorder %s419_s4, %s302_s19  ;;  %p306_p6 = scmp.lt.u32.totalorder %s302_s19, %s419_s4 }
 0x305   :  { %p308_p7 = pnand %p306_p6, %p303_p5 }
 0x307   :  { %311 = shalt.err (!%p308_p7)
}
 0x308   :  { %216 = dma.vmem_to_hbm [thread:$0]  %s214_s2, 16, %s419_s4, [#allocation3]  }
 0x309   :  { %312 = dma.done.wait [#allocation3], 16  }
 0x30a   :  { %313 = vsyncadd [#allocation3], 4294967280 }
 0x30b   :  { %220 = vsyncpa [#allocation3], 1 }

// kernel: model_forward.33
= control target key start
LH: loop header
LB: loop body
LE: loop exit
PB: predicated region body
PF: predicated region fallthrough
CT: control target
= control target key end

     0   :  { %v240_v3 = vmov 0.0|0.0   ;;  %vm241_vm0 = vmmov 0   ;;  %v242_v6 = vmov 0.0   ;;  %vm20_vm1 = vcmask 261120   ;;  %s312_s0 = inlined_call_operand.vmem [shape: f32[2,8,32], index: 0, kind: input, shape index: {}]   ;;  %s313_s1 = inlined_call_operand.vmem [shape: f32[32,4], index: 1, kind: input, shape index: {}]   ;;  %s314_s2 = inlined_call_operand.vmem [shape: f32[1,4], index: 2, kind: input, shape index: {}]   ;;  %s315_s3 = inlined_call_operand.vmem [shape: s32[2,1], index: 3, kind: input, shape index: {}]   ;;  %s316_s4 = inlined_call_operand.hbm [shape: f32[1,1], index: 4, kind: output, shape index: {}]  }
   0x1   :  { %v38_v0 = vld [vmem:[%s313_s1] sm:$0xff]  ;;  %v39_v1 = vld [vmem:[%s313_s1 + $0x8] sm:$0xff]  ;;  %v40_v2 = vld [vmem:[%s313_s1 + $0x10] sm:$0xff]  ;;  %198 = vmatprep.subr.bf16.mxu0 %v240_v3  ;;  %195 = vmatprep.mubr.msk.f32.mxu0 %vm241_vm0, %v242_v6 }
   0x2   :  { %v199_v4 = vpack.c.bf16 %v39_v1, %v38_v0  ;;  %v41_v5 = vld [vmem:[%s313_s1 + $0x18] sm:$0xff]  ;;  %v18_v7 = vld [vmem:[%s312_s0] sm:$0xff]  ;;  %v19_v8 = vld [vmem:[%s312_s0 + $0x8] sm:$0xff] }
   0x3   :  { %v21_v9 = vsel %vm20_vm1, %v18_v7, 0.0  ;;  %v28_v10 = vsel %vm20_vm1, %v19_v8, 0.0 }
   0x4   :  { %9 = vsyncpa [#allocation3], 0  ;;  %200 = vmatpush3.bf16.msra.mxu0 %v199_v4  ;;  %v202_v11 = vpack.c.bf16 %v41_v5, %v40_v2  ;;  %v22_v12 = vrot.slane %v21_v9, 4  ;;  %v29_v13 = vrot.slane %v28_v10, 4  ;;  %vm51_vm2 = vcmask 1041409  }
   0x5   :  { %201 = vmatprep.subr.bf16.mxu0 %v240_v3  ;;  %v243_v27 = vmov 0   ;;  %v180_v28 = vld [vmem:[%s314_s2] ss:$0 sm:$0xff]  ;;  %vm126_vm3 = vcmask 25600   ;;  %v139_v37 = vlaneseq  ;;  %vm150_vm5 = vcmask 1024   ;;  %s244_s2 = smov [#allocation2]  }
   0x6   :  { %v23_v14 = vadd.f32 %v22_v12, %v21_v9  ;;  %v30_v15 = vadd.f32 %v29_v13, %v28_v10  ;;  %211 = vset.pattern.permute.xlu0 %v243_v27  ;;  %v125_v33 = vld [vmem:[%s315_s3] sm:$0x3]  ;;  %s172_s3 = sshll.u32 %s244_s2, 4  ;;  %vm164_vm6 = vcmask 0   ;;  %s173_s3 = int_to_ptr.vmem [resolvable:$true] %s172_s3 }
   0x7   :  { %v140_v38 = vand.u32 127, %v139_v37  ;;  %s216_s30 = scalar_lea.vmem %s173_s3, 16  ;;  %s220_s5 = scalar_lea.vmem %s173_s3, 32 }
   0x8   :  { %203 = vmatpush3.bf16.msra.mxu0 %v202_v11  ;;  %v24_v16 = vrot.slane %v23_v14, 2  ;;  %v31_v17 = vrot.slane %v30_v15, 2  ;;  %p217_p0 = scmp.ne.s32.totalorder %s173_s3, %s216_s30  ;;  %p221_p1 = scmp.lt.s32.totalorder %s173_s3, %s173_s3 }
   0x9   :  { %p222_p2 = scmp.lt.s32.totalorder %s220_s5, %s216_s30 }
   0xa   :  { %v25_v18 = vadd.f32 %v24_v16, %v23_v14  ;;  %v32_v19 = vadd.f32 %v31_v17, %v30_v15 }
   0xb   :  { %p223_p3 = por %p222_p2, %p221_p1 }
   0xc   :  { %v26_v20 = vrot.slane %v25_v18, 1  ;;  %v33_v21 = vrot.slane %v32_v19, 1 }
   0xd   :  { %p224_p4 = pnand %p223_p3, %p217_p0 }
   0xe   :  { %v27_v22 = vadd.f32 %v26_v20, %v25_v18  ;;  %v34_v23 = vadd.f32 %v33_v21, %v32_v19 }
  0x10   :  { %v36_v24 = vmul.f32 0.125, %v27_v22  ;;  %v37_v25 = vmul.f32 0.125, %v34_v23 }
  0x12   :  { %v52_v26 = vsel %vm51_vm2, %v37_v25, %v36_v24 }
  0x13   :  { %196 = vmatmul.mubr.msk.f32.vlgmr.msra.gmra.mrb[0].mxu0 %vm20_vm1, %v52_v26 }
  0xe6   :  { %v121_v29 = vpop.f32.mrb[0].mxu0 }
  0xe7   :  { %v122_v30 = vadd.f32 %v180_v28, %v121_v29  ;;  %v197_v31 = vpop.f32.mrb[1].mxu0 }
  0xe9   :  { %v127_v32 = vsel %vm126_vm3, %v122_v30, -inf }
  0xea   :  { %128 = vmax.xlane.f32.xlu0 %v127_v32 }
 0x100   :  { %142 = vperm.xlu0 %211, %v125_v33  }
 0x177   :  { %v129_v34 = vpop.xlane.xlu0 %128 }
 0x178   :  { %v130_v35 = vsub.f32 %v122_v30, %v129_v34 }
 0x17a   :  { %v131_v36 = vmul.f32 1.442695, %v130_v35 }
 0x17c   :  { %212 = vpow2.f32 %v131_v36 }
 0x17f   :  { %v143_v39 = vpop.permute.xlu0 %142 }
 0x180   :  { %vm144_vm4 = vcmp.eq.s32.totalorder %v140_v38, %v143_v39 }
 0x181   :  { %v145_v42 = vsel %vm144_vm4, %v122_v30, 0.0 }
 0x182   :  { %v146_v43 = vsel %vm126_vm3, %v145_v42, 0.0 }
 0x186   :  { %v213_v40 = vpop.eup %212 }
 0x187   :  { %v133_v41 = vsel %vm126_vm3, %v213_v40, 0.0 }
 0x188   :  { %134 = vadd.xlane.f32.xlu1 %v133_v41 }
 0x18c   :  { %147 = vadd.xlane.f32.xlu1 %v146_v43 }
 0x215   :  { %v135_v44 = vpop.xlane.xlu1 %134 }
 0x216   :  { %214 = vlog2.f32 %v135_v44 }
 0x219   :  { %v148_v48 = vpop.xlane.xlu1 %147 }
 0x220   :  { %v215_v45 = vpop.eup %214 }
 0x221   :  { %v137_v46 = vmul.f32 0.6931472, %v215_v45 }
 0x223   :  { %v138_v47 = vadd.f32 %v137_v46, %v129_v34 }
 0x225   :  { %v149_v49 = vsub.f32 %v138_v47, %v148_v48 }
 0x227   :  { %v151_v50 = vsel %vm150_vm5, %v149_v49, 0.0 }
 0x228   :  { %152 = vadd.xlane.f32.xlu1 %v151_v50 }
 0x2b5   :  { %v153_v51 = vpop.xlane.xlu1 %152 }
 0x2b6   :  { %v154_v52 = vrot.slane %v153_v51, 4 }
 0x2b8   :  { %v155_v53 = vadd.f32 %v154_v52, %v153_v51 }
 0x2ba   :  { %v156_v54 = vrot.slane %v155_v53, 2 }
 0x2bc   :  { %v157_v55 = vadd.f32 %v156_v54, %v155_v53 }
 0x2be   :  { %v158_v56 = vrot.slane %v157_v55, 1 }
 0x2c0   :  { %v159_v57 = vadd.f32 %v158_v56, %v157_v55 }
 0x2c2   :  { %204 = vpush %v159_v57 }
 0x2f3   :  { %s205_s29 = spop %204 }
 0x2f4   :  { %v161_v58 = vstv %s205_s29 }
 0x2f5   :  { %v163_v59 = vmul.f32 0.5, %v161_v58 }
 0x2f7   :  { %165 = vst.msk [vmem:[#allocation2] sm:$0x1] %vm164_vm6, %v163_v59 }
 0x2f8   :  { %227 = shalt.err (!%p224_p4)
}
 0x2f9   :  { %s228_s8 = scalar_lea.hbm %s316_s4, 16 }
 0x2fa   :  { %p229_p5 = scmp.ne.s32.totalorder %s316_s4, %s228_s8  ;;  %p232_p6 = scmp.lt.u32.totalorder %s228_s8, %s316_s4 }
 0x2fc   :  { %p234_p7 = pnand %p232_p6, %p229_p5 }
 0x2fe   :  { %237 = shalt.err (!%p234_p7)
}
 0x2ff   :  { %175 = dma.vmem_to_hbm [thread:$0]  %s173_s3, 16, %s316_s4, [#allocation3]  }
 0x300   :  { %238 = dma.done.wait [#allocation3], 16  }
 0x301   :  { %239 = vsyncadd [#allocation3], 4294967280 }
 0x302   :  { %179 = vsyncpa [#allocation3], 1 }

</bundles_post_ra>
